<compile_context>
chip_gen: v5e
topology: v5e:2x2
jax: 0.10.0
libtpu: 0.0.40
codegen_flags: <defaults>
</compile_context>

<pallas_src>
import functools
import numpy as np
import jax
import jax.numpy as jnp
from jax.experimental import pallas as pl
from jax.experimental.pallas import tpu as pltpu


# ---- packed input lane layout: one (n, 128) bf16 slab ------------------------------- #
FEAT_OFF, FEAT_DIM = 0, 32
SH_OFF,   SH_DIM   = 32, 16
APP_OFF,  APP_DIM  = 48, 32
TR_OFF,   TR_DIM   = 80, 16
SEL_LANE           = 96
IN_WIDTH           = 128

# ---- packed output lane layout: one (n, 128) f32 slab -------------------------------- #
OUT_WIDTH = 128
DEN_LANE  = 0      # density            (base block occupies lanes 0:16; lanes 1:16 = geo)
RGB_LANE  = 16     # rgb (3)            (head block occupies lanes 16:24)
DTR_LANE  = 24     # density_transient  (transient block occupies lanes 24:32)
RGBT_LANE = 25     # rgb_transient (3)
UNC_LANE  = 28     # uncertainty


# ------------------------------------------------------------------------------------- #
# Pallas kernel: fused mlp_base + mlp_head + mlp_transient + activations
# ------------------------------------------------------------------------------------- #
def field_kernel(
    x_ref,                                                   # (tile, 128) bf16 packed inputs
    wb0_ref, wb1_ref,                                        # mlp_base
    wh0_ref, wh0g_ref, wh1_ref, wh2_ref,                     # mlp_head
    wt0_ref, wt0g_ref, wt1_ref, wt2_ref,                     # mlp_transient
    out_ref,                                                 # (tile, 128) f32 packed outputs
    *, rgb_bias):
    f32, bf16 = jnp.float32, jnp.bfloat16
    x = x_ref[...]                                           # (tile, 128) bf16

    # selector (0/1) lives in lane SEL_LANE; recover it with an iota mask + lane reduce
    # (pure VPU/XLU filler) instead of a packed-bf16 lane-offset slice.
    lane = jax.lax.broadcasted_iota(jnp.int32, x.shape, 1)
    sel = jnp.sum(jnp.where(lane == SEL_LANE, x, 0).astype(f32),
                  axis=-1, keepdims=True)                    # (tile, 1)

    # ---- mlp_base: hashgrid feats -> ReLU(64) -> (1 + geo_feat_dim)
    # Wb0 is zero-padded to K=128, so the whole packed slab feeds the MXU (no lane slice).
    h0 = jnp.maximum(jnp.dot(x, wb0_ref[...], preferred_element_type=f32), 0.0)
    base16 = jnp.dot(h0.astype(bf16), wb1_ref[...], preferred_element_type=f32)   # (tile, 16)
    base16_b = base16.astype(bf16)

    # activated base block: lane 0 = trunc_exp(raw_density) * selector, lanes 1:16 = geo feats
    cols16 = jax.lax.broadcasted_iota(jnp.int32, base16.shape, 1)
    act_b = jnp.where(cols16 == 0, jnp.exp(base16) * sel, base16)

    # ---- mlp_head: cat([sh, geo, app]) -> ReLU(64) -> ReLU(64) -> 3
    # realized as x @ Wh0_pack (sh+app rows live at their packed offsets, rest zero)
    #           + base16 @ Wh0_geo16 (density row zeroed) — no lane-offset slices anywhere.
    c = jnp.maximum(jnp.dot(x, wh0_ref[...], preferred_element_type=f32)
                    + jnp.dot(base16_b, wh0g_ref[...], preferred_element_type=f32), 0.0)
    c = jnp.maximum(jnp.dot(c.astype(bf16), wh1_ref[...], preferred_element_type=f32), 0.0)
    raw_rgb = jnp.dot(c.astype(bf16), wh2_ref[...], preferred_element_type=f32)    # (tile, 8)
    act_rgb = 1.0 / (1.0 + jnp.exp(-(raw_rgb + rgb_bias)))                          # sigmoid

    # ---- mlp_transient: cat([geo, trans]) -> ReLU(128) -> ReLU(128) -> 5
    t = jnp.maximum(jnp.dot(x, wt0_ref[...], preferred_element_type=f32)
                    + jnp.dot(base16_b, wt0g_ref[...], preferred_element_type=f32), 0.0)
    t = jnp.maximum(jnp.dot(t.astype(bf16), wt1_ref[...], preferred_element_type=f32), 0.0)
    out_t = jnp.dot(t.astype(bf16), wt2_ref[...], preferred_element_type=f32)       # (tile, 8)

    # per-column activation select (col 0: trunc_exp*sel, cols 1:3: sigmoid, col 4: softplus)
    cols8 = jax.lax.broadcasted_iota(jnp.int32, out_t.shape, 1)
    sig_t = 1.0 / (1.0 + jnp.exp(-(out_t + rgb_bias)))
    sp_t = jnp.maximum(out_t, 0.0) + jnp.log(1.0 + jnp.exp(-jnp.abs(out_t)))        # softplus
    act_t = jnp.where(cols8 == 0, jnp.exp(out_t) * sel,
                      jnp.where(cols8 <= 3, sig_t, sp_t))

    # single lane-dense (tile, 128) store: [base(16) | head(8) | transient(8) | zeros(96)]
    pad = jnp.zeros((x.shape[0], OUT_WIDTH - 32), f32)
    out_ref[...] = jnp.concatenate([act_b, act_rgb, act_t, pad], axis=-1)


def run_field_kernel(packed, weights, *, rgb_bias, tile_n=512):
    """packed: (n, IN_WIDTH) bf16 slab. Returns (n, OUT_WIDTH) f32 packed outputs."""
    n = packed.shape[0]
    n_pad = (-n) % tile_n                       # pad rows so any n works; sliced off below
    if n_pad:
        packed = jnp.concatenate(
            [packed, jnp.zeros((n_pad, IN_WIDTH), packed.dtype)], axis=0)
    n_rows = n + n_pad
    grid = (n_rows // tile_n,)

    in_specs = ([pl.BlockSpec((tile_n, IN_WIDTH), lambda i: (i, 0))]
                + [pl.BlockSpec(w.shape, lambda i: (0, 0)) for w in weights])
    out_specs = pl.BlockSpec((tile_n, OUT_WIDTH), lambda i: (i, 0))
    out_shape = jax.ShapeDtypeStruct((n_rows, OUT_WIDTH), jnp.float32)

    kernel = functools.partial(field_kernel, rgb_bias=rgb_bias)
    out = pl.pallas_call(
        kernel,
        grid_spec=pltpu.PrefetchScalarGridSpec(
            num_scalar_prefetch=0, grid=grid,
            in_specs=in_specs, out_specs=out_specs),
        out_shape=out_shape,
        compiler_params=pltpu.CompilerParams(
            dimension_semantics=("parallel",),
            vmem_limit_bytes=64 * 1024 * 1024),   # safe on v5e/v6e/v7x; footprint is ~2 MB/tile
    )(packed, *weights)
    return out[:n]


# ------------------------------------------------------------------------------------- #
# Parameter / input packing for the kernel layout
# ------------------------------------------------------------------------------------- #
def pack_inputs(feat, sh, app, trans, sel_f):
    """Pack per-sample inputs into one lane-dense (n, 128) bf16 slab."""
    n = feat.shape[0]
    lane_pad = jnp.zeros((n, IN_WIDTH - (SEL_LANE + 1)), jnp.float32)
    x = jnp.concatenate([feat, sh, app, trans, sel_f, lane_pad], axis=-1)
    return x.astype(jnp.bfloat16)


def prep_weights(Wb0, Wb1, Wh0, Wh1, Wh2, Wt0, Wt1, Wt2, *, sh_dim, geo_feat_dim):
    """Zero-pad / merge tcnn weights to match the packed lane layout; cast to bf16 (MXU)."""
    f32 = jnp.float32

    def place_rows(off, w):
        return jnp.zeros((IN_WIDTH, w.shape[1]), f32).at[off:off + w.shape[0]].set(w)

    wb0p = place_rows(FEAT_OFF, Wb0)                                    # (128, 64)
    wh0p = (place_rows(SH_OFF, Wh0[:sh_dim])
            + place_rows(APP_OFF, Wh0[sh_dim + geo_feat_dim:]))         # (128, 64)
    wt0p = place_rows(TR_OFF, Wt0[geo_feat_dim:])                       # (128, 128)

    def geo16(w_geo, width):                                            # row 0 (density) zeroed
        return jnp.zeros((16, width), f32).at[1:1 + geo_feat_dim].set(w_geo)

    wh0g = geo16(Wh0[sh_dim:sh_dim + geo_feat_dim], Wh0.shape[1])       # (16, 64)
    wt0g = geo16(Wt0[:geo_feat_dim], Wt0.shape[1])                      # (16, 128)

    wh2p = jnp.zeros((Wh2.shape[0], 8), f32).at[:, :3].set(Wh2)         # (64, 8)
    wt2p = jnp.zeros((Wt2.shape[0], 8), f32).at[:, :5].set(Wt2)         # (128, 8)

    ws = [wb0p, Wb1, wh0p, wh0g, Wh1, wh2p, wt0p, wt0g, Wt1, wt2p]
    return [w.astype(jnp.bfloat16) for w in ws]


# ------------------------------------------------------------------------------------- #
# JAX glue: encodings (gather-heavy / cheap elementwise)
# ------------------------------------------------------------------------------------- #
def sh_encoding_deg4(d):
    """tcnn SphericalHarmonics degree-4 basis; d in [-1, 1], shape (n, 3) -> (n, 16)."""
    x, y, z = d[:, 0], d[:, 1], d[:, 2]
    xx, yy, zz = x * x, y * y, z * z
    xy, yz, xz = x * y, y * z, x * z
    return jnp.stack([
        jnp.full_like(x, 0.28209479177387814),
        -0.48860251190291987 * y,
        0.48860251190291987 * z,
        -0.48860251190291987 * x,
        1.0925484305920792 * xy,
        -1.0925484305920792 * yz,
        0.94617469575755997 * zz - 0.31539156525251999,
        -1.0925484305920792 * xz,
        0.54627421529603959 * xx - 0.54627421529603959 * yy,
        0.59004358992664352 * y * (-3.0 * xx + yy),
        2.8906114426405538 * xy * z,
        0.45704579946446572 * y * (1.0 - 5.0 * zz),
        0.3731763325901154 * z * (5.0 * zz - 3.0),
        0.45704579946446572 * x * (1.0 - 5.0 * zz),
        1.4453057213202769 * z * (xx - yy),
        0.59004358992664352 * x * (-xx + 3.0 * yy),
    ], axis=-1).astype(jnp.float32)


def hash_grid_encode(pos01, tables, base_res, growth, log2_hashmap_size):
    """Instant-NGP / tcnn HashGrid encoding (trilinear). pos01: (n,3) in [0,1]."""
    # TODO(synk): data-dependent hash-table gather stays in plain JAX (no clean Pallas TPU gather).
    n = pos01.shape[0]
    L, T, F = tables.shape
    assert T == (1 << log2_hashmap_size)
    outs = []
    for lvl in range(L):
        scale = float(base_res) * (growth ** lvl) - 1.0
        res = int(np.ceil(scale)) + 1
        p = pos01 * scale + 0.5
        p0f = jnp.floor(p)
        frac = (p - p0f).astype(jnp.float32)
        p0 = p0f.astype(jnp.uint32)
        dense = (res ** 3) <= T
        acc = jnp.zeros((n, F), jnp.float32)
        for corner in range(8):
            off = np.array([(corner >> d) & 1 for d in range(3)], dtype=np.uint32)
            pc = p0 + jnp.asarray(off)[None, :]
            w = jnp.prod(jnp.where(jnp.asarray(off)[None, :] == 1, frac, 1.0 - frac),
                         axis=-1, keepdims=True)
            if dense:
                idx = pc[:, 0] + pc[:, 1] * np.uint32(res) + pc[:, 2] * np.uint32(res * res)
            else:
                idx = (pc[:, 0]
                       ^ (pc[:, 1] * np.uint32(2654435761))
                       ^ (pc[:, 2] * np.uint32(805459861)))
            idx = (idx % np.uint32(T)).astype(jnp.int32)
            acc = acc + w * tables[lvl][idx]
        outs.append(acc)
    return jnp.concatenate(outs, axis=-1)


# ------------------------------------------------------------------------------------- #
# Full forward + pure-JAX reference
# ------------------------------------------------------------------------------------- #
def nerfacto_field_forward(positions, viewdirs, app_emb, trans_emb, params, cfg):
    bound = cfg["bound"]
    # --- density() preamble: normalize, selector, mask (plain JAX, feeds the hash gather)
    pn = (positions + bound) / (2.0 * bound)
    sel = jnp.all((pn >= 0.0) & (pn <= 1.0), axis=-1)
    pn = pn * sel[:, None].astype(pn.dtype)
    sel_f = sel.astype(jnp.float32)[:, None]

    feat = hash_grid_encode(pn, params["grid"], cfg["base_res"], cfg["growth"],
                            cfg["log2_hashmap_size"])
    # direction encoder: module maps viewdirs -> [0,1], tcnn SH maps back to [-1,1]
    d01 = (viewdirs + 1.0) / 2.0
    sh = sh_encoding_deg4(d01 * 2.0 - 1.0)

    packed = pack_inputs(feat, sh, app_emb, trans_emb, sel_f)
    out = run_field_kernel(packed, params["mlp"], rgb_bias=cfg["rgb_bias"],
                           tile_n=cfg.get("tile_n", 512))

    outputs = {
        "rgb":               out[:, RGB_LANE:RGB_LANE + 3],
        "density":           out[:, DEN_LANE:DEN_LANE + 1],
        "density_transient": out[:, DTR_LANE:DTR_LANE + 1],
        "rgb_transient":     out[:, RGBT_LANE:RGBT_LANE + 3],
        "uncertainty":       out[:, UNC_LANE:UNC_LANE + 1],
    }
    aux = (feat, sh, sel_f)
    return outputs, aux


def reference_forward(feat, sh, app, trans, sel_f, raw_weights, geo_feat_dim, rgb_bias):
    """Pure-JAX reference mirroring the kernel's bf16 operand rounding (f32 accumulate)."""
    bf = lambda a: a.astype(jnp.bfloat16).astype(jnp.float32)
    Wb0, Wb1, Wh0, Wh1, Wh2, Wt0, Wt1, Wt2 = [bf(w) for w in raw_weights]
    dot = lambda a, b: jnp.dot(a, b, precision=jax.lax.Precision.HIGHEST)
    sh_dim = sh.shape[1]
    featb, shb, appb, trb = bf(feat), bf(sh), bf(app), bf(trans)

    h0 = jnp.maximum(dot(featb, Wb0), 0.0)
    base = dot(bf(h0), Wb1)
    density = jnp.exp(base[:, :1]) * sel_f
    geo = bf(base)[:, 1:1 + geo_feat_dim]

    Wh0_sh = Wh0[:sh_dim]
    Wh0_geo = Wh0[sh_dim:sh_dim + geo_feat_dim]
    Wh0_app = Wh0[sh_dim + geo_feat_dim:]
    h = jnp.maximum(dot(shb, Wh0_sh) + dot(geo, Wh0_geo) + dot(appb, Wh0_app), 0.0)
    h = jnp.maximum(dot(bf(h), Wh1), 0.0)
    rgb = jax.nn.sigmoid(dot(bf(h), Wh2) + rgb_bias)

    Wt0_geo, Wt0_tr = Wt0[:geo_feat_dim], Wt0[geo_feat_dim:]
    t = jnp.maximum(dot(geo, Wt0_geo) + dot(trb, Wt0_tr), 0.0)
    t = jnp.maximum(dot(bf(t), Wt1), 0.0)
    o = dot(bf(t), Wt2)
    return dict(rgb=rgb, density=density,
                density_transient=jnp.exp(o[:, :1]) * sel_f,
                rgb_transient=jax.nn.sigmoid(o[:, 1:4] + rgb_bias),
                uncertainty=jax.nn.softplus(o[:, 4:5]))


# ------------------------------------------------------------------------------------- #
# main
# ------------------------------------------------------------------------------------- #
if __name__ == "__main__":
    # ---- module hyperparameters (NerfactoField defaults, tcnn-MLP path)
    bound = 1.0
    num_levels, base_res, max_res = 16, 16, 2048
    log2_hashmap_size, features_per_level = 19, 2
    hidden_dim, geo_feat_dim = 64, 15
    hidden_dim_color, hidden_dim_transient = 64, 128
    appearance_embedding_dim, transient_embedding_dim = 32, 16
    rgb_bias = 0.0
    growth = float(np.exp((np.log(max_res) - np.log(base_res)) / (num_levels - 1)))
    grid_in_dim = num_levels * features_per_level        # 32
    sh_dim = 16
    head_in = sh_dim + geo_feat_dim + appearance_embedding_dim    # 63
    trans_in = geo_feat_dim + transient_embedding_dim             # 31

    n = 1000     # not a multiple of tile_n -> exercises the row-padding path
    key = jax.random.PRNGKey(0)
    keys = jax.random.split(key, 16)

    # ---- deterministic synthetic parameters
    T = 1 << log2_hashmap_size
    grid_tables = jax.random.uniform(keys[0], (num_levels, T, features_per_level),
                                     jnp.float32, -1e-4, 1e-4)

    def init_w(k, shape):
        b = 1.0 / np.sqrt(shape[0])
        return jax.random.uniform(k, shape, jnp.float32, -b, b)

    Wb0 = init_w(keys[1], (grid_in_dim, hidden_dim))
    Wb1 = init_w(keys[2], (hidden_dim, 1 + geo_feat_dim))
    Wh0 = init_w(keys[3], (head_in, hidden_dim_color))
    Wh1 = init_w(keys[4], (hidden_dim_color, hidden_dim_color))
    Wh2 = init_w(keys[5], (hidden_dim_color, 3))
    Wt0 = init_w(keys[6], (trans_in, hidden_dim_transient))
    Wt1 = init_w(keys[7], (hidden_dim_transient, hidden_dim_transient))
    Wt2 = init_w(keys[8], (hidden_dim_transient, 5))
    raw_weights = [Wb0, Wb1, Wh0, Wh1, Wh2, Wt0, Wt1, Wt2]

    mlp_weights = prep_weights(Wb0, Wb1, Wh0, Wh1, Wh2, Wt0, Wt1, Wt2,
                               sh_dim=sh_dim, geo_feat_dim=geo_feat_dim)

    params = {"grid": grid_tables, "mlp": mlp_weights}
    cfg = {"bound": bound, "base_res": base_res, "growth": growth,
           "log2_hashmap_size": log2_hashmap_size, "geo_feat_dim": geo_feat_dim,
           "rgb_bias": rgb_bias, "tile_n": 512}

    # ---- deterministic example inputs
    positions = jax.random.uniform(keys[9], (n, 3), jnp.float32,
                                   -1.2 * bound, 1.2 * bound)   # some points out of bounds
    vd = jax.random.normal(keys[10], (n, 3), jnp.float32)
    viewdirs = vd / jnp.linalg.norm(vd, axis=-1, keepdims=True)
    embedded_appearance = 0.1 * jax.random.normal(
        keys[11], (n, appearance_embedding_dim), jnp.float32)
    embedded_transient = 0.1 * jax.random.normal(
        keys[12], (n, transient_embedding_dim), jnp.float32)

    outputs, (feat, sh, sel_f) = nerfacto_field_forward(
        positions, viewdirs, embedded_appearance, embedded_transient, params, cfg)
    outputs = jax.tree_util.tree_map(jax.block_until_ready, outputs)

    # ---- correctness check against a pure-JAX reference of the same (bf16-rounded) math
    ref = reference_forward(feat, sh, embedded_appearance, embedded_transient,
                            sel_f, raw_weights, geo_feat_dim, rgb_bias)
    for k in ("rgb", "density", "density_transient", "rgb_transient", "uncertainty"):
        np.testing.assert_allclose(np.asarray(outputs[k]), np.asarray(ref[k]),
                                   rtol=5e-3, atol=5e-4, err_msg=k)

    print("KERNEL_OK")
</pallas_src>

<mosaic_0001>
module attributes {stable_mosaic.version = 11 : i64} {
  func.func @field_kernel(%arg0: i32, %arg1: memref<512x128xbf16, #tpu.memory_space<vmem>>, %arg2: memref<128x64xbf16, #tpu.memory_space<vmem>>, %arg3: memref<64x16xbf16, #tpu.memory_space<vmem>>, %arg4: memref<128x64xbf16, #tpu.memory_space<vmem>>, %arg5: memref<16x64xbf16, #tpu.memory_space<vmem>>, %arg6: memref<64x64xbf16, #tpu.memory_space<vmem>>, %arg7: memref<64x8xbf16, #tpu.memory_space<vmem>>, %arg8: memref<128x128xbf16, #tpu.memory_space<vmem>>, %arg9: memref<16x128xbf16, #tpu.memory_space<vmem>>, %arg10: memref<128x128xbf16, #tpu.memory_space<vmem>>, %arg11: memref<128x8xbf16, #tpu.memory_space<vmem>>, %arg12: memref<512x128xf32, #tpu.memory_space<vmem>>) attributes {dimension_semantics = [#tpu.dimension_semantics<parallel>], iteration_bounds = array<i64: 2>, scalar_prefetch = 0 : i64, scratch_operands = 0 : i64, tpu.core_type = #tpu.core_type<tc>, window_params = [{transform_indices = @transform_0, window_bounds = array<i64: 512, 128>}, {pipeline_mode = #tpu.pipeline_mode<synchronous>, transform_indices = @transform_1, window_bounds = array<i64: 128, 64>}, {pipeline_mode = #tpu.pipeline_mode<synchronous>, transform_indices = @transform_2, window_bounds = array<i64: 64, 16>}, {pipeline_mode = #tpu.pipeline_mode<synchronous>, transform_indices = @transform_3, window_bounds = array<i64: 128, 64>}, {pipeline_mode = #tpu.pipeline_mode<synchronous>, transform_indices = @transform_4, window_bounds = array<i64: 16, 64>}, {pipeline_mode = #tpu.pipeline_mode<synchronous>, transform_indices = @transform_5, window_bounds = array<i64: 64, 64>}, {pipeline_mode = #tpu.pipeline_mode<synchronous>, transform_indices = @transform_6, window_bounds = array<i64: 64, 8>}, {pipeline_mode = #tpu.pipeline_mode<synchronous>, transform_indices = @transform_7, window_bounds = array<i64: 128, 128>}, {pipeline_mode = #tpu.pipeline_mode<synchronous>, transform_indices = @transform_8, window_bounds = array<i64: 16, 128>}, {pipeline_mode = #tpu.pipeline_mode<synchronous>, transform_indices = @transform_9, window_bounds = array<i64: 128, 128>}, {pipeline_mode = #tpu.pipeline_mode<synchronous>, transform_indices = @transform_10, window_bounds = array<i64: 128, 8>}, {transform_indices = @transform_11, window_bounds = array<i64: 512, 128>}]} {
    %c0 = arith.constant 0 : index
    %c0_0 = arith.constant 0 : index
    %0 = vector.load %arg1[%c0, %c0_0] : memref<512x128xbf16, #tpu.memory_space<vmem>>, vector<512x128xbf16>
    %1 = tpu.iota {dimensions = array<i32: 1>} : vector<512x128xi32>
    %c96_i32 = arith.constant 96 : i32
    %2 = vector.broadcast %c96_i32 : i32 to vector<512x128xi32>
    %3 = arith.cmpi eq, %1, %2 : vector<512x128xi32>
    %c0_i32 = arith.constant 0 : i32
    %4 = arith.sitofp %c0_i32 : i32 to bf16
    %5 = vector.broadcast %4 : bf16 to vector<512x128xbf16>
    %6 = arith.select %3, %0, %5 : vector<512x128xi1>, vector<512x128xbf16>
    %7 = arith.extf %6 : vector<512x128xbf16> to vector<512x128xf32>
    %cst = arith.constant dense<0.000000e+00> : vector<512xf32>
    %8 = vector.multi_reduction <add>, %7, %cst [1] : vector<512x128xf32> to vector<512xf32>
    %9 = vector.shape_cast %8 : vector<512xf32> to vector<512x1xf32>
    %c0_1 = arith.constant 0 : index
    %c0_2 = arith.constant 0 : index
    %10 = vector.load %arg2[%c0_1, %c0_2] : memref<128x64xbf16, #tpu.memory_space<vmem>>, vector<128x64xbf16>
    %cst_3 = arith.constant dense<0.000000e+00> : vector<512x64xf32>
    %11 = tpu.matmul %0, %10, %cst_3 {dimension_numbers = #tpu.dot_dimension_numbers<[1], [0], [0], [1], [0, 0, 1, 1], [], []>} : vector<512x128xbf16>, vector<128x64xbf16>, vector<512x64xf32> -> vector<512x64xf32>
    %cst_4 = arith.constant 0.000000e+00 : f32
    %12 = vector.broadcast %cst_4 : f32 to vector<512x64xf32>
    %13 = arith.maximumf %11, %12 : vector<512x64xf32>
    %14 = arith.truncf %13 : vector<512x64xf32> to vector<512x64xbf16>
    %c0_5 = arith.constant 0 : index
    %c0_6 = arith.constant 0 : index
    %15 = vector.load %arg3[%c0_5, %c0_6] : memref<64x16xbf16, #tpu.memory_space<vmem>>, vector<64x16xbf16>
    %cst_7 = arith.constant dense<0.000000e+00> : vector<512x16xf32>
    %16 = tpu.matmul %14, %15, %cst_7 {dimension_numbers = #tpu.dot_dimension_numbers<[1], [0], [0], [1], [0, 0, 1, 1], [], []>} : vector<512x64xbf16>, vector<64x16xbf16>, vector<512x16xf32> -> vector<512x16xf32>
    %17 = arith.truncf %16 : vector<512x16xf32> to vector<512x16xbf16>
    %18 = tpu.iota {dimensions = array<i32: 1>} : vector<512x16xi32>
    %c0_i32_8 = arith.constant 0 : i32
    %19 = vector.broadcast %c0_i32_8 : i32 to vector<512x16xi32>
    %20 = arith.cmpi eq, %18, %19 : vector<512x16xi32>
    %21 = math.exp %16 : vector<512x16xf32>
    %22 = vector.broadcast %9 : vector<512x1xf32> to vector<512x16xf32>
    %23 = arith.mulf %21, %22 : vector<512x16xf32>
    %24 = arith.select %20, %23, %16 : vector<512x16xi1>, vector<512x16xf32>
    %c0_9 = arith.constant 0 : index
    %c0_10 = arith.constant 0 : index
    %25 = vector.load %arg4[%c0_9, %c0_10] : memref<128x64xbf16, #tpu.memory_space<vmem>>, vector<128x64xbf16>
    %cst_11 = arith.constant dense<0.000000e+00> : vector<512x64xf32>
    %26 = tpu.matmul %0, %25, %cst_11 {dimension_numbers = #tpu.dot_dimension_numbers<[1], [0], [0], [1], [0, 0, 1, 1], [], []>} : vector<512x128xbf16>, vector<128x64xbf16>, vector<512x64xf32> -> vector<512x64xf32>
    %c0_12 = arith.constant 0 : index
    %c0_13 = arith.constant 0 : index
    %27 = vector.load %arg5[%c0_12, %c0_13] : memref<16x64xbf16, #tpu.memory_space<vmem>>, vector<16x64xbf16>
    %cst_14 = arith.constant dense<0.000000e+00> : vector<512x64xf32>
    %28 = tpu.matmul %17, %27, %cst_14 {dimension_numbers = #tpu.dot_dimension_numbers<[1], [0], [0], [1], [0, 0, 1, 1], [], []>} : vector<512x16xbf16>, vector<16x64xbf16>, vector<512x64xf32> -> vector<512x64xf32>
    %29 = arith.addf %26, %28 : vector<512x64xf32>
    %cst_15 = arith.constant 0.000000e+00 : f32
    %30 = vector.broadcast %cst_15 : f32 to vector<512x64xf32>
    %31 = arith.maximumf %29, %30 : vector<512x64xf32>
    %32 = arith.truncf %31 : vector<512x64xf32> to vector<512x64xbf16>
    %c0_16 = arith.constant 0 : index
    %c0_17 = arith.constant 0 : index
    %33 = vector.load %arg6[%c0_16, %c0_17] : memref<64x64xbf16, #tpu.memory_space<vmem>>, vector<64x64xbf16>
    %cst_18 = arith.constant dense<0.000000e+00> : vector<512x64xf32>
    %34 = tpu.matmul %32, %33, %cst_18 {dimension_numbers = #tpu.dot_dimension_numbers<[1], [0], [0], [1], [0, 0, 1, 1], [], []>} : vector<512x64xbf16>, vector<64x64xbf16>, vector<512x64xf32> -> vector<512x64xf32>
    %cst_19 = arith.constant 0.000000e+00 : f32
    %35 = vector.broadcast %cst_19 : f32 to vector<512x64xf32>
    %36 = arith.maximumf %34, %35 : vector<512x64xf32>
    %37 = arith.truncf %36 : vector<512x64xf32> to vector<512x64xbf16>
    %c0_20 = arith.constant 0 : index
    %c0_21 = arith.constant 0 : index
    %38 = vector.load %arg7[%c0_20, %c0_21] : memref<64x8xbf16, #tpu.memory_space<vmem>>, vector<64x8xbf16>
    %cst_22 = arith.constant dense<0.000000e+00> : vector<512x8xf32>
    %39 = tpu.matmul %37, %38, %cst_22 {dimension_numbers = #tpu.dot_dimension_numbers<[1], [0], [0], [1], [0, 0, 1, 1], [], []>} : vector<512x64xbf16>, vector<64x8xbf16>, vector<512x8xf32> -> vector<512x8xf32>
    %cst_23 = arith.constant 0.000000e+00 : f32
    %40 = vector.broadcast %cst_23 : f32 to vector<512x8xf32>
    %41 = arith.addf %39, %40 : vector<512x8xf32>
    %cst_24 = arith.constant 0.000000e+00 : f32
    %42 = vector.broadcast %cst_24 : f32 to vector<512x8xf32>
    %43 = arith.subf %42, %41 : vector<512x8xf32>
    %44 = math.exp %43 : vector<512x8xf32>
    %cst_25 = arith.constant 1.000000e+00 : f32
    %45 = vector.broadcast %cst_25 : f32 to vector<512x8xf32>
    %46 = arith.addf %45, %44 : vector<512x8xf32>
    %cst_26 = arith.constant 1.000000e+00 : f32
    %47 = vector.broadcast %cst_26 : f32 to vector<512x8xf32>
    %48 = arith.divf %47, %46 : vector<512x8xf32>
    %c0_27 = arith.constant 0 : index
    %c0_28 = arith.constant 0 : index
    %49 = vector.load %arg8[%c0_27, %c0_28] : memref<128x128xbf16, #tpu.memory_space<vmem>>, vector<128x128xbf16>
    %cst_29 = arith.constant dense<0.000000e+00> : vector<512x128xf32>
    %50 = tpu.matmul %0, %49, %cst_29 {dimension_numbers = #tpu.dot_dimension_numbers<[1], [0], [0], [1], [0, 0, 1, 1], [], []>} : vector<512x128xbf16>, vector<128x128xbf16>, vector<512x128xf32> -> vector<512x128xf32>
    %c0_30 = arith.constant 0 : index
    %c0_31 = arith.constant 0 : index
    %51 = vector.load %arg9[%c0_30, %c0_31] : memref<16x128xbf16, #tpu.memory_space<vmem>>, vector<16x128xbf16>
    %cst_32 = arith.constant dense<0.000000e+00> : vector<512x128xf32>
    %52 = tpu.matmul %17, %51, %cst_32 {dimension_numbers = #tpu.dot_dimension_numbers<[1], [0], [0], [1], [0, 0, 1, 1], [], []>} : vector<512x16xbf16>, vector<16x128xbf16>, vector<512x128xf32> -> vector<512x128xf32>
    %53 = arith.addf %50, %52 : vector<512x128xf32>
    %cst_33 = arith.constant 0.000000e+00 : f32
    %54 = vector.broadcast %cst_33 : f32 to vector<512x128xf32>
    %55 = arith.maximumf %53, %54 : vector<512x128xf32>
    %56 = arith.truncf %55 : vector<512x128xf32> to vector<512x128xbf16>
    %c0_34 = arith.constant 0 : index
    %c0_35 = arith.constant 0 : index
    %57 = vector.load %arg10[%c0_34, %c0_35] : memref<128x128xbf16, #tpu.memory_space<vmem>>, vector<128x128xbf16>
    %cst_36 = arith.constant dense<0.000000e+00> : vector<512x128xf32>
    %58 = tpu.matmul %56, %57, %cst_36 {dimension_numbers = #tpu.dot_dimension_numbers<[1], [0], [0], [1], [0, 0, 1, 1], [], []>} : vector<512x128xbf16>, vector<128x128xbf16>, vector<512x128xf32> -> vector<512x128xf32>
    %cst_37 = arith.constant 0.000000e+00 : f32
    %59 = vector.broadcast %cst_37 : f32 to vector<512x128xf32>
    %60 = arith.maximumf %58, %59 : vector<512x128xf32>
    %61 = arith.truncf %60 : vector<512x128xf32> to vector<512x128xbf16>
    %c0_38 = arith.constant 0 : index
    %c0_39 = arith.constant 0 : index
    %62 = vector.load %arg11[%c0_38, %c0_39] : memref<128x8xbf16, #tpu.memory_space<vmem>>, vector<128x8xbf16>
    %cst_40 = arith.constant dense<0.000000e+00> : vector<512x8xf32>
    %63 = tpu.matmul %61, %62, %cst_40 {dimension_numbers = #tpu.dot_dimension_numbers<[1], [0], [0], [1], [0, 0, 1, 1], [], []>} : vector<512x128xbf16>, vector<128x8xbf16>, vector<512x8xf32> -> vector<512x8xf32>
    %64 = tpu.iota {dimensions = array<i32: 1>} : vector<512x8xi32>
    %cst_41 = arith.constant 0.000000e+00 : f32
    %65 = vector.broadcast %cst_41 : f32 to vector<512x8xf32>
    %66 = arith.addf %63, %65 : vector<512x8xf32>
    %cst_42 = arith.constant 0.000000e+00 : f32
    %67 = vector.broadcast %cst_42 : f32 to vector<512x8xf32>
    %68 = arith.subf %67, %66 : vector<512x8xf32>
    %69 = math.exp %68 : vector<512x8xf32>
    %cst_43 = arith.constant 1.000000e+00 : f32
    %70 = vector.broadcast %cst_43 : f32 to vector<512x8xf32>
    %71 = arith.addf %70, %69 : vector<512x8xf32>
    %cst_44 = arith.constant 1.000000e+00 : f32
    %72 = vector.broadcast %cst_44 : f32 to vector<512x8xf32>
    %73 = arith.divf %72, %71 : vector<512x8xf32>
    %cst_45 = arith.constant 0.000000e+00 : f32
    %74 = vector.broadcast %cst_45 : f32 to vector<512x8xf32>
    %75 = arith.maximumf %63, %74 : vector<512x8xf32>
    %76 = math.absf %63 : vector<512x8xf32>
    %cst_46 = arith.constant 0.000000e+00 : f32
    %77 = vector.broadcast %cst_46 : f32 to vector<512x8xf32>
    %78 = arith.subf %77, %76 : vector<512x8xf32>
    %79 = math.exp %78 : vector<512x8xf32>
    %cst_47 = arith.constant 1.000000e+00 : f32
    %80 = vector.broadcast %cst_47 : f32 to vector<512x8xf32>
    %81 = arith.addf %80, %79 : vector<512x8xf32>
    %82 = math.log %81 : vector<512x8xf32>
    %83 = arith.addf %75, %82 : vector<512x8xf32>
    %c0_i32_48 = arith.constant 0 : i32
    %84 = vector.broadcast %c0_i32_48 : i32 to vector<512x8xi32>
    %85 = arith.cmpi eq, %64, %84 : vector<512x8xi32>
    %86 = math.exp %63 : vector<512x8xf32>
    %87 = vector.broadcast %9 : vector<512x1xf32> to vector<512x8xf32>
    %88 = arith.mulf %86, %87 : vector<512x8xf32>
    %c3_i32 = arith.constant 3 : i32
    %89 = vector.broadcast %c3_i32 : i32 to vector<512x8xi32>
    %90 = arith.cmpi sle, %64, %89 : vector<512x8xi32>
    %91 = arith.select %90, %73, %83 : vector<512x8xi1>, vector<512x8xf32>
    %92 = arith.select %85, %88, %91 : vector<512x8xi1>, vector<512x8xf32>
    %cst_49 = arith.constant 0.000000e+00 : f32
    %93 = vector.broadcast %cst_49 : f32 to vector<512x96xf32>
    %94 = tpu.concatenate %24, %48, %92, %93 in 1 : vector<512x16xf32>, vector<512x8xf32>, vector<512x8xf32>, vector<512x96xf32> -> vector<512x128xf32>
    %c0_50 = arith.constant 0 : index
    %c0_51 = arith.constant 0 : index
    %95 = vector.load %arg12[%c0_50, %c0_51] : memref<512x128xf32, #tpu.memory_space<vmem>>, vector<512x128xf32>
    tpu.vector_store %arg12[%c0_50, %c0_51], %94 {strides = array<i32>} : memref<512x128xf32, #tpu.memory_space<vmem>>, vector<512x128xf32>,
    return
  }
  func.func @transform_0(%arg0: i32) -> (i32, i32) {
    %c0_i32 = arith.constant 0 : i32
    %c0_i32_0 = arith.constant 0 : i32
    return %arg0, %c0_i32 : i32, i32
  }
  func.func @transform_1(%arg0: i32) -> (i32, i32) {
    %c0_i32 = arith.constant 0 : i32
    %c0_i32_0 = arith.constant 0 : i32
    %c0_i32_1 = arith.constant 0 : i32
    return %c0_i32, %c0_i32_0 : i32, i32
  }
  func.func @transform_2(%arg0: i32) -> (i32, i32) {
    %c0_i32 = arith.constant 0 : i32
    %c0_i32_0 = arith.constant 0 : i32
    %c0_i32_1 = arith.constant 0 : i32
    return %c0_i32, %c0_i32_0 : i32, i32
  }
  func.func @transform_3(%arg0: i32) -> (i32, i32) {
    %c0_i32 = arith.constant 0 : i32
    %c0_i32_0 = arith.constant 0 : i32
    %c0_i32_1 = arith.constant 0 : i32
    return %c0_i32, %c0_i32_0 : i32, i32
  }
  func.func @transform_4(%arg0: i32) -> (i32, i32) {
    %c0_i32 = arith.constant 0 : i32
    %c0_i32_0 = arith.constant 0 : i32
    %c0_i32_1 = arith.constant 0 : i32
    return %c0_i32, %c0_i32_0 : i32, i32
  }
  func.func @transform_5(%arg0: i32) -> (i32, i32) {
    %c0_i32 = arith.constant 0 : i32
    %c0_i32_0 = arith.constant 0 : i32
    %c0_i32_1 = arith.constant 0 : i32
    return %c0_i32, %c0_i32_0 : i32, i32
  }
  func.func @transform_6(%arg0: i32) -> (i32, i32) {
    %c0_i32 = arith.constant 0 : i32
    %c0_i32_0 = arith.constant 0 : i32
    %c0_i32_1 = arith.constant 0 : i32
    return %c0_i32, %c0_i32_0 : i32, i32
  }
  func.func @transform_7(%arg0: i32) -> (i32, i32) {
    %c0_i32 = arith.constant 0 : i32
    %c0_i32_0 = arith.constant 0 : i32
    %c0_i32_1 = arith.constant 0 : i32
    return %c0_i32, %c0_i32_0 : i32, i32
  }
  func.func @transform_8(%arg0: i32) -> (i32, i32) {
    %c0_i32 = arith.constant 0 : i32
    %c0_i32_0 = arith.constant 0 : i32
    %c0_i32_1 = arith.constant 0 : i32
    return %c0_i32, %c0_i32_0 : i32, i32
  }
  func.func @transform_9(%arg0: i32) -> (i32, i32) {
    %c0_i32 = arith.constant 0 : i32
    %c0_i32_0 = arith.constant 0 : i32
    %c0_i32_1 = arith.constant 0 : i32
    return %c0_i32, %c0_i32_0 : i32, i32
  }
  func.func @transform_10(%arg0: i32) -> (i32, i32) {
    %c0_i32 = arith.constant 0 : i32
    %c0_i32_0 = arith.constant 0 : i32
    %c0_i32_1 = arith.constant 0 : i32
    return %c0_i32, %c0_i32_0 : i32, i32
  }
  func.func @transform_11(%arg0: i32) -> (i32, i32) {
    %c0_i32 = arith.constant 0 : i32
    %c0_i32_0 = arith.constant 0 : i32
    return %arg0, %c0_i32 : i32, i32
  }
}

</mosaic_0001>

<bundles_post_ra>
// kernel: tpu_custom_call.1
= control target key start
LH: loop header
LB: loop body
LE: loop exit
PB: predicated region body
PF: predicated region fallthrough
CT: control target
= control target key end

     0   :  { %16 = vsyncpa [#allocation3], 0  ;;  %s15975_s0 = inlined_call_operand.hbm [shape: bf16[1024,128], index: 0, kind: input, shape index: {}]   ;;  %s15976_s1 = inlined_call_operand.vmem [shape: bf16[128,64], index: 1, kind: input, shape index: {}]   ;;  %s15977_s2 = inlined_call_operand.vmem [shape: bf16[64,16], index: 2, kind: input, shape index: {}]   ;;  %s15978_s3 = inlined_call_operand.vmem [shape: bf16[128,64], index: 3, kind: input, shape index: {}]   ;;  %s15979_s4 = inlined_call_operand.vmem [shape: bf16[16,64], index: 4, kind: input, shape index: {}]   ;;  %s15980_s5 = inlined_call_operand.vmem [shape: bf16[64,64], index: 5, kind: input, shape index: {}]   ;;  %s15981_s6 = inlined_call_operand.vmem [shape: bf16[64,8], index: 6, kind: input, shape index: {}]   ;;  %s15982_s7 = inlined_call_operand.vmem [shape: bf16[128,128], index: 7, kind: input, shape index: {}]   ;;  %s15983_s8 = inlined_call_operand.vmem [shape: bf16[16,128], index: 8, kind: input, shape index: {}]   ;;  %s15984_s9 = inlined_call_operand.vmem [shape: bf16[128,128], index: 9, kind: input, shape index: {}]   ;;  %s15985_s10 = inlined_call_operand.vmem [shape: bf16[128,8], index: 10, kind: input, shape index: {}]   ;;  %s15986_s11 = inlined_call_operand.hbm [shape: f32[1024,128], index: 11, kind: output, shape index: {}]  }
   0x1   :  { %18 = vsyncpa [#allocation3 + $0x1], 0 }
   0x2   :  { %19 = vsyncpa [#allocation4], 0 }
   0x3   :  { %21 = vsyncpa [#allocation4 + $0x1], 0  ;;  %s10378_s17 = smov 0   ;;  %s10380_s18 = smov 0  }
   0x4   :  { %s10382_s19 = smov 0   ;;  %s10384_s20 = smov 0  }
   0x5 LB: > { %16174 = sst [smem:[#allocation8_spill]] %s10298_s17  ;;  %s10399_s21 = sadd.s32 4294967295, %s10310_s20   ;;  %s10310_s20 = sphi %s10384_s20, %s16754_s20   ;;  %s10306_s19 = sphi %s10382_s19, %s16759_s19   ;;  %s10302_s18 = sphi %s10380_s18, %s16758_s18   ;;  %s10298_s17 = sphi %s10378_s17, %s16757_s17  }
   0x6   : > { %16175 = sst [smem:[#allocation9_spill]] %s10306_s19  ;;  %s8455_s22 = sadd.s32 4294967294, %s10310_s20  }
   0x7   : > { %s10403_s23 = sadd.s32 1, %s10310_s20   ;;  %s34_s24 = sadd.s32 1, %s10306_s19 }
   0x8   : > { %16176 = sst [smem:[#allocation10_spill]] %s10403_s23  ;;  %s31_s25 = ssub.s32 %s10310_s20, %s10403_s23 }
   0x9   : > { %p41_p0 = scmp.ne.s32.totalorder %s10306_s19, %s10302_s18  ;;  %p32_p1 = scmp.eq.s32.totalorder %s31_s25, 0 }
   0xa   : > { %p42_p2 = scmp.eq.s32.totalorder %s10310_s20, 0  ;;  %p47_p3 = scmp.ne.s32.totalorder %s10302_s18, %s10298_s17 }
   0xb   : > { %p48_p4 = scmp.eq.s32.totalorder %s10399_s21, 0  ;;  %p281_p7 = scmp.eq.s32.totalorder %s10399_s21, 1 }
   0xc   : > { %s10415_s26 = scalar_select %p32_p1, %s10306_s19, %s34_s24  }
   0xd   : > { %p10417_p5 = por %p42_p2, %p41_p0  ;;  %p10421_p6 = por %p48_p4, %p47_p3 }
   0xe   : > { %16177 = sst [smem:[#allocation11_spill]] %s10415_s26  ;;  %p287_p8 = scmp.eq.s32.totalorder %s8455_s22, 1 }
   0xf   : > { %p9086_p10 = scmp.lt.s32.totalorder %s10310_s20, 2  ;;  %p10428_p11 = por %p281_p7, %p41_p0 }
  0x10   : > { %p10432_p12 = por %p287_p8, %p47_p3  ;;  %s337_s12 = sand.u32 1, %s10306_s19  }
  0x11   : > { %s8973_s13 = sshll.u32 %s10310_s20, 8  ;;  %s8458_s14 = sshll.u32 %s337_s12, 8 }
  0x12   : > { %s16181_s30 = scalar_select %p10432_p12, 1, 0 }
  0x13   : > { %s346_s24 = scalar_lea.hbm %s15975_s0, %s8973_s13  ;;  %s341_s22 = scalar_lea.vmem [#allocation2], %s8458_s14 }
  0x14   : > { %16182 = sst [smem:[#allocation12_spill]] %s16181_s30  ;;  %s347_s25 = sshll.u32 %s346_s24, 4  ;;  %s348_s25 = int_to_ptr.hbm [resolvable:$true] %s347_s25 }
  0x15   : > { %s349_s26 = sshll.u32 %s341_s22, 4  ;;  %p10443_p13 = pnand %p9086_p10, %p10417_p5  ;;  %s350_s26 = int_to_ptr.vmem [resolvable:$true] %s349_s26 }
  0x16   : > { %p8461_p0 = scmp.ge.s32.totalorder %s10310_s20, 1  ;;  %p357_p1 = scmp.lt.s32.totalorder %s10310_s20, 3 }
  0x17   : > { %s338_s19 = scalar_lea.sflag [#allocation3], %s337_s12  ;;  %s10214_s30 = sshra.s32 %s348_s25, 4  ;;  %s10215_s30 = int_to_ptr.hbm [resolvable:$true] %s10214_s30 }
  0x18   : > { %s10216_s17 = scalar_lea.hbm %s10215_s30, 256  ;;  %p10218_p3 = pneg %p10443_p13 }
  0x19   : > { %p10217_p2 = scmp.ne.s32.totalorder %s10215_s30, %s10216_s17  ;;  %s10221_s27 = scalar_lea.hbm %s15975_s0, 512 }
  0x1a   : > { %p10222_p5 = scmp.lt.s32.totalorder %s10215_s30, %s15975_s0  ;;  %p10223_p8 = scmp.lt.s32.totalorder %s10221_s27, %s10216_s17 }
  0x1b   : > { %p10219_p4 = pnand %p10218_p3, %p10217_p2 }
  0x1c   : > { %p10224_p10 = por %p10223_p8, %p10222_p5 }
  0x1d   : > { %p10220_p7 = pneg %p10219_p4 }
  0x1f   : > { %p10225_p9 = pnand %p10224_p10, %p10220_p7 }
  0x21   : > { %10228 = shalt.err (!%p10225_p9)
}
  0x22   : > { %s10312_s12 = smov 64   ;;  %s10313_s24 = smov 4  }
  0x23   : > { %9081 = dma.hbm_to_vmem [thread:$0]  (!%p10443_p13), %s348_s25, 4096, %s350_s26, %s338_s19, %s10312_s12, %s10312_s12, %s10313_s24  }
  0x24   : > { %p358_p2 = pnand %p8461_p0, %p357_p1 }
  0x26   : > { %361 = sbr.rel (%p358_p2) target bundleno = 2490 (0x9ba), region = 64 }
  0x2b   : > { %s10464_s22 = sand.u32 1, %s10302_s18  }
  0x2c   : > { %s8462_s17 = sshll.u32 %s10464_s22, 8  ;;  %s364_s30 = scalar_lea.sflag [#allocation3], %s10464_s22 }
  0x2d   : > { %s10468_s13 = scalar_lea.vmem [#allocation2], %s8462_s17 }
  0x2e   : > { %10289 = dma.done.wait (%p10421_p6), %s364_s30, 4096  }
  0x2f   : > { %10291 = vsyncadd (%p10421_p6), %s364_s30, 4294963200  ;;  %v9013_v0 = vld [vmem:[%s15976_s1 + $0x38] sm:$0xff]  ;;  %v9012_v1 = vld [vmem:[%s15976_s1 + $0x30] sm:$0xff]  ;;  %vm1287_vm2 = vcmask 523264   ;;  %vm1866_vm3 = vcmask 130048   ;;  %s10314_s25 = smov 16  }
  0x30   : > { %990 = vmatpush.bf16.msra.mxu0 %v9013_v0  ;;  %v9017_v2 = vld [vmem:[%s15977_s2 + $0x18] sm:$0xff]  ;;  %v9011_v3 = vld [vmem:[%s15976_s1 + $0x28] sm:$0xff]  ;;  %v9010_v4 = vld [vmem:[%s15976_s1 + $0x20] sm:$0xff]  ;;  %s9060_s16 = sshll.u32 %s10399_s21, 9  ;;  %s8367_s21 = scalar_lea.sflag [#allocation4], %s10464_s22 }
  0x31   : > { %9061 = vmatpush.bf16.msra.mxu1 %v9017_v2  ;;  %v9009_v5 = vld [vmem:[%s15976_s1 + $0x18] sm:$0xff]  ;;  %v9008_v6 = vld [vmem:[%s15976_s1 + $0x10] sm:$0xff]  ;;  %v9007_v7 = vld [vmem:[%s15976_s1 + $0x8] sm:$0xff]  ;;  %s8378_s24 = scalar_lea.hbm %s15986_s11, %s9060_s16  ;;  %s10264_s27 = scalar_lea.hbm %s15986_s11, 1024 }
  0x32   : > { %v9006_v8 = vld [vmem:[%s15976_s1] sm:$0xff]  ;;  %v8975_v10 = vld [vmem:[%s10468_s13 + $0x8] sm:$0xff]  ;;  %v8976_v11 = vld [vmem:[%s10468_s13 + $0x10] sm:$0xff]  ;;  %s8381_s30 = sshll.u32 %s8378_s24, 4  ;;  %s8382_s30 = int_to_ptr.hbm [resolvable:$true] %s8381_s30 }
  0x33   : > { %v8974_v9 = vld [vmem:[%s10468_s13] sm:$0xff]  ;;  %v8977_v12 = vld [vmem:[%s10468_s13 + $0x18] sm:$0xff]  ;;  %v8979_v14 = vld [vmem:[%s10468_s13 + $0x28] sm:$0xff]  ;;  %s10258_s19 = sshra.s32 %s8382_s30, 4  ;;  %s10259_s19 = int_to_ptr.hbm [resolvable:$true] %s10258_s19 }
  0x34   : > { %991 = vmatpush.bf16.msra.mxu0 %v9012_v1  ;;  %v8978_v13 = vld [vmem:[%s10468_s13 + $0x20] sm:$0xff]  ;;  %v8980_v15 = vld [vmem:[%s10468_s13 + $0x30] sm:$0xff]  ;;  %v8981_v17 = vld [vmem:[%s10468_s13 + $0x38] sm:$0xff]  ;;  %s10260_s23 = scalar_lea.hbm %s10259_s19, 512  ;;  %p10265_p0 = scmp.lt.s32.totalorder %s10259_s19, %s15986_s11 }
  0x35   : > { %v9016_v16 = vld [vmem:[%s15977_s2 + $0x10] sm:$0xff]  ;;  %v8982_v18 = vld [vmem:[%s10468_s13 + $0x40] sm:$0xff]  ;;  %v8983_v24 = vld [vmem:[%s10468_s13 + $0x48] sm:$0xff]  ;;  %p10261_p6 = scmp.ne.s32.totalorder %s10259_s19, %s10260_s23  ;;  %p10266_p1 = scmp.lt.s32.totalorder %s10264_s27, %s10260_s23 }
  0x36   : > { %9062 = vmatpush.bf16.msra.mxu1 %v9016_v16  ;;  %v8984_v30 = vld [vmem:[%s10468_s13 + $0x50] sm:$0xff]  ;;  %v8985_v36 = vld [vmem:[%s10468_s13 + $0x58] sm:$0xff]  ;;  %v8986_v42 = vld [vmem:[%s10468_s13 + $0x60] sm:$0xff] }
  0x37   : > { %v8987_v48 = vld [vmem:[%s10468_s13 + $0x68] sm:$0xff]  ;;  %v8988_v54 = vld [vmem:[%s10468_s13 + $0x70] sm:$0xff]  ;;  %v8989_v61 = vld [vmem:[%s10468_s13 + $0x78] sm:$0xff]  ;;  %p10262_p9 = pnand %p10261_p6, %p10428_p11  ;;  %p10267_p3 = por %p10266_p1, %p10265_p0 }
  0x38   : > { %992 = vmatpush.bf16.msra.mxu0 %v9011_v3  ;;  %v9015_v60 = vld [vmem:[%s15977_s2 + $0x8] sm:$0xff]  ;;  %v8990_v3 = vld [vmem:[%s10468_s13 + $0x80] sm:$0xff] }
  0x39   : > { %p10263_p13 = pneg %p10262_p9 }
  0x3a   : > { %9063 = vmatpush.bf16.msra.mxu1 %v9015_v60 }
  0x3b   : > { %p10268_p4 = pnand %p10267_p3, %p10263_p13 }
  0x3c   : > { %993 = vmatpush.bf16.msra.mxu0 %v9010_v4 }
  0x40   : > { %994 = vmatpush.bf16.msra.mxu0 %v9009_v5 }
  0x44   : > { %995 = vmatpush.bf16.msra.mxu0 %v9008_v6 }
  0x48   : > { %996 = vmatpush.bf16.msra.mxu0 %v9007_v7 }
  0x4c   : > { %997 = vmatpush.bf16.msra.mxu0 %v9006_v8 }
  0x4f   : > { %998 = vmatmul.bf16.vlgmr.msra.gmra.mxu0 %v8974_v9  ;;  %v8991_v9 = vld [vmem:[%s10468_s13 + $0x88] sm:$0xff] }
  0x50   : > { %1388 = vmatpush.bf16.msrb.mxu0 %v9017_v2 }
  0x54   : > { %1389 = vmatpush.bf16.msrb.mxu0 %v9016_v16 }
  0x58   : > { %1390 = vmatpush.bf16.msrb.mxu0 %v9015_v60 }
  0x5f   : > { %1003 = vmatmul.bf16.gmra.mxu0 %v8975_v10 }
  0x6f   : > { %1008 = vmatmul.bf16.gmra.mxu0 %v8976_v11  ;;  %v474_v11 = vlaneseq }
  0x7f   : > { %1013 = vmatmul.bf16.gmra.mxu0 %v8977_v12 }
  0x8f   : > { %1018 = vmatmul.bf16.gmra.mxu0 %v8978_v13 }
  0x9f   : > { %1023 = vmatmul.bf16.gmra.mxu0 %v8979_v14 }
  0xaf   : > { %1028 = vmatmul.bf16.gmra.mxu0 %v8980_v15  ;;  %v10543_v15 = vand.u32 127, %v474_v11  ;;  %v8994_v11 = vld [vmem:[%s10468_s13 + $0xa0] sm:$0xff] }
  0xb1   : > { %16184 = vst [vmem:[#allocation13_spill] sm:$0xff] %v10543_v15  ;;  %vm476_vm0 = vcmp.eq.s32.totalorder %v10543_v15, 96 }
  0xb2   : > { %vm10549_vm1 = vmpackc.low %vm476_vm0, %vm476_vm0 }
  0xbf   : > { %1033 = vmatmul.bf16.gmra.mxu0 %v8981_v17  ;;  %v410_v17 = vld [vmem:[%s10468_s13] sm:$0xf] }
  0xcc   : > { %v999_v19 = vpop.f32.mrf.mxu0 }
  0xcd   : > { %v1159_v21 = vmax.f32 %v999_v19, 0.0  ;;  %v478_v19 = vsel %vm10549_vm1, %v410_v17, 0 }
  0xcf   : > { %1038 = vmatmul.bf16.gmra.mxu0 %v8982_v18 }
  0xd4   : > { %v1001_v20 = vpop.f32.mrf.mxu0 }
  0xd5   : > { %v1160_v22 = vmax.f32 %v1001_v20, 0.0  ;;  %v542_v20 = vunpack.c.l.bf16 %v478_v19 }
  0xd7   : > { %v10513_v23 = vpack.c.bf16 %v1160_v22, %v1159_v21  ;;  %v8992_v21 = vld [vmem:[%s10468_s13 + $0x90] sm:$0xff]  ;;  %606 = vadd.xlane.f32.xlu0 %v542_v20  ;;  %v425_v20 = vld [vmem:[%s10468_s13 + $0x3c] sm:$0xf] }
  0xdc   : > { %v1004_v25 = vpop.f32.mrf.mxu0 }
  0xdd   : > { %v1161_v27 = vmax.f32 %v1004_v25, 0.0 }
  0xdf   : > { %1043 = vmatmul.bf16.gmra.mxu0 %v8983_v24  ;;  %v412_v24 = vld [vmem:[%s10468_s13 + $0x8] sm:$0xf] }
  0xe0   : > { %v480_v25 = vsel %vm10549_vm1, %v412_v24, 0  ;;  %v493_v24 = vsel %vm10549_vm1, %v425_v20, 0 }
  0xe4   : > { %v1006_v26 = vpop.f32.mrf.mxu0 }
  0xe5   : > { %v1162_v28 = vmax.f32 %v1006_v26, 0.0  ;;  %v411_v26 = vld [vmem:[%s10468_s13 + $0x4] sm:$0xf] }
  0xe7   : > { %v10516_v29 = vpack.c.bf16 %v1162_v28, %v1161_v27  ;;  %v544_v27 = vunpack.c.l.bf16 %v480_v25  ;;  %v479_v28 = vsel %vm10549_vm1, %v411_v26, 0  ;;  %v557_v25 = vunpack.c.l.bf16 %v493_v24 }
  0xe9   : > { %610 = vadd.xlane.f32.xlu1 %v544_v27 }
  0xec   : > { %v1009_v31 = vpop.f32.mrf.mxu0 }
  0xed   : > { %v1163_v33 = vmax.f32 %v1009_v31, 0.0 }
  0xef   : > { %1048 = vmatmul.bf16.gmra.mxu0 %v8984_v30  ;;  %v543_v30 = vunpack.c.l.bf16 %v479_v28 }
  0xf1   : > { %608 = vadd.xlane.f32.xlu0 %v543_v30 }
  0xf4   : > { %v1011_v32 = vpop.f32.mrf.mxu0 }
  0xf5   : > { %v1164_v34 = vmax.f32 %v1011_v32, 0.0 }
  0xf7   : > { %v10519_v35 = vpack.c.bf16 %v1164_v34, %v1163_v33 }
  0xfc   : > { %v1014_v37 = vpop.f32.mrf.mxu0 }
  0xfd   : > { %v1165_v39 = vmax.f32 %v1014_v37, 0.0  ;;  %v413_v37 = vld [vmem:[%s10468_s13 + $0xc] sm:$0xf] }
  0xff   : > { %1053 = vmatmul.bf16.gmra.mxu0 %v8985_v36  ;;  %v414_v36 = vld [vmem:[%s10468_s13 + $0x10] sm:$0xf] }
 0x104   : > { %v1016_v38 = vpop.f32.mrf.mxu0 }
 0x105   : > { %v1166_v40 = vmax.f32 %v1016_v38, 0.0  ;;  %v482_v38 = vsel %vm10549_vm1, %v414_v36, 0 }
 0x107   : > { %v10522_v41 = vpack.c.bf16 %v1166_v40, %v1165_v39  ;;  %v481_v39 = vsel %vm10549_vm1, %v413_v37, 0  ;;  %v416_v40 = vld [vmem:[%s10468_s13 + $0x18] sm:$0xf]  ;;  %v428_v37 = vld [vmem:[%s10468_s13 + $0x48] sm:$0xf] }
 0x10c   : > { %v1019_v43 = vpop.f32.mrf.mxu0 }
 0x10d   : > { %v1167_v45 = vmax.f32 %v1019_v43, 0.0  ;;  %v545_v43 = vunpack.c.l.bf16 %v481_v39 }
 0x10f   : > { %1058 = vmatmul.bf16.gmra.mxu0 %v8986_v42  ;;  %v546_v42 = vunpack.c.l.bf16 %v482_v38  ;;  %612 = vadd.xlane.f32.xlu1 %v545_v43  ;;  %v8995_v43 = vld [vmem:[%s10468_s13 + $0xa8] sm:$0xff] }
 0x111   : > { %614 = vadd.xlane.f32.xlu2 %v546_v42 }
 0x114   : > { %v1021_v44 = vpop.f32.mrf.mxu0 }
 0x115   : > { %v1168_v46 = vmax.f32 %v1021_v44, 0.0  ;;  %v484_v44 = vsel %vm10549_vm1, %v416_v40, 0  ;;  %v496_v40 = vsel %vm10549_vm1, %v428_v37, 0 }
 0x116   : > { %v560_v42 = vunpack.c.l.bf16 %v496_v40 }
 0x117   : > { %v10525_v47 = vpack.c.bf16 %v1168_v46, %v1167_v45  ;;  %v548_v45 = vunpack.c.l.bf16 %v484_v44  ;;  %v8993_v46 = vld [vmem:[%s10468_s13 + $0x98] sm:$0xff] }
 0x119   : > { %618 = vadd.xlane.f32.xlu0 %v548_v45  ;;  %v427_v45 = vld [vmem:[%s10468_s13 + $0x44] sm:$0xf] }
 0x11c   : > { %v1024_v49 = vpop.f32.mrf.mxu0 }
 0x11d   : > { %v1169_v51 = vmax.f32 %v1024_v49, 0.0  ;;  %v415_v49 = vld [vmem:[%s10468_s13 + $0x14] sm:$0xf] }
 0x11f   : > { %1063 = vmatmul.bf16.gmra.mxu0 %v8987_v48 }
 0x124   : > { %v1026_v50 = vpop.f32.mrf.mxu0 }
 0x125   : > { %v1170_v52 = vmax.f32 %v1026_v50, 0.0  ;;  %v417_v50 = vld [vmem:[%s10468_s13 + $0x1c] sm:$0xf] }
 0x127   : > { %v10528_v53 = vpack.c.bf16 %v1170_v52, %v1169_v51  ;;  %v483_v51 = vsel %vm10549_vm1, %v415_v49, 0  ;;  %v485_v52 = vsel %vm10549_vm1, %v417_v50, 0  ;;  %v431_v50 = vld [vmem:[%s10468_s13 + $0x54] sm:$0xf] }
 0x12c   : > { %v1029_v55 = vpop.f32.mrf.mxu0 }
 0x12d   : > { %v1171_v57 = vmax.f32 %v1029_v55, 0.0  ;;  %v547_v55 = vunpack.c.l.bf16 %v483_v51 }
 0x12f   : > { %1068 = vmatmul.bf16.gmra.mxu0 %v8988_v54  ;;  %v419_v54 = vld [vmem:[%s10468_s13 + $0x24] sm:$0xf]  ;;  %616 = vadd.xlane.f32.xlu2 %v547_v55 }
 0x134   : > { %v1031_v56 = vpop.f32.mrf.mxu0 }
 0x135   : > { %v1172_v58 = vmax.f32 %v1031_v56, 0.0  ;;  %v549_v56 = vunpack.c.l.bf16 %v485_v52 }
 0x137   : > { %v10531_v59 = vpack.c.bf16 %v1172_v58, %v1171_v57  ;;  %v487_v57 = vsel %vm10549_vm1, %v419_v54, 0  ;;  %620 = vadd.xlane.f32.xlu1 %v549_v56  ;;  %v499_v54 = vsel %vm10549_vm1, %v431_v50, 0 }
 0x138   : > { %v551_v58 = vunpack.c.l.bf16 %v487_v57  ;;  %v563_v55 = vunpack.c.l.bf16 %v499_v54  ;;  %v9014_v57 = vld [vmem:[%s15977_s2] sm:$0xff] }
 0x139   : > { %9064 = vmatpush.bf16.msra.mxu1 %v9014_v57  ;;  %1391 = vmatpush.bf16.msrb.mxu0 %v9014_v57  ;;  %v442_v57 = vld [vmem:[%s10468_s13 + $0x80] sm:$0xf] }
 0x13a   : > { %624 = vadd.xlane.f32.xlu0 %v551_v58 }
 0x13c   : > { %v1034_v62 = vpop.f32.mrf.mxu0 }
 0x13d   : > { %v1173_v0 = vmax.f32 %v1034_v62, 0.0 }
 0x13f   : > { %1073 = vmatmul.bf16.gmra.mxu0 %v8989_v61 }
 0x144   : > { %v1036_v63 = vpop.f32.mrf.mxu0 }
 0x145   : > { %v1174_v1 = vmax.f32 %v1036_v63, 0.0 }
 0x147   : > { %v10537_v2 = vpack.c.bf16 %v1174_v1, %v1173_v0  ;;  %v418_v0 = vld [vmem:[%s10468_s13 + $0x20] sm:$0xf]  ;;  %v420_v1 = vld [vmem:[%s10468_s13 + $0x28] sm:$0xf] }
 0x14c   : > { %v1039_v4 = vpop.f32.mrf.mxu0 }
 0x14d   : > { %v1175_v6 = vmax.f32 %v1039_v4, 0.0  ;;  %v488_v4 = vsel %vm10549_vm1, %v420_v1, 0  ;;  %v434_v1 = vld [vmem:[%s10468_s13 + $0x60] sm:$0xf] }
 0x14f   : > { %1078 = vmatmul.bf16.gmra.mxu0 %v8990_v3  ;;  %v486_v3 = vsel %vm10549_vm1, %v418_v0, 0  ;;  %v432_v0 = vld [vmem:[%s10468_s13 + $0x58] sm:$0xf] }
 0x154   : > { %v1041_v5 = vpop.f32.mrf.mxu0 }
 0x155   : > { %v1176_v7 = vmax.f32 %v1041_v5, 0.0  ;;  %v422_v5 = vld [vmem:[%s10468_s13 + $0x30] sm:$0xf] }
 0x157   : > { %v10540_v8 = vpack.c.bf16 %v1176_v7, %v1175_v6  ;;  %v550_v6 = vunpack.c.l.bf16 %v486_v3  ;;  %v552_v7 = vunpack.c.l.bf16 %v488_v4  ;;  %v500_v4 = vsel %vm10549_vm1, %v432_v0, 0 }
 0x159   : > { %622 = vadd.xlane.f32.xlu2 %v550_v6  ;;  %626 = vadd.xlane.f32.xlu1 %v552_v7  ;;  %v564_v7 = vunpack.c.l.bf16 %v500_v4 }
 0x15c   : > { %v1044_v10 = vpop.f32.mrf.mxu0 }
 0x15d   : > { %v1177_v13 = vmax.f32 %v1044_v10, 0.0 }
 0x15f   : > { %1083 = vmatmul.bf16.gmra.mxu0 %v8991_v9  ;;  %v490_v9 = vsel %vm10549_vm1, %v422_v5, 0  ;;  %v502_v5 = vsel %vm10549_vm1, %v434_v1, 0  ;;  %v443_v1 = vld [vmem:[%s10468_s13 + $0x84] sm:$0xf] }
 0x160   : > { %v554_v10 = vunpack.c.l.bf16 %v490_v9  ;;  %v566_v9 = vunpack.c.l.bf16 %v502_v5 }
 0x162   : > { %630 = vadd.xlane.f32.xlu0 %v554_v10  ;;  %v8996_v10 = vld [vmem:[%s10468_s13 + $0xb0] sm:$0xff] }
 0x164   : > { %v1046_v12 = vpop.f32.mrf.mxu0 }
 0x165   : > { %v1178_v14 = vmax.f32 %v1046_v12, 0.0 }
 0x167   : > { %v10545_v16 = vpack.c.bf16 %v1178_v14, %v1177_v13  ;;  %v421_v13 = vld [vmem:[%s10468_s13 + $0x2c] sm:$0xf]  ;;  %v423_v14 = vld [vmem:[%s10468_s13 + $0x34] sm:$0xf] }
 0x168   : > { %v489_v17 = vsel %vm10549_vm1, %v421_v13, 0  ;;  %v491_v19 = vsel %vm10549_vm1, %v423_v14, 0  ;;  %v435_v13 = vld [vmem:[%s10468_s13 + $0x64] sm:$0xf] }
 0x16a   : > { %636 = vadd.xlane.f32.xlu0 %v557_v25 }
 0x16c   : > { %v1049_v22 = vpop.f32.mrf.mxu0 }
 0x16d   : > { %v1179_v32 = vmax.f32 %v1049_v22, 0.0  ;;  %v555_v22 = vunpack.c.l.bf16 %v491_v19  ;;  %v437_v19 = vld [vmem:[%s10468_s13 + $0x6c] sm:$0xf] }
 0x16f   : > { %1088 = vmatmul.bf16.gmra.mxu0 %v8992_v21  ;;  %v553_v21 = vunpack.c.l.bf16 %v489_v17  ;;  %632 = vadd.xlane.f32.xlu1 %v555_v22  ;;  %v503_v17 = vsel %vm10549_vm1, %v435_v13, 0  ;;  %v505_v22 = vsel %vm10549_vm1, %v437_v19, 0  ;;  %v8999_v13 = vld [vmem:[%s10468_s13 + $0xc8] sm:$0xff] }
 0x170   : > { %v569_v24 = vunpack.c.l.bf16 %v505_v22 }
 0x171   : > { %628 = vadd.xlane.f32.xlu2 %v553_v21  ;;  %v567_v21 = vunpack.c.l.bf16 %v503_v17  ;;  %v445_v17 = vld [vmem:[%s10468_s13 + $0x8c] sm:$0xf] }
 0x172   : > { %642 = vadd.xlane.f32.xlu0 %v560_v42  ;;  %v513_v19 = vsel %vm10549_vm1, %v445_v17, 0 }
 0x174   : > { %v1051_v31 = vpop.f32.mrf.mxu0 }
 0x175   : > { %v1180_v33 = vmax.f32 %v1051_v31, 0.0  ;;  %v424_v31 = vld [vmem:[%s10468_s13 + $0x38] sm:$0xf] }
 0x177   : > { %v10562_v34 = vpack.c.bf16 %v1180_v33, %v1179_v32  ;;  %v426_v32 = vld [vmem:[%s10468_s13 + $0x40] sm:$0xf]  ;;  %v492_v33 = vsel %vm10549_vm1, %v424_v31, 0  ;;  %v436_v31 = vld [vmem:[%s10468_s13 + $0x68] sm:$0xf] }
 0x178   : > { %v494_v36 = vsel %vm10549_vm1, %v426_v32, 0  ;;  %v556_v38 = vunpack.c.l.bf16 %v492_v33  ;;  %v438_v32 = vld [vmem:[%s10468_s13 + $0x70] sm:$0xf]  ;;  %v440_v33 = vld [vmem:[%s10468_s13 + $0x78] sm:$0xf] }
 0x179   : > { %v558_v39 = vunpack.c.l.bf16 %v494_v36  ;;  %v504_v36 = vsel %vm10549_vm1, %v436_v31, 0  ;;  %v506_v37 = vsel %vm10549_vm1, %v438_v32, 0  ;;  %v9000_v32 = vld [vmem:[%s10468_s13 + $0xd0] sm:$0xff] }
 0x17a   : > { %634 = vadd.xlane.f32.xlu2 %v556_v38  ;;  %648 = vadd.xlane.f32.xlu0 %v563_v55  ;;  %v508_v38 = vsel %vm10549_vm1, %v440_v33, 0  ;;  %v570_v40 = vunpack.c.l.bf16 %v506_v37 }
 0x17b   : > { %638 = vadd.xlane.f32.xlu1 %v558_v39  ;;  %v568_v39 = vunpack.c.l.bf16 %v504_v36  ;;  %v572_v42 = vunpack.c.l.bf16 %v508_v38  ;;  %v447_v36 = vld [vmem:[%s10468_s13 + $0x94] sm:$0xf] }
 0x17c   : > { %v1054_v48 = vpop.f32.mrf.mxu0  ;;  %v515_v37 = vsel %vm10549_vm1, %v447_v36, 0 }
 0x17d   : > { %v1181_v61 = vmax.f32 %v1054_v48, 0.0  ;;  %v495_v48 = vsel %vm10549_vm1, %v427_v45, 0  ;;  %v439_v45 = vld [vmem:[%s10468_s13 + $0x74] sm:$0xf]  ;;  %v579_v38 = vunpack.c.l.bf16 %v515_v37 }
 0x17e   : > { %v559_v51 = vunpack.c.l.bf16 %v495_v48  ;;  %v507_v48 = vsel %vm10549_vm1, %v439_v45, 0  ;;  %v455_v37 = vld [vmem:[%s10468_s13 + $0xb4] sm:$0xf] }
 0x17f   : > { %1093 = vmatmul.bf16.gmra.mxu0 %v8993_v46  ;;  %v429_v46 = vld [vmem:[%s10468_s13 + $0x4c] sm:$0xf]  ;;  %v571_v50 = vunpack.c.l.bf16 %v507_v48  ;;  %v9001_v48 = vld [vmem:[%s10468_s13 + $0xd8] sm:$0xff] }
 0x180   : > { %v497_v49 = vsel %vm10549_vm1, %v429_v46, 0  ;;  %v441_v46 = vld [vmem:[%s10468_s13 + $0x7c] sm:$0xf] }
 0x181   : > { %v561_v52 = vunpack.c.l.bf16 %v497_v49  ;;  %v509_v49 = vsel %vm10549_vm1, %v441_v46, 0 }
 0x182   : > { %640 = vadd.xlane.f32.xlu2 %v559_v51  ;;  %654 = vadd.xlane.f32.xlu0 %v566_v9  ;;  %v573_v51 = vunpack.c.l.bf16 %v509_v49 }
 0x183   : > { %644 = vadd.xlane.f32.xlu1 %v561_v52 }
 0x184   : > { %v1056_v60 = vpop.f32.mrf.mxu0 }
 0x185   : > { %v1182_v62 = vmax.f32 %v1056_v60, 0.0 }
 0x187   : > { %v10583_v63 = vpack.c.bf16 %v1182_v62, %v1181_v61  ;;  %v430_v62 = vld [vmem:[%s10468_s13 + $0x50] sm:$0xf] }
 0x188   : > { %v498_v3 = vsel %vm10549_vm1, %v430_v62, 0  ;;  %v8998_v62 = vld [vmem:[%s10468_s13 + $0xc0] sm:$0xff] }
 0x189   : > { %v562_v6 = vunpack.c.l.bf16 %v498_v3  ;;  %v511_v3 = vsel %vm10549_vm1, %v443_v1, 0 }
 0x18a   : > { %660 = vadd.xlane.f32.xlu0 %v569_v24  ;;  %v575_v4 = vunpack.c.l.bf16 %v511_v3  ;;  %v451_v3 = vld [vmem:[%s10468_s13 + $0xa4] sm:$0xf] }
 0x18b   : > { %646 = vadd.xlane.f32.xlu2 %v562_v6  ;;  %650 = vadd.xlane.f32.xlu1 %v564_v7 }
 0x18c   : > { %v1059_v12 = vpop.f32.mrf.mxu0 }
 0x18d   : > { %v1183_v27 = vmax.f32 %v1059_v12, 0.0  ;;  %v433_v12 = vld [vmem:[%s10468_s13 + $0x5c] sm:$0xf] }
 0x18e   : > { %v501_v14 = vsel %vm10549_vm1, %v433_v12, 0 }
 0x18f   : > { %1098 = vmatmul.bf16.gmra.mxu0 %v8994_v11  ;;  %v565_v20 = vunpack.c.l.bf16 %v501_v14 }
 0x192   : > { %666 = vadd.xlane.f32.xlu0 %v572_v42 }
 0x193   : > { %652 = vadd.xlane.f32.xlu2 %v565_v20  ;;  %656 = vadd.xlane.f32.xlu1 %v567_v21  ;;  %v577_v20 = vunpack.c.l.bf16 %v513_v19  ;;  %v453_v19 = vld [vmem:[%s10468_s13 + $0xac] sm:$0xf] }
 0x194   : > { %v1061_v26 = vpop.f32.mrf.mxu0 }
 0x195   : > { %v1184_v28 = vmax.f32 %v1061_v26, 0.0 }
 0x197   : > { %v10604_v30 = vpack.c.bf16 %v1184_v28, %v1183_v27 }
 0x19a   : > { %672 = vadd.xlane.f32.xlu0 %v575_v4  ;;  %v519_v4 = vsel %vm10549_vm1, %v451_v3, 0 }
 0x19b   : > { %658 = vadd.xlane.f32.xlu2 %v568_v39  ;;  %662 = vadd.xlane.f32.xlu1 %v570_v40 }
 0x19c   : > { %v1064_v44 = vpop.f32.mrf.mxu0 }
 0x19d   : > { %v1185_v58 = vmax.f32 %v1064_v44, 0.0 }
 0x19f   : > { %1103 = vmatmul.bf16.gmra.mxu0 %v8995_v43  ;;  %v8997_v43 = vld [vmem:[%s10468_s13 + $0xb8] sm:$0xff] }
 0x1a3   : > { %664 = vadd.xlane.f32.xlu2 %v571_v50  ;;  %668 = vadd.xlane.f32.xlu1 %v573_v51  ;;  %v449_v50 = vld [vmem:[%s10468_s13 + $0x9c] sm:$0xf] }
 0x1a4   : > { %v1066_v56 = vpop.f32.mrf.mxu0  ;;  %v517_v51 = vsel %vm10549_vm1, %v449_v50, 0 }
 0x1a5   : > { %v1186_v60 = vmax.f32 %v1066_v56, 0.0 }
 0x1a7   : > { %v10628_v61 = vpack.c.bf16 %v1186_v60, %v1185_v58  ;;  %v510_v58 = vsel %vm10549_vm1, %v442_v57, 0 }
 0x1a8   : > { %v574_v60 = vunpack.c.l.bf16 %v510_v58  ;;  %v450_v58 = vld [vmem:[%s10468_s13 + $0xa0] sm:$0xf] }
 0x1ab   : > { %670 = vadd.xlane.f32.xlu2 %v574_v60  ;;  %v518_v60 = vsel %vm10549_vm1, %v450_v58, 0 }
 0x1ac   : > { %v1069_v11 = vpop.f32.mrf.mxu0 }
 0x1ad   : > { %v1187_v26 = vmax.f32 %v1069_v11, 0.0 }
 0x1af   : > { %1108 = vmatmul.bf16.gmra.mxu0 %v8996_v10  ;;  %v444_v10 = vld [vmem:[%s10468_s13 + $0x88] sm:$0xf] }
 0x1b0   : > { %v512_v11 = vsel %vm10549_vm1, %v444_v10, 0 }
 0x1b1   : > { %v576_v12 = vunpack.c.l.bf16 %v512_v11  ;;  %v452_v11 = vld [vmem:[%s10468_s13 + $0xa8] sm:$0xf] }
 0x1b3   : > { %674 = vadd.xlane.f32.xlu1 %v576_v12  ;;  %676 = vadd.xlane.f32.xlu2 %v577_v20  ;;  %v520_v12 = vsel %vm10549_vm1, %v452_v11, 0  ;;  %v521_v20 = vsel %vm10549_vm1, %v453_v19, 0 }
 0x1b4   : > { %v1071_v25 = vpop.f32.mrf.mxu0 }
 0x1b5   : > { %v1188_v27 = vmax.f32 %v1071_v25, 0.0 }
 0x1b7   : > { %v10649_v28 = vpack.c.bf16 %v1188_v27, %v1187_v26  ;;  %v446_v26 = vld [vmem:[%s10468_s13 + $0x90] sm:$0xf] }
 0x1b8   : > { %v514_v27 = vsel %vm10549_vm1, %v446_v26, 0 }
 0x1b9   : > { %v578_v31 = vunpack.c.l.bf16 %v514_v27  ;;  %v454_v27 = vld [vmem:[%s10468_s13 + $0xb0] sm:$0xf] }
 0x1bb   : > { %678 = vadd.xlane.f32.xlu0 %v578_v31  ;;  %680 = vadd.xlane.f32.xlu1 %v579_v38  ;;  %v522_v31 = vsel %vm10549_vm1, %v454_v27, 0  ;;  %v523_v38 = vsel %vm10549_vm1, %v455_v37, 0 }
 0x1bc   : > { %v1074_v44 = vpop.f32.mrf.mxu0 }
 0x1bd   : > { %v1189_v54 = vmax.f32 %v1074_v44, 0.0  ;;  %v448_v44 = vld [vmem:[%s10468_s13 + $0x98] sm:$0xf] }
 0x1be   : > { %v516_v45 = vsel %vm10549_vm1, %v448_v44, 0 }
 0x1bf   : > { %1113 = vmatmul.bf16.gmra.mxu0 %v8997_v43  ;;  %v580_v46 = vunpack.c.l.bf16 %v516_v45  ;;  %v456_v45 = vld [vmem:[%s10468_s13 + $0xb8] sm:$0xf] }
 0x1c1   : > { %682 = vadd.xlane.f32.xlu2 %v580_v46  ;;  %v524_v46 = vsel %vm10549_vm1, %v456_v45, 0  ;;  %v463_v45 = vld [vmem:[%s10468_s13 + $0xd4] sm:$0xf] }
 0x1c4   : > { %v1076_v52 = vpop.f32.mrf.mxu0 }
 0x1c5   : > { %v1190_v55 = vmax.f32 %v1076_v52, 0.0  ;;  %v581_v52 = vunpack.c.l.bf16 %v517_v51  ;;  %v457_v51 = vld [vmem:[%s10468_s13 + $0xbc] sm:$0xf] }
 0x1c7   : > { %v1238_v56 = vpack.c.bf16 %v1190_v55, %v1189_v54  ;;  %684 = vadd.xlane.f32.xlu0 %v581_v52  ;;  %v525_v52 = vsel %vm10549_vm1, %v457_v51, 0 }
 0x1c9   : > { %8655 = vmatmul.msk.bf16.vlgmr.msra.gmra.mxu1 %vm1287_vm2, %v1238_v56 }
 0x1cc   : > { %v1079_v0 = vpop.f32.mrf.mxu0 }
 0x1cd   : > { %v1191_v6 = vmax.f32 %v1079_v0, 0.0  ;;  %v9002_v0 = vld [vmem:[%s10468_s13 + $0xe0] sm:$0xff] }
 0x1cf   : > { %1118 = vmatmul.bf16.gmra.mxu0 %v8998_v62  ;;  %v582_v62 = vunpack.c.l.bf16 %v518_v60 }
 0x1d1   : > { %686 = vadd.xlane.f32.xlu1 %v582_v62  ;;  %v458_v62 = vld [vmem:[%s10468_s13 + $0xc0] sm:$0xf] }
 0x1d4   : > { %v1081_v5 = vpop.f32.mrf.mxu0 }
 0x1d5   : > { %v1192_v7 = vmax.f32 %v1081_v5, 0.0  ;;  %v583_v5 = vunpack.c.l.bf16 %v519_v4  ;;  %v9026_v4 = vld [vmem:[%s15979_s4] sm:$0xff] }
 0x1d6   : > { %9065 = vmatpush.bf16.msra.mxu3 %v9026_v4  ;;  %1970 = vmatpush.bf16.msra.mxu2 %v9026_v4 }
 0x1d7   : > { %v1239_v9 = vpack.c.bf16 %v1192_v7, %v1191_v6  ;;  %688 = vadd.xlane.f32.xlu2 %v583_v5 }
 0x1d9   : > { %8656 = vmatmul.msk.bf16.gmra.mxu1 %vm1287_vm2, %v1239_v9 }
 0x1dc   : > { %v1084_v14 = vpop.f32.mrf.mxu0 }
 0x1dd   : > { %v1193_v22 = vmax.f32 %v1084_v14, 0.0  ;;  %v9003_v14 = vld [vmem:[%s10468_s13 + $0xe8] sm:$0xff] }
 0x1df   : > { %1123 = vmatmul.bf16.gmra.mxu0 %v8999_v13  ;;  %v584_v13 = vunpack.c.l.bf16 %v520_v12 }
 0x1e1   : > { %690 = vadd.xlane.f32.xlu0 %v584_v13 }
 0x1e4   : > { %v1086_v21 = vpop.f32.mrf.mxu0 }
 0x1e5   : > { %v1194_v24 = vmax.f32 %v1086_v21, 0.0  ;;  %v585_v21 = vunpack.c.l.bf16 %v521_v20  ;;  %v460_v20 = vld [vmem:[%s10468_s13 + $0xc8] sm:$0xf] }
 0x1e7   : > { %v1240_v25 = vpack.c.bf16 %v1194_v24, %v1193_v22  ;;  %692 = vadd.xlane.f32.xlu1 %v585_v21 }
 0x1e9   : > { %8657 = vmatmul.msk.bf16.gmra.mxu1 %vm1287_vm2, %v1240_v25 }
 0x1ec   : > { %v1089_v33 = vpop.f32.mrf.mxu0 }
 0x1ed   : > { %v1195_v40 = vmax.f32 %v1089_v33, 0.0  ;;  %v9004_v33 = vld [vmem:[%s10468_s13 + $0xf0] sm:$0xff] }
 0x1ef   : > { %1128 = vmatmul.bf16.gmra.mxu0 %v9000_v32  ;;  %v586_v32 = vunpack.c.l.bf16 %v522_v31 }
 0x1f1   : > { %694 = vadd.xlane.f32.xlu2 %v586_v32 }
 0x1f4   : > { %v1091_v39 = vpop.f32.mrf.mxu0 }
 0x1f5   : > { %v1196_v42 = vmax.f32 %v1091_v39, 0.0  ;;  %v587_v39 = vunpack.c.l.bf16 %v523_v38 }
 0x1f7   : > { %v1241_v43 = vpack.c.bf16 %v1196_v42, %v1195_v40  ;;  %696 = vadd.xlane.f32.xlu0 %v587_v39  ;;  %v462_v39 = vld [vmem:[%s10468_s13 + $0xd0] sm:$0xf] }
 0x1f9   : > { %8658 = vmatmul.msk.bf16.gmra.mxu1 %vm1287_vm2, %v1241_v43 }
 0x1fc   : > { %v1094_v49 = vpop.f32.mrf.mxu0 }
 0x1fd   : > { %v1197_v55 = vmax.f32 %v1094_v49, 0.0  ;;  %v9005_v49 = vld [vmem:[%s10468_s13 + $0xf8] sm:$0xff] }
 0x1ff   : > { %1133 = vmatmul.bf16.gmra.mxu0 %v9001_v48  ;;  %v588_v48 = vunpack.c.l.bf16 %v524_v46  ;;  %v9024_v46 = vld [vmem:[%s15978_s3 + $0x30] sm:$0xff] }
 0x201   : > { %698 = vadd.xlane.f32.xlu1 %v588_v48  ;;  %v531_v48 = vsel %vm10549_vm1, %v463_v45, 0 }
 0x204   : > { %v1096_v54 = vpop.f32.mrf.mxu0 }
 0x205   : > { %v1198_v56 = vmax.f32 %v1096_v54, 0.0  ;;  %v589_v54 = vunpack.c.l.bf16 %v525_v52 }
 0x207   : > { %v1242_v57 = vpack.c.bf16 %v1198_v56, %v1197_v55  ;;  %700 = vadd.xlane.f32.xlu2 %v589_v54 }
 0x209   : > { %8659 = vmatmul.msk.bf16.gmra.mxu1 %vm1287_vm2, %v1242_v57 }
 0x20c   : > { %v1099_v1 = vpop.f32.mrf.mxu0 }
 0x20d   : > { %v1199_v7 = vmax.f32 %v1099_v1, 0.0 }
 0x20f   : > { %1138 = vmatmul.bf16.gmra.mxu0 %v9002_v0  ;;  %v526_v0 = vsel %vm10549_vm1, %v458_v62, 0 }
 0x210   : > { %v590_v1 = vunpack.c.l.bf16 %v526_v0 }
 0x212   : > { %702 = vadd.xlane.f32.xlu0 %v590_v1  ;;  %v465_v1 = vld [vmem:[%s10468_s13 + $0xdc] sm:$0xf] }
 0x214   : > { %v1101_v6 = vpop.f32.mrf.mxu0 }
 0x215   : > { %v1200_v9 = vmax.f32 %v1101_v6, 0.0 }
 0x217   : > { %v1243_v10 = vpack.c.bf16 %v1200_v9, %v1199_v7  ;;  %v459_v7 = vld [vmem:[%s10468_s13 + $0xc4] sm:$0xf]  ;;  %v9025_v9 = vld [vmem:[%s15978_s3 + $0x38] sm:$0xff] }
 0x218   : > { %2180 = vmatpush.bf16.msrb.mxu3 %v9025_v9 }
 0x219   : > { %8660 = vmatmul.msk.bf16.gmra.mxu1 %vm1287_vm2, %v1243_v10  ;;  %v527_v10 = vsel %vm10549_vm1, %v459_v7, 0 }
 0x21a   : > { %v591_v11 = vunpack.c.l.bf16 %v527_v10 }
 0x21c   : > { %v1104_v17 = vpop.f32.mrf.mxu0  ;;  %704 = vadd.xlane.f32.xlu1 %v591_v11  ;;  %2181 = vmatpush.bf16.msrb.mxu3 %v9024_v46  ;;  %v469_v46 = vld [vmem:[%s10468_s13 + $0xec] sm:$0xf] }
 0x21d   : > { %v1201_v24 = vmax.f32 %v1104_v17, 0.0 }
 0x21f   : > { %1143 = vmatmul.bf16.gmra.mxu0 %v9003_v14 }
 0x224   : > { %v1106_v22 = vpop.f32.mrf.mxu0 }
 0x225   : > { %v1202_v25 = vmax.f32 %v1106_v22, 0.0 }
 0x227   : > { %v1244_v26 = vpack.c.bf16 %v1202_v25, %v1201_v24 }
 0x229   : > { %8661 = vmatmul.msk.bf16.gmra.mxu1 %vm1287_vm2, %v1244_v26  ;;  %v461_v26 = vld [vmem:[%s10468_s13 + $0xcc] sm:$0xf] }
 0x22a   : > { %v529_v27 = vsel %vm10549_vm1, %v461_v26, 0 }
 0x22b   : > { %v593_v31 = vunpack.c.l.bf16 %v529_v27 }
 0x22c   : > { %v1109_v36 = vpop.f32.mrf.mxu0 }
 0x22d   : > { %v1203_v42 = vmax.f32 %v1109_v36, 0.0  ;;  %708 = vadd.xlane.f32.xlu0 %v593_v31 }
 0x22f   : > { %1148 = vmatmul.bf16.gmra.mxu0 %v9004_v33 }
 0x234   : > { %v1111_v40 = vpop.f32.mrf.mxu0 }
 0x235   : > { %v1204_v43 = vmax.f32 %v1111_v40, 0.0  ;;  %v530_v40 = vsel %vm10549_vm1, %v462_v39, 0 }
 0x237   : > { %v1245_v44 = vpack.c.bf16 %v1204_v43, %v1203_v42 }
 0x239   : > { %8662 = vmatmul.msk.bf16.gmra.mxu1 %vm1287_vm2, %v1245_v44 }
 0x23c   : > { %v1114_v50 = vpop.f32.mrf.mxu0 }
 0x23d   : > { %v1205_v56 = vmax.f32 %v1114_v50, 0.0 }
 0x23f   : > { %1153 = vmatmul.bf16.gmra.mxu0 %v9005_v49  ;;  %v595_v49 = vunpack.c.l.bf16 %v531_v48  ;;  %v537_v48 = vsel %vm10549_vm1, %v469_v46, 0 }
 0x244   : > { %v1116_v55 = vpop.f32.mrf.mxu0 }
 0x245   : > { %v1206_v57 = vmax.f32 %v1116_v55, 0.0  ;;  %v464_v55 = vld [vmem:[%s10468_s13 + $0xd8] sm:$0xf] }
 0x246   : > { %v10731_v58 = vpop.f32.mrf.mxu1 }
 0x247   : > { %16187 = vst [vmem:[#allocation14_spill] sm:$0xff] %v10731_v58  ;;  %v1246_v60 = vpack.c.bf16 %v1206_v57, %v1205_v56  ;;  %v532_v56 = vsel %vm10549_vm1, %v464_v55, 0  ;;  %v470_v55 = vld [vmem:[%s10468_s13 + $0xf0] sm:$0xf] }
 0x248   : > { %v596_v57 = vunpack.c.l.bf16 %v532_v56  ;;  %v9022_v56 = vld [vmem:[%s15978_s3 + $0x20] sm:$0xff] }
 0x249   : > { %8663 = vmatmul.msk.bf16.gmra.mxu1 %vm1287_vm2, %v1246_v60 }
 0x24a   : > { %714 = vadd.xlane.f32.xlu0 %v596_v57  ;;  %v538_v57 = vsel %vm10549_vm1, %v470_v55, 0 }
 0x24c   : > { %v1119_v3 = vpop.f32.mrf.mxu0 }
 0x24d   : > { %v1207_v13 = vmax.f32 %v1119_v3, 0.0  ;;  %v533_v3 = vsel %vm10549_vm1, %v465_v1, 0 }
 0x24e   : > { %v10740_v5 = vpop.f32.mrf.mxu1  ;;  %v597_v4 = vunpack.c.l.bf16 %v533_v3 }
 0x24f   : > { %16188 = vst [vmem:[#allocation15_spill] sm:$0xff] %v10740_v5  ;;  %v10744_v6 = vpack.c.bf16 %v10740_v5, %v10731_v58  ;;  %8640 = vmatmul.msk.bf16.vlgmr.msrb.gmra.mxu0 %vm1287_vm2, %v10513_v23  ;;  %v528_v23 = vsel %vm10549_vm1, %v460_v20, 0  ;;  %v9023_v20 = vld [vmem:[%s15978_s3 + $0x28] sm:$0xff] }
 0x250   : > { %v592_v21 = vunpack.c.l.bf16 %v528_v23  ;;  %2182 = vmatpush.bf16.msrb.mxu3 %v9023_v20 }
 0x252   : > { %706 = vadd.xlane.f32.xlu2 %v592_v21 }
 0x254   : > { %v1121_v12 = vpop.f32.mrf.mxu0  ;;  %2183 = vmatpush.bf16.msrb.mxu3 %v9022_v56 }
 0x255   : > { %v1208_v14 = vmax.f32 %v1121_v12, 0.0  ;;  %v466_v12 = vld [vmem:[%s10468_s13 + $0xe0] sm:$0xf] }
 0x256   : > { %v10754_v17 = vpop.f32.mrf.mxu1 }
 0x257   : > { %16189 = vst [vmem:[#allocation16_spill] sm:$0xff] %v10754_v17  ;;  %v1247_v19 = vpack.c.bf16 %v1208_v14, %v1207_v13  ;;  %v534_v13 = vsel %vm10549_vm1, %v466_v12, 0 }
 0x258   : > { %v598_v14 = vunpack.c.l.bf16 %v534_v13 }
 0x259   : > { %8664 = vmatmul.msk.bf16.gmra.mxu1 %vm1287_vm2, %v1247_v19 }
 0x25a   : > { %712 = vadd.xlane.f32.xlu2 %v595_v49  ;;  %v601_v49 = vunpack.c.l.bf16 %v537_v48  ;;  %v9021_v48 = vld [vmem:[%s15978_s3 + $0x18] sm:$0xff] }
 0x25b   : > { %2184 = vmatpush.bf16.msrb.mxu3 %v9021_v48 }
 0x25c   : > { %v1124_v22 = vpop.f32.mrf.mxu0 }
 0x25d   : > { %v1209_v33 = vmax.f32 %v1124_v22, 0.0  ;;  %v467_v22 = vld [vmem:[%s10468_s13 + $0xe4] sm:$0xf] }
 0x25e   : > { %v10760_v24 = vpop.f32.mrf.mxu1  ;;  %v535_v26 = vsel %vm10549_vm1, %v467_v22, 0 }
 0x25f   : > { %16190 = vst [vmem:[#allocation17_spill] sm:$0xff] %v10760_v24  ;;  %v10764_v25 = vpack.c.bf16 %v10760_v24, %v10754_v17  ;;  %8641 = vmatmul.msk.bf16.gmra.mxu0 %vm1287_vm2, %v10516_v29  ;;  %v594_v29 = vunpack.c.l.bf16 %v530_v40  ;;  %v599_v27 = vunpack.c.l.bf16 %v535_v26 }
 0x261   : > { %710 = vadd.xlane.f32.xlu1 %v594_v29  ;;  %720 = vadd.xlane.f32.xlu0 %v599_v27 }
 0x262   : > { %718 = vadd.xlane.f32.xlu2 %v598_v14 }
 0x264   : > { %v1126_v32 = vpop.f32.mrf.mxu0 }
 0x265   : > { %v1210_v36 = vmax.f32 %v1126_v32, 0.0 }
 0x266   : > { %v10771_v37 = vpop.f32.mrf.mxu1 }
 0x267   : > { %16191 = vst [vmem:[#allocation18_spill] sm:$0xff] %v10771_v37  ;;  %v1248_v38 = vpack.c.bf16 %v1210_v36, %v1209_v33 }
 0x269   : > { %8665 = vmatmul.msk.bf16.gmra.mxu1 %vm1287_vm2, %v1248_v38  ;;  %716 = vadd.xlane.f32.xlu1 %v597_v4  ;;  %v468_v38 = vld [vmem:[%s10468_s13 + $0xe8] sm:$0xf] }
 0x26a   : > { %v536_v39 = vsel %vm10549_vm1, %v468_v38, 0  ;;  %724 = vadd.xlane.f32.xlu2 %v601_v49 }
 0x26b   : > { %v600_v40 = vunpack.c.l.bf16 %v536_v39 }
 0x26c   : > { %v1129_v42 = vpop.f32.mrf.mxu0 }
 0x26e   : > { %v10777_v43 = vpop.f32.mrf.mxu1 }
 0x26f   : > { %16192 = vst [vmem:[#allocation19_spill] sm:$0xff] %v10777_v43  ;;  %8642 = vmatmul.msk.bf16.gmra.mxu0 %vm1287_vm2, %v10519_v35  ;;  %v10783_v44 = vpack.c.bf16 %v10777_v43, %v10771_v37  ;;  %v1211_v35 = vmax.f32 %v1129_v42, 0.0 }
 0x271   : > { %8693 = vmatmul.msk.bf16.vlgmr.msra.gmra.mxu3 %vm1866_vm3, %v10783_v44  ;;  %722 = vadd.xlane.f32.xlu1 %v600_v40 }
 0x274   : > { %v1131_v50 = vpop.f32.mrf.mxu0 }
 0x275   : > { %v1212_v51 = vmax.f32 %v1131_v50, 0.0 }
 0x276   : > { %v10793_v52 = vpop.f32.mrf.mxu1 }
 0x277   : > { %16193 = vst [vmem:[#allocation20_spill] sm:$0xff] %v10793_v52  ;;  %v1249_v54 = vpack.c.bf16 %v1212_v51, %v1211_v35 }
 0x279   : > { %8666 = vmatmul.msk.bf16.gmra.mxu1 %vm1287_vm2, %v1249_v54 }
 0x27c   : > { %v1134_v60 = vpop.f32.mrf.mxu0 }
 0x27d   : > { %v1213_v9 = vmax.f32 %v1134_v60, 0.0  ;;  %v602_v60 = vunpack.c.l.bf16 %v538_v57 }
 0x27e   : > { %v10799_v62 = vpop.f32.mrf.mxu1 }
 0x27f   : > { %16194 = vst [vmem:[#allocation21_spill] sm:$0xff] %v10799_v62  ;;  %8643 = vmatmul.msk.bf16.gmra.mxu0 %vm1287_vm2, %v10522_v41  ;;  %v10805_v0 = vpack.c.bf16 %v10799_v62, %v10793_v52  ;;  %726 = vadd.xlane.f32.xlu0 %v602_v60 }
 0x281   : > { %8694 = vmatmul.msk.bf16.gmra.mxu3 %vm1866_vm3, %v10805_v0 }
 0x284   : > { %v1136_v7 = vpop.f32.mrf.mxu0 }
 0x285   : > { %v1214_v10 = vmax.f32 %v1136_v7, 0.0  ;;  %v471_v7 = vld [vmem:[%s10468_s13 + $0xf4] sm:$0xf] }
 0x286   : > { %v10812_v11 = vpop.f32.mrf.mxu1 }
 0x287   : > { %16195 = vst [vmem:[#allocation22_spill] sm:$0xff] %v10812_v11  ;;  %v1250_v41 = vpack.c.bf16 %v1214_v10, %v1213_v9  ;;  %v539_v9 = vsel %vm10549_vm1, %v471_v7, 0 }
 0x288   : > { %v603_v10 = vunpack.c.l.bf16 %v539_v9 }
 0x289   : > { %8667 = vmatmul.msk.bf16.gmra.mxu1 %vm1287_vm2, %v1250_v41 }
 0x28a   : > { %728 = vadd.xlane.f32.xlu1 %v603_v10 }
 0x28c   : > { %v1139_v19 = vpop.f32.mrf.mxu0 }
 0x28d   : > { %v1215_v32 = vmax.f32 %v1139_v19, 0.0  ;;  %v472_v19 = vld [vmem:[%s10468_s13 + $0xf8] sm:$0xf] }
 0x28e   : > { %v10821_v23 = vpop.f32.mrf.mxu1  ;;  %v540_v20 = vsel %vm10549_vm1, %v472_v19, 0 }
 0x28f   : > { %16196 = vst [vmem:[#allocation23_spill] sm:$0xff] %v10821_v23  ;;  %8644 = vmatmul.msk.bf16.gmra.mxu0 %vm1287_vm2, %v10525_v47  ;;  %v10827_v21 = vpack.c.bf16 %v10821_v23, %v10812_v11  ;;  %v604_v22 = vunpack.c.l.bf16 %v540_v20 }
 0x291   : > { %8695 = vmatmul.msk.bf16.gmra.mxu3 %vm1866_vm3, %v10827_v21  ;;  %730 = vadd.xlane.f32.xlu2 %v604_v22 }
 0x294   : > { %v1141_v31 = vpop.f32.mrf.mxu0 }
 0x295   : > { %v1216_v33 = vmax.f32 %v1141_v31, 0.0 }
 0x296   : > { %v10834_v36 = vpop.f32.mrf.mxu1 }
 0x297   : > { %16197 = vst [vmem:[#allocation24_spill] sm:$0xff] %v10834_v36  ;;  %v1251_v47 = vpack.c.bf16 %v1216_v33, %v1215_v32  ;;  %v473_v32 = vld [vmem:[%s10468_s13 + $0xfc] sm:$0xf] }
 0x298   : > { %v541_v33 = vsel %vm10549_vm1, %v473_v32, 0 }
 0x299   : > { %8668 = vmatmul.msk.bf16.gmra.mxu1 %vm1287_vm2, %v1251_v47  ;;  %v605_v47 = vunpack.c.l.bf16 %v541_v33 }
 0x29b   : > { %732 = vadd.xlane.f32.xlu0 %v605_v47 }
 0x29c   : > { %v1144_v29 = vpop.f32.mrf.mxu0 }
 0x29d   : > { %v1217_v35 = vmax.f32 %v1144_v29, 0.0 }
 0x29e   : > { %v10840_v42 = vpop.f32.mrf.mxu1 }
 0x29f   : > { %16198 = vst [vmem:[#allocation25_spill] sm:$0xff] %v10840_v42  ;;  %8645 = vmatmul.msk.bf16.gmra.mxu0 %vm1287_vm2, %v10528_v53  ;;  %v10846_v45 = vpack.c.bf16 %v10840_v42, %v10834_v36 }
 0x2a1   : > { %8696 = vmatmul.msk.bf16.gmra.mxu3 %vm1866_vm3, %v10846_v45 }
 0x2a4   : > { %v1146_v50 = vpop.f32.mrf.mxu0 }
 0x2a5   : > { %v1218_v51 = vmax.f32 %v1146_v50, 0.0 }
 0x2a6   : > { %v10853_v54 = vpop.f32.mrf.mxu1 }
 0x2a7   : > { %16199 = vst [vmem:[#allocation26_spill] sm:$0xff] %v10853_v54  ;;  %v1252_v53 = vpack.c.bf16 %v1218_v51, %v1217_v35 }
 0x2a9   : > { %8669 = vmatmul.msk.bf16.gmra.mxu1 %vm1287_vm2, %v1252_v53 }
 0x2ac   : > { %v1149_v1 = vpop.f32.mrf.mxu0 }
 0x2ad   : > { %v1219_v12 = vmax.f32 %v1149_v1, 0.0 }
 0x2ae   : > { %v10862_v3 = vpop.f32.mrf.mxu1 }
 0x2af   : > { %16200 = vst [vmem:[#allocation27_spill] sm:$0xff] %v10862_v3  ;;  %8646 = vmatmul.msk.bf16.gmra.mxu0 %vm1287_vm2, %v10531_v59  ;;  %v10868_v4 = vpack.c.bf16 %v10862_v3, %v10853_v54 }
 0x2b1   : > { %8697 = vmatmul.msk.bf16.gmra.mxu3 %vm1866_vm3, %v10868_v4 }
 0x2b4   : > { %v1151_v41 = vpop.f32.mrf.mxu0 }
 0x2b5   : > { %v1220_v13 = vmax.f32 %v1151_v41, 0.0 }
 0x2b6   : > { %v10875_v14 = vpop.f32.mrf.mxu1 }
 0x2b7   : > { %16201 = vst [vmem:[#allocation28_spill] sm:$0xff] %v10875_v14  ;;  %v1253_v59 = vpack.c.bf16 %v1220_v13, %v1219_v12 }
 0x2b9   : > { %8670 = vmatmul.msk.bf16.gmra.mxu1 %vm1287_vm2, %v1253_v59 }
 0x2bc   : > { %v1154_v26 = vpop.f32.mrf.mxu0 }
 0x2bd   : > { %v1221_v39 = vmax.f32 %v1154_v26, 0.0 }
 0x2be   : > { %v10881_v27 = vpop.f32.mrf.mxu1 }
 0x2bf   : > { %16202 = vst [vmem:[#allocation29_spill] sm:$0xff] %v10881_v27  ;;  %8647 = vmatmul.msk.bf16.gmra.mxu0 %vm1287_vm2, %v10537_v2  ;;  %v10887_v31 = vpack.c.bf16 %v10881_v27, %v10875_v14  ;;  %v9030_v2 = vld [vmem:[%s15980_s5 + $0x18] sm:$0xff] }
 0x2c0   : > { %2577 = vmatpush.bf16.msrb.mxu2 %v9030_v2 }
 0x2c1   : > { %8698 = vmatmul.msk.bf16.gmra.mxu3 %vm1866_vm3, %v10887_v31 }
 0x2c4   : > { %v1156_v38 = vpop.f32.mrf.mxu0 }
 0x2c5   : > { %v1222_v40 = vmax.f32 %v1156_v38, 0.0  ;;  %v9029_v38 = vld [vmem:[%s15980_s5 + $0x10] sm:$0xff] }
 0x2c6   : > { %v10894_v29 = vpop.f32.mrf.mxu1  ;;  %2578 = vmatpush.bf16.msrb.mxu2 %v9029_v38 }
 0x2c7   : > { %16203 = vst [vmem:[#allocation30_spill] sm:$0xff] %v10894_v29  ;;  %v1254_v46 = vpack.c.bf16 %v1222_v40, %v1221_v39 }
 0x2c9   : > { %8671 = vmatmul.msk.bf16.gmra.mxu1 %vm1287_vm2, %v1254_v46 }
 0x2cc   : > { %v10903_v18 = vpop.f32.mrf.mxu0 }
 0x2cd   : > { %16204 = vst [vmem:[#allocation31_spill] sm:$0xff] %v10903_v18 }
 0x2ce   : > { %v10905_v49 = vpop.f32.mrf.mxu1 }
 0x2cf   : > { %16205 = vst [vmem:[#allocation32_spill] sm:$0xff] %v10905_v49  ;;  %8648 = vmatmul.msk.bf16.gmra.mxu0 %vm1287_vm2, %v10540_v8  ;;  %v10911_v50 = vpack.c.bf16 %v10905_v49, %v10894_v29 }
 0x2d1   : > { %8699 = vmatmul.msk.bf16.gmra.mxu3 %vm1866_vm3, %v10911_v50 }
 0x2d4   : > { %v10915_v35 = vpop.f32.mrf.mxu0 }
 0x2d5   : > { %16206 = vst [vmem:[#allocation33_spill] sm:$0xff] %v10915_v35  ;;  %v10919_v51 = vpack.c.bf16 %v10915_v35, %v10903_v18 }
 0x2d6   : > { %v10921_v53 = vpop.f32.mrf.mxu1 }
 0x2d7   : > { %16207 = vst [vmem:[#allocation34_spill] sm:$0xff] %v10921_v53  ;;  %8676 = vmatmul.msk.bf16.vlgmr.msra.gmra.mxu2 %vm1866_vm3, %v10919_v51 }
 0x2dc   : > { %v10925_v55 = vpop.f32.mrf.mxu0 }
 0x2dd   : > { %16208 = vst [vmem:[#allocation35_spill] sm:$0xff] %v10925_v55 }
 0x2de   : > { %v10927_v8 = vpop.f32.mrf.mxu1 }
 0x2df   : > { %16209 = vst [vmem:[#allocation36_spill] sm:$0xff] %v10927_v8  ;;  %8649 = vmatmul.msk.bf16.gmra.mxu0 %vm1287_vm2, %v10545_v16  ;;  %v10933_v56 = vpack.c.bf16 %v10927_v8, %v10921_v53  ;;  %v9020_v16 = vld [vmem:[%s15978_s3 + $0x10] sm:$0xff] }
 0x2e0   : > { %2185 = vmatpush.bf16.msrb.mxu3 %v9020_v16 }
 0x2e1   : > { %8700 = vmatmul.msk.bf16.gmra.mxu3 %vm1866_vm3, %v10933_v56 }
 0x2e4   : > { %v10937_v57 = vpop.f32.mrf.mxu0 }
 0x2e5   : > { %16210 = vst [vmem:[#allocation37_spill] sm:$0xff] %v10937_v57  ;;  %v10941_v60 = vpack.c.bf16 %v10937_v57, %v10925_v55 }
 0x2e6   : > { %v10943_v1 = vpop.f32.mrf.mxu1 }
 0x2e7   : > { %16211 = vst [vmem:[#allocation38_spill] sm:$0xff] %v10943_v1  ;;  %8677 = vmatmul.msk.bf16.gmra.mxu2 %vm1866_vm3, %v10941_v60 }
 0x2ec   : > { %v10950_v7 = vpop.f32.mrf.mxu0 }
 0x2ed   : > { %16212 = vst [vmem:[#allocation39_spill] sm:$0xff] %v10950_v7 }
 0x2ee   : > { %v10952_v9 = vpop.f32.mrf.mxu1 }
 0x2ef   : > { %16213 = vst [vmem:[#allocation40_spill] sm:$0xff] %v10952_v9  ;;  %8650 = vmatmul.msk.bf16.gmra.mxu0 %vm1287_vm2, %v10562_v34  ;;  %v10958_v10 = vpack.c.bf16 %v10952_v9, %v10943_v1 }
 0x2f1   : > { %8701 = vmatmul.msk.bf16.gmra.mxu3 %vm1866_vm3, %v10958_v10 }
 0x2f4   : > { %v10962_v41 = vpop.f32.mrf.mxu0  ;;  %v10964_v12 = vpop.f32.mrf.mxu3 }
 0x2f5   : > { %16214 = vst [vmem:[#allocation41_spill] sm:$0xff] %v10962_v41  ;;  %v10968_v13 = vpack.c.bf16 %v10962_v41, %v10950_v7 }
 0x2f6   : > { %v10970_v59 = vpop.f32.mrf.mxu1 }
 0x2f7   : > { %16215 = vst [vmem:[#allocation42_spill] sm:$0xff] %v10970_v59  ;;  %8678 = vmatmul.msk.bf16.gmra.mxu2 %vm1866_vm3, %v10968_v13 }
 0x2fc   : > { %v10974_v34 = vpop.f32.mrf.mxu0  ;;  %v10976_v19 = vpop.f32.mrf.mxu3 }
 0x2fd   : > { %16216 = vst [vmem:[#allocation43_spill] sm:$0xff] %v10974_v34 }
 0x2fe   : > { %v10978_v20 = vpop.f32.mrf.mxu1 }
 0x2ff   : > { %16217 = vst [vmem:[#allocation44_spill] sm:$0xff] %v10978_v20  ;;  %8651 = vmatmul.msk.bf16.gmra.mxu0 %vm1287_vm2, %v10583_v63  ;;  %v10984_v22 = vpack.c.bf16 %v10978_v20, %v10970_v59  ;;  %v9019_v63 = vld [vmem:[%s15978_s3 + $0x8] sm:$0xff] }
 0x300   : > { %2186 = vmatpush.bf16.msrb.mxu3 %v9019_v63 }
 0x301   : > { %8702 = vmatmul.msk.bf16.gmra.mxu3 %vm1866_vm3, %v10984_v22 }
 0x304   : > { %v10988_v26 = vpop.f32.mrf.mxu0  ;;  %v10990_v32 = vpop.f32.mrf.mxu3 }
 0x305   : > { %16218 = vst [vmem:[#allocation45_spill] sm:$0xff] %v10988_v26  ;;  %v10994_v33 = vpack.c.bf16 %v10988_v26, %v10974_v34 }
 0x306   : > { %v10996_v47 = vpop.f32.mrf.mxu1 }
 0x307   : > { %16219 = vst [vmem:[#allocation46_spill] sm:$0xff] %v10996_v47  ;;  %8679 = vmatmul.msk.bf16.gmra.mxu2 %vm1866_vm3, %v10994_v33 }
 0x30c   : > { %v11006_v39 = vpop.f32.mrf.mxu0  ;;  %v11008_v40 = vpop.f32.mrf.mxu3 }
 0x30d   : > { %16220 = vst [vmem:[#allocation47_spill] sm:$0xff] %v11006_v39 }
 0x30e   : > { %v11010_v46 = vpop.f32.mrf.mxu1 }
 0x30f   : > { %16221 = vst [vmem:[#allocation48_spill] sm:$0xff] %v11010_v46  ;;  %8652 = vmatmul.msk.bf16.gmra.mxu0 %vm1287_vm2, %v10604_v30  ;;  %v11016_v2 = vpack.c.bf16 %v11010_v46, %v10996_v47  ;;  %v9043_v30 = vld [vmem:[%s15983_s8] sm:$0xff] }
 0x310   : > { %4382 = vmatpush.bf16.msra.mxu0 %v9043_v30 }
 0x311   : > { %8703 = vmatmul.msk.bf16.gmra.mxu3 %vm1866_vm3, %v11016_v2 }
 0x314   : > { %v11020_v48 = vpop.f32.mrf.mxu0  ;;  %v11022_v16 = vpop.f32.mrf.mxu3 }
 0x315   : > { %16222 = vst [vmem:[#allocation49_spill] sm:$0xff] %v11020_v48  ;;  %v11026_v63 = vpack.c.bf16 %v11020_v48, %v11006_v39  ;;  %v9041_v39 = vld [vmem:[%s15982_s7 + $0x30] sm:$0xff] }
 0x316   : > { %v11028_v38 = vpop.f32.mrf.mxu1 }
 0x317   : > { %16223 = vst [vmem:[#allocation50_spill] sm:$0xff] %v11028_v38  ;;  %8680 = vmatmul.msk.bf16.gmra.mxu2 %vm1866_vm3, %v11026_v63 }
 0x31c   : > { %v11035_v46 = vpop.f32.mrf.mxu0  ;;  %v11037_v9 = vpop.f32.mrf.mxu3 }
 0x31d   : > { %16224 = vst [vmem:[#allocation51_spill] sm:$0xff] %v11035_v46 }
 0x31e   : > { %v11039_v20 = vpop.f32.mrf.mxu1 }
 0x31f   : > { %16225 = vst [vmem:[#allocation52_spill] sm:$0xff] %v11039_v20  ;;  %8653 = vmatmul.msk.bf16.gmra.mxu0 %vm1287_vm2, %v10628_v61  ;;  %v11045_v8 = vpack.c.bf16 %v11039_v20, %v11028_v38  ;;  %v9018_v61 = vld [vmem:[%s15978_s3] sm:$0xff] }
 0x320   : > { %2187 = vmatpush.bf16.msrb.mxu3 %v9018_v61 }
 0x321   : > { %8704 = vmatmul.msk.bf16.gmra.mxu3 %vm1866_vm3, %v11045_v8 }
 0x324   : > { %v11049_v47 = vpop.f32.mrf.mxu0  ;;  %v11051_v59 = vpop.f32.mrf.mxu3 }
 0x325   : > { %16226 = vst [vmem:[#allocation53_spill] sm:$0xff] %v11049_v47  ;;  %v11055_v1 = vpack.c.bf16 %v11049_v47, %v11035_v46 }
 0x326   : > { %v11057_v30 = vpop.f32.mrf.mxu1 }
 0x327   : > { %16227 = vst [vmem:[#allocation54_spill] sm:$0xff] %v11057_v30  ;;  %8681 = vmatmul.msk.bf16.gmra.mxu2 %vm1866_vm3, %v11055_v1 }
 0x32c   : > { %v11064_v20 = vpop.f32.mrf.mxu0  ;;  %v11066_v38 = vpop.f32.mrf.mxu3 }
 0x32d   : > { %16228 = vst [vmem:[#allocation55_spill] sm:$0xff] %v11064_v20 }
 0x32e   : > { %v11068_v53 = vpop.f32.mrf.mxu1 }
 0x32f   : > { %16229 = vst [vmem:[#allocation56_spill] sm:$0xff] %v11068_v53  ;;  %v11072_v49 = vpack.c.bf16 %v11068_v53, %v11057_v30  ;;  %8654 = vmatmul.msk.bf16.gmra.mxu0 %vm1287_vm2, %v10649_v28 }
 0x331   : > { %8705 = vmatmul.msk.bf16.gmra.mxu3 %vm1866_vm3, %v11072_v49 }
 0x334   : > { %v11078_v29 = vpop.f32.mrf.mxu0  ;;  %v11080_v27 = vpop.f32.mrf.mxu3 }
 0x335   : > { %16230 = vst [vmem:[#allocation57_spill] sm:$0xff] %v11078_v29  ;;  %v11084_v61 = vpack.c.bf16 %v11078_v29, %v11064_v20 }
 0x336   : > { %v11086_v14 = vpop.f32.mrf.mxu1 }
 0x337   : > { %16231 = vst [vmem:[#allocation58_spill] sm:$0xff] %v11086_v14  ;;  %8682 = vmatmul.msk.bf16.gmra.mxu2 %vm1866_vm3, %v11084_v61 }
 0x33c   : > { %v11090_v53 = vpop.f32.mrf.mxu0  ;;  %v11092_v30 = vpop.f32.mrf.mxu3 }
 0x33d   : > { %16232 = vst [vmem:[#allocation59_spill] sm:$0xff] %v11090_v53 }
 0x33e   : > { %v11094_v28 = vpop.f32.mrf.mxu1 }
 0x33f   : > { %16233 = vst [vmem:[#allocation60_spill] sm:$0xff] %v11094_v28  ;;  %v11098_v3 = vpack.c.bf16 %v11094_v28, %v11086_v14  ;;  %8840 = vmatmul.msk.bf16.vlgmr.msra.gmra.mxu0 %vm1866_vm3, %v10919_v51  ;;  %v9042_v51 = vld [vmem:[%s15982_s7 + $0x38] sm:$0xff]  ;;  %v9028_v28 = vld [vmem:[%s15980_s5 + $0x8] sm:$0xff] }
 0x340   : > { %4592 = vmatpush.bf16.msra.mxu3 %v9042_v51  ;;  %2579 = vmatpush.bf16.msrb.mxu2 %v9028_v28 }
 0x341   : > { %8706 = vmatmul.msk.bf16.gmra.mxu3 %vm1866_vm3, %v11098_v3 }
 0x344   : > { %v11104_v42 = vpop.f32.mrf.mxu0  ;;  %v11106_v36 = vpop.f32.mrf.mxu3  ;;  %4593 = vmatpush.bf16.msra.mxu3 %v9041_v39  ;;  %v9027_v39 = vld [vmem:[%s15980_s5] sm:$0xff] }
 0x345   : > { %16234 = vst [vmem:[#allocation61_spill] sm:$0xff] %v11104_v42  ;;  %v11110_v54 = vpack.c.bf16 %v11104_v42, %v11090_v53  ;;  %2580 = vmatpush.bf16.msrb.mxu2 %v9027_v39 }
 0x346   : > { %v11112_v11 = vpop.f32.mrf.mxu1 }
 0x347   : > { %16235 = vst [vmem:[#allocation62_spill] sm:$0xff] %v11112_v11  ;;  %8683 = vmatmul.msk.bf16.gmra.mxu2 %vm1866_vm3, %v11110_v54 }
 0x34c   : > { %v11122_v14 = vpop.f32.mrf.mxu0  ;;  %v11124_v62 = vpop.f32.mrf.mxu3 }
 0x34d   : > { %16236 = vst [vmem:[#allocation63_spill] sm:$0xff] %v11122_v14 }
 0x34e   : > { %v11126_v23 = vpop.f32.mrf.mxu1 }
 0x34f   : > { %16237 = vst [vmem:[#allocation64_spill] sm:$0xff] %v11126_v23  ;;  %v11130_v43 = vpack.c.bf16 %v11126_v23, %v11112_v11  ;;  %8841 = vmatmul.msk.bf16.gmra.mxu0 %vm1866_vm3, %v10941_v60  ;;  %v10150_v11 = vld [vmem:[%s10468_s13] sm:$0xff] }
 0x351   : > { %8707 = vmatmul.msk.bf16.gmra.mxu3 %vm1866_vm3, %v11130_v43 }
 0x354   : > { %v11136_v51 = vpop.f32.mrf.mxu0  ;;  %v11138_v37 = vpop.f32.mrf.mxu3 }
 0x355   : > { %16238 = vst [vmem:[#allocation65_spill] sm:$0xff] %v11136_v51  ;;  %v11142_v52 = vpack.c.bf16 %v11136_v51, %v11122_v14  ;;  %v9034_v51 = vld [vmem:[%s15981_s6 + $0x18] sm:$0xff] }
 0x356   : > { %2970 = vmatpush.bf16.msrb.mxu1 %v9034_v51 }
 0x357   : > { %8684 = vmatmul.msk.bf16.gmra.mxu2 %vm1866_vm3, %v11142_v52 }
 0x35a   : > { %v11146_v28 = vpop.f32.mrf.mxu2 }
 0x35c   : > { %v11148_v23 = vpop.f32.mrf.mxu0  ;;  %v11150_v60 = vpop.f32.mrf.mxu3 }
 0x35d   : > { %16239 = vst [vmem:[#allocation66_spill] sm:$0xff] %v11148_v23 }
 0x35e   : > { %16240 = vst [vmem:[#allocation67_spill] sm:$0xff] %v11150_v60 }
 0x35f   : > { %8842 = vmatmul.msk.bf16.gmra.mxu0 %vm1866_vm3, %v10968_v13 }
 0x361   : > { %2188 = vmatmul.bf16.vlgmr.msrb.gmra.mxu3 %v10150_v11 }
 0x362   : > { %v11155_v17 = vpop.f32.mrf.mxu2 }
 0x364   : > { %v11157_v5 = vpop.f32.mrf.mxu0  ;;  %v11159_v24 = vpop.f32.mrf.mxu3 }
 0x365   : > { %16241 = vst [vmem:[#allocation68_spill] sm:$0xff] %v11157_v5  ;;  %v11163_v58 = vpack.c.bf16 %v11157_v5, %v11148_v23  ;;  %v10151_v5 = vld [vmem:[%s10468_s13 + $0x8] sm:$0xff] }
 0x366   : > { %16242 = vst [vmem:[#allocation69_spill] sm:$0xff] %v11159_v24 }
 0x367   : > { %8685 = vmatmul.msk.bf16.gmra.mxu2 %vm1866_vm3, %v11163_v58 }
 0x36a   : > { %v11170_v13 = vpop.f32.mrf.mxu2 }
 0x36c   : > { %v11172_v11 = vpop.f32.mrf.mxu0  ;;  %v11174_v14 = vpop.f32.mrf.mxu3 }
 0x36d   : > { %16243 = vst [vmem:[#allocation70_spill] sm:$0xff] %v11172_v11 }
 0x36e   : > { %16244 = vst [vmem:[#allocation71_spill] sm:$0xff] %v11174_v14 }
 0x36f   : > { %8843 = vmatmul.msk.bf16.gmra.mxu0 %vm1866_vm3, %v10994_v33 }
 0x371   : > { %2193 = vmatmul.bf16.gmra.mxu3 %v10151_v5  ;;  %v10152_v5 = vld [vmem:[%s10468_s13 + $0x10] sm:$0xff] }
 0x372   : > { %v11179_v23 = vpop.f32.mrf.mxu2 }
 0x374   : > { %v11181_v53 = vpop.f32.mrf.mxu0  ;;  %v11183_v29 = vpop.f32.mrf.mxu3 }
 0x375   : > { %16245 = vst [vmem:[#allocation72_spill] sm:$0xff] %v11181_v53  ;;  %v11187_v42 = vpack.c.bf16 %v11181_v53, %v11172_v11 }
 0x376   : > { %16246 = vst [vmem:[#allocation73_spill] sm:$0xff] %v11183_v29 }
 0x377   : > { %8686 = vmatmul.msk.bf16.gmra.mxu2 %vm1866_vm3, %v11187_v42 }
 0x37a   : > { %v11191_v51 = vpop.f32.mrf.mxu2 }
 0x37c   : > { %v11193_v47 = vpop.f32.mrf.mxu0  ;;  %v11195_v33 = vpop.f32.mrf.mxu3 }
 0x37d   : > { %16247 = vst [vmem:[#allocation74_spill] sm:$0xff] %v11193_v47 }
 0x37e   : > { %16248 = vst [vmem:[#allocation75_spill] sm:$0xff] %v11195_v33 }
 0x37f   : > { %8844 = vmatmul.msk.bf16.gmra.mxu0 %vm1866_vm3, %v11026_v63 }
 0x381   : > { %2198 = vmatmul.bf16.gmra.mxu3 %v10152_v5 }
 0x382   : > { %v11200_v46 = vpop.f32.mrf.mxu2 }
 0x384   : > { %v11202_v20 = vpop.f32.mrf.mxu0  ;;  %v11204_v11 = vpop.f32.mrf.mxu3 }
 0x385   : > { %16249 = vst [vmem:[#allocation76_spill] sm:$0xff] %v11202_v20  ;;  %v11208_v53 = vpack.c.bf16 %v11202_v20, %v11193_v47  ;;  %v10153_v20 = vld [vmem:[%s10468_s13 + $0x18] sm:$0xff] }
 0x386   : > { %16250 = vst [vmem:[#allocation77_spill] sm:$0xff] %v11204_v11 }
 0x387   : > { %8687 = vmatmul.msk.bf16.gmra.mxu2 %vm1866_vm3, %v11208_v53 }
 0x38a   : > { %v11215_v63 = vpop.f32.mrf.mxu2 }
 0x38c   : > { %v11217_v5 = vpop.f32.mrf.mxu0  ;;  %v11219_v26 = vpop.f32.mrf.mxu3 }
 0x38d   : > { %16251 = vst [vmem:[#allocation78_spill] sm:$0xff] %v11217_v5 }
 0x38e   : > { %16252 = vst [vmem:[#allocation79_spill] sm:$0xff] %v11219_v26 }
 0x38f   : > { %8845 = vmatmul.msk.bf16.gmra.mxu0 %vm1866_vm3, %v11055_v1 }
 0x391   : > { %2203 = vmatmul.bf16.gmra.mxu3 %v10153_v20 }
 0x392   : > { %v11224_v47 = vpop.f32.mrf.mxu2 }
 0x394   : > { %v11226_v48 = vpop.f32.mrf.mxu0  ;;  %v11228_v41 = vpop.f32.mrf.mxu3 }
 0x395   : > { %16253 = vst [vmem:[#allocation80_spill] sm:$0xff] %v11226_v48  ;;  %v11232_v7 = vpack.c.bf16 %v11226_v48, %v11217_v5  ;;  %v10154_v48 = vld [vmem:[%s10468_s13 + $0x20] sm:$0xff] }
 0x396   : > { %16254 = vst [vmem:[#allocation81_spill] sm:$0xff] %v11228_v41 }
 0x397   : > { %8688 = vmatmul.msk.bf16.gmra.mxu2 %vm1866_vm3, %v11232_v7 }
 0x39a   : > { %v11239_v1 = vpop.f32.mrf.mxu2 }
 0x39c   : > { %v11241_v20 = vpop.f32.mrf.mxu0  ;;  %v11243_v34 = vpop.f32.mrf.mxu3 }
 0x39d   : > { %16255 = vst [vmem:[#allocation82_spill] sm:$0xff] %v11241_v20 }
 0x39e   : > { %16256 = vst [vmem:[#allocation83_spill] sm:$0xff] %v11243_v34 }
 0x39f   : > { %8846 = vmatmul.msk.bf16.gmra.mxu0 %vm1866_vm3, %v11084_v61 }
 0x3a1   : > { %2208 = vmatmul.bf16.gmra.mxu3 %v10154_v48  ;;  %v9033_v48 = vld [vmem:[%s15981_s6 + $0x10] sm:$0xff] }
 0x3a2   : > { %v11248_v5 = vpop.f32.mrf.mxu2  ;;  %2971 = vmatpush.bf16.msrb.mxu1 %v9033_v48 }
 0x3a4   : > { %v11250_v41 = vpop.f32.mrf.mxu0  ;;  %v11252_v55 = vpop.f32.mrf.mxu3 }
 0x3a5   : > { %16257 = vst [vmem:[#allocation84_spill] sm:$0xff] %v11250_v41  ;;  %v11256_v26 = vpack.c.bf16 %v11250_v41, %v11241_v20  ;;  %v10155_v20 = vld [vmem:[%s10468_s13 + $0x28] sm:$0xff] }
 0x3a6   : > { %16258 = vst [vmem:[#allocation85_spill] sm:$0xff] %v11252_v55 }
 0x3a7   : > { %8689 = vmatmul.msk.bf16.gmra.mxu2 %vm1866_vm3, %v11256_v26 }
 0x3aa   : > { %v11260_v39 = vpop.f32.mrf.mxu2 }
 0x3ac   : > { %v11262_v34 = vpop.f32.mrf.mxu0  ;;  %v11264_v61 = vpop.f32.mrf.mxu3 }
 0x3ad   : > { %16259 = vst [vmem:[#allocation86_spill] sm:$0xff] %v11262_v34 }
 0x3ae   : > { %16260 = vst [vmem:[#allocation87_spill] sm:$0xff] %v11264_v61 }
 0x3af   : > { %8847 = vmatmul.msk.bf16.gmra.mxu0 %vm1866_vm3, %v11110_v54 }
 0x3b1   : > { %2213 = vmatmul.bf16.gmra.mxu3 %v10155_v20  ;;  %v10156_v20 = vld [vmem:[%s10468_s13 + $0x30] sm:$0xff] }
 0x3b2   : > { %v11272_v41 = vpop.f32.mrf.mxu2 }
 0x3b4   : > { %v11274_v55 = vpop.f32.mrf.mxu0  ;;  %v11276_v11 = vpop.f32.mrf.mxu3 }
 0x3b5   : > { %16261 = vst [vmem:[#allocation88_spill] sm:$0xff] %v11274_v55  ;;  %v11280_v57 = vpack.c.bf16 %v11274_v55, %v11262_v34  ;;  %v9040_v55 = vld [vmem:[%s15982_s7 + $0x28] sm:$0xff] }
 0x3b6   : > { %16262 = vst [vmem:[#allocation89_spill] sm:$0xff] %v11276_v11  ;;  %4594 = vmatpush.bf16.msra.mxu3 %v9040_v55 }
 0x3b7   : > { %8690 = vmatmul.msk.bf16.gmra.mxu2 %vm1866_vm3, %v11280_v57 }
 0x3ba   : > { %v11284_v61 = vpop.f32.mrf.mxu2 }
 0x3bc   : > { %v11286_v48 = vpop.f32.mrf.mxu3  ;;  %v11288_v54 = vpop.f32.mrf.mxu0 }
 0x3bd   : > { %16263 = vst [vmem:[#allocation90_spill] sm:$0xff] %v11286_v48  ;;  %v10157_v48 = vld [vmem:[%s10468_s13 + $0x38] sm:$0xff] }
 0x3be   : > { %16264 = vst [vmem:[#allocation91_spill] sm:$0xff] %v11288_v54 }
 0x3bf   : > { %8848 = vmatmul.msk.bf16.gmra.mxu0 %vm1866_vm3, %v11142_v52 }
 0x3c1   : > { %2218 = vmatmul.bf16.gmra.mxu3 %v10156_v20 }
 0x3c2   : > { %v11296_v34 = vpop.f32.mrf.mxu2 }
 0x3c4   : > { %v11298_v11 = vpop.f32.mrf.mxu3  ;;  %v11300_v33 = vpop.f32.mrf.mxu0 }
 0x3c5   : > { %16265 = vst [vmem:[#allocation92_spill] sm:$0xff] %v11298_v11 }
 0x3c6   : > { %16266 = vst [vmem:[#allocation93_spill] sm:$0xff] %v11300_v33  ;;  %v9051_v33 = vld [vmem:[%s15984_s9 + $0x38] sm:$0xff] }
 0x3c7   : > { %8691 = vmatmul.msk.bf16.gmra.mxu2 %vm1866_vm3, %v10744_v6 }
 0x3c8   : > { %4921 = vmatpush.bf16.msra.mxu2 %v9051_v33 }
 0x3ca   : > { %v11304_v54 = vpop.f32.mrf.mxu2 }
 0x3cc   : > { %v11306_v52 = vpop.f32.mrf.mxu3  ;;  %v11308_v20 = vpop.f32.mrf.mxu0 }
 0x3cd   : > { %16267 = vst [vmem:[#allocation94_spill] sm:$0xff] %v11306_v52 }
 0x3ce   : > { %16268 = vst [vmem:[#allocation95_spill] sm:$0xff] %v11308_v20 }
 0x3cf   : > { %8849 = vmatmul.msk.bf16.gmra.mxu0 %vm1866_vm3, %v11163_v58 }
 0x3d1   : > { %2223 = vmatmul.bf16.gmra.mxu3 %v10157_v48  ;;  %v10158_v48 = vld [vmem:[%s10468_s13 + $0x40] sm:$0xff] }
 0x3d2   : > { %v11313_v55 = vpop.f32.mrf.mxu2 }
 0x3d4   : > { %v11318_v11 = vpop.f32.mrf.mxu3  ;;  %v11320_v29 = vpop.f32.mrf.mxu0 }
 0x3d5   : > { %16269 = vst [vmem:[#allocation96_spill] sm:$0xff] %v11318_v11 }
 0x3d6   : > { %16270 = vst [vmem:[#allocation97_spill] sm:$0xff] %v11320_v29 }
 0x3d7   : > { %8692 = vmatmul.msk.bf16.gmra.mxu2 %vm1866_vm3, %v10764_v25 }
 0x3da   : > { %v11324_v20 = vpop.f32.mrf.mxu2 }
 0x3dc   : > { %v11326_v52 = vpop.f32.mrf.mxu3  ;;  %v11328_v58 = vpop.f32.mrf.mxu0 }
 0x3dd   : > { %16271 = vst [vmem:[#allocation98_spill] sm:$0xff] %v11326_v52 }
 0x3de   : > { %16272 = vst [vmem:[#allocation99_spill] sm:$0xff] %v11328_v58 }
 0x3df   : > { %8850 = vmatmul.msk.bf16.gmra.mxu0 %vm1866_vm3, %v11187_v42 }
 0x3e1   : > { %2228 = vmatmul.bf16.gmra.mxu3 %v10158_v48  ;;  %v10159_v48 = vld [vmem:[%s10468_s13 + $0x48] sm:$0xff] }
 0x3e2   : > { %v11333_v15 = vpop.f32.mrf.mxu2 }
 0x3e4   : > { %v2189_v11 = vpop.f32.mrf.mxu3  ;;  %v11335_v29 = vpop.f32.mrf.mxu0 }
 0x3e5   : > { %16273 = vst [vmem:[#allocation100_spill] sm:$0xff] %v11335_v29  ;;  %v2190_v18 = vadd.f32 %v2189_v11, %v11146_v28  ;;  %v9032_v29 = vld [vmem:[%s15981_s6 + $0x8] sm:$0xff] }
 0x3e6   : > { %2972 = vmatpush.bf16.msrb.mxu1 %v9032_v29  ;;  %v9039_v29 = vld [vmem:[%s15982_s7 + $0x20] sm:$0xff] }
 0x3e7   : > { %v2349_v52 = vmax.f32 %v2190_v18, 0.0  ;;  %4595 = vmatpush.bf16.msra.mxu3 %v9039_v29 }
 0x3ea   : > { %v11337_v33 = vpop.f32.mrf.mxu2 }
 0x3ec   : > { %v2191_v35 = vpop.f32.mrf.mxu3  ;;  %v11340_v14 = vpop.f32.mrf.mxu0 }
 0x3ed   : > { %v2192_v58 = vadd.f32 %v2191_v35, %v11155_v17 }
 0x3ef   : > { %v2350_v24 = vmax.f32 %v2192_v58, 0.0  ;;  %8851 = vmatmul.msk.bf16.gmra.mxu0 %vm1866_vm3, %v11208_v53 }
 0x3f1   : > { %v2413_v42 = vpack.c.bf16 %v2350_v24, %v2349_v52  ;;  %2233 = vmatmul.bf16.gmra.mxu3 %v10159_v48 }
 0x3f2   : > { %v11349_v60 = vpop.f32.mrf.mxu2 }
 0x3f3   : > { %8756 = vmatmul.msk.bf16.vlgmr.msrb.gmra.mxu2 %vm1287_vm2, %v2413_v42  ;;  %v10160_v42 = vld [vmem:[%s10468_s13 + $0x50] sm:$0xff] }
 0x3f4   : > { %v2194_v28 = vpop.f32.mrf.mxu3  ;;  %v11352_v17 = vpop.f32.mrf.mxu0 }
 0x3f5   : > { %16274 = vst [vmem:[#allocation101_spill] sm:$0xff] %v11352_v17  ;;  %v2195_v35 = vadd.f32 %v2194_v28, %v11170_v13 }
 0x3f7   : > { %v2351_v52 = vmax.f32 %v2195_v35, 0.0 }
 0x3fa   : > { %v11354_v18 = vpop.f32.mrf.mxu2 }
 0x3fc   : > { %v2196_v24 = vpop.f32.mrf.mxu3  ;;  %v11357_v53 = vpop.f32.mrf.mxu0 }
 0x3fd   : > { %v2197_v11 = vadd.f32 %v2196_v24, %v11179_v23 }
 0x3ff   : > { %v2352_v58 = vmax.f32 %v2197_v11, 0.0  ;;  %8852 = vmatmul.msk.bf16.gmra.mxu0 %vm1866_vm3, %v11232_v7 }
 0x401   : > { %v2414_v48 = vpack.c.bf16 %v2352_v58, %v2351_v52  ;;  %2238 = vmatmul.bf16.gmra.mxu3 %v10160_v42 }
 0x402   : > { %v11366_v17 = vpop.f32.mrf.mxu2 }
 0x403   : > { %8757 = vmatmul.msk.bf16.gmra.mxu2 %vm1287_vm2, %v2414_v48  ;;  %v10161_v48 = vld [vmem:[%s10468_s13 + $0x58] sm:$0xff] }
 0x404   : > { %v2199_v13 = vpop.f32.mrf.mxu3  ;;  %v11369_v23 = vpop.f32.mrf.mxu0 }
 0x405   : > { %v2200_v7 = vadd.f32 %v2199_v13, %v11191_v51  ;;  %v9050_v51 = vld [vmem:[%s15984_s9 + $0x30] sm:$0xff] }
 0x406   : > { %4922 = vmatpush.bf16.msra.mxu2 %v9050_v51 }
 0x407   : > { %v2353_v52 = vmax.f32 %v2200_v7, 0.0 }
 0x40a   : > { %v11371_v28 = vpop.f32.mrf.mxu2 }
 0x40c   : > { %v2201_v35 = vpop.f32.mrf.mxu3  ;;  %v11375_v11 = vpop.f32.mrf.mxu0 }
 0x40d   : > { %v2202_v24 = vadd.f32 %v2201_v35, %v11200_v46  ;;  %16275 = vst [vmem:[#allocation102_spill] sm:$0xff] %v11375_v11  ;;  %v10162_v11 = vld [vmem:[%s10468_s13 + $0x60] sm:$0xff] }
 0x40f   : > { %v2354_v58 = vmax.f32 %v2202_v24, 0.0  ;;  %8853 = vmatmul.msk.bf16.gmra.mxu0 %vm1866_vm3, %v11256_v26 }
 0x411   : > { %v2415_v42 = vpack.c.bf16 %v2354_v58, %v2353_v52  ;;  %2243 = vmatmul.bf16.gmra.mxu3 %v10161_v48 }
 0x412   : > { %v11380_v29 = vpop.f32.mrf.mxu2 }
 0x413   : > { %8758 = vmatmul.msk.bf16.gmra.mxu2 %vm1287_vm2, %v2415_v42 }
 0x414   : > { %v2204_v46 = vpop.f32.mrf.mxu3  ;;  %v11386_v13 = vpop.f32.mrf.mxu0 }
 0x415   : > { %16276 = vst [vmem:[#allocation103_spill] sm:$0xff] %v11386_v13  ;;  %v2205_v26 = vadd.f32 %v2204_v46, %v11215_v63 }
 0x417   : > { %v2355_v52 = vmax.f32 %v2205_v26, 0.0 }
 0x41a   : > { %v11388_v7 = vpop.f32.mrf.mxu2 }
 0x41c   : > { %v2206_v35 = vpop.f32.mrf.mxu3  ;;  %v11394_v48 = vpop.f32.mrf.mxu0 }
 0x41d   : > { %v2207_v24 = vadd.f32 %v2206_v35, %v11224_v47 }
 0x41f   : > { %v2356_v58 = vmax.f32 %v2207_v24, 0.0  ;;  %8854 = vmatmul.msk.bf16.gmra.mxu0 %vm1866_vm3, %v11280_v57 }
 0x421   : > { %v2416_v42 = vpack.c.bf16 %v2356_v58, %v2355_v52  ;;  %2248 = vmatmul.bf16.gmra.mxu3 %v10162_v11  ;;  %v10163_v52 = vld [vmem:[%s10468_s13 + $0x68] sm:$0xff] }
 0x422   : > { %v11397_v51 = vpop.f32.mrf.mxu2 }
 0x423   : > { %8759 = vmatmul.msk.bf16.gmra.mxu2 %vm1287_vm2, %v2416_v42 }
 0x424   : > { %v2209_v13 = vpop.f32.mrf.mxu3  ;;  %v11403_v46 = vpop.f32.mrf.mxu0 }
 0x425   : > { %v2210_v47 = vadd.f32 %v2209_v13, %v11239_v1 }
 0x427   : > { %v2357_v35 = vmax.f32 %v2210_v47, 0.0 }
 0x42a   : > { %v11400_v63 = vpop.f32.mrf.mxu2 }
 0x42c   : > { %v2211_v26 = vpop.f32.mrf.mxu3  ;;  %v11412_v1 = vpop.f32.mrf.mxu0 }
 0x42d   : > { %v2212_v57 = vadd.f32 %v2211_v26, %v11248_v5  ;;  %v9031_v5 = vld [vmem:[%s15981_s6] sm:$0xff] }
 0x42e   : > { %2973 = vmatpush.bf16.msrb.mxu1 %v9031_v5 }
 0x42f   : > { %v2358_v24 = vmax.f32 %v2212_v57, 0.0  ;;  %8855 = vmatmul.msk.bf16.gmra.mxu0 %vm1866_vm3, %v10744_v6 }
 0x431   : > { %v2417_v11 = vpack.c.bf16 %v2358_v24, %v2357_v35  ;;  %2253 = vmatmul.bf16.gmra.mxu3 %v10163_v52  ;;  %v10164_v52 = vld [vmem:[%s10468_s13 + $0x70] sm:$0xff] }
 0x432   : > { %v11409_v58 = vpop.f32.mrf.mxu2 }
 0x433   : > { %8760 = vmatmul.msk.bf16.gmra.mxu2 %vm1287_vm2, %v2417_v11 }
 0x434   : > { %v2214_v42 = vpop.f32.mrf.mxu3  ;;  %v11421_v35 = vpop.f32.mrf.mxu0 }
 0x435   : > { %v2215_v13 = vadd.f32 %v2214_v42, %v11260_v39  ;;  %v9038_v39 = vld [vmem:[%s15982_s7 + $0x18] sm:$0xff] }
 0x436   : > { %4596 = vmatpush.bf16.msra.mxu3 %v9038_v39 }
 0x437   : > { %v2359_v57 = vmax.f32 %v2215_v13, 0.0 }
 0x43a   : > { %v11418_v47 = vpop.f32.mrf.mxu2 }
 0x43c   : > { %v2216_v6 = vpop.f32.mrf.mxu3  ;;  %v11432_v5 = vpop.f32.mrf.mxu0 }
 0x43d   : > { %v2217_v26 = vadd.f32 %v2216_v6, %v11272_v41  ;;  %16277 = vst [vmem:[#allocation104_spill] sm:$0xff] %v11432_v5 }
 0x43f   : > { %v2360_v24 = vmax.f32 %v2217_v26, 0.0  ;;  %8856 = vmatmul.msk.bf16.gmra.mxu0 %vm1866_vm3, %v10764_v25 }
 0x441   : > { %v2418_v11 = vpack.c.bf16 %v2360_v24, %v2359_v57  ;;  %2258 = vmatmul.bf16.gmra.mxu3 %v10164_v52 }
 0x442   : > { %v11430_v41 = vpop.f32.mrf.mxu2 }
 0x443   : > { %8761 = vmatmul.msk.bf16.gmra.mxu2 %vm1287_vm2, %v2418_v11  ;;  %v10165_v11 = vld [vmem:[%s10468_s13 + $0x78] sm:$0xff] }
 0x444   : > { %v2219_v42 = vpop.f32.mrf.mxu3  ;;  %v11441_v39 = vpop.f32.mrf.mxu0 }
 0x445   : > { %v2220_v13 = vadd.f32 %v2219_v42, %v11284_v61  ;;  %16278 = vst [vmem:[#allocation105_spill] sm:$0xff] %v11441_v39  ;;  %v9049_v61 = vld [vmem:[%s15984_s9 + $0x28] sm:$0xff] }
 0x446   : > { %4923 = vmatpush.bf16.msra.mxu2 %v9049_v61 }
 0x447   : > { %v2361_v26 = vmax.f32 %v2220_v13, 0.0 }
 0x44a   : > { %v11438_v24 = vpop.f32.mrf.mxu2 }
 0x44c   : > { %v2221_v6 = vpop.f32.mrf.mxu3 }
 0x44d   : > { %v2222_v25 = vadd.f32 %v2221_v6, %v11296_v34  ;;  %v11450_v6 = vpop.f32.mrf.mxu0 }
 0x44e   : > { %16279 = vst [vmem:[#allocation106_spill] sm:$0xff] %v11450_v6 }
 0x44f   : > { %v2362_v57 = vmax.f32 %v2222_v25, 0.0  ;;  %8857 = vmatmul.msk.bf16.gmra.mxu0 %vm1866_vm3, %v10783_v44 }
 0x451   : > { %v2419_v52 = vpack.c.bf16 %v2362_v57, %v2361_v26  ;;  %2263 = vmatmul.bf16.gmra.mxu3 %v10165_v11  ;;  %v10166_v11 = vld [vmem:[%s10468_s13 + $0x80] sm:$0xff] }
 0x452   : > { %v11447_v42 = vpop.f32.mrf.mxu2 }
 0x453   : > { %8762 = vmatmul.msk.bf16.gmra.mxu2 %vm1287_vm2, %v2419_v52 }
 0x454   : > { %v2224_v34 = vpop.f32.mrf.mxu3 }
 0x455   : > { %v2225_v44 = vadd.f32 %v2224_v34, %v11304_v54  ;;  %v11459_v54 = vpop.f32.mrf.mxu0 }
 0x456   : > { %16280 = vst [vmem:[#allocation107_spill] sm:$0xff] %v11459_v54  ;;  %v10168_v54 = vld [vmem:[%s10468_s13 + $0x90] sm:$0xff] }
 0x457   : > { %v2363_v26 = vmax.f32 %v2225_v44, 0.0 }
 0x45a   : > { %v11457_v61 = vpop.f32.mrf.mxu2 }
 0x45c   : > { %v2226_v13 = vpop.f32.mrf.mxu3 }
 0x45d   : > { %v2227_v25 = vadd.f32 %v2226_v13, %v11313_v55 }
 0x45f   : > { %v2364_v57 = vmax.f32 %v2227_v25, 0.0  ;;  %8858 = vmatmul.msk.bf16.gmra.mxu0 %vm1866_vm3, %v10805_v0  ;;  %v11467_v25 = vpop.f32.mrf.mxu0 }
 0x460   : > { %16281 = vst [vmem:[#allocation108_spill] sm:$0xff] %v11467_v25 }
 0x461   : > { %v2420_v52 = vpack.c.bf16 %v2364_v57, %v2363_v26  ;;  %2268 = vmatmul.bf16.gmra.mxu3 %v10166_v11  ;;  %v10167_v57 = vld [vmem:[%s10468_s13 + $0x88] sm:$0xff] }
 0x462   : > { %v11463_v44 = vpop.f32.mrf.mxu2 }
 0x463   : > { %8763 = vmatmul.msk.bf16.gmra.mxu2 %vm1287_vm2, %v2420_v52 }
 0x464   : > { %v2229_v39 = vpop.f32.mrf.mxu3 }
 0x465   : > { %v2230_v34 = vadd.f32 %v2229_v39, %v11324_v20 }
 0x467   : > { %v2365_v13 = vmax.f32 %v2230_v34, 0.0  ;;  %v11477_v39 = vpop.f32.mrf.mxu0 }
 0x468   : > { %16282 = vst [vmem:[#allocation109_spill] sm:$0xff] %v11477_v39  ;;  %v9037_v39 = vld [vmem:[%s15982_s7 + $0x10] sm:$0xff] }
 0x469   : > { %4597 = vmatpush.bf16.msra.mxu3 %v9037_v39 }
 0x46c   : > { %v2231_v6 = vpop.f32.mrf.mxu3 }
 0x46d   : > { %v2232_v55 = vadd.f32 %v2231_v6, %v11333_v15  ;;  %v11474_v15 = vld [vmem:[%s15985_s10 + $0x38] sm:$0xff] }
 0x46e   : > { %5250 = vmatpush.bf16.msra.mxu1 %v11474_v15 }
 0x46f   : > { %v2366_v0 = vmax.f32 %v2232_v55, 0.0  ;;  %8859 = vmatmul.msk.bf16.gmra.mxu0 %vm1866_vm3, %v10827_v21 }
 0x471   : > { %v2421_v26 = vpack.c.bf16 %v2366_v0, %v2365_v13  ;;  %2273 = vmatmul.bf16.gmra.mxu3 %v10167_v57 }
 0x473   : > { %8764 = vmatmul.msk.bf16.gmra.mxu2 %vm1287_vm2, %v2421_v26 }
 0x474   : > { %v2234_v52 = vpop.f32.mrf.mxu3 }
 0x475   : > { %v2235_v21 = vadd.f32 %v2234_v52, %v11337_v33  ;;  %v11489_v33 = vpop.f32.mrf.mxu0 }
 0x476   : > { %v2582_v20 = vpop.f32.mrf.mxu2  ;;  %16283 = vst [vmem:[#allocation110_spill] sm:$0xff] %v11489_v33 }
 0x477   : > { %v2367_v55 = vmax.f32 %v2235_v21, 0.0  ;;  %v2742_v13 = vmax.f32 %v2582_v20, 0.0 }
 0x47c   : > { %v2236_v6 = vpop.f32.mrf.mxu3 }
 0x47d   : > { %v2237_v11 = vadd.f32 %v2236_v6, %v11349_v60  ;;  %v11493_v6 = vpop.f32.mrf.mxu0 }
 0x47e   : > { %v2584_v34 = vpop.f32.mrf.mxu2  ;;  %16284 = vst [vmem:[#allocation111_spill] sm:$0xff] %v11493_v6 }
 0x47f   : > { %v2368_v0 = vmax.f32 %v2237_v11, 0.0  ;;  %v2743_v26 = vmax.f32 %v2584_v34, 0.0  ;;  %8860 = vmatmul.msk.bf16.gmra.mxu0 %vm1866_vm3, %v10846_v45 }
 0x481   : > { %v2422_v57 = vpack.c.bf16 %v2368_v0, %v2367_v55  ;;  %v2806_v25 = vpack.c.bf16 %v2743_v26, %v2742_v13  ;;  %2278 = vmatmul.bf16.gmra.mxu3 %v10168_v54  ;;  %v10169_v0 = vld [vmem:[%s10468_s13 + $0x98] sm:$0xff] }
 0x483   : > { %8765 = vmatmul.msk.bf16.gmra.mxu2 %vm1287_vm2, %v2422_v57  ;;  %8804 = vmatmul.msk.bf16.vlgmr.msrb.gmra.mxu1 %vm1287_vm2, %v2806_v25 }
 0x484   : > { %v2239_v60 = vpop.f32.mrf.mxu3 }
 0x485   : > { %v2240_v45 = vadd.f32 %v2239_v60, %v11354_v18  ;;  %v11503_v57 = vpop.f32.mrf.mxu0 }
 0x486   : > { %v2587_v52 = vpop.f32.mrf.mxu2  ;;  %16285 = vst [vmem:[#allocation112_spill] sm:$0xff] %v11503_v57 }
 0x487   : > { %v2369_v11 = vmax.f32 %v2240_v45, 0.0  ;;  %v2744_v34 = vmax.f32 %v2587_v52, 0.0 }
 0x48c   : > { %v2241_v20 = vpop.f32.mrf.mxu3 }
 0x48d   : > { %v2242_v21 = vadd.f32 %v2241_v20, %v11366_v17  ;;  %v9048_v17 = vld [vmem:[%s15984_s9 + $0x20] sm:$0xff] }
 0x48e   : > { %v2589_v54 = vpop.f32.mrf.mxu2  ;;  %4924 = vmatpush.bf16.msra.mxu2 %v9048_v17 }
 0x48f   : > { %v2370_v55 = vmax.f32 %v2242_v21, 0.0  ;;  %v2745_v13 = vmax.f32 %v2589_v54, 0.0  ;;  %8861 = vmatmul.msk.bf16.gmra.mxu0 %vm1866_vm3, %v10868_v4 }
 0x491   : > { %v2423_v25 = vpack.c.bf16 %v2370_v55, %v2369_v11  ;;  %v2807_v39 = vpack.c.bf16 %v2745_v13, %v2744_v34  ;;  %2283 = vmatmul.bf16.gmra.mxu3 %v10169_v0  ;;  %v10170_v13 = vld [vmem:[%s10468_s13 + $0xa0] sm:$0xff] }
 0x493   : > { %8766 = vmatmul.msk.bf16.gmra.mxu2 %vm1287_vm2, %v2423_v25  ;;  %8805 = vmatmul.msk.bf16.gmra.mxu1 %vm1287_vm2, %v2807_v39  ;;  %v11510_v25 = vpop.f32.mrf.mxu0 }
 0x494   : > { %v2244_v18 = vpop.f32.mrf.mxu3  ;;  %16286 = vst [vmem:[#allocation113_spill] sm:$0xff] %v11510_v25 }
 0x495   : > { %v2245_v4 = vadd.f32 %v2244_v18, %v11371_v28 }
 0x496   : > { %v2592_v26 = vpop.f32.mrf.mxu2 }
 0x497   : > { %v2371_v20 = vmax.f32 %v2245_v4, 0.0  ;;  %v2746_v21 = vmax.f32 %v2592_v26, 0.0 }
 0x49b   : > { %v11515_v17 = vpop.f32.mrf.mxu0 }
 0x49c   : > { %v2246_v60 = vpop.f32.mrf.mxu3  ;;  %16287 = vst [vmem:[#allocation114_spill] sm:$0xff] %v11515_v17 }
 0x49d   : > { %v2247_v52 = vadd.f32 %v2246_v60, %v11380_v29 }
 0x49e   : > { %v2594_v45 = vpop.f32.mrf.mxu2 }
 0x49f   : > { %v2372_v54 = vmax.f32 %v2247_v52, 0.0  ;;  %v2747_v11 = vmax.f32 %v2594_v45, 0.0  ;;  %8862 = vmatmul.msk.bf16.gmra.mxu0 %vm1866_vm3, %v10887_v31 }
 0x4a1   : > { %v2424_v34 = vpack.c.bf16 %v2372_v54, %v2371_v20  ;;  %v2808_v55 = vpack.c.bf16 %v2747_v11, %v2746_v21  ;;  %2288 = vmatmul.bf16.gmra.mxu3 %v10170_v13  ;;  %v10171_v21 = vld [vmem:[%s10468_s13 + $0xa8] sm:$0xff]  ;;  %v11528_v11 = vld [vmem:[%s15985_s10 + $0x30] sm:$0xff] }
 0x4a2   : > { %5251 = vmatpush.bf16.msra.mxu1 %v11528_v11 }
 0x4a3   : > { %8767 = vmatmul.msk.bf16.gmra.mxu2 %vm1287_vm2, %v2424_v34  ;;  %8806 = vmatmul.msk.bf16.gmra.mxu1 %vm1287_vm2, %v2808_v55 }
 0x4a4   : > { %v2249_v28 = vpop.f32.mrf.mxu3 }
 0x4a5   : > { %v2250_v39 = vadd.f32 %v2249_v28, %v11388_v7 }
 0x4a6   : > { %v2597_v29 = vpop.f32.mrf.mxu2 }
 0x4a7   : > { %v2373_v26 = vmax.f32 %v2250_v39, 0.0  ;;  %v2748_v4 = vmax.f32 %v2597_v29, 0.0 }
 0x4ac   : > { %v2251_v0 = vpop.f32.mrf.mxu3 }
 0x4ad   : > { %v2252_v31 = vadd.f32 %v2251_v0, %v11397_v51  ;;  %v11523_v51 = vpop.f32.mrf.mxu0 }
 0x4ae   : > { %v2599_v18 = vpop.f32.mrf.mxu2  ;;  %16288 = vst [vmem:[#allocation115_spill] sm:$0xff] %v11523_v51 }
 0x4af   : > { %v2374_v60 = vmax.f32 %v2252_v31, 0.0  ;;  %v2749_v52 = vmax.f32 %v2599_v18, 0.0  ;;  %8863 = vmatmul.msk.bf16.gmra.mxu0 %vm1866_vm3, %v10911_v50 }
 0x4b1   : > { %v2425_v45 = vpack.c.bf16 %v2374_v60, %v2373_v26  ;;  %v2809_v20 = vpack.c.bf16 %v2749_v52, %v2748_v4  ;;  %2293 = vmatmul.bf16.gmra.mxu3 %v10171_v21  ;;  %v10172_v4 = vld [vmem:[%s10468_s13 + $0xb0] sm:$0xff]  ;;  %v11543_v60 = vpop.xlane.xlu2 %614 }
 0x4b3   : > { %8768 = vmatmul.msk.bf16.gmra.mxu2 %vm1287_vm2, %v2425_v45  ;;  %8807 = vmatmul.msk.bf16.gmra.mxu1 %vm1287_vm2, %v2809_v20 }
 0x4b4   : > { %v2254_v7 = vpop.f32.mrf.mxu3 }
 0x4b5   : > { %v2255_v50 = vadd.f32 %v2254_v7, %v11400_v63  ;;  %v11535_v31 = vpop.f32.mrf.mxu0  ;;  %v9036_v63 = vld [vmem:[%s15982_s7 + $0x8] sm:$0xff] }
 0x4b6   : > { %v2602_v54 = vpop.f32.mrf.mxu2  ;;  %16289 = vst [vmem:[#allocation116_spill] sm:$0xff] %v11535_v31  ;;  %4598 = vmatpush.bf16.msra.mxu3 %v9036_v63  ;;  %v11566_v63 = vpop.xlane.xlu0 %606 }
 0x4b7   : > { %v2375_v28 = vmax.f32 %v2255_v50, 0.0  ;;  %v2750_v29 = vmax.f32 %v2602_v54, 0.0  ;;  %16292 = vst [vmem:[#allocation119_spill] sm:$0xff] %v11566_v63 }
 0x4b9   : > { %v11549_v54 = vpop.xlane.xlu2 %616 }
 0x4bc   : > { %v2256_v34 = vpop.f32.mrf.mxu3 }
 0x4bd   : > { %v2257_v55 = vadd.f32 %v2256_v34, %v11409_v58  ;;  %v11545_v52 = vpop.f32.mrf.mxu0 }
 0x4be   : > { %v2604_v13 = vpop.f32.mrf.mxu2  ;;  %16290 = vst [vmem:[#allocation117_spill] sm:$0xff] %v11545_v52  ;;  %v10176_v52 = vld [vmem:[%s10468_s13 + $0xd0] sm:$0xff] }
 0x4bf   : > { %v2376_v39 = vmax.f32 %v2257_v55, 0.0  ;;  %v2751_v0 = vmax.f32 %v2604_v13, 0.0  ;;  %8864 = vmatmul.msk.bf16.gmra.mxu0 %vm1866_vm3, %v10933_v56 }
 0x4c1   : > { %v2426_v18 = vpack.c.bf16 %v2376_v39, %v2375_v28  ;;  %v2810_v26 = vpack.c.bf16 %v2751_v0, %v2750_v29  ;;  %2298 = vmatmul.bf16.gmra.mxu3 %v10172_v4  ;;  %v10173_v39 = vld [vmem:[%s10468_s13 + $0xb8] sm:$0xff]  ;;  %v11559_v0 = vpop.xlane.xlu1 %610 }
 0x4c3   : > { %8769 = vmatmul.msk.bf16.gmra.mxu2 %vm1287_vm2, %v2426_v18  ;;  %8808 = vmatmul.msk.bf16.gmra.mxu1 %vm1287_vm2, %v2810_v26 }
 0x4c4   : > { %v2259_v58 = vpop.f32.mrf.mxu3 }
 0x4c5   : > { %v2260_v45 = vadd.f32 %v2259_v58, %v11418_v47  ;;  %v9047_v47 = vld [vmem:[%s15984_s9 + $0x18] sm:$0xff]  ;;  %v11561_v18 = vpop.f32.mrf.mxu0 }
 0x4c6   : > { %v2607_v56 = vpop.f32.mrf.mxu2  ;;  %16291 = vst [vmem:[#allocation118_spill] sm:$0xff] %v11561_v18  ;;  %4925 = vmatpush.bf16.msra.mxu2 %v9047_v47 }
 0x4c7   : > { %v2377_v50 = vmax.f32 %v2260_v45, 0.0  ;;  %v2752_v34 = vmax.f32 %v2607_v56, 0.0 }
 0x4cc   : > { %v2261_v20 = vpop.f32.mrf.mxu3 }
 0x4cd   : > { %v2262_v21 = vadd.f32 %v2261_v20, %v11430_v41  ;;  %v11569_v20 = vpop.xlane.xlu1 %612 }
 0x4ce   : > { %v2609_v7 = vpop.f32.mrf.mxu2  ;;  %16293 = vst [vmem:[#allocation120_spill] sm:$0xff] %v11569_v20 }
 0x4cf   : > { %v2378_v55 = vmax.f32 %v2262_v21, 0.0  ;;  %v2753_v13 = vmax.f32 %v2609_v7, 0.0  ;;  %8865 = vmatmul.msk.bf16.gmra.mxu0 %vm1866_vm3, %v10958_v10  ;;  %v11563_v10 = vpop.xlane.xlu2 %622  ;;  %v11571_v21 = vpop.f32.mrf.mxu0 }
 0x4d0   : > { %16294 = vst [vmem:[#allocation121_spill] sm:$0xff] %v11571_v21 }
 0x4d1   : > { %v2427_v28 = vpack.c.bf16 %v2378_v55, %v2377_v50  ;;  %v2811_v29 = vpack.c.bf16 %v2753_v13, %v2752_v34  ;;  %2303 = vmatmul.bf16.gmra.mxu3 %v10173_v39  ;;  %v11580_v39 = vpop.xlane.xlu0 %608 }
 0x4d2   : > { %16295 = vst [vmem:[#allocation122_spill] sm:$0xff] %v11580_v39 }
 0x4d3   : > { %8770 = vmatmul.msk.bf16.gmra.mxu2 %vm1287_vm2, %v2427_v28  ;;  %8809 = vmatmul.msk.bf16.gmra.mxu1 %vm1287_vm2, %v2811_v29 }
 0x4d4   : > { %v2264_v41 = vpop.f32.mrf.mxu3 }
 0x4d5   : > { %v2265_v4 = vadd.f32 %v2264_v41, %v11438_v24  ;;  %v10174_v24 = vld [vmem:[%s10468_s13 + $0xc0] sm:$0xff]  ;;  %v11582_v41 = vpop.xlane.xlu1 %620 }
 0x4d6   : > { %v2612_v26 = vpop.f32.mrf.mxu2 }
 0x4d7   : > { %v2379_v7 = vmax.f32 %v2265_v4, 0.0  ;;  %v2754_v50 = vmax.f32 %v2612_v26, 0.0  ;;  %v11576_v29 = vpop.xlane.xlu2 %628  ;;  %v11584_v26 = vpop.f32.mrf.mxu0 }
 0x4d8   : > { %16296 = vst [vmem:[#allocation123_spill] sm:$0xff] %v11584_v26  ;;  %v10175_v26 = vld [vmem:[%s10468_s13 + $0xc8] sm:$0xff] }
 0x4dc   : > { %v2266_v58 = vpop.f32.mrf.mxu3 }
 0x4dd   : > { %v2267_v56 = vadd.f32 %v2266_v58, %v11447_v42 }
 0x4de   : > { %v2614_v45 = vpop.f32.mrf.mxu2 }
 0x4df   : > { %v2380_v34 = vmax.f32 %v2267_v56, 0.0  ;;  %v2755_v55 = vmax.f32 %v2614_v45, 0.0  ;;  %8866 = vmatmul.msk.bf16.gmra.mxu0 %vm1866_vm3, %v10984_v22  ;;  %v11587_v58 = vpop.xlane.xlu2 %634 }
 0x4e1   : > { %v2428_v13 = vpack.c.bf16 %v2380_v34, %v2379_v7  ;;  %v2812_v28 = vpack.c.bf16 %v2755_v55, %v2754_v50  ;;  %2308 = vmatmul.bf16.gmra.mxu3 %v10174_v24 }
 0x4e3   : > { %8771 = vmatmul.msk.bf16.gmra.mxu2 %vm1287_vm2, %v2428_v13  ;;  %8810 = vmatmul.msk.bf16.gmra.mxu1 %vm1287_vm2, %v2812_v28  ;;  %v11592_v13 = vpop.xlane.xlu0 %618 }
 0x4e4   : > { %v2269_v42 = vpop.f32.mrf.mxu3  ;;  %16297 = vst [vmem:[#allocation124_spill] sm:$0xff] %v11592_v13 }
 0x4e5   : > { %v2270_v22 = vadd.f32 %v2269_v42, %v11457_v61  ;;  %v11595_v61 = vpop.xlane.xlu1 %626  ;;  %v11597_v42 = vpop.f32.mrf.mxu0 }
 0x4e6   : > { %v2617_v47 = vpop.f32.mrf.mxu2  ;;  %16298 = vst [vmem:[#allocation125_spill] sm:$0xff] %v11597_v42 }
 0x4e7   : > { %v2381_v7 = vmax.f32 %v2270_v22, 0.0  ;;  %v2756_v50 = vmax.f32 %v2617_v47, 0.0  ;;  %v11601_v22 = vpop.xlane.xlu2 %640 }
 0x4e8   : > { %16299 = vst [vmem:[#allocation126_spill] sm:$0xff] %v11601_v22 }
 0x4ec   : > { %v2271_v4 = vpop.f32.mrf.mxu3 }
 0x4ed   : > { %v2272_v56 = vadd.f32 %v2271_v4, %v11463_v44  ;;  %v11603_v4 = vpop.xlane.xlu0 %624 }
 0x4ee   : > { %v2619_v45 = vpop.f32.mrf.mxu2 }
 0x4ef   : > { %v2382_v34 = vmax.f32 %v2272_v56, 0.0  ;;  %v2757_v55 = vmax.f32 %v2619_v45, 0.0  ;;  %8867 = vmatmul.msk.bf16.gmra.mxu0 %vm1866_vm3, %v11016_v2  ;;  %v11606_v45 = vpop.xlane.xlu1 %632  ;;  %v11613_v21 = vpop.xlane.xlu2 %646 }
 0x4f0   : > { %16301 = vst [vmem:[#allocation128_spill] sm:$0xff] %v11613_v21 }
 0x4f1   : > { %v2429_v28 = vpack.c.bf16 %v2382_v34, %v2381_v7  ;;  %v2813_v24 = vpack.c.bf16 %v2757_v55, %v2756_v50  ;;  %2313 = vmatmul.bf16.gmra.mxu3 %v10175_v26  ;;  %v11608_v26 = vpop.f32.mrf.mxu0 }
 0x4f2   : > { %16300 = vst [vmem:[#allocation127_spill] sm:$0xff] %v11608_v26 }
 0x4f3   : > { %8772 = vmatmul.msk.bf16.gmra.mxu2 %vm1287_vm2, %v2429_v28  ;;  %8811 = vmatmul.msk.bf16.gmra.mxu1 %vm1287_vm2, %v2813_v24 }
 0x4f4   : > { %v2274_v44 = vpop.f32.mrf.mxu3 }
 0x4f5   : > { %v2275_v2 = vadd.f32 %v2274_v44, %v10964_v12 }
 0x4f6   : > { %v2622_v47 = vpop.f32.mrf.mxu2 }
 0x4f7   : > { %v2383_v34 = vmax.f32 %v2275_v2, 0.0  ;;  %v2758_v55 = vmax.f32 %v2622_v47, 0.0 }
 0x4fc   : > { %v2276_v56 = vpop.f32.mrf.mxu3 }
 0x4fd   : > { %v2277_v7 = vadd.f32 %v2276_v56, %v10976_v19  ;;  %v11618_v19 = vpop.xlane.xlu0 %630  ;;  %v11623_v56 = vpop.xlane.xlu1 %638 }
 0x4fe   : > { %v2624_v50 = vpop.f32.mrf.mxu2  ;;  %16302 = vst [vmem:[#allocation129_spill] sm:$0xff] %v11623_v56 }
 0x4ff   : > { %v2384_v28 = vmax.f32 %v2277_v7, 0.0  ;;  %v2759_v24 = vmax.f32 %v2624_v50, 0.0  ;;  %8868 = vmatmul.msk.bf16.gmra.mxu0 %vm1866_vm3, %v11045_v8  ;;  %v9057_v8 = vld [vmem:[%s15985_s10 + $0x28] sm:$0xff]  ;;  %v11625_v7 = vpop.f32.mrf.mxu0  ;;  %v11627_v50 = vpop.xlane.xlu2 %652 }
 0x500   : > { %v2975_v42 = vpop.f32.mrf.mxu1  ;;  %16303 = vst [vmem:[#allocation130_spill] sm:$0xff] %v11625_v7  ;;  %5252 = vmatpush.bf16.msra.mxu1 %v9057_v8 }
 0x501   : > { %v2430_v12 = vpack.c.bf16 %v2384_v28, %v2383_v34  ;;  %v2814_v44 = vpack.c.bf16 %v2759_v24, %v2758_v55  ;;  %v3135_v18 = vsub.f32 0.0, %v2975_v42  ;;  %2318 = vmatmul.bf16.gmra.mxu3 %v10176_v52  ;;  %16304 = vst [vmem:[#allocation131_spill] sm:$0xff] %v11627_v50 }
 0x503   : > { %v3199_v31 = vmul.f32 1.442695, %v3135_v18  ;;  %8773 = vmatmul.msk.bf16.gmra.mxu2 %vm1287_vm2, %v2430_v12  ;;  %8812 = vmatmul.msk.bf16.gmra.mxu1 %vm1287_vm2, %v2814_v44 }
 0x504   : > { %v2279_v47 = vpop.f32.mrf.mxu3 }
 0x505   : > { %9126 = vpow2.f32 %v3199_v31  ;;  %v2280_v34 = vadd.f32 %v2279_v47, %v10990_v32  ;;  %v11631_v12 = vpop.xlane.xlu0 %636  ;;  %v11638_v47 = vpop.xlane.xlu1 %644 }
 0x506   : > { %v2627_v2 = vpop.f32.mrf.mxu2  ;;  %16305 = vst [vmem:[#allocation132_spill] sm:$0xff] %v11638_v47 }
 0x507   : > { %v2385_v7 = vmax.f32 %v2280_v34, 0.0  ;;  %v2760_v26 = vmax.f32 %v2627_v2, 0.0 }
 0x508   : > { %v2977_v42 = vpop.f32.mrf.mxu1 }
 0x509   : > { %v3136_v52 = vsub.f32 0.0, %v2977_v42  ;;  %v9035_v42 = vld [vmem:[%s15982_s7] sm:$0xff] }
 0x50a   : > { %4599 = vmatpush.bf16.msra.mxu3 %v9035_v42  ;;  %v11648_v42 = vpop.xlane.xlu2 %658 }
 0x50b   : > { %v9127_v18 = vpop.eup %9126  ;;  %v3201_v55 = vmul.f32 1.442695, %v3136_v52  ;;  %16307 = vst [vmem:[#allocation134_spill] sm:$0xff] %v11648_v42 }
 0x50c   : > { %v3327_v28 = vadd.f32 1.0, %v9127_v18  ;;  %v2281_v31 = vpop.f32.mrf.mxu3 }
 0x50d   : > { %9128 = vpow2.f32 %v3201_v55  ;;  %v2282_v24 = vadd.f32 %v2281_v31, %v11008_v40  ;;  %v11640_v40 = vpop.f32.mrf.mxu0  ;;  %v10177_v31 = vld [vmem:[%s10468_s13 + $0xd8] sm:$0xff] }
 0x50e   : > { %9130 = vrcp.f32 %v3327_v28  ;;  %v2629_v44 = vpop.f32.mrf.mxu2  ;;  %16306 = vst [vmem:[#allocation133_spill] sm:$0xff] %v11640_v40  ;;  %9066 = vmatpush.bf16.msrb.mxu3 %v11474_v15  ;;  %vm3396_vm5 = vweird.f32 %v3327_v28 }
 0x50f   : > { %v2386_v51 = vmax.f32 %v2282_v24, 0.0  ;;  %v2761_v17 = vmax.f32 %v2629_v44, 0.0  ;;  %8869 = vmatmul.msk.bf16.gmra.mxu0 %vm1866_vm3, %v11072_v49 }
 0x510   : > { %v2980_v32 = vpop.f32.mrf.mxu1 }
 0x511   : > { %v2431_v52 = vpack.c.bf16 %v2386_v51, %v2385_v7  ;;  %v2815_v18 = vpack.c.bf16 %v2761_v17, %v2760_v26  ;;  %v3137_v55 = vsub.f32 0.0, %v2980_v32  ;;  %2323 = vmatmul.bf16.gmra.mxu3 %v10177_v31  ;;  %v11652_v26 = vpop.xlane.xlu0 %642  ;;  %v3400_v32 = vand.u32 2147483647, %v3327_v28 }
 0x512   : > { %9067 = vmatpush.bf16.msrb.mxu3 %v11528_v11  ;;  %16308 = vst [vmem:[#allocation135_spill] sm:$0xff] %v11652_v26 }
 0x513   : > { %v9129_v34 = vpop.eup %9128  ;;  %v3203_v2 = vmul.f32 1.442695, %v3137_v55  ;;  %8774 = vmatmul.msk.bf16.gmra.mxu2 %vm1287_vm2, %v2431_v52  ;;  %8813 = vmatmul.msk.bf16.gmra.mxu1 %vm1287_vm2, %v2815_v18  ;;  %v3402_v52 = vand.u32 2147483648, %v3327_v28  ;;  %vm3401_vm7 = vcmp.eq.f32.partialorder %v3400_v32, 8.507059e+37 }
 0x514   : > { %v9131_v49 = vpop.eup %9130  ;;  %v11646_v24 = vadd.f32 1.0, %v9129_v34  ;;  %v2284_v44 = vpop.f32.mrf.mxu3 }
 0x515   : > { %9132 = vpow2.f32 %v3203_v2  ;;  %v3392_v51 = vmul.f32 %v9131_v49, %v3327_v28  ;;  %vm3397_vm4 = vweird.f32 %v9131_v49  ;;  %v2285_v31 = vadd.f32 %v2284_v44, %v11022_v16  ;;  %v11655_v2 = vpop.xlane.xlu1 %650  ;;  %v11657_v40 = vpop.f32.mrf.mxu0  ;;  %v9046_v28 = vld [vmem:[%s15984_s9 + $0x10] sm:$0xff] }
 0x516   : > { %9134 = vrcp.f32 %v11646_v24  ;;  %v2632_v17 = vpop.f32.mrf.mxu2  ;;  %9068 = vmatpush.bf16.msrb.mxu3 %v9057_v8  ;;  %16309 = vst [vmem:[#allocation136_spill] sm:$0xff] %v11655_v2  ;;  %vm3398_vm6 = vmor %vm3396_vm5, %vm3397_vm4  ;;  %4926 = vmatpush.bf16.msra.mxu2 %v9046_v28  ;;  %vm3411_vm9 = vweird.f32 %v11646_v24 }
 0x517   : > { %v3393_v15 = vsub.f32 1.0, %v3392_v51  ;;  %16310 = vst [vmem:[#allocation137_spill] sm:$0xff] %v11657_v40  ;;  %v2387_v44 = vmax.f32 %v2285_v31, 0.0  ;;  %v2762_v32 = vmax.f32 %v2632_v17, 0.0  ;;  %v10178_v17 = vld [vmem:[%s10468_s13 + $0xe0] sm:$0xff] }
 0x518   : > { %v2982_v7 = vpop.f32.mrf.mxu1 }
 0x519   : > { %v3138_v18 = vsub.f32 0.0, %v2982_v7  ;;  %v3394_v55 = vmul.f32 %v9131_v49, %v3393_v15  ;;  %v3403_v7 = vor.u32 1.1754944e-38, %v3402_v52 }
 0x51b   : > { %v9133_v34 = vpop.eup %9132  ;;  %v3205_v25 = vmul.f32 1.442695, %v3138_v18  ;;  %v3395_v57 = vadd.f32 %v9131_v49, %v3394_v55  ;;  %v11667_v55 = vpop.xlane.xlu2 %664 }
 0x51c   : > { %v9135_v11 = vpop.eup %9134  ;;  %v11659_v51 = vadd.f32 1.0, %v9133_v34  ;;  %v2286_v6 = vpop.f32.mrf.mxu3  ;;  %16311 = vst [vmem:[#allocation138_spill] sm:$0xff] %v11667_v55 }
 0x51d   : > { %9136 = vpow2.f32 %v3205_v25  ;;  %v2287_v15 = vadd.f32 %v2286_v6, %v11037_v9  ;;  %v3399_v16 = vsel %vm3398_vm6, %v9131_v49, %v3395_v57  ;;  %v3407_v8 = vmul.f32 %v9135_v11, %v11646_v24 }
 0x51e   : > { %9138 = vrcp.f32 %v11659_v51  ;;  %v2634_v40 = vpop.f32.mrf.mxu2  ;;  %v3404_v18 = vsel %vm3401_vm7, %v3403_v7, %v3399_v16  ;;  %vm3412_vm8 = vweird.f32 %v9135_v11  ;;  %v3415_v57 = vand.u32 2147483647, %v11646_v24 }
 0x51f   : > { %v2388_v52 = vmax.f32 %v2287_v15, 0.0  ;;  %v2763_v25 = vmax.f32 %v2634_v40, 0.0  ;;  %8870 = vmatmul.msk.bf16.gmra.mxu0 %vm1866_vm3, %v11098_v3  ;;  %7660 = vrot.lane.b32.xlu1 %v3404_v18, %s10314_s25  ;;  %v3408_v9 = vsub.f32 1.0, %v3407_v8  ;;  %v3417_v49 = vand.u32 2147483648, %v11646_v24  ;;  %v11675_v15 = vpop.xlane.xlu0 %648  ;;  %vm3413_vm10 = vmor %vm3411_vm9, %vm3412_vm8 }
 0x520   : > { %v2985_v6 = vpop.f32.mrf.mxu1  ;;  %16312 = vst [vmem:[#allocation139_spill] sm:$0xff] %v11675_v15  ;;  %vm3416_vm11 = vcmp.eq.f32.partialorder %v3415_v57, 8.507059e+37  ;;  %vm3426_vm13 = vweird.f32 %v11659_v51 }
 0x521   : > { %v2432_v31 = vpack.c.bf16 %v2388_v52, %v2387_v44  ;;  %v2816_v34 = vpack.c.bf16 %v2763_v25, %v2762_v32  ;;  %v3139_v7 = vsub.f32 0.0, %v2985_v6  ;;  %2328 = vmatmul.bf16.gmra.mxu3 %v10178_v17  ;;  %v3409_v40 = vmul.f32 %v9135_v11, %v3408_v9  ;;  %v11683_v32 = vpop.xlane.xlu1 %656  ;;  %v11685_v52 = vpop.f32.mrf.mxu0 }
 0x522   : > { %v3418_v28 = vor.u32 1.1754944e-38, %v3417_v49  ;;  %16313 = vst [vmem:[#allocation140_spill] sm:$0xff] %v11683_v32  ;;  %v3432_v49 = vand.u32 2147483648, %v11659_v51 }
 0x523   : > { %v9137_v3 = vpop.eup %9136  ;;  %v3207_v16 = vmul.f32 1.442695, %v3139_v7  ;;  %8775 = vmatmul.msk.bf16.gmra.mxu2 %vm1287_vm2, %v2432_v31  ;;  %8814 = vmatmul.msk.bf16.gmra.mxu1 %vm1287_vm2, %v2816_v34  ;;  %v3410_v8 = vadd.f32 %v9135_v11, %v3409_v40  ;;  %16314 = vst [vmem:[#allocation141_spill] sm:$0xff] %v11685_v52  ;;  %v3430_v7 = vand.u32 2147483647, %v11659_v51  ;;  %v11692_v17 = vpop.xlane.xlu2 %670 }
 0x524   : > { %v9139_v18 = vpop.eup %9138  ;;  %v11680_v33 = vadd.f32 1.0, %v9137_v3  ;;  %v2289_v44 = vpop.f32.mrf.mxu3  ;;  %16315 = vst [vmem:[#allocation142_spill] sm:$0xff] %v11692_v17  ;;  %v3433_v52 = vor.u32 1.1754944e-38, %v3432_v49 }
 0x525   : > { %9140 = vpow2.f32 %v3207_v16  ;;  %v3414_v25 = vsel %vm3413_vm10, %v9135_v11, %v3410_v8  ;;  %v3422_v9 = vmul.f32 %v9139_v18, %v11659_v51  ;;  %vm3427_vm12 = vweird.f32 %v9139_v18 }
 0x526   : > { %9142 = vrcp.f32 %v11680_v33  ;;  %v2637_v6 = vpop.f32.mrf.mxu2  ;;  %v3419_v24 = vsel %vm3416_vm11, %v3418_v28, %v3414_v25  ;;  %v2290_v11 = vadd.f32 %v2289_v44, %v11051_v59  ;;  %vm3428_vm14 = vmor %vm3426_vm13, %vm3427_vm12  ;;  %vm3431_vm15 = vcmp.eq.f32.partialorder %v3430_v7, 8.507059e+37 }
 0x527   : > { %7662 = vrot.lane.b32.xlu2 %v3419_v24, %s10314_s25  ;;  %v3423_v31 = vsub.f32 1.0, %v3422_v9  ;;  %v11696_v25 = vpop.xlane.xlu0 %654  ;;  %v2764_v17 = vmax.f32 %v2637_v6, 0.0  ;;  %v3445_v49 = vand.u32 2147483647, %v11680_v33  ;;  %v10179_v6 = vld [vmem:[%s10468_s13 + $0xe8] sm:$0xff]  ;;  %vm3441_vm1 = vweird.f32 %v11680_v33 }
 0x528   : > { %v2987_v34 = vpop.f32.mrf.mxu1  ;;  %16316 = vst [vmem:[#allocation143_spill] sm:$0xff] %v11696_v25  ;;  %v2389_v44 = vmax.f32 %v2290_v11, 0.0 }
 0x529   : > { %v3140_v40 = vsub.f32 0.0, %v2987_v34  ;;  %v3424_v3 = vmul.f32 %v9139_v18, %v3423_v31  ;;  %vm3446_vm5 = vcmp.eq.f32.partialorder %v3445_v49, 8.507059e+37 }
 0x52b   : > { %v9141_v57 = vpop.eup %9140  ;;  %v3209_v16 = vmul.f32 1.442695, %v3140_v40  ;;  %v3425_v8 = vadd.f32 %v9139_v18, %v3424_v3  ;;  %v11703_v3 = vpop.xlane.xlu1 %662 }
 0x52c   : > { %v9143_v28 = vpop.eup %9142  ;;  %v11698_v9 = vadd.f32 1.0, %v9141_v57  ;;  %v2291_v24 = vpop.f32.mrf.mxu3  ;;  %16317 = vst [vmem:[#allocation144_spill] sm:$0xff] %v11703_v3 }
 0x52d   : > { %9144 = vpow2.f32 %v3209_v16  ;;  %v2292_v31 = vadd.f32 %v2291_v24, %v11066_v38  ;;  %v3429_v34 = vsel %vm3428_vm14, %v9139_v18, %v3425_v8  ;;  %v3437_v59 = vmul.f32 %v9143_v28, %v11680_v33  ;;  %v11705_v57 = vpop.f32.mrf.mxu0  ;;  %v11712_v11 = vpop.xlane.xlu2 %676 }
 0x52e   : > { %9146 = vrcp.f32 %v11698_v9  ;;  %v2639_v40 = vpop.f32.mrf.mxu2  ;;  %v3434_v51 = vsel %vm3431_vm15, %v3433_v52, %v3429_v34  ;;  %16318 = vst [vmem:[#allocation145_spill] sm:$0xff] %v11705_v57  ;;  %vm3442_vm0 = vweird.f32 %v9143_v28  ;;  %v3447_v52 = vand.u32 2147483648, %v11680_v33 }
 0x52f   : > { %v2390_v55 = vmax.f32 %v2292_v31, 0.0  ;;  %v2765_v7 = vmax.f32 %v2639_v40, 0.0  ;;  %8871 = vmatmul.msk.bf16.gmra.mxu0 %vm1866_vm3, %v11130_v43  ;;  %7664 = vrot.lane.b32.xlu0 %v3434_v51, %s10314_s25  ;;  %v3438_v38 = vsub.f32 1.0, %v3437_v59  ;;  %16319 = vst [vmem:[#allocation146_spill] sm:$0xff] %v11712_v11  ;;  %vm3443_vm4 = vmor %vm3441_vm1, %vm3442_vm0  ;;  %vm3456_vm7 = vweird.f32 %v11698_v9 }
 0x530   : > { %v2990_v18 = vpop.f32.mrf.mxu1 }
 0x531   : > { %v2433_v16 = vpack.c.bf16 %v2390_v55, %v2389_v44  ;;  %v2817_v8 = vpack.c.bf16 %v2765_v7, %v2764_v17  ;;  %v3141_v24 = vsub.f32 0.0, %v2990_v18  ;;  %2333 = vmatmul.bf16.gmra.mxu3 %v10179_v6  ;;  %v3439_v31 = vmul.f32 %v9143_v28, %v3438_v38  ;;  %v11722_v7 = vpop.xlane.xlu0 %660 }
 0x532   : > { %v3448_v55 = vor.u32 1.1754944e-38, %v3447_v52  ;;  %16320 = vst [vmem:[#allocation147_spill] sm:$0xff] %v11722_v7 }
 0x533   : > { %v9145_v34 = vpop.eup %9144  ;;  %v3211_v40 = vmul.f32 1.442695, %v3141_v24  ;;  %8776 = vmatmul.msk.bf16.gmra.mxu2 %vm1287_vm2, %v2433_v16  ;;  %8815 = vmatmul.msk.bf16.gmra.mxu1 %vm1287_vm2, %v2817_v8  ;;  %v3440_v43 = vadd.f32 %v9143_v28, %v3439_v31  ;;  %v3460_v8 = vand.u32 2147483647, %v11698_v9  ;;  %v3462_v24 = vand.u32 2147483648, %v11698_v9  ;;  %v11728_v52 = vpop.xlane.xlu1 %668 }
 0x534   : > { %v9147_v59 = vpop.eup %9146  ;;  %v11718_v51 = vadd.f32 1.0, %v9145_v34  ;;  %v2294_v57 = vpop.f32.mrf.mxu3  ;;  %16321 = vst [vmem:[#allocation148_spill] sm:$0xff] %v11728_v52 }
 0x535   : > { %9148 = vpow2.f32 %v3211_v40  ;;  %v3444_v17 = vsel %vm3443_vm4, %v9143_v28, %v3440_v43  ;;  %v3452_v44 = vmul.f32 %v9147_v59, %v11698_v9  ;;  %v11730_v28 = vpop.xlane.xlu2 %682  ;;  %vm3457_vm6 = vweird.f32 %v9147_v59 }
 0x536   : > { %9150 = vrcp.f32 %v11718_v51  ;;  %v2642_v38 = vpop.f32.mrf.mxu2  ;;  %v3449_v18 = vsel %vm3446_vm5, %v3448_v55, %v3444_v17  ;;  %16322 = vst [vmem:[#allocation149_spill] sm:$0xff] %v11730_v28  ;;  %v2295_v31 = vadd.f32 %v2294_v57, %v11080_v27  ;;  %vm3458_vm8 = vmor %vm3456_vm7, %vm3457_vm6  ;;  %vm3461_vm9 = vcmp.eq.f32.partialorder %v3460_v8, 8.507059e+37 }
 0x537   : > { %7666 = vrot.lane.b32.xlu2 %v3449_v18, %s10314_s25  ;;  %v3453_v33 = vsub.f32 1.0, %v3452_v44  ;;  %v3463_v18 = vor.u32 1.1754944e-38, %v3462_v24  ;;  %v2766_v9 = vmax.f32 %v2642_v38, 0.0  ;;  %vm3471_vm11 = vweird.f32 %v11718_v51 }
 0x538   : > { %v2992_v16 = vpop.f32.mrf.mxu1  ;;  %v2391_v27 = vmax.f32 %v2295_v31, 0.0 }
 0x539   : > { %v3142_v49 = vsub.f32 0.0, %v2992_v16  ;;  %v3454_v6 = vmul.f32 %v9147_v59, %v3453_v33  ;;  %v11740_v8 = vpop.xlane.xlu0 %666 }
 0x53a   : > { %16323 = vst [vmem:[#allocation150_spill] sm:$0xff] %v11740_v8 }
 0x53b   : > { %v9149_v34 = vpop.eup %9148  ;;  %v3213_v40 = vmul.f32 1.442695, %v3142_v49  ;;  %v3455_v43 = vadd.f32 %v9147_v59, %v3454_v6 }
 0x53c   : > { %v9151_v55 = vpop.eup %9150  ;;  %v11734_v17 = vadd.f32 1.0, %v9149_v34  ;;  %v2296_v44 = vpop.f32.mrf.mxu3 }
 0x53d   : > { %9152 = vpow2.f32 %v3213_v40  ;;  %v2297_v28 = vadd.f32 %v2296_v44, %v11092_v30  ;;  %v3459_v16 = vsel %vm3458_vm8, %v9147_v59, %v3455_v43  ;;  %v3467_v33 = vmul.f32 %v9151_v55, %v11718_v51  ;;  %v11744_v40 = vpop.xlane.xlu1 %674  ;;  %v11746_v31 = vpop.xlane.xlu2 %688 }
 0x53e   : > { %9154 = vrcp.f32 %v11734_v17  ;;  %v2644_v57 = vpop.f32.mrf.mxu2  ;;  %v3464_v49 = vsel %vm3461_vm9, %v3463_v18, %v3459_v16  ;;  %vm3472_vm10 = vweird.f32 %v9151_v55  ;;  %v3475_v30 = vand.u32 2147483647, %v11718_v51  ;;  %16324 = vst [vmem:[#allocation151_spill] sm:$0xff] %v11744_v40 }
 0x53f   : > { %v2392_v6 = vmax.f32 %v2297_v28, 0.0  ;;  %v2767_v34 = vmax.f32 %v2644_v57, 0.0  ;;  %7668 = vrot.lane.b32.xlu1 %v3464_v49, %s10314_s25  ;;  %v3468_v11 = vsub.f32 1.0, %v3467_v33  ;;  %v3477_v59 = vand.u32 2147483648, %v11718_v51  ;;  %16325 = vst [vmem:[#allocation152_spill] sm:$0xff] %v11746_v31  ;;  %v10180_v28 = vld [vmem:[%s10468_s13 + $0xf0] sm:$0xff]  ;;  %vm3473_vm12 = vmor %vm3471_vm11, %vm3472_vm10 }
 0x540   : > { %v2995_v24 = vpop.f32.mrf.mxu1  ;;  %vm3476_vm13 = vcmp.eq.f32.partialorder %v3475_v30, 8.507059e+37  ;;  %v9056_v51 = vld [vmem:[%s15985_s10 + $0x20] sm:$0xff]  ;;  %vm3486_vm15 = vweird.f32 %v11734_v17 }
 0x541   : > { %v2434_v43 = vpack.c.bf16 %v2392_v6, %v2391_v27  ;;  %v2818_v44 = vpack.c.bf16 %v2767_v34, %v2766_v9  ;;  %v3143_v38 = vsub.f32 0.0, %v2995_v24  ;;  %2338 = vmatmul.bf16.gmra.mxu3 %v10180_v28  ;;  %v3469_v18 = vmul.f32 %v9151_v55, %v3468_v11  ;;  %5253 = vmatpush.bf16.msra.mxu1 %v9056_v51 }
 0x542   : > { %v3478_v27 = vor.u32 1.1754944e-38, %v3477_v59  ;;  %v3490_v59 = vand.u32 2147483647, %v11734_v17  ;;  %9069 = vmatpush.bf16.msrb.mxu3 %v9056_v51 }
 0x543   : > { %v9153_v16 = vpop.eup %9152  ;;  %v3215_v33 = vmul.f32 1.442695, %v3143_v38  ;;  %8777 = vmatmul.msk.bf16.gmra.mxu2 %vm1287_vm2, %v2434_v43  ;;  %8816 = vmatmul.msk.bf16.gmra.mxu1 %vm1287_vm2, %v2818_v44  ;;  %v3470_v57 = vadd.f32 %v9151_v55, %v3469_v18  ;;  %v11761_v43 = vpop.xlane.xlu0 %672 }
 0x544   : > { %v9155_v49 = vpop.eup %9154  ;;  %v11752_v52 = vadd.f32 1.0, %v9153_v16  ;;  %v2299_v40 = vpop.f32.mrf.mxu3  ;;  %16326 = vst [vmem:[#allocation153_spill] sm:$0xff] %v11761_v43  ;;  %vm3491_vm1 = vcmp.eq.f32.partialorder %v3490_v59, 8.507059e+37 }
 0x545   : > { %9156 = vpow2.f32 %v3215_v33  ;;  %v3474_v9 = vsel %vm3473_vm12, %v9151_v55, %v3470_v57  ;;  %v3482_v11 = vmul.f32 %v9155_v49, %v11734_v17  ;;  %v3492_v55 = vand.u32 2147483648, %v11734_v17  ;;  %v11765_v30 = vpop.xlane.xlu1 %680  ;;  %v11767_v38 = vpop.xlane.xlu2 %694 }
 0x546   : > { %9158 = vrcp.f32 %v11752_v52  ;;  %v2647_v6 = vpop.f32.mrf.mxu2  ;;  %v3479_v34 = vsel %vm3476_vm13, %v3478_v27, %v3474_v9  ;;  %16327 = vst [vmem:[#allocation154_spill] sm:$0xff] %v11765_v30  ;;  %vm3487_vm14 = vweird.f32 %v9155_v49  ;;  %v2300_v16 = vadd.f32 %v2299_v40, %v11106_v36 }
 0x547   : > { %7670 = vrot.lane.b32.xlu0 %v3479_v34, %s10314_s25  ;;  %v3483_v24 = vsub.f32 1.0, %v3482_v11  ;;  %16328 = vst [vmem:[#allocation155_spill] sm:$0xff] %v11767_v38  ;;  %vm3488_vm0 = vmor %vm3486_vm15, %vm3487_vm14  ;;  %v3493_v51 = vor.u32 1.1754944e-38, %v3492_v55  ;;  %v2768_v17 = vmax.f32 %v2647_v6, 0.0  ;;  %vm3501_vm5 = vweird.f32 %v11752_v52 }
 0x548   : > { %v2997_v44 = vpop.f32.mrf.mxu1  ;;  %v2393_v36 = vmax.f32 %v2300_v16, 0.0 }
 0x549   : > { %v3144_v28 = vsub.f32 0.0, %v2997_v44  ;;  %v3484_v18 = vmul.f32 %v9155_v49, %v3483_v24 }
 0x54b   : > { %v9157_v33 = vpop.eup %9156  ;;  %v3217_v57 = vmul.f32 1.442695, %v3144_v28  ;;  %v3485_v27 = vadd.f32 %v9155_v49, %v3484_v18  ;;  %v11777_v59 = vpop.xlane.xlu0 %678 }
 0x54c   : > { %v9159_v9 = vpop.eup %9158  ;;  %v11771_v11 = vadd.f32 1.0, %v9157_v33  ;;  %v2301_v34 = vpop.f32.mrf.mxu3  ;;  %16329 = vst [vmem:[#allocation156_spill] sm:$0xff] %v11777_v59 }
 0x54d   : > { %9160 = vpow2.f32 %v3217_v57  ;;  %v2302_v38 = vadd.f32 %v2301_v34, %v11124_v62  ;;  %v3489_v44 = vsel %vm3488_vm0, %v9155_v49, %v3485_v27  ;;  %v3497_v24 = vmul.f32 %v9159_v9, %v11752_v52  ;;  %v11781_v57 = vpop.xlane.xlu1 %686  ;;  %v11783_v16 = vpop.xlane.xlu2 %700 }
 0x54e   : > { %9162 = vrcp.f32 %v11771_v11  ;;  %v2649_v40 = vpop.f32.mrf.mxu2  ;;  %v3494_v28 = vsel %vm3491_vm1, %v3493_v51, %v3489_v44  ;;  %vm3502_vm4 = vweird.f32 %v9159_v9  ;;  %v3505_v62 = vand.u32 2147483647, %v11752_v52  ;;  %16330 = vst [vmem:[#allocation157_spill] sm:$0xff] %v11781_v57 }
 0x54f   : > { %v2394_v18 = vmax.f32 %v2302_v38, 0.0  ;;  %v2769_v33 = vmax.f32 %v2649_v40, 0.0  ;;  %7672 = vrot.lane.b32.xlu2 %v3494_v28, %s10314_s25  ;;  %v3498_v31 = vsub.f32 1.0, %v3497_v24  ;;  %v3507_v49 = vand.u32 2147483648, %v11752_v52  ;;  %16331 = vst [vmem:[#allocation158_spill] sm:$0xff] %v11783_v16  ;;  %v10181_v38 = vld [vmem:[%s10468_s13 + $0xf8] sm:$0xff]  ;;  %vm3503_vm6 = vmor %vm3501_vm5, %vm3502_vm4 }
 0x550   : > { %v3000_v55 = vpop.f32.mrf.mxu1  ;;  %vm3506_vm7 = vcmp.eq.f32.partialorder %v3505_v62, 8.507059e+37  ;;  %vm3516_vm9 = vweird.f32 %v11771_v11  ;;  %v16335_v16 = vld [vmem:[#allocation67_spill] sm:$0xff] }
 0x551   : > { %v2435_v27 = vpack.c.bf16 %v2394_v18, %v2393_v36  ;;  %v2819_v34 = vpack.c.bf16 %v2769_v33, %v2768_v17  ;;  %v3145_v6 = vsub.f32 0.0, %v3000_v55  ;;  %2343 = vmatmul.bf16.gmra.mxu3 %v10181_v38  ;;  %v3499_v51 = vmul.f32 %v9159_v9, %v3498_v31 }
 0x552   : > { %v3508_v36 = vor.u32 1.1754944e-38, %v3507_v49 }
 0x553   : > { %v9161_v44 = vpop.eup %9160  ;;  %v3219_v24 = vmul.f32 1.442695, %v3145_v6  ;;  %8778 = vmatmul.msk.bf16.gmra.mxu2 %vm1287_vm2, %v2435_v27  ;;  %8817 = vmatmul.msk.bf16.gmra.mxu1 %vm1287_vm2, %v2819_v34  ;;  %v3500_v40 = vadd.f32 %v9159_v9, %v3499_v51  ;;  %v11795_v52 = vpop.xlane.xlu0 %684  ;;  %v3520_v34 = vand.u32 2147483647, %v11771_v11  ;;  %v3522_v6 = vand.u32 2147483648, %v11771_v11 }
 0x554   : > { %v9163_v28 = vpop.eup %9162  ;;  %v11789_v30 = vadd.f32 1.0, %v9161_v44  ;;  %v2304_v57 = vpop.f32.mrf.mxu3  ;;  %16332 = vst [vmem:[#allocation159_spill] sm:$0xff] %v11795_v52 }
 0x555   : > { %9164 = vpow2.f32 %v3219_v24  ;;  %v3504_v17 = vsel %vm3503_vm6, %v9159_v9, %v3500_v40  ;;  %v3512_v31 = vmul.f32 %v9163_v28, %v11771_v11  ;;  %v11799_v49 = vpop.xlane.xlu1 %692  ;;  %v11801_v9 = vpop.xlane.xlu2 %706  ;;  %vm3517_vm8 = vweird.f32 %v9163_v28  ;;  %v9045_v11 = vld [vmem:[%s15984_s9 + $0x8] sm:$0xff] }
 0x556   : > { %9166 = vrcp.f32 %v11789_v30  ;;  %v2652_v18 = vpop.f32.mrf.mxu2  ;;  %v3509_v33 = vsel %vm3506_vm7, %v3508_v36, %v3504_v17  ;;  %16333 = vst [vmem:[#allocation160_spill] sm:$0xff] %v11799_v49  ;;  %v2305_v51 = vadd.f32 %v2304_v57, %v11138_v37  ;;  %vm3518_vm10 = vmor %vm3516_vm9, %vm3517_vm8  ;;  %vm3521_vm11 = vcmp.eq.f32.partialorder %v3520_v34, 8.507059e+37  ;;  %4927 = vmatpush.bf16.msra.mxu2 %v9045_v11 }
 0x557   : > { %7674 = vrot.lane.b32.xlu1 %v3509_v33, %s10314_s25  ;;  %v3513_v55 = vsub.f32 1.0, %v3512_v31  ;;  %16334 = vst [vmem:[#allocation161_spill] sm:$0xff] %v11801_v9  ;;  %v3523_v33 = vor.u32 1.1754944e-38, %v3522_v6  ;;  %vm3531_vm13 = vweird.f32 %v11789_v30 }
 0x558   : > { %v3002_v27 = vpop.f32.mrf.mxu1  ;;  %v2395_v37 = vmax.f32 %v2305_v51, 0.0  ;;  %v3537_v51 = vand.u32 2147483648, %v11789_v30 }
 0x559   : > { %v3146_v62 = vsub.f32 0.0, %v3002_v27  ;;  %v3514_v38 = vmul.f32 %v9163_v28, %v3513_v55 }
 0x55b   : > { %v9165_v44 = vpop.eup %9164  ;;  %v3221_v24 = vmul.f32 1.442695, %v3146_v62  ;;  %v3515_v40 = vadd.f32 %v9163_v28, %v3514_v38  ;;  %v2770_v38 = vmax.f32 %v2652_v18, 0.0 }
 0x55c   : > { %v9167_v36 = vpop.eup %9166  ;;  %v11805_v17 = vadd.f32 1.0, %v9165_v44  ;;  %v2306_v31 = vpop.f32.mrf.mxu3 }
 0x55d   : > { %9168 = vpow2.f32 %v3221_v24  ;;  %v2307_v9 = vadd.f32 %v2306_v31, %v16335_v16  ;;  %v3519_v27 = vsel %vm3518_vm10, %v9163_v28, %v3515_v40  ;;  %v3527_v55 = vmul.f32 %v9167_v36, %v11789_v30  ;;  %v11814_v16 = vpop.xlane.xlu0 %690  ;;  %v11818_v40 = vpop.xlane.xlu1 %698 }
 0x55e   : > { %9170 = vrcp.f32 %v11805_v17  ;;  %v2654_v57 = vpop.f32.mrf.mxu2  ;;  %v3524_v62 = vsel %vm3521_vm11, %v3523_v33, %v3519_v27  ;;  %16336 = vst [vmem:[#allocation67_spill] sm:$0xff] %v11814_v16  ;;  %vm3532_vm12 = vweird.f32 %v9167_v36  ;;  %v3535_v24 = vand.u32 2147483647, %v11789_v30  ;;  %v11820_v31 = vpop.xlane.xlu2 %712  ;;  %v10182_v27 = vld [vmem:[%s10468_s13] sm:$0xff] }
 0x55f   : > { %v2396_v44 = vmax.f32 %v2307_v9, 0.0  ;;  %v2771_v34 = vmax.f32 %v2654_v57, 0.0  ;;  %7676 = vrot.lane.b32.xlu0 %v3524_v62, %s10314_s25  ;;  %v3528_v6 = vsub.f32 1.0, %v3527_v55  ;;  %16337 = vst [vmem:[#allocation162_spill] sm:$0xff] %v11818_v40  ;;  %vm3533_vm14 = vmor %vm3531_vm13, %vm3532_vm12  ;;  %vm3546_vm1 = vweird.f32 %v11805_v17 }
 0x560   : > { %v3005_v28 = vpop.f32.mrf.mxu1  ;;  %16338 = vst [vmem:[#allocation163_spill] sm:$0xff] %v11820_v31  ;;  %vm3536_vm15 = vcmp.eq.f32.partialorder %v3535_v24, 8.507059e+37 }
 0x561   : > { %v2436_v18 = vpack.c.bf16 %v2396_v44, %v2395_v37  ;;  %v2820_v33 = vpack.c.bf16 %v2771_v34, %v2770_v38  ;;  %v3147_v9 = vsub.f32 0.0, %v3005_v28  ;;  %4600 = vmatmul.bf16.vlgmr.msra.gmra.mxu3 %v10182_v27  ;;  %v3529_v57 = vmul.f32 %v9167_v36, %v3528_v6  ;;  %v16342_v27 = vld [vmem:[#allocation69_spill] sm:$0xff] }
 0x562   : > { %v3538_v37 = vor.u32 1.1754944e-38, %v3537_v51 }
 0x563   : > { %v9169_v55 = vpop.eup %9168  ;;  %v3223_v62 = vmul.f32 1.442695, %v3147_v9  ;;  %8779 = vmatmul.msk.bf16.gmra.mxu2 %vm1287_vm2, %v2436_v18  ;;  %8818 = vmatmul.msk.bf16.gmra.mxu1 %vm1287_vm2, %v2820_v33  ;;  %v3530_v49 = vadd.f32 %v9167_v36, %v3529_v57  ;;  %v3550_v33 = vand.u32 2147483647, %v11805_v17  ;;  %v3552_v9 = vand.u32 2147483648, %v11805_v17 }
 0x564   : > { %v9171_v11 = vpop.eup %9170  ;;  %v11826_v16 = vadd.f32 1.0, %v9169_v55  ;;  %v2309_v40 = vpop.f32.mrf.mxu3 }
 0x565   : > { %9172 = vpow2.f32 %v3223_v62  ;;  %v3534_v38 = vsel %vm3533_vm14, %v9167_v36, %v3530_v49  ;;  %v3542_v44 = vmul.f32 %v9171_v11, %v11805_v17  ;;  %v11832_v30 = vpop.xlane.xlu0 %696  ;;  %v11836_v51 = vpop.xlane.xlu1 %704  ;;  %vm3547_vm0 = vweird.f32 %v9171_v11 }
 0x566   : > { %9174 = vrcp.f32 %v11826_v16  ;;  %v2657_v34 = vpop.f32.mrf.mxu2  ;;  %v3539_v6 = vsel %vm3536_vm15, %v3538_v37, %v3534_v38  ;;  %16339 = vst [vmem:[#allocation164_spill] sm:$0xff] %v11832_v30  ;;  %v11838_v49 = vpop.xlane.xlu2 %718  ;;  %v2310_v57 = vadd.f32 %v2309_v40, %v16342_v27  ;;  %vm3548_vm4 = vmor %vm3546_vm1, %vm3547_vm0  ;;  %vm3551_vm5 = vcmp.eq.f32.partialorder %v3550_v33, 8.507059e+37  ;;  %v16344_v30 = vld [vmem:[#allocation33_spill] sm:$0xff] }
 0x567   : > { %7678 = vrot.lane.b32.xlu2 %v3539_v6, %s10314_s25  ;;  %v3543_v28 = vsub.f32 1.0, %v3542_v44  ;;  %16340 = vst [vmem:[#allocation165_spill] sm:$0xff] %v11836_v51  ;;  %v3553_v31 = vor.u32 1.1754944e-38, %v3552_v9  ;;  %v16343_v51 = vld [vmem:[#allocation71_spill] sm:$0xff]  ;;  %v1588_v40 = vmul.f32 1.442695, %v16344_v30  ;;  %vm3561_vm7 = vweird.f32 %v11826_v16 }
 0x568   : > { %v3007_v18 = vpop.f32.mrf.mxu1  ;;  %16341 = vst [vmem:[#allocation166_spill] sm:$0xff] %v11838_v49  ;;  %v2772_v27 = vmax.f32 %v2657_v34, 0.0 }
 0x569   : > { %v3148_v36 = vsub.f32 0.0, %v3007_v18  ;;  %v3544_v24 = vmul.f32 %v9171_v11, %v3543_v28 }
 0x56b   : > { %v9173_v55 = vpop.eup %9172  ;;  %v3225_v62 = vmul.f32 1.442695, %v3148_v36  ;;  %v3545_v37 = vadd.f32 %v9171_v11, %v3544_v24  ;;  %v2397_v36 = vmax.f32 %v2310_v57, 0.0 }
 0x56c   : > { %v9175_v38 = vpop.eup %9174  ;;  %v11842_v44 = vadd.f32 1.0, %v9173_v55  ;;  %v2311_v6 = vpop.f32.mrf.mxu3 }
 0x56d   : > { %9176 = vpow2.f32 %v3225_v62  ;;  %v2312_v49 = vadd.f32 %v2311_v6, %v16343_v51  ;;  %v3549_v18 = vsel %vm3548_vm4, %v9171_v11, %v3545_v37  ;;  %v3557_v28 = vmul.f32 %v9175_v38, %v11826_v16  ;;  %v11849_v9 = vpop.xlane.xlu0 %702  ;;  %v11853_v37 = vpop.xlane.xlu1 %710 }
 0x56e   : > { %9178 = vrcp.f32 %v11842_v44  ;;  %v2659_v24 = vpop.f32.mrf.mxu2  ;;  %v3554_v17 = vsel %vm3551_vm5, %v3553_v31, %v3549_v18  ;;  %16345 = vst [vmem:[#allocation69_spill] sm:$0xff] %v11849_v9  ;;  %vm3562_vm6 = vweird.f32 %v9175_v38  ;;  %v3565_v11 = vand.u32 2147483647, %v11826_v16  ;;  %v11855_v57 = vpop.xlane.xlu2 %724 }
 0x56f   : > { %v2398_v55 = vmax.f32 %v2312_v49, 0.0  ;;  %v2773_v52 = vmax.f32 %v2659_v24, 0.0  ;;  %7680 = vrot.lane.b32.xlu1 %v3554_v17, %s10314_s25  ;;  %v3558_v33 = vsub.f32 1.0, %v3557_v28  ;;  %v3567_v62 = vand.u32 2147483648, %v11826_v16  ;;  %16346 = vst [vmem:[#allocation71_spill] sm:$0xff] %v11853_v37  ;;  %v10183_v49 = vld [vmem:[%s10468_s13 + $0x8] sm:$0xff]  ;;  %vm3563_vm8 = vmor %vm3561_vm7, %vm3562_vm6 }
 0x570   : > { %v3010_v51 = vpop.f32.mrf.mxu1  ;;  %16347 = vst [vmem:[#allocation33_spill] sm:$0xff] %v11855_v57  ;;  %9180 = vpow2.f32 %v1588_v40  ;;  %vm3566_vm9 = vcmp.eq.f32.partialorder %v3565_v11, 8.507059e+37  ;;  %vm3576_vm12 = vweird.f32 %v11842_v44 }
 0x571   : > { %v2437_v31 = vpack.c.bf16 %v2398_v55, %v2397_v36  ;;  %v2821_v6 = vpack.c.bf16 %v2773_v52, %v2772_v27  ;;  %v3149_v34 = vsub.f32 0.0, %v3010_v51  ;;  %4605 = vmatmul.bf16.gmra.mxu3 %v10183_v49  ;;  %v3559_v18 = vmul.f32 %v9175_v38, %v3558_v33  ;;  %v16348_v33 = vld [vmem:[#allocation31_spill] sm:$0xff] }
 0x572   : > { %v3568_v52 = vor.u32 1.1754944e-38, %v3567_v62  ;;  %v1586_v51 = vmul.f32 1.442695, %v16348_v33  ;;  %v3582_v62 = vand.u32 2147483648, %v11842_v44 }
 0x573   : > { %v9177_v24 = vpop.eup %9176  ;;  %v3227_v28 = vmul.f32 1.442695, %v3149_v34  ;;  %8780 = vmatmul.msk.bf16.gmra.mxu2 %vm1287_vm2, %v2437_v31  ;;  %8819 = vmatmul.msk.bf16.gmra.mxu1 %vm1287_vm2, %v2821_v6  ;;  %v3560_v17 = vadd.f32 %v9175_v38, %v3559_v18  ;;  %v3580_v34 = vand.u32 2147483647, %v11842_v44 }
 0x574   : > { %v9179_v9 = vpop.eup %9178  ;;  %v11861_v37 = vadd.f32 1.0, %v9177_v24  ;;  %v2314_v57 = vpop.f32.mrf.mxu3 }
 0x575   : > { %9182 = vpow2.f32 %v3227_v28  ;;  %v3564_v36 = vsel %vm3563_vm8, %v9175_v38, %v3560_v17  ;;  %v3572_v40 = vmul.f32 %v9179_v9, %v11842_v44  ;;  %v11868_v31 = vpop.xlane.xlu0 %708  ;;  %v11872_v11 = vpop.xlane.xlu1 %716  ;;  %vm3577_vm10 = vweird.f32 %v9179_v9  ;;  %v16352_v28 = vld [vmem:[#allocation13_spill] sm:$0xff] }
 0x576   : > { %9184 = vrcp.f32 %v11861_v37  ;;  %v2662_v27 = vpop.f32.mrf.mxu2  ;;  %v3569_v55 = vsel %vm3566_vm9, %v3568_v52, %v3564_v36  ;;  %16349 = vst [vmem:[#allocation31_spill] sm:$0xff] %v11868_v31  ;;  %v9181_v38 = vpop.eup %9180  ;;  %vm1585_vm11 = vcmp.eq.s32.totalorder %v16352_v28, 0  ;;  %v16353_v17 = vld [vmem:[#allocation73_spill] sm:$0xff]  ;;  %vm3578_vm13 = vmor %vm3576_vm12, %vm3577_vm10  ;;  %vm3581_vm14 = vcmp.eq.f32.partialorder %v3580_v34, 8.507059e+37 }
 0x577   : > { %7682 = vrot.lane.b32.xlu0 %v3569_v55, %s10314_s25  ;;  %v3573_v16 = vsub.f32 1.0, %v3572_v40  ;;  %16350 = vst [vmem:[#allocation167_spill] sm:$0xff] %v11872_v11  ;;  %v11874_v49 = vpop.xlane.xlu2 %730  ;;  %v2315_v52 = vadd.f32 %v2314_v57, %v16353_v17  ;;  %9186 = vpow2.f32 %v1586_v51  ;;  %v3583_v11 = vor.u32 1.1754944e-38, %v3582_v62  ;;  %v16355_v51 = vld [vmem:[#allocation37_spill] sm:$0xff] }
 0x578   : > { %v3012_v6 = vpop.f32.mrf.mxu1  ;;  %16351 = vst [vmem:[#allocation168_spill] sm:$0xff] %v11874_v49  ;;  %vm3591_vm0 = vweird.f32 %v11861_v37 }
 0x579   : > { %v3150_v18 = vsub.f32 0.0, %v3012_v6  ;;  %v3574_v24 = vmul.f32 %v9179_v9, %v3573_v16  ;;  %v1715_v16 = vmul.f32 %v9181_v38, %v11580_v39  ;;  %v16354_v6 = vld [vmem:[#allocation75_spill] sm:$0xff]  ;;  %v2399_v44 = vmax.f32 %v2315_v52, 0.0 }
 0x57a   : > { %v3597_v52 = vand.u32 2147483648, %v11861_v37 }
 0x57b   : > { %v9183_v36 = vpop.eup %9182  ;;  %v3229_v40 = vmul.f32 1.442695, %v3150_v18  ;;  %v3575_v55 = vadd.f32 %v9179_v9, %v3574_v24  ;;  %v1592_v18 = vmul.f32 1.442695, %v16355_v51 }
 0x57c   : > { %v9185_v31 = vpop.eup %9184  ;;  %v11879_v59 = vadd.f32 1.0, %v9183_v36  ;;  %v2316_v43 = vpop.f32.mrf.mxu3  ;;  %v2774_v36 = vmax.f32 %v2662_v27, 0.0 }
 0x57d   : > { %9188 = vpow2.f32 %v3229_v40  ;;  %v2317_v49 = vadd.f32 %v2316_v43, %v16354_v6  ;;  %v3579_v3 = vsel %vm3578_vm13, %v9179_v9, %v3575_v55  ;;  %v3587_v57 = vmul.f32 %v9185_v31, %v11861_v37  ;;  %v11887_v38 = vpop.xlane.xlu0 %714  ;;  %v11894_v27 = vpop.xlane.xlu1 %722  ;;  %v10184_v6 = vld [vmem:[%s10468_s13 + $0x10] sm:$0xff] }
 0x57e   : > { %9190 = vrcp.f32 %v11879_v59  ;;  %v2664_v24 = vpop.f32.mrf.mxu2  ;;  %v3584_v17 = vsel %vm3581_vm14, %v3583_v11, %v3579_v3  ;;  %16356 = vst [vmem:[#allocation13_spill] sm:$0xff] %v11887_v38  ;;  %v1779_v9 = vsel %vm1585_vm11, %v1715_v16, %v16344_v30  ;;  %vm3592_vm15 = vweird.f32 %v9185_v31  ;;  %v9187_v3 = vpop.eup %9186 }
 0x57f   : > { %v2400_v5 = vmax.f32 %v2317_v49, 0.0  ;;  %v2775_v34 = vmax.f32 %v2664_v24, 0.0  ;;  %7684 = vrot.lane.b32.xlu2 %v3584_v17, %s10314_s25  ;;  %v3588_v62 = vsub.f32 1.0, %v3587_v57  ;;  %v3595_v40 = vand.u32 2147483647, %v11861_v37  ;;  %16357 = vst [vmem:[#allocation73_spill] sm:$0xff] %v11894_v27  ;;  %vm3593_vm1 = vmor %vm3591_vm0, %vm3592_vm15 }
 0x580   : > { %v3015_v43 = vpop.f32.mrf.mxu1  ;;  %9192 = vpow2.f32 %v1592_v18  ;;  %v9055_v37 = vld [vmem:[%s15985_s10 + $0x18] sm:$0xff]  ;;  %vm3606_vm6 = vweird.f32 %v11879_v59 }
 0x581   : > { %v2438_v11 = vpack.c.bf16 %v2400_v5, %v2399_v44  ;;  %v2822_v49 = vpack.c.bf16 %v2775_v34, %v2774_v36  ;;  %v3151_v55 = vsub.f32 0.0, %v3015_v43  ;;  %4610 = vmatmul.bf16.gmra.mxu3 %v10184_v6  ;;  %v7663_v57 = vpop.permute.xlu2 %7662  ;;  %v3589_v24 = vmul.f32 %v9185_v31, %v3588_v62  ;;  %5254 = vmatpush.bf16.msra.mxu1 %v9055_v37 }
 0x582   : > { %v11898_v17 = vsel %vm1866_vm3, %v1779_v9, %v7663_v57  ;;  %v3598_v34 = vor.u32 1.1754944e-38, %v3597_v52  ;;  %vm3596_vm4 = vcmp.eq.f32.partialorder %v3595_v40, 8.507059e+37  ;;  %v3612_v40 = vand.u32 2147483648, %v11879_v59  ;;  %9070 = vmatpush.bf16.msrb.mxu3 %v9055_v37 }
 0x583   : > { %16358 = vst [vmem:[#allocation75_spill] sm:$0xff] %v11898_v17  ;;  %v9189_v39 = vpop.eup %9188  ;;  %v3231_v30 = vmul.f32 1.442695, %v3151_v55  ;;  %8781 = vmatmul.msk.bf16.gmra.mxu2 %vm1287_vm2, %v2438_v11  ;;  %8820 = vmatmul.msk.bf16.gmra.mxu1 %vm1287_vm2, %v2822_v49  ;;  %v3590_v16 = vadd.f32 %v9185_v31, %v3589_v24 }
 0x584   : > { %v9191_v5 = vpop.eup %9190  ;;  %v11903_v44 = vadd.f32 1.0, %v9189_v39  ;;  %v2319_v36 = vpop.f32.mrf.mxu3  ;;  %v1714_v39 = vmul.f32 %v9187_v3, %v11566_v63 }
 0x585   : > { %9194 = vpow2.f32 %v3231_v30  ;;  %v3594_v62 = vsel %vm3593_vm1, %v9185_v31, %v3590_v16  ;;  %v3602_v18 = vmul.f32 %v9191_v5, %v11879_v59  ;;  %v11913_v49 = vpop.xlane.xlu0 %720  ;;  %v3610_v31 = vand.u32 2147483647, %v11879_v59  ;;  %v11917_v6 = vpop.xlane.xlu1 %728  ;;  %v16361_v30 = vld [vmem:[#allocation77_spill] sm:$0xff] }
 0x586   : > { %9196 = vrcp.f32 %v11903_v44  ;;  %v2667_v43 = vpop.f32.mrf.mxu2  ;;  %v3599_v9 = vsel %vm3596_vm4, %v3598_v34, %v3594_v62  ;;  %16359 = vst [vmem:[#allocation37_spill] sm:$0xff] %v11913_v49  ;;  %v9193_v55 = vpop.eup %9192  ;;  %vm3607_vm5 = vweird.f32 %v9191_v5  ;;  %v2320_v3 = vadd.f32 %v2319_v36, %v16361_v30  ;;  %v16362_v36 = vld [vmem:[#allocation79_spill] sm:$0xff] }
 0x587   : > { %7686 = vrot.lane.b32.xlu1 %v3599_v9, %s10314_s25  ;;  %v3603_v11 = vsub.f32 1.0, %v3602_v18  ;;  %16360 = vst [vmem:[#allocation169_spill] sm:$0xff] %v11917_v6  ;;  %v1778_v34 = vsel %vm1585_vm11, %v1714_v39, %v16348_v33  ;;  %vm3608_vm7 = vmor %vm3606_vm6, %vm3607_vm5  ;;  %vm3611_vm8 = vcmp.eq.f32.partialorder %v3610_v31, 8.507059e+37  ;;  %v16363_v33 = vld [vmem:[#allocation35_spill] sm:$0xff]  ;;  %vm3621_vm10 = vweird.f32 %v11903_v44 }
 0x588   : > { %v3017_v52 = vpop.f32.mrf.mxu1  ;;  %v1590_v39 = vmul.f32 1.442695, %v16363_v33  ;;  %v2401_v59 = vmax.f32 %v2320_v3, 0.0  ;;  %v3627_v3 = vand.u32 2147483648, %v11903_v44 }
 0x589   : > { %v3152_v57 = vsub.f32 0.0, %v3017_v52  ;;  %v3604_v24 = vmul.f32 %v9191_v5, %v3603_v11  ;;  %v3613_v52 = vor.u32 1.1754944e-38, %v3612_v40  ;;  %v1717_v11 = vmul.f32 %v9193_v55, %v11569_v20 }
 0x58b   : > { %v9195_v16 = vpop.eup %9194  ;;  %v3233_v62 = vmul.f32 1.442695, %v3152_v57  ;;  %v3605_v18 = vadd.f32 %v9191_v5, %v3604_v24 }
 0x58c   : > { %v9197_v9 = vpop.eup %9196  ;;  %v11924_v49 = vadd.f32 1.0, %v9195_v16  ;;  %v2321_v37 = vpop.f32.mrf.mxu3  ;;  %v2776_v16 = vmax.f32 %v2667_v43, 0.0 }
 0x58d   : > { %9198 = vpow2.f32 %v3233_v62  ;;  %v2322_v30 = vadd.f32 %v2321_v37, %v16362_v36  ;;  %v3609_v6 = vsel %vm3608_vm7, %v9191_v5, %v3605_v18  ;;  %v3617_v17 = vmul.f32 %v9197_v9, %v11903_v44  ;;  %v11932_v55 = vpop.xlane.xlu0 %726 }
 0x58e   : > { %9200 = vrcp.f32 %v11924_v49  ;;  %v2669_v57 = vpop.f32.mrf.mxu2  ;;  %v3614_v24 = vsel %vm3611_vm8, %v3613_v52, %v3609_v6  ;;  %16364 = vst [vmem:[#allocation77_spill] sm:$0xff] %v11932_v55  ;;  %v1781_v5 = vsel %vm1585_vm11, %v1717_v11, %v16355_v51  ;;  %vm3622_vm9 = vweird.f32 %v9197_v9  ;;  %v10185_v52 = vld [vmem:[%s10468_s13 + $0x18] sm:$0xff] }
 0x58f   : > { %v2402_v63 = vmax.f32 %v2322_v30, 0.0  ;;  %v2777_v31 = vmax.f32 %v2669_v57, 0.0  ;;  %7688 = vrot.lane.b32.xlu0 %v3614_v24, %s10314_s25  ;;  %v3618_v40 = vsub.f32 1.0, %v3617_v17  ;;  %v3625_v18 = vand.u32 2147483647, %v11903_v44  ;;  %vm3623_vm12 = vmor %vm3621_vm10, %vm3622_vm9 }
 0x590   : > { %v3020_v62 = vpop.f32.mrf.mxu1  ;;  %9202 = vpow2.f32 %v1590_v39  ;;  %vm3636_vm15 = vweird.f32 %v11924_v49 }
 0x591   : > { %v2439_v37 = vpack.c.bf16 %v2402_v63, %v2401_v59  ;;  %v2823_v6 = vpack.c.bf16 %v2777_v31, %v2776_v16  ;;  %v3153_v43 = vsub.f32 0.0, %v3020_v62  ;;  %4615 = vmatmul.bf16.gmra.mxu3 %v10185_v52  ;;  %v7661_v36 = vpop.permute.xlu1 %7660  ;;  %v7667_v30 = vpop.permute.xlu2 %7666  ;;  %v3619_v17 = vmul.f32 %v9197_v9, %v3618_v40 }
 0x592   : > { %v11941_v57 = vsel %vm1866_vm3, %v1778_v34, %v7661_v36  ;;  %v11944_v24 = vsel %vm1866_vm3, %v1781_v5, %v7667_v30  ;;  %v3628_v34 = vor.u32 1.1754944e-38, %v3627_v3  ;;  %vm3626_vm13 = vcmp.eq.f32.partialorder %v3625_v18, 8.507059e+37 }
 0x593   : > { %16365 = vst [vmem:[#allocation79_spill] sm:$0xff] %v11941_v57  ;;  %v9199_v51 = vpop.eup %9198  ;;  %v3235_v11 = vmul.f32 1.442695, %v3153_v43  ;;  %8782 = vmatmul.msk.bf16.gmra.mxu2 %vm1287_vm2, %v2439_v37  ;;  %8821 = vmatmul.msk.bf16.gmra.mxu1 %vm1287_vm2, %v2823_v6  ;;  %v3620_v63 = vadd.f32 %v9197_v9, %v3619_v17  ;;  %v16367_v37 = vld [vmem:[#allocation43_spill] sm:$0xff]  ;;  %v3640_v52 = vand.u32 2147483647, %v11924_v49 }
 0x594   : > { %16366 = vst [vmem:[#allocation35_spill] sm:$0xff] %v11944_v24  ;;  %v9201_v59 = vpop.eup %9200  ;;  %v11949_v16 = vadd.f32 1.0, %v9199_v51  ;;  %v2324_v31 = vpop.f32.mrf.mxu3  ;;  %v1598_v6 = vmul.f32 1.442695, %v16367_v37  ;;  %v3642_v36 = vand.u32 2147483648, %v11924_v49  ;;  %v16369_v17 = vld [vmem:[#allocation81_spill] sm:$0xff] }
 0x595   : > { %9204 = vpow2.f32 %v3235_v11  ;;  %v3624_v40 = vsel %vm3623_vm12, %v9197_v9, %v3620_v63  ;;  %v3632_v39 = vmul.f32 %v9201_v59, %v11924_v49  ;;  %v11958_v30 = vpop.xlane.xlu0 %732  ;;  %vm3637_vm14 = vweird.f32 %v9201_v59 }
 0x596   : > { %9206 = vrcp.f32 %v11949_v16  ;;  %v2672_v62 = vpop.f32.mrf.mxu2  ;;  %v3629_v5 = vsel %vm3626_vm13, %v3628_v34, %v3624_v40  ;;  %v9203_v3 = vpop.eup %9202  ;;  %16368 = vst [vmem:[#allocation43_spill] sm:$0xff] %v11958_v30  ;;  %v2325_v51 = vadd.f32 %v2324_v31, %v16369_v17  ;;  %vm3638_vm0 = vmor %vm3636_vm15, %vm3637_vm14  ;;  %vm3641_vm1 = vcmp.eq.f32.partialorder %v3640_v52, 8.507059e+37 }
 0x597   : > { %7690 = vrot.lane.b32.xlu2 %v3629_v5, %s10314_s25  ;;  %v3633_v44 = vsub.f32 1.0, %v3632_v39  ;;  %9208 = vpow2.f32 %v1598_v6  ;;  %v1716_v39 = vmul.f32 %v9203_v3, %v11559_v0  ;;  %v3643_v30 = vor.u32 1.1754944e-38, %v3642_v36  ;;  %v16371_v6 = vld [vmem:[#allocation39_spill] sm:$0xff]  ;;  %v9044_v3 = vld [vmem:[%s15984_s9] sm:$0xff] }
 0x598   : > { %v3022_v43 = vpop.f32.mrf.mxu1  ;;  %v2403_v49 = vmax.f32 %v2325_v51, 0.0  ;;  %v2778_v52 = vmax.f32 %v2672_v62, 0.0  ;;  %v3655_v51 = vand.u32 2147483647, %v11949_v16  ;;  %4928 = vmatpush.bf16.msra.mxu2 %v9044_v3  ;;  %vm3651_vm5 = vweird.f32 %v11949_v16 }
 0x599   : > { %v3154_v9 = vsub.f32 0.0, %v3022_v43  ;;  %v3634_v18 = vmul.f32 %v9201_v59, %v3633_v44  ;;  %v16370_v44 = vld [vmem:[#allocation83_spill] sm:$0xff] }
 0x59a   : > { %vm3656_vm7 = vcmp.eq.f32.partialorder %v3655_v51, 8.507059e+37 }
 0x59b   : > { %v9205_v11 = vpop.eup %9204  ;;  %v3237_v63 = vmul.f32 1.442695, %v3154_v9  ;;  %v3635_v34 = vadd.f32 %v9201_v59, %v3634_v18  ;;  %v1594_v9 = vmul.f32 1.442695, %v16371_v6 }
 0x59c   : > { %v9207_v40 = vpop.eup %9206  ;;  %v11963_v5 = vadd.f32 1.0, %v9205_v11  ;;  %v2326_v24 = vpop.f32.mrf.mxu3 }
 0x59d   : > { %9210 = vpow2.f32 %v3237_v63  ;;  %v2327_v43 = vadd.f32 %v2326_v24, %v16370_v44  ;;  %v3639_v57 = vsel %vm3638_vm0, %v9201_v59, %v3635_v34  ;;  %v3647_v31 = vmul.f32 %v9207_v40, %v11949_v16 }
 0x59e   : > { %9212 = vrcp.f32 %v11963_v5  ;;  %v2674_v18 = vpop.f32.mrf.mxu2  ;;  %v3644_v17 = vsel %vm3641_vm1, %v3643_v30, %v3639_v57  ;;  %v1780_v59 = vsel %vm1585_vm11, %v1716_v39, %v16363_v33  ;;  %vm3652_vm4 = vweird.f32 %v9207_v40  ;;  %v9209_v30 = vpop.eup %9208 }
 0x59f   : > { %v2404_v36 = vmax.f32 %v2327_v43, 0.0  ;;  %v2779_v11 = vmax.f32 %v2674_v18, 0.0  ;;  %7692 = vrot.lane.b32.xlu1 %v3644_v17, %s10314_s25  ;;  %v3648_v24 = vsub.f32 1.0, %v3647_v31  ;;  %v3657_v57 = vand.u32 2147483648, %v11949_v16  ;;  %v10186_v43 = vld [vmem:[%s10468_s13 + $0x20] sm:$0xff]  ;;  %vm3653_vm6 = vmor %vm3651_vm5, %vm3652_vm4 }
 0x5a0   : > { %v3025_v63 = vpop.f32.mrf.mxu1  ;;  %9214 = vpow2.f32 %v1594_v9  ;;  %v1720_v3 = vmul.f32 %v9209_v30, %v11592_v13  ;;  %vm3666_vm9 = vweird.f32 %v11963_v5 }
 0x5a1   : > { %v2440_v34 = vpack.c.bf16 %v2404_v36, %v2403_v49  ;;  %v2824_v44 = vpack.c.bf16 %v2779_v11, %v2778_v52  ;;  %v3155_v62 = vsub.f32 0.0, %v3025_v63  ;;  %4620 = vmatmul.bf16.gmra.mxu3 %v10186_v43  ;;  %v7665_v18 = vpop.permute.xlu0 %7664  ;;  %v3649_v17 = vmul.f32 %v9207_v40, %v3648_v24 }
 0x5a2   : > { %v11980_v31 = vsel %vm1866_vm3, %v1780_v59, %v7665_v18  ;;  %v3658_v11 = vor.u32 1.1754944e-38, %v3657_v57 }
 0x5a3   : > { %16372 = vst [vmem:[#allocation81_spill] sm:$0xff] %v11980_v31  ;;  %v9211_v20 = vpop.eup %9210  ;;  %v3239_v33 = vmul.f32 1.442695, %v3155_v62  ;;  %8783 = vmatmul.msk.bf16.gmra.mxu2 %vm1287_vm2, %v2440_v34  ;;  %8822 = vmatmul.msk.bf16.gmra.mxu1 %vm1287_vm2, %v2824_v44  ;;  %v3650_v39 = vadd.f32 %v9207_v40, %v3649_v17  ;;  %v16373_v34 = vld [vmem:[#allocation41_spill] sm:$0xff]  ;;  %v3670_v44 = vand.u32 2147483647, %v11963_v5 }
 0x5a4   : > { %v9213_v49 = vpop.eup %9212  ;;  %v11986_v52 = vadd.f32 1.0, %v9211_v20  ;;  %v2329_v36 = vpop.f32.mrf.mxu3  ;;  %v1596_v16 = vmul.f32 1.442695, %v16373_v34  ;;  %v3672_v62 = vand.u32 2147483648, %v11963_v5  ;;  %v16374_v17 = vld [vmem:[#allocation85_spill] sm:$0xff] }
 0x5a5   : > { %9216 = vpow2.f32 %v3239_v33  ;;  %v3654_v24 = vsel %vm3653_vm6, %v9207_v40, %v3650_v39  ;;  %v3662_v9 = vmul.f32 %v9213_v49, %v11963_v5  ;;  %v1784_v40 = vsel %vm1585_vm11, %v1720_v3, %v16367_v37 }
 0x5a6   : > { %9218 = vrcp.f32 %v11986_v52  ;;  %v2677_v59 = vpop.f32.mrf.mxu2  ;;  %v3659_v63 = vsel %vm3656_vm7, %v3658_v11, %v3654_v24  ;;  %v9215_v57 = vpop.eup %9214  ;;  %vm3667_vm8 = vweird.f32 %v9213_v49  ;;  %v2330_v33 = vadd.f32 %v2329_v36, %v16374_v17  ;;  %v16376_v36 = vld [vmem:[#allocation87_spill] sm:$0xff] }
 0x5a7   : > { %7694 = vrot.lane.b32.xlu0 %v3659_v63, %s10314_s25  ;;  %v3663_v30 = vsub.f32 1.0, %v3662_v9  ;;  %9220 = vpow2.f32 %v1596_v16  ;;  %v1718_v31 = vmul.f32 %v9215_v57, %v11543_v60  ;;  %vm3668_vm10 = vmor %vm3666_vm9, %vm3667_vm8  ;;  %vm3671_vm12 = vcmp.eq.f32.partialorder %v3670_v44, 8.507059e+37  ;;  %v16377_v16 = vld [vmem:[#allocation49_spill] sm:$0xff] }
 0x5a8   : > { %v3027_v20 = vpop.f32.mrf.mxu1  ;;  %v3673_v3 = vor.u32 1.1754944e-38, %v3672_v62  ;;  %v2405_v5 = vmax.f32 %v2330_v33, 0.0  ;;  %vm3681_vm14 = vweird.f32 %v11986_v52 }
 0x5a9   : > { %v3156_v51 = vsub.f32 0.0, %v3027_v20  ;;  %v7673_v43 = vpop.permute.xlu2 %7672  ;;  %v3664_v18 = vmul.f32 %v9213_v49, %v3663_v30 }
 0x5aa   : > { %v12000_v39 = vsel %vm1866_vm3, %v1784_v40, %v7673_v43 }
 0x5ab   : > { %16375 = vst [vmem:[#allocation83_spill] sm:$0xff] %v12000_v39  ;;  %v9217_v11 = vpop.eup %9216  ;;  %v3241_v24 = vmul.f32 1.442695, %v3156_v51  ;;  %v3665_v9 = vadd.f32 %v9213_v49, %v3664_v18  ;;  %v1604_v51 = vmul.f32 1.442695, %v16377_v16  ;;  %v2780_v18 = vmax.f32 %v2677_v59, 0.0 }
 0x5ac   : > { %v9219_v63 = vpop.eup %9218  ;;  %v12004_v13 = vadd.f32 1.0, %v9217_v11  ;;  %v2331_v37 = vpop.f32.mrf.mxu3  ;;  %v10187_v59 = vld [vmem:[%s10468_s13 + $0x28] sm:$0xff] }
 0x5ad   : > { %9222 = vpow2.f32 %v3241_v24  ;;  %v2332_v30 = vadd.f32 %v2331_v37, %v16376_v36  ;;  %v3669_v20 = vsel %vm3668_vm10, %v9213_v49, %v3665_v9  ;;  %v3677_v40 = vmul.f32 %v9219_v63, %v11986_v52  ;;  %v9221_v33 = vpop.eup %9220 }
 0x5ae   : > { %9224 = vrcp.f32 %v12004_v13  ;;  %v2679_v43 = vpop.f32.mrf.mxu2  ;;  %v3674_v57 = vsel %vm3671_vm12, %v3673_v3, %v3669_v20  ;;  %v1782_v49 = vsel %vm1585_vm11, %v1718_v31, %v16371_v6  ;;  %vm3682_vm13 = vweird.f32 %v9219_v63 }
 0x5af   : > { %v2406_v17 = vmax.f32 %v2332_v30, 0.0  ;;  %v2781_v11 = vmax.f32 %v2679_v43, 0.0  ;;  %7696 = vrot.lane.b32.xlu2 %v3674_v57, %s10314_s25  ;;  %v3678_v44 = vsub.f32 1.0, %v3677_v40  ;;  %v3685_v24 = vand.u32 2147483647, %v11986_v52  ;;  %vm3683_vm15 = vmor %vm3681_vm14, %vm3682_vm13 }
 0x5b0   : > { %v3030_v62 = vpop.f32.mrf.mxu1  ;;  %v3687_v9 = vand.u32 2147483648, %v11986_v52  ;;  %9226 = vpow2.f32 %v1604_v51  ;;  %vm3696_vm4 = vweird.f32 %v12004_v13 }
 0x5b1   : > { %v2441_v37 = vpack.c.bf16 %v2406_v17, %v2405_v5  ;;  %v2825_v36 = vpack.c.bf16 %v2781_v11, %v2780_v18  ;;  %v3157_v3 = vsub.f32 0.0, %v3030_v62  ;;  %4625 = vmatmul.bf16.gmra.mxu3 %v10187_v59  ;;  %v7669_v30 = vpop.permute.xlu1 %7668  ;;  %v3679_v20 = vmul.f32 %v9219_v63, %v3678_v44 }
 0x5b2   : > { %v12018_v40 = vsel %vm1866_vm3, %v1782_v49, %v7669_v30  ;;  %v3688_v17 = vor.u32 1.1754944e-38, %v3687_v9  ;;  %v1719_v11 = vmul.f32 %v9221_v33, %v11549_v54  ;;  %vm3686_vm0 = vcmp.eq.f32.partialorder %v3685_v24, 8.507059e+37 }
 0x5b3   : > { %16378 = vst [vmem:[#allocation39_spill] sm:$0xff] %v12018_v40  ;;  %v9223_v43 = vpop.eup %9222  ;;  %v3243_v6 = vmul.f32 1.442695, %v3157_v3  ;;  %8784 = vmatmul.msk.bf16.gmra.mxu2 %vm1287_vm2, %v2441_v37  ;;  %8823 = vmatmul.msk.bf16.gmra.mxu1 %vm1287_vm2, %v2825_v36  ;;  %v3680_v31 = vadd.f32 %v9219_v63, %v3679_v20  ;;  %v16379_v37 = vld [vmem:[#allocation45_spill] sm:$0xff]  ;;  %v3700_v59 = vand.u32 2147483647, %v12004_v13 }
 0x5b4   : > { %v9225_v5 = vpop.eup %9224  ;;  %v12023_v57 = vadd.f32 1.0, %v9223_v43  ;;  %v2334_v18 = vpop.f32.mrf.mxu3  ;;  %v1600_v52 = vmul.f32 1.442695, %v16379_v37  ;;  %v3702_v9 = vand.u32 2147483648, %v12004_v13  ;;  %v16380_v43 = vld [vmem:[#allocation89_spill] sm:$0xff] }
 0x5b5   : > { %9228 = vpow2.f32 %v3243_v6  ;;  %v3684_v44 = vsel %vm3683_vm15, %v9219_v63, %v3680_v31  ;;  %v3692_v51 = vmul.f32 %v9225_v5, %v12004_v13  ;;  %v1783_v63 = vsel %vm1585_vm11, %v1719_v11, %v16373_v34 }
 0x5b6   : > { %9230 = vrcp.f32 %v12023_v57  ;;  %v2682_v49 = vpop.f32.mrf.mxu2  ;;  %v3689_v62 = vsel %vm3686_vm0, %v3688_v17, %v3684_v44  ;;  %v9227_v33 = vpop.eup %9226  ;;  %vm3697_vm1 = vweird.f32 %v9225_v5  ;;  %v2335_v6 = vadd.f32 %v2334_v18, %v16380_v43  ;;  %v16382_v18 = vld [vmem:[#allocation90_spill] sm:$0xff] }
 0x5b7   : > { %7698 = vrot.lane.b32.xlu1 %v3689_v62, %s10314_s25  ;;  %v3693_v36 = vsub.f32 1.0, %v3692_v51  ;;  %9232 = vpow2.f32 %v1600_v52  ;;  %vm3698_vm5 = vmor %vm3696_vm4, %vm3697_vm1  ;;  %vm3701_vm6 = vcmp.eq.f32.partialorder %v3700_v59, 8.507059e+37  ;;  %v3703_v34 = vor.u32 1.1754944e-38, %v3702_v9  ;;  %v16383_v52 = vld [vmem:[#allocation47_spill] sm:$0xff] }
 0x5b8   : > { %v3032_v3 = vpop.f32.mrf.mxu1  ;;  %v1723_v11 = vmul.f32 %v9227_v33, %v11603_v4  ;;  %v2407_v13 = vmax.f32 %v2335_v6, 0.0  ;;  %vm3711_vm8 = vweird.f32 %v12023_v57 }
 0x5b9   : > { %v3158_v30 = vsub.f32 0.0, %v3032_v3  ;;  %v7671_v24 = vpop.permute.xlu0 %7670  ;;  %v3694_v20 = vmul.f32 %v9225_v5, %v3693_v36 }
 0x5ba   : > { %v12038_v31 = vsel %vm1866_vm3, %v1783_v63, %v7671_v24 }
 0x5bb   : > { %16381 = vst [vmem:[#allocation41_spill] sm:$0xff] %v12038_v31  ;;  %v9229_v17 = vpop.eup %9228  ;;  %v3245_v44 = vmul.f32 1.442695, %v3158_v30  ;;  %v3695_v51 = vadd.f32 %v9225_v5, %v3694_v20  ;;  %v1602_v30 = vmul.f32 1.442695, %v16383_v52 }
 0x5bc   : > { %v9231_v62 = vpop.eup %9230  ;;  %v12041_v3 = vadd.f32 1.0, %v9229_v17  ;;  %v2336_v39 = vpop.f32.mrf.mxu3  ;;  %v2782_v17 = vmax.f32 %v2682_v49, 0.0  ;;  %v10188_v49 = vld [vmem:[%s10468_s13 + $0x30] sm:$0xff] }
 0x5bd   : > { %9234 = vpow2.f32 %v3245_v44  ;;  %v2337_v36 = vadd.f32 %v2336_v39, %v16382_v18  ;;  %v3699_v63 = vsel %vm3698_vm5, %v9225_v5, %v3695_v51  ;;  %v3707_v24 = vmul.f32 %v9231_v62, %v12023_v57  ;;  %v9233_v6 = vpop.eup %9232 }
 0x5be   : > { %9236 = vrcp.f32 %v12041_v3  ;;  %v2684_v20 = vpop.f32.mrf.mxu2  ;;  %v3704_v43 = vsel %vm3701_vm6, %v3703_v34, %v3699_v63  ;;  %v1787_v39 = vsel %vm1585_vm11, %v1723_v11, %v16377_v16  ;;  %vm3712_vm7 = vweird.f32 %v9231_v62 }
 0x5bf   : > { %v2408_v40 = vmax.f32 %v2337_v36, 0.0  ;;  %v2783_v59 = vmax.f32 %v2684_v20, 0.0  ;;  %7700 = vrot.lane.b32.xlu0 %v3704_v43, %s10314_s25  ;;  %v3708_v9 = vsub.f32 1.0, %v3707_v24  ;;  %v3715_v5 = vand.u32 2147483647, %v12023_v57  ;;  %vm3713_vm9 = vmor %vm3711_vm8, %vm3712_vm7 }
 0x5c0   : > { %v3035_v33 = vpop.f32.mrf.mxu1  ;;  %v3717_v44 = vand.u32 2147483648, %v12023_v57  ;;  %9238 = vpow2.f32 %v1602_v30  ;;  %v9054_v57 = vld [vmem:[%s15985_s10 + $0x10] sm:$0xff]  ;;  %vm3726_vm13 = vweird.f32 %v12041_v3 }
 0x5c1   : > { %v2442_v51 = vpack.c.bf16 %v2408_v40, %v2407_v13  ;;  %v2826_v18 = vpack.c.bf16 %v2783_v59, %v2782_v17  ;;  %v3159_v34 = vsub.f32 0.0, %v3035_v33  ;;  %4630 = vmatmul.bf16.gmra.mxu3 %v10188_v49  ;;  %v7679_v36 = vpop.permute.xlu2 %7678  ;;  %v3709_v63 = vmul.f32 %v9231_v62, %v3708_v9  ;;  %5255 = vmatpush.bf16.msra.mxu1 %v9054_v57 }
 0x5c2   : > { %v12056_v24 = vsel %vm1866_vm3, %v1787_v39, %v7679_v36  ;;  %v3718_v17 = vor.u32 1.1754944e-38, %v3717_v44  ;;  %v1721_v59 = vmul.f32 %v9233_v6, %v11582_v41  ;;  %vm3716_vm10 = vcmp.eq.f32.partialorder %v3715_v5, 8.507059e+37  ;;  %9071 = vmatpush.bf16.msrb.mxu3 %v9054_v57 }
 0x5c3   : > { %16384 = vst [vmem:[#allocation85_spill] sm:$0xff] %v12056_v24  ;;  %v9235_v20 = vpop.eup %9234  ;;  %v3247_v43 = vmul.f32 1.442695, %v3159_v34  ;;  %8785 = vmatmul.msk.bf16.gmra.mxu2 %vm1287_vm2, %v2442_v51  ;;  %8824 = vmatmul.msk.bf16.gmra.mxu1 %vm1287_vm2, %v2826_v18  ;;  %v3710_v16 = vadd.f32 %v9231_v62, %v3709_v63  ;;  %v16385_v51 = vld [vmem:[#allocation55_spill] sm:$0xff]  ;;  %v3730_v6 = vand.u32 2147483647, %v12041_v3 }
 0x5c4   : > { %v9237_v40 = vpop.eup %9236  ;;  %v12061_v11 = vadd.f32 1.0, %v9235_v20  ;;  %v2339_v13 = vpop.f32.mrf.mxu3  ;;  %v1610_v18 = vmul.f32 1.442695, %v16385_v51  ;;  %v1785_v36 = vsel %vm1585_vm11, %v1721_v59, %v16379_v37 }
 0x5c5   : > { %9240 = vpow2.f32 %v3247_v43  ;;  %v3714_v9 = vsel %vm3713_vm9, %v9231_v62, %v3710_v16  ;;  %v3722_v30 = vmul.f32 %v9237_v40, %v12041_v3  ;;  %v3732_v62 = vand.u32 2147483648, %v12041_v3  ;;  %v16386_v43 = vld [vmem:[#allocation92_spill] sm:$0xff] }
 0x5c6   : > { %9242 = vrcp.f32 %v12061_v11  ;;  %v2687_v33 = vpop.f32.mrf.mxu2  ;;  %v3719_v39 = vsel %vm3716_vm10, %v3718_v17, %v3714_v9  ;;  %v9239_v5 = vpop.eup %9238  ;;  %vm3727_vm12 = vweird.f32 %v9237_v40  ;;  %v2340_v16 = vadd.f32 %v2339_v13, %v16386_v43  ;;  %v16388_v13 = vld [vmem:[#allocation94_spill] sm:$0xff] }
 0x5c7   : > { %7702 = vrot.lane.b32.xlu2 %v3719_v39, %s10314_s25  ;;  %v3723_v44 = vsub.f32 1.0, %v3722_v30  ;;  %9244 = vpow2.f32 %v1610_v18  ;;  %vm3728_vm14 = vmor %vm3726_vm13, %vm3727_vm12  ;;  %vm3731_vm15 = vcmp.eq.f32.partialorder %v3730_v6, 8.507059e+37  ;;  %v3733_v59 = vor.u32 1.1754944e-38, %v3732_v62  ;;  %v16389_v18 = vld [vmem:[#allocation51_spill] sm:$0xff] }
 0x5c8   : > { %v3037_v34 = vpop.f32.mrf.mxu1  ;;  %v2409_v3 = vmax.f32 %v2340_v16, 0.0  ;;  %v2784_v43 = vmax.f32 %v2687_v33, 0.0  ;;  %v10189_v33 = vld [vmem:[%s10468_s13 + $0x38] sm:$0xff]  ;;  %vm3741_vm1 = vweird.f32 %v12061_v11 }
 0x5c9   : > { %v3160_v49 = vsub.f32 0.0, %v3037_v34  ;;  %v7675_v63 = vpop.permute.xlu1 %7674  ;;  %v3724_v20 = vmul.f32 %v9237_v40, %v3723_v44  ;;  %v1722_v34 = vmul.f32 %v9239_v5, %v11563_v10 }
 0x5ca   : > { %v12079_v17 = vsel %vm1866_vm3, %v1785_v36, %v7675_v63 }
 0x5cb   : > { %16387 = vst [vmem:[#allocation87_spill] sm:$0xff] %v12079_v17  ;;  %v9241_v9 = vpop.eup %9240  ;;  %v3249_v30 = vmul.f32 1.442695, %v3160_v49  ;;  %v3725_v39 = vadd.f32 %v9237_v40, %v3724_v20  ;;  %v1606_v49 = vmul.f32 1.442695, %v16389_v18 }
 0x5cc   : > { %v9243_v57 = vpop.eup %9242  ;;  %v12083_v24 = vadd.f32 1.0, %v9241_v9  ;;  %v2341_v37 = vpop.f32.mrf.mxu3 }
 0x5cd   : > { %9246 = vpow2.f32 %v3249_v30  ;;  %v2342_v44 = vadd.f32 %v2341_v37, %v16388_v13  ;;  %v3729_v36 = vsel %vm3728_vm14, %v9237_v40, %v3725_v39  ;;  %v3737_v63 = vmul.f32 %v9243_v57, %v12061_v11  ;;  %v9245_v16 = vpop.eup %9244 }
 0x5ce   : > { %9248 = vrcp.f32 %v12083_v24  ;;  %v2689_v20 = vpop.f32.mrf.mxu2  ;;  %v3734_v5 = vsel %vm3731_vm15, %v3733_v59, %v3729_v36  ;;  %v1786_v40 = vsel %vm1585_vm11, %v1722_v34, %v16383_v52  ;;  %vm3742_vm0 = vweird.f32 %v9243_v57 }
 0x5cf   : > { %v2410_v9 = vmax.f32 %v2342_v44, 0.0  ;;  %v2785_v17 = vmax.f32 %v2689_v20, 0.0  ;;  %7704 = vrot.lane.b32.xlu1 %v3734_v5, %s10314_s25  ;;  %v3738_v6 = vsub.f32 1.0, %v3737_v63  ;;  %v3745_v30 = vand.u32 2147483647, %v12061_v11  ;;  %vm3743_vm4 = vmor %vm3741_vm1, %vm3742_vm0 }
 0x5d0   : > { %v3040_v62 = vpop.f32.mrf.mxu1  ;;  %v3747_v39 = vand.u32 2147483648, %v12061_v11  ;;  %9250 = vpow2.f32 %v1606_v49  ;;  %vm3756_vm7 = vweird.f32 %v12083_v24 }
 0x5d1   : > { %v2443_v37 = vpack.c.bf16 %v2410_v9, %v2409_v3  ;;  %v2827_v13 = vpack.c.bf16 %v2785_v17, %v2784_v43  ;;  %v3161_v59 = vsub.f32 0.0, %v3040_v62  ;;  %4635 = vmatmul.bf16.gmra.mxu3 %v10189_v33  ;;  %v7677_v44 = vpop.permute.xlu0 %7676  ;;  %v3739_v36 = vmul.f32 %v9243_v57, %v3738_v6 }
 0x5d2   : > { %v12097_v63 = vsel %vm1866_vm3, %v1786_v40, %v7677_v44  ;;  %v1726_v17 = vmul.f32 %v9245_v16, %v11618_v19  ;;  %v3748_v9 = vor.u32 1.1754944e-38, %v3747_v39  ;;  %vm3746_vm5 = vcmp.eq.f32.partialorder %v3745_v30, 8.507059e+37 }
 0x5d3   : > { %16390 = vst [vmem:[#allocation49_spill] sm:$0xff] %v12097_v63  ;;  %v9247_v20 = vpop.eup %9246  ;;  %v3251_v52 = vmul.f32 1.442695, %v3161_v59  ;;  %8786 = vmatmul.msk.bf16.gmra.mxu2 %vm1287_vm2, %v2443_v37  ;;  %8825 = vmatmul.msk.bf16.gmra.mxu1 %vm1287_vm2, %v2827_v13  ;;  %v3740_v34 = vadd.f32 %v9243_v57, %v3739_v36  ;;  %v16391_v37 = vld [vmem:[#allocation53_spill] sm:$0xff]  ;;  %v3760_v59 = vand.u32 2147483647, %v12083_v24 }
 0x5d4   : > { %v9249_v3 = vpop.eup %9248  ;;  %v12103_v5 = vadd.f32 1.0, %v9247_v20  ;;  %v2344_v43 = vpop.f32.mrf.mxu3  ;;  %v1608_v11 = vmul.f32 1.442695, %v16391_v37  ;;  %v3762_v33 = vand.u32 2147483648, %v12083_v24  ;;  %v16392_v20 = vld [vmem:[#allocation96_spill] sm:$0xff] }
 0x5d5   : > { %9252 = vpow2.f32 %v3251_v52  ;;  %v3744_v6 = vsel %vm3743_vm4, %v9243_v57, %v3740_v34  ;;  %v3752_v49 = vmul.f32 %v9249_v3, %v12083_v24  ;;  %v1790_v57 = vsel %vm1585_vm11, %v1726_v17, %v16385_v51 }
 0x5d6   : > { %9254 = vrcp.f32 %v12103_v5  ;;  %v2692_v40 = vpop.f32.mrf.mxu2  ;;  %v3749_v62 = vsel %vm3746_vm5, %v3748_v9, %v3744_v6  ;;  %v9251_v39 = vpop.eup %9250  ;;  %vm3757_vm6 = vweird.f32 %v9249_v3  ;;  %v2345_v52 = vadd.f32 %v2344_v43, %v16392_v20  ;;  %v16394_v43 = vld [vmem:[#allocation98_spill] sm:$0xff] }
 0x5d7   : > { %7706 = vrot.lane.b32.xlu0 %v3749_v62, %s10314_s25  ;;  %v3753_v16 = vsub.f32 1.0, %v3752_v49  ;;  %9256 = vpow2.f32 %v1608_v11  ;;  %v1724_v63 = vmul.f32 %v9251_v39, %v11595_v61  ;;  %vm3758_vm8 = vmor %vm3756_vm7, %vm3757_vm6  ;;  %vm3761_vm9 = vcmp.eq.f32.partialorder %v3760_v59, 8.507059e+37  ;;  %v16395_v11 = vld [vmem:[#allocation61_spill] sm:$0xff] }
 0x5d8   : > { %v3042_v13 = vpop.f32.mrf.mxu1  ;;  %v3763_v17 = vor.u32 1.1754944e-38, %v3762_v33  ;;  %v2411_v24 = vmax.f32 %v2345_v52, 0.0  ;;  %vm3771_vm12 = vweird.f32 %v12103_v5 }
 0x5d9   : > { %v3162_v30 = vsub.f32 0.0, %v3042_v13  ;;  %v7685_v44 = vpop.permute.xlu2 %7684  ;;  %v3754_v36 = vmul.f32 %v9249_v3, %v3753_v16 }
 0x5da   : > { %v12117_v34 = vsel %vm1866_vm3, %v1790_v57, %v7685_v44 }
 0x5db   : > { %16393 = vst [vmem:[#allocation45_spill] sm:$0xff] %v12117_v34  ;;  %v9253_v9 = vpop.eup %9252  ;;  %v3253_v6 = vmul.f32 1.442695, %v3162_v30  ;;  %v3755_v49 = vadd.f32 %v9249_v3, %v3754_v36  ;;  %v1616_v30 = vmul.f32 1.442695, %v16395_v11  ;;  %v2786_v36 = vmax.f32 %v2692_v40, 0.0 }
 0x5dc   : > { %v9255_v62 = vpop.eup %9254  ;;  %v12121_v31 = vadd.f32 1.0, %v9253_v9  ;;  %v2346_v51 = vpop.f32.mrf.mxu3  ;;  %v10190_v40 = vld [vmem:[%s10468_s13 + $0x40] sm:$0xff] }
 0x5dd   : > { %9258 = vpow2.f32 %v3253_v6  ;;  %v2347_v16 = vadd.f32 %v2346_v51, %v16394_v43  ;;  %v3759_v13 = vsel %vm3758_vm8, %v9249_v3, %v3755_v49  ;;  %v3767_v57 = vmul.f32 %v9255_v62, %v12103_v5  ;;  %v9257_v52 = vpop.eup %9256 }
 0x5de   : > { %9260 = vrcp.f32 %v12121_v31  ;;  %v2694_v44 = vpop.f32.mrf.mxu2  ;;  %v3764_v39 = vsel %vm3761_vm9, %v3763_v17, %v3759_v13  ;;  %v1788_v3 = vsel %vm1585_vm11, %v1724_v63, %v16389_v18  ;;  %vm3772_vm10 = vweird.f32 %v9255_v62 }
 0x5df   : > { %v2412_v20 = vmax.f32 %v2347_v16, 0.0  ;;  %v2787_v9 = vmax.f32 %v2694_v44, 0.0  ;;  %7708 = vrot.lane.b32.xlu2 %v3764_v39, %s10314_s25  ;;  %v3768_v59 = vsub.f32 1.0, %v3767_v57  ;;  %v3775_v6 = vand.u32 2147483647, %v12103_v5  ;;  %vm3773_vm13 = vmor %vm3771_vm12, %vm3772_vm10 }
 0x5e0   : > { %v3045_v33 = vpop.f32.mrf.mxu1  ;;  %v3777_v49 = vand.u32 2147483648, %v12103_v5  ;;  %9262 = vpow2.f32 %v1616_v30  ;;  %vm3786_vm0 = vweird.f32 %v12121_v31 }
 0x5e1   : > { %v2444_v51 = vpack.c.bf16 %v2412_v20, %v2411_v24  ;;  %v2828_v43 = vpack.c.bf16 %v2787_v9, %v2786_v36  ;;  %v3163_v17 = vsub.f32 0.0, %v3045_v33  ;;  %4640 = vmatmul.bf16.gmra.mxu3 %v10190_v40  ;;  %v7681_v16 = vpop.permute.xlu1 %7680  ;;  %v3769_v13 = vmul.f32 %v9255_v62, %v3768_v59 }
 0x5e2   : > { %v12135_v57 = vsel %vm1866_vm3, %v1788_v3, %v7681_v16  ;;  %v3778_v20 = vor.u32 1.1754944e-38, %v3777_v49  ;;  %v1725_v9 = vmul.f32 %v9257_v52, %v11576_v29  ;;  %vm3776_vm14 = vcmp.eq.f32.partialorder %v3775_v6, 8.507059e+37 }
 0x5e3   : > { %16396 = vst [vmem:[#allocation89_spill] sm:$0xff] %v12135_v57  ;;  %v9259_v44 = vpop.eup %9258  ;;  %v3255_v18 = vmul.f32 1.442695, %v3163_v17  ;;  %8787 = vmatmul.msk.bf16.gmra.mxu2 %vm1287_vm2, %v2444_v51  ;;  %8826 = vmatmul.msk.bf16.gmra.mxu1 %vm1287_vm2, %v2828_v43  ;;  %v3770_v63 = vadd.f32 %v9255_v62, %v3769_v13  ;;  %v16397_v51 = vld [vmem:[#allocation57_spill] sm:$0xff]  ;;  %v3790_v40 = vand.u32 2147483647, %v12121_v31 }
 0x5e4   : > { %v9261_v24 = vpop.eup %9260  ;;  %v12140_v39 = vadd.f32 1.0, %v9259_v44  ;;  %v4601_v36 = vpop.f32.mrf.mxu3  ;;  %v1612_v5 = vmul.f32 1.442695, %v16397_v51  ;;  %v3792_v49 = vand.u32 2147483648, %v12121_v31  ;;  %v16398_v44 = vld [vmem:[#allocation91_spill] sm:$0xff] }
 0x5e5   : > { %9264 = vpow2.f32 %v3255_v18  ;;  %v3774_v59 = vsel %vm3773_vm13, %v9255_v62, %v3770_v63  ;;  %v3782_v30 = vmul.f32 %v9261_v24, %v12121_v31  ;;  %v1789_v62 = vsel %vm1585_vm11, %v1725_v9, %v16391_v37 }
 0x5e6   : > { %9266 = vrcp.f32 %v12140_v39  ;;  %v2697_v3 = vpop.f32.mrf.mxu2  ;;  %v3779_v33 = vsel %vm3776_vm14, %v3778_v20, %v3774_v59  ;;  %v9263_v52 = vpop.eup %9262  ;;  %vm3787_vm15 = vweird.f32 %v9261_v24  ;;  %v4602_v18 = vadd.f32 %v4601_v36, %v16398_v44  ;;  %v16400_v36 = vld [vmem:[#allocation93_spill] sm:$0xff] }
 0x5e7   : > { %7710 = vrot.lane.b32.xlu1 %v3779_v33, %s10314_s25  ;;  %v3783_v43 = vsub.f32 1.0, %v3782_v30  ;;  %9268 = vpow2.f32 %v1612_v5  ;;  %vm3788_vm1 = vmor %vm3786_vm0, %vm3787_vm15  ;;  %vm3791_vm4 = vcmp.eq.f32.partialorder %v3790_v40, 8.507059e+37  ;;  %v3793_v37 = vor.u32 1.1754944e-38, %v3792_v49  ;;  %v16401_v5 = vld [vmem:[#allocation59_spill] sm:$0xff] }
 0x5e8   : > { %v3047_v17 = vpop.f32.mrf.mxu1  ;;  %v1729_v9 = vmul.f32 %v9263_v52, %v11631_v12  ;;  %v4761_v31 = vmax.f32 %v4602_v18, 0.0  ;;  %vm3801_vm6 = vweird.f32 %v12140_v39 }
 0x5e9   : > { %v3164_v16 = vsub.f32 0.0, %v3047_v17  ;;  %v7683_v6 = vpop.permute.xlu0 %7682  ;;  %v3784_v13 = vmul.f32 %v9261_v24, %v3783_v43 }
 0x5ea   : > { %v12155_v63 = vsel %vm1866_vm3, %v1789_v62, %v7683_v6 }
 0x5eb   : > { %16399 = vst [vmem:[#allocation90_spill] sm:$0xff] %v12155_v63  ;;  %v9265_v20 = vpop.eup %9264  ;;  %v3257_v59 = vmul.f32 1.442695, %v3164_v16  ;;  %v3785_v30 = vadd.f32 %v9261_v24, %v3784_v13  ;;  %v1614_v16 = vmul.f32 1.442695, %v16401_v5 }
 0x5ec   : > { %v9267_v33 = vpop.eup %9266  ;;  %v12158_v17 = vadd.f32 1.0, %v9265_v20  ;;  %v4603_v34 = vpop.f32.mrf.mxu3  ;;  %v2788_v20 = vmax.f32 %v2697_v3, 0.0  ;;  %v10191_v3 = vld [vmem:[%s10468_s13 + $0x48] sm:$0xff] }
 0x5ed   : > { %9270 = vpow2.f32 %v3257_v59  ;;  %v4604_v43 = vadd.f32 %v4603_v34, %v16400_v36  ;;  %v3789_v62 = vsel %vm3788_vm1, %v9261_v24, %v3785_v30  ;;  %v3797_v6 = vmul.f32 %v9267_v33, %v12140_v39  ;;  %v9269_v18 = vpop.eup %9268 }
 0x5ee   : > { %9272 = vrcp.f32 %v12158_v17  ;;  %v2699_v13 = vpop.f32.mrf.mxu2  ;;  %v3794_v44 = vsel %vm3791_vm4, %v3793_v37, %v3789_v62  ;;  %v1793_v34 = vsel %vm1585_vm11, %v1729_v9, %v16395_v11  ;;  %vm3802_vm5 = vweird.f32 %v9267_v33 }
 0x5ef   : > { %v4762_v57 = vmax.f32 %v4604_v43, 0.0  ;;  %v2789_v40 = vmax.f32 %v2699_v13, 0.0  ;;  %7712 = vrot.lane.b32.xlu0 %v3794_v44, %s10314_s25  ;;  %v3798_v49 = vsub.f32 1.0, %v3797_v6  ;;  %v3805_v24 = vand.u32 2147483647, %v12140_v39  ;;  %vm3803_vm7 = vmor %vm3801_vm6, %vm3802_vm5 }
 0x5f0   : > { %v3050_v52 = vpop.f32.mrf.mxu1  ;;  %v3807_v59 = vand.u32 2147483648, %v12140_v39  ;;  %9274 = vpow2.f32 %v1614_v16  ;;  %vm3816_vm10 = vweird.f32 %v12158_v17 }
 0x5f1   : > { %v4825_v30 = vpack.c.bf16 %v4762_v57, %v4761_v31  ;;  %v2829_v36 = vpack.c.bf16 %v2789_v40, %v2788_v20  ;;  %v3165_v37 = vsub.f32 0.0, %v3050_v52  ;;  %4645 = vmatmul.bf16.gmra.mxu3 %v10191_v3  ;;  %v7691_v43 = vpop.permute.xlu2 %7690  ;;  %v3799_v62 = vmul.f32 %v9267_v33, %v3798_v49 }
 0x5f2   : > { %v12173_v6 = vsel %vm1866_vm3, %v1793_v34, %v7691_v43  ;;  %v3808_v20 = vor.u32 1.1754944e-38, %v3807_v59  ;;  %v1727_v40 = vmul.f32 %v9269_v18, %v11606_v45  ;;  %vm3806_vm8 = vcmp.eq.f32.partialorder %v3805_v24, 8.507059e+37 }
 0x5f3   : > { %16402 = vst [vmem:[#allocation47_spill] sm:$0xff] %v12173_v6  ;;  %v9271_v13 = vpop.eup %9270  ;;  %v3259_v44 = vmul.f32 1.442695, %v3165_v37  ;;  %8827 = vmatmul.msk.bf16.gmra.mxu1 %vm1287_vm2, %v2829_v36  ;;  %4929 = vmatmul.bf16.vlgmr.msra.gmra.mxu2 %v4825_v30  ;;  %v3800_v11 = vadd.f32 %v9267_v33, %v3799_v62  ;;  %v16403_v30 = vld [vmem:[#allocation66_spill] sm:$0xff]  ;;  %v3820_v3 = vand.u32 2147483647, %v12158_v17 }
 0x5f4   : > { %v9273_v9 = vpop.eup %9272  ;;  %v12177_v57 = vadd.f32 1.0, %v9271_v13  ;;  %v4606_v31 = vpop.f32.mrf.mxu3  ;;  %v1622_v39 = vmul.f32 1.442695, %v16403_v30  ;;  %v3822_v59 = vand.u32 2147483648, %v12158_v17  ;;  %v16404_v13 = vld [vmem:[#allocation95_spill] sm:$0xff] }
 0x5f5   : > { %9276 = vpow2.f32 %v3259_v44  ;;  %v3804_v49 = vsel %vm3803_vm7, %v9267_v33, %v3800_v11  ;;  %v3812_v16 = vmul.f32 %v9273_v9, %v12158_v17  ;;  %v1791_v33 = vsel %vm1585_vm11, %v1727_v40, %v16397_v51 }
 0x5f6   : > { %9278 = vrcp.f32 %v12177_v57  ;;  %v2702_v52 = vpop.f32.mrf.mxu2  ;;  %v3809_v34 = vsel %vm3806_vm8, %v3808_v20, %v3804_v49  ;;  %v9275_v18 = vpop.eup %9274  ;;  %vm3817_vm9 = vweird.f32 %v9273_v9  ;;  %v4607_v44 = vadd.f32 %v4606_v31, %v16404_v13  ;;  %v16406_v31 = vld [vmem:[#allocation97_spill] sm:$0xff] }
 0x5f7   : > { %7714 = vrot.lane.b32.xlu2 %v3809_v34, %s10314_s25  ;;  %v3813_v36 = vsub.f32 1.0, %v3812_v16  ;;  %9280 = vpow2.f32 %v1622_v39  ;;  %vm3818_vm12 = vmor %vm3816_vm10, %vm3817_vm9  ;;  %vm3821_vm13 = vcmp.eq.f32.partialorder %v3820_v3, 8.507059e+37  ;;  %v3823_v40 = vor.u32 1.1754944e-38, %v3822_v59  ;;  %v16407_v39 = vld [vmem:[#allocation63_spill] sm:$0xff] }
 0x5f8   : > { %v3052_v37 = vpop.f32.mrf.mxu1  ;;  %v4763_v17 = vmax.f32 %v4607_v44, 0.0  ;;  %v2790_v13 = vmax.f32 %v2702_v52, 0.0  ;;  %vm3831_vm15 = vweird.f32 %v12177_v57 }
 0x5f9   : > { %v3166_v43 = vsub.f32 0.0, %v3052_v37  ;;  %v7687_v24 = vpop.permute.xlu1 %7686  ;;  %v3814_v62 = vmul.f32 %v9273_v9, %v3813_v36  ;;  %v1728_v37 = vmul.f32 %v9275_v18, %v11587_v58 }
 0x5fa   : > { %v12192_v11 = vsel %vm1866_vm3, %v1791_v33, %v7687_v24 }
 0x5fb   : > { %16405 = vst [vmem:[#allocation55_spill] sm:$0xff] %v12192_v11  ;;  %v9277_v20 = vpop.eup %9276  ;;  %v3261_v49 = vmul.f32 1.442695, %v3166_v43  ;;  %v3815_v16 = vadd.f32 %v9273_v9, %v3814_v62  ;;  %v1618_v43 = vmul.f32 1.442695, %v16407_v39 }
 0x5fc   : > { %v9279_v34 = vpop.eup %9278  ;;  %v12196_v6 = vadd.f32 1.0, %v9277_v20  ;;  %v4608_v51 = vpop.f32.mrf.mxu3 }
 0x5fd   : > { %9282 = vpow2.f32 %v3261_v49  ;;  %v4609_v36 = vadd.f32 %v4608_v51, %v16406_v31  ;;  %v3819_v33 = vsel %vm3818_vm12, %v9273_v9, %v3815_v16  ;;  %v3827_v24 = vmul.f32 %v9279_v34, %v12177_v57  ;;  %v9281_v44 = vpop.eup %9280 }
 0x5fe   : > { %9284 = vrcp.f32 %v12196_v6  ;;  %v2704_v62 = vpop.f32.mrf.mxu2  ;;  %v3824_v18 = vsel %vm3821_vm13, %v3823_v40, %v3819_v33  ;;  %v1792_v9 = vsel %vm1585_vm11, %v1728_v37, %v16401_v5  ;;  %vm3832_vm14 = vweird.f32 %v9279_v34  ;;  %v10192_v40 = vld [vmem:[%s10468_s13 + $0x50] sm:$0xff] }
 0x5ff   : > { %v4764_v20 = vmax.f32 %v4609_v36, 0.0  ;;  %v2791_v11 = vmax.f32 %v2704_v62, 0.0  ;;  %7716 = vrot.lane.b32.xlu1 %v3824_v18, %s10314_s25  ;;  %v3828_v3 = vsub.f32 1.0, %v3827_v24  ;;  %v3835_v49 = vand.u32 2147483647, %v12177_v57  ;;  %vm3833_vm0 = vmor %vm3831_vm15, %vm3832_vm14 }
 0x600   : > { %v3055_v59 = vpop.f32.mrf.mxu1  ;;  %v3837_v16 = vand.u32 2147483648, %v12177_v57  ;;  %9286 = vpow2.f32 %v1618_v43  ;;  %v9053_v57 = vld [vmem:[%s15985_s10 + $0x8] sm:$0xff]  ;;  %vm3846_vm5 = vweird.f32 %v12196_v6 }
 0x601   : > { %v2830_v51 = vpack.c.bf16 %v2791_v11, %v2790_v13  ;;  %v3167_v31 = vsub.f32 0.0, %v3055_v59  ;;  %4650 = vmatmul.bf16.gmra.mxu3 %v10192_v40  ;;  %v7689_v52 = vpop.permute.xlu0 %7688  ;;  %v4826_v36 = vpack.c.bf16 %v4764_v20, %v4763_v17  ;;  %v3829_v33 = vmul.f32 %v9279_v34, %v3828_v3  ;;  %5256 = vmatpush.bf16.msra.mxu1 %v9053_v57 }
 0x602   : > { %v12210_v24 = vsel %vm1866_vm3, %v1792_v9, %v7689_v52  ;;  %v1732_v11 = vmul.f32 %v9281_v44, %v11652_v26  ;;  %v3838_v17 = vor.u32 1.1754944e-38, %v3837_v16  ;;  %vm3836_vm1 = vcmp.eq.f32.partialorder %v3835_v49, 8.507059e+37  ;;  %v16409_v44 = vld [vmem:[#allocation65_spill] sm:$0xff]  ;;  %9072 = vmatpush.bf16.msrb.mxu3 %v9053_v57 }
 0x603   : > { %16408 = vst [vmem:[#allocation92_spill] sm:$0xff] %v12210_v24  ;;  %v9283_v62 = vpop.eup %9282  ;;  %v3263_v5 = vmul.f32 1.442695, %v3167_v31  ;;  %8828 = vmatmul.msk.bf16.gmra.mxu1 %vm1287_vm2, %v2830_v51  ;;  %4934 = vmatmul.bf16.gmra.mxu2 %v4826_v36  ;;  %v3830_v37 = vadd.f32 %v9279_v34, %v3829_v33  ;;  %v1620_v51 = vmul.f32 1.442695, %v16409_v44  ;;  %v16514_v26 = vld [vmem:[#allocation69_spill] sm:$0xff] }
 0x604   : > { %v9285_v18 = vpop.eup %9284  ;;  %v12215_v13 = vadd.f32 1.0, %v9283_v62  ;;  %v4611_v59 = vpop.f32.mrf.mxu3  ;;  %v3850_v16 = vand.u32 2147483647, %v12196_v6  ;;  %v1796_v52 = vsel %vm1585_vm11, %v1732_v11, %v16403_v30 }
 0x605   : > { %9288 = vpow2.f32 %v3263_v5  ;;  %v3834_v20 = vsel %vm3833_vm0, %v9279_v34, %v3830_v37  ;;  %v3842_v43 = vmul.f32 %v9285_v18, %v12196_v6  ;;  %v3852_v34 = vand.u32 2147483648, %v12196_v6  ;;  %v16410_v5 = vld [vmem:[#allocation99_spill] sm:$0xff] }
 0x606   : > { %9290 = vrcp.f32 %v12215_v13  ;;  %v2707_v3 = vpop.f32.mrf.mxu2  ;;  %v3839_v9 = vsel %vm3836_vm1, %v3838_v17, %v3834_v20  ;;  %v9287_v49 = vpop.eup %9286  ;;  %vm3847_vm4 = vweird.f32 %v9285_v18  ;;  %v4612_v37 = vadd.f32 %v4611_v59, %v16410_v5  ;;  %v16412_v59 = vld [vmem:[#allocation100_spill] sm:$0xff] }
 0x607   : > { %7718 = vrot.lane.b32.xlu0 %v3839_v9, %s10314_s25  ;;  %v3843_v31 = vsub.f32 1.0, %v3842_v43  ;;  %9292 = vpow2.f32 %v1620_v51  ;;  %v1730_v24 = vmul.f32 %v9287_v49, %v11623_v56  ;;  %vm3848_vm6 = vmor %vm3846_vm5, %vm3847_vm4  ;;  %vm3851_vm7 = vcmp.eq.f32.partialorder %v3850_v16, 8.507059e+37  ;;  %v16413_v51 = vld [vmem:[#allocation72_spill] sm:$0xff] }
 0x608   : > { %v3057_v40 = vpop.f32.mrf.mxu1  ;;  %v3853_v11 = vor.u32 1.1754944e-38, %v3852_v34  ;;  %v4765_v6 = vmax.f32 %v4612_v37, 0.0  ;;  %vm3861_vm9 = vweird.f32 %v12215_v13 }
 0x609   : > { %v3168_v36 = vsub.f32 0.0, %v3057_v40  ;;  %v7697_v33 = vpop.permute.xlu2 %7696  ;;  %v3844_v62 = vmul.f32 %v9285_v18, %v3843_v31 }
 0x60a   : > { %v12232_v17 = vsel %vm1866_vm3, %v1796_v52, %v7697_v33 }
 0x60b   : > { %16411 = vst [vmem:[#allocation94_spill] sm:$0xff] %v12232_v17  ;;  %v9289_v20 = vpop.eup %9288  ;;  %v3265_v43 = vmul.f32 1.442695, %v3168_v36  ;;  %v3845_v9 = vadd.f32 %v9285_v18, %v3844_v62  ;;  %v1628_v36 = vmul.f32 1.442695, %v16413_v51  ;;  %v2792_v62 = vmax.f32 %v2707_v3, 0.0 }
 0x60c   : > { %v9291_v57 = vpop.eup %9290  ;;  %v12236_v63 = vadd.f32 1.0, %v9289_v20  ;;  %v4613_v30 = vpop.f32.mrf.mxu3 }
 0x60d   : > { %9294 = vpow2.f32 %v3265_v43  ;;  %v4614_v31 = vadd.f32 %v4613_v30, %v16412_v59  ;;  %v3849_v40 = vsel %vm3848_vm6, %v9285_v18, %v3845_v9  ;;  %v3857_v52 = vmul.f32 %v9291_v57, %v12215_v13  ;;  %v9293_v37 = vpop.eup %9292 }
 0x60e   : > { %9296 = vrcp.f32 %v12236_v63  ;;  %v2709_v33 = vpop.f32.mrf.mxu2  ;;  %v3854_v49 = vsel %vm3851_vm7, %v3853_v11, %v3849_v40  ;;  %v1794_v18 = vsel %vm1585_vm11, %v1730_v24, %v16407_v39  ;;  %vm3862_vm8 = vweird.f32 %v9291_v57  ;;  %v10193_v11 = vld [vmem:[%s10468_s13 + $0x58] sm:$0xff] }
 0x60f   : > { %v4766_v5 = vmax.f32 %v4614_v31, 0.0  ;;  %v2793_v20 = vmax.f32 %v2709_v33, 0.0  ;;  %7720 = vrot.lane.b32.xlu2 %v3854_v49, %s10314_s25  ;;  %v3858_v16 = vsub.f32 1.0, %v3857_v52  ;;  %v3865_v43 = vand.u32 2147483647, %v12215_v13  ;;  %vm3863_vm10 = vmor %vm3861_vm9, %vm3862_vm8 }
 0x610   : > { %v3060_v34 = vpop.f32.mrf.mxu1  ;;  %v3867_v9 = vand.u32 2147483648, %v12215_v13  ;;  %9298 = vpow2.f32 %v1628_v36  ;;  %vm3876_vm14 = vweird.f32 %v12236_v63 }
 0x611   : > { %v2831_v30 = vpack.c.bf16 %v2793_v20, %v2792_v62  ;;  %v3169_v59 = vsub.f32 0.0, %v3060_v34  ;;  %4655 = vmatmul.bf16.gmra.mxu3 %v10193_v11  ;;  %v7693_v3 = vpop.permute.xlu1 %7692  ;;  %v4827_v31 = vpack.c.bf16 %v4766_v5, %v4765_v6  ;;  %v3859_v40 = vmul.f32 %v9291_v57, %v3858_v16 }
 0x612   : > { %v12250_v52 = vsel %vm1866_vm3, %v1794_v18, %v7693_v3  ;;  %v3868_v6 = vor.u32 1.1754944e-38, %v3867_v9  ;;  %v1731_v5 = vmul.f32 %v9293_v37, %v11601_v22  ;;  %vm3866_vm12 = vcmp.eq.f32.partialorder %v3865_v43, 8.507059e+37 }
 0x613   : > { %16414 = vst [vmem:[#allocation51_spill] sm:$0xff] %v12250_v52  ;;  %v9295_v33 = vpop.eup %9294  ;;  %v3267_v39 = vmul.f32 1.442695, %v3169_v59  ;;  %8829 = vmatmul.msk.bf16.gmra.mxu1 %vm1287_vm2, %v2831_v30  ;;  %4939 = vmatmul.bf16.gmra.mxu2 %v4827_v31  ;;  %v3860_v24 = vadd.f32 %v9291_v57, %v3859_v40  ;;  %v16415_v30 = vld [vmem:[#allocation68_spill] sm:$0xff]  ;;  %v3880_v3 = vand.u32 2147483647, %v12236_v63 }
 0x614   : > { %v9297_v49 = vpop.eup %9296  ;;  %v12254_v62 = vadd.f32 1.0, %v9295_v33  ;;  %v4616_v20 = vpop.f32.mrf.mxu3  ;;  %v1624_v13 = vmul.f32 1.442695, %v16415_v30  ;;  %v3882_v9 = vand.u32 2147483648, %v12236_v63 }
 0x615   : > { %9300 = vpow2.f32 %v3267_v39  ;;  %v3864_v16 = vsel %vm3863_vm10, %v9291_v57, %v3860_v24  ;;  %v3872_v36 = vmul.f32 %v9297_v49, %v12236_v63  ;;  %v1795_v57 = vsel %vm1585_vm11, %v1731_v5, %v16409_v44 }
 0x616   : > { %9302 = vrcp.f32 %v12254_v62  ;;  %v2712_v18 = vpop.f32.mrf.mxu2  ;;  %v3869_v34 = vsel %vm3866_vm12, %v3868_v6, %v3864_v16  ;;  %v9299_v37 = vpop.eup %9298  ;;  %vm3877_vm13 = vweird.f32 %v9297_v49  ;;  %v4617_v33 = vadd.f32 %v4616_v20, %v11340_v14  ;;  %v16417_v14 = vld [vmem:[#allocation101_spill] sm:$0xff] }
 0x617   : > { %7722 = vrot.lane.b32.xlu1 %v3869_v34, %s10314_s25  ;;  %v3873_v59 = vsub.f32 1.0, %v3872_v36  ;;  %9304 = vpow2.f32 %v1624_v13  ;;  %vm3878_vm15 = vmor %vm3876_vm14, %vm3877_vm13  ;;  %vm3881_vm0 = vcmp.eq.f32.partialorder %v3880_v3, 8.507059e+37  ;;  %v3883_v44 = vor.u32 1.1754944e-38, %v3882_v9  ;;  %v16418_v13 = vld [vmem:[#allocation70_spill] sm:$0xff] }
 0x618   : > { %v3062_v11 = vpop.f32.mrf.mxu1  ;;  %v1735_v5 = vmul.f32 %v9299_v37, %v11675_v15  ;;  %v4767_v63 = vmax.f32 %v4617_v33, 0.0  ;;  %vm3891_vm4 = vweird.f32 %v12254_v62 }
 0x619   : > { %v3170_v31 = vsub.f32 0.0, %v3062_v11  ;;  %v7695_v43 = vpop.permute.xlu0 %7694  ;;  %v3874_v40 = vmul.f32 %v9297_v49, %v3873_v59 }
 0x61a   : > { %v12269_v39 = vsel %vm1866_vm3, %v1795_v57, %v7695_v43 }
 0x61b   : > { %16416 = vst [vmem:[#allocation53_spill] sm:$0xff] %v12269_v39  ;;  %v9301_v24 = vpop.eup %9300  ;;  %v3269_v6 = vmul.f32 1.442695, %v3170_v31  ;;  %v3875_v16 = vadd.f32 %v9297_v49, %v3874_v40  ;;  %v1626_v31 = vmul.f32 1.442695, %v16418_v13 }
 0x61c   : > { %v9303_v36 = vpop.eup %9302  ;;  %v12272_v34 = vadd.f32 1.0, %v9301_v24  ;;  %v4618_v11 = vpop.f32.mrf.mxu3  ;;  %v2794_v24 = vmax.f32 %v2712_v18, 0.0 }
 0x61d   : > { %9306 = vpow2.f32 %v3269_v6  ;;  %v4619_v20 = vadd.f32 %v4618_v11, %v16417_v14  ;;  %v3879_v59 = vsel %vm3878_vm15, %v9297_v49, %v3875_v16  ;;  %v3887_v57 = vmul.f32 %v9303_v36, %v12254_v62  ;;  %v9305_v33 = vpop.eup %9304 }
 0x61e   : > { %9308 = vrcp.f32 %v12272_v34  ;;  %v2714_v43 = vpop.f32.mrf.mxu2  ;;  %v3884_v40 = vsel %vm3881_vm0, %v3883_v44, %v3879_v59  ;;  %v1799_v49 = vsel %vm1585_vm11, %v1735_v5, %v16413_v51  ;;  %vm3892_vm1 = vweird.f32 %v9303_v36  ;;  %v10194_v44 = vld [vmem:[%s10468_s13 + $0x60] sm:$0xff] }
 0x61f   : > { %v4768_v17 = vmax.f32 %v4619_v20, 0.0  ;;  %v2795_v3 = vmax.f32 %v2714_v43, 0.0  ;;  %7724 = vrot.lane.b32.xlu0 %v3884_v40, %s10314_s25  ;;  %v3888_v9 = vsub.f32 1.0, %v3887_v57  ;;  %v3895_v6 = vand.u32 2147483647, %v12254_v62  ;;  %vm3893_vm5 = vmor %vm3891_vm4, %vm3892_vm1 }
 0x620   : > { %v3065_v37 = vpop.f32.mrf.mxu1  ;;  %v3897_v16 = vand.u32 2147483648, %v12254_v62  ;;  %9310 = vpow2.f32 %v1626_v31  ;;  %vm3906_vm8 = vweird.f32 %v12272_v34 }
 0x621   : > { %v2832_v11 = vpack.c.bf16 %v2795_v3, %v2794_v24  ;;  %v3171_v14 = vsub.f32 0.0, %v3065_v37  ;;  %4660 = vmatmul.bf16.gmra.mxu3 %v10194_v44  ;;  %v7703_v18 = vpop.permute.xlu2 %7702  ;;  %v4828_v20 = vpack.c.bf16 %v4768_v17, %v4767_v63  ;;  %v3889_v59 = vmul.f32 %v9303_v36, %v3888_v9 }
 0x622   : > { %v12287_v57 = vsel %vm1866_vm3, %v1799_v49, %v7703_v18  ;;  %v3898_v17 = vor.u32 1.1754944e-38, %v3897_v16  ;;  %v1733_v63 = vmul.f32 %v9305_v33, %v11638_v47  ;;  %vm3896_vm6 = vcmp.eq.f32.partialorder %v3895_v6, 8.507059e+37 }
 0x623   : > { %16419 = vst [vmem:[#allocation96_spill] sm:$0xff] %v12287_v57  ;;  %v9307_v43 = vpop.eup %9306  ;;  %v3271_v40 = vmul.f32 1.442695, %v3171_v14  ;;  %8830 = vmatmul.msk.bf16.gmra.mxu1 %vm1287_vm2, %v2832_v11  ;;  %4944 = vmatmul.bf16.gmra.mxu2 %v4828_v20  ;;  %v3890_v51 = vadd.f32 %v9303_v36, %v3889_v59  ;;  %v16420_v11 = vld [vmem:[#allocation78_spill] sm:$0xff]  ;;  %v3910_v18 = vand.u32 2147483647, %v12272_v34 }
 0x624   : > { %v9309_v5 = vpop.eup %9308  ;;  %v12291_v24 = vadd.f32 1.0, %v9307_v43  ;;  %v4621_v3 = vpop.f32.mrf.mxu3  ;;  %v1634_v62 = vmul.f32 1.442695, %v16420_v11  ;;  %v3912_v16 = vand.u32 2147483648, %v12272_v34 }
 0x625   : > { %9312 = vpow2.f32 %v3271_v40  ;;  %v3894_v9 = vsel %vm3893_vm5, %v9303_v36, %v3890_v51  ;;  %v3902_v31 = vmul.f32 %v9309_v5, %v12272_v34  ;;  %v1797_v36 = vsel %vm1585_vm11, %v1733_v63, %v16415_v30 }
 0x626   : > { %9314 = vrcp.f32 %v12291_v24  ;;  %v2717_v37 = vpop.f32.mrf.mxu2  ;;  %v3899_v49 = vsel %vm3896_vm6, %v3898_v17, %v3894_v9  ;;  %v9311_v33 = vpop.eup %9310  ;;  %vm3907_vm7 = vweird.f32 %v9309_v5  ;;  %v4622_v43 = vadd.f32 %v4621_v3, %v11357_v53 }
 0x627   : > { %7726 = vrot.lane.b32.xlu2 %v3899_v49, %s10314_s25  ;;  %v3903_v14 = vsub.f32 1.0, %v3902_v31  ;;  %9316 = vpow2.f32 %v1634_v62  ;;  %v1734_v49 = vmul.f32 %v9311_v33, %v11613_v21  ;;  %vm3908_vm9 = vmor %vm3906_vm8, %vm3907_vm7  ;;  %vm3911_vm10 = vcmp.eq.f32.partialorder %v3910_v18, 8.507059e+37  ;;  %v16422_v62 = vld [vmem:[#allocation74_spill] sm:$0xff] }
 0x628   : > { %v3067_v44 = vpop.f32.mrf.mxu1  ;;  %v3913_v63 = vor.u32 1.1754944e-38, %v3912_v16  ;;  %v4769_v34 = vmax.f32 %v4622_v43, 0.0  ;;  %v3925_v16 = vand.u32 2147483647, %v12291_v24  ;;  %vm3921_vm13 = vweird.f32 %v12291_v24 }
 0x629   : > { %v3172_v20 = vsub.f32 0.0, %v3067_v44  ;;  %v7699_v6 = vpop.permute.xlu1 %7698  ;;  %v3904_v59 = vmul.f32 %v9309_v5, %v3903_v14 }
 0x62a   : > { %v12306_v40 = vsel %vm1866_vm3, %v1797_v36, %v7699_v6  ;;  %v2796_v6 = vmax.f32 %v2717_v37, 0.0  ;;  %vm3926_vm15 = vcmp.eq.f32.partialorder %v3925_v16, 8.507059e+37 }
 0x62b   : > { %16421 = vst [vmem:[#allocation98_spill] sm:$0xff] %v12306_v40  ;;  %v9313_v51 = vpop.eup %9312  ;;  %v3273_v17 = vmul.f32 1.442695, %v3172_v20  ;;  %v3905_v9 = vadd.f32 %v9309_v5, %v3904_v59  ;;  %v1630_v20 = vmul.f32 1.442695, %v16422_v62 }
 0x62c   : > { %v9315_v31 = vpop.eup %9314  ;;  %v12310_v44 = vadd.f32 1.0, %v9313_v51  ;;  %v4623_v30 = vpop.f32.mrf.mxu3 }
 0x62d   : > { %9318 = vpow2.f32 %v3273_v17  ;;  %v4624_v53 = vadd.f32 %v4623_v30, %v11369_v23  ;;  %v3909_v3 = vsel %vm3908_vm9, %v9309_v5, %v3905_v9  ;;  %v3917_v14 = vmul.f32 %v9315_v31, %v12291_v24  ;;  %v9317_v43 = vpop.eup %9316 }
 0x62e   : > { %9320 = vrcp.f32 %v12310_v44  ;;  %v2719_v36 = vpop.f32.mrf.mxu2  ;;  %v3914_v33 = vsel %vm3911_vm10, %v3913_v63, %v3909_v3  ;;  %v1798_v23 = vsel %vm1585_vm11, %v1734_v49, %v16418_v13  ;;  %vm3922_vm12 = vweird.f32 %v9315_v31  ;;  %v10195_v63 = vld [vmem:[%s10468_s13 + $0x68] sm:$0xff] }
 0x62f   : > { %v4770_v59 = vmax.f32 %v4624_v53, 0.0  ;;  %v2797_v51 = vmax.f32 %v2719_v36, 0.0  ;;  %7728 = vrot.lane.b32.xlu1 %v3914_v33, %s10314_s25  ;;  %v3918_v18 = vsub.f32 1.0, %v3917_v14  ;;  %v3927_v17 = vand.u32 2147483648, %v12291_v24  ;;  %vm3923_vm14 = vmor %vm3921_vm13, %vm3922_vm12 }
 0x630   : > { %v3070_v5 = vpop.f32.mrf.mxu1  ;;  %9322 = vpow2.f32 %v1630_v20  ;;  %vm3936_vm1 = vweird.f32 %v12310_v44 }
 0x631   : > { %v2833_v9 = vpack.c.bf16 %v2797_v51, %v2796_v6  ;;  %v3173_v30 = vsub.f32 0.0, %v3070_v5  ;;  %4665 = vmatmul.bf16.gmra.mxu3 %v10195_v63  ;;  %v7701_v37 = vpop.permute.xlu0 %7700  ;;  %v4829_v53 = vpack.c.bf16 %v4770_v59, %v4769_v34  ;;  %v3919_v3 = vmul.f32 %v9315_v31, %v3918_v18 }
 0x632   : > { %v12324_v14 = vsel %vm1866_vm3, %v1798_v23, %v7701_v37  ;;  %v1738_v6 = vmul.f32 %v9317_v43, %v11696_v25  ;;  %v3928_v34 = vor.u32 1.1754944e-38, %v3927_v17  ;;  %v3940_v63 = vand.u32 2147483647, %v12310_v44 }
 0x633   : > { %16423 = vst [vmem:[#allocation61_spill] sm:$0xff] %v12324_v14  ;;  %v9319_v36 = vpop.eup %9318  ;;  %v3275_v13 = vmul.f32 1.442695, %v3173_v30  ;;  %8831 = vmatmul.msk.bf16.gmra.mxu1 %vm1287_vm2, %v2833_v9  ;;  %4949 = vmatmul.bf16.gmra.mxu2 %v4829_v53  ;;  %v3920_v49 = vadd.f32 %v9315_v31, %v3919_v3  ;;  %v16424_v9 = vld [vmem:[#allocation76_spill] sm:$0xff]  ;;  %v3942_v37 = vand.u32 2147483648, %v12310_v44  ;;  %v10206_v14 = vld [vmem:[%s10468_s13 + $0xc0] sm:$0xff] }
 0x634   : > { %v9321_v33 = vpop.eup %9320  ;;  %v12329_v51 = vadd.f32 1.0, %v9319_v36  ;;  %v4626_v5 = vpop.f32.mrf.mxu3  ;;  %v1632_v24 = vmul.f32 1.442695, %v16424_v9  ;;  %v16425_v36 = vld [vmem:[#allocation102_spill] sm:$0xff]  ;;  %vm3941_vm5 = vcmp.eq.f32.partialorder %v3940_v63, 8.507059e+37 }
 0x635   : > { %9324 = vpow2.f32 %v3275_v13  ;;  %v3924_v59 = vsel %vm3923_vm14, %v9315_v31, %v3920_v49  ;;  %v3932_v20 = vmul.f32 %v9321_v33, %v12310_v44  ;;  %v1802_v31 = vsel %vm1585_vm11, %v1738_v6, %v16420_v11 }
 0x636   : > { %9326 = vrcp.f32 %v12329_v51  ;;  %v2722_v18 = vpop.f32.mrf.mxu2  ;;  %v3929_v23 = vsel %vm3926_vm15, %v3928_v34, %v3924_v59  ;;  %v9323_v17 = vpop.eup %9322  ;;  %vm3937_vm0 = vweird.f32 %v9321_v33  ;;  %v4627_v13 = vadd.f32 %v4626_v5, %v16425_v36  ;;  %v16427_v5 = vld [vmem:[#allocation103_spill] sm:$0xff] }
 0x637   : > { %7730 = vrot.lane.b32.xlu0 %v3929_v23, %s10314_s25  ;;  %v3933_v43 = vsub.f32 1.0, %v3932_v20  ;;  %9328 = vpow2.f32 %v1632_v24  ;;  %v1736_v57 = vmul.f32 %v9323_v17, %v11655_v2  ;;  %vm3938_vm4 = vmor %vm3936_vm1, %vm3937_vm0  ;;  %v3943_v6 = vor.u32 1.1754944e-38, %v3942_v37  ;;  %v16428_v24 = vld [vmem:[#allocation84_spill] sm:$0xff]  ;;  %v16512_v2 = vld [vmem:[#allocation158_spill] sm:$0xff] }
 0x638   : > { %v3072_v30 = vpop.f32.mrf.mxu1  ;;  %v4771_v44 = vmax.f32 %v4627_v13, 0.0  ;;  %vm3951_vm7 = vweird.f32 %v12329_v51 }
 0x639   : > { %v3174_v16 = vsub.f32 0.0, %v3072_v30  ;;  %v7709_v53 = vpop.permute.xlu2 %7708  ;;  %v3934_v3 = vmul.f32 %v9321_v33, %v3933_v43 }
 0x63a   : > { %v12343_v49 = vsel %vm1866_vm3, %v1802_v31, %v7709_v53 }
 0x63b   : > { %16426 = vst [vmem:[#allocation57_spill] sm:$0xff] %v12343_v49  ;;  %v9325_v34 = vpop.eup %9324  ;;  %v3277_v59 = vmul.f32 1.442695, %v3174_v16  ;;  %v3935_v20 = vadd.f32 %v9321_v33, %v3934_v3  ;;  %v1640_v16 = vmul.f32 1.442695, %v16428_v24  ;;  %v2798_v3 = vmax.f32 %v2722_v18, 0.0 }
 0x63c   : > { %v9327_v23 = vpop.eup %9326  ;;  %v12347_v40 = vadd.f32 1.0, %v9325_v34  ;;  %v4628_v11 = vpop.f32.mrf.mxu3 }
 0x63d   : > { %9330 = vpow2.f32 %v3277_v59  ;;  %v4629_v43 = vadd.f32 %v4628_v11, %v16427_v5  ;;  %v3939_v30 = vsel %vm3938_vm4, %v9321_v33, %v3935_v20  ;;  %v3947_v31 = vmul.f32 %v9327_v23, %v12329_v51  ;;  %v9329_v13 = vpop.eup %9328 }
 0x63e   : > { %9332 = vrcp.f32 %v12347_v40  ;;  %v2724_v53 = vpop.f32.mrf.mxu2  ;;  %v3944_v17 = vsel %vm3941_vm5, %v3943_v6, %v3939_v30  ;;  %v1800_v33 = vsel %vm1585_vm11, %v1736_v57, %v16422_v62  ;;  %vm3952_vm6 = vweird.f32 %v9327_v23  ;;  %v10196_v6 = vld [vmem:[%s10468_s13 + $0x70] sm:$0xff] }
 0x63f   : > { %v4772_v36 = vmax.f32 %v4629_v43, 0.0  ;;  %v2799_v34 = vmax.f32 %v2724_v53, 0.0  ;;  %7732 = vrot.lane.b32.xlu2 %v3944_v17, %s10314_s25  ;;  %v3948_v63 = vsub.f32 1.0, %v3947_v31  ;;  %v3955_v59 = vand.u32 2147483647, %v12329_v51  ;;  %vm3953_vm8 = vmor %vm3951_vm7, %vm3952_vm6 }
 0x640   : > { %v3075_v37 = vpop.f32.mrf.mxu1  ;;  %v3957_v20 = vand.u32 2147483648, %v12329_v51  ;;  %9334 = vpow2.f32 %v1640_v16  ;;  %v9052_v51 = vld [vmem:[%s15985_s10] sm:$0xff]  ;;  %vm3966_vm12 = vweird.f32 %v12347_v40 }
 0x641   : > { %v2834_v11 = vpack.c.bf16 %v2799_v34, %v2798_v3  ;;  %v3175_v5 = vsub.f32 0.0, %v3075_v37  ;;  %4670 = vmatmul.bf16.gmra.mxu3 %v10196_v6  ;;  %v7705_v18 = vpop.permute.xlu1 %7704  ;;  %v4830_v43 = vpack.c.bf16 %v4772_v36, %v4771_v44  ;;  %v3949_v30 = vmul.f32 %v9327_v23, %v3948_v63  ;;  %5257 = vmatpush.bf16.msra.mxu1 %v9052_v51 }
 0x642   : > { %v12361_v31 = vsel %vm1866_vm3, %v1800_v33, %v7705_v18  ;;  %v3958_v44 = vor.u32 1.1754944e-38, %v3957_v20  ;;  %v1737_v36 = vmul.f32 %v9329_v13, %v11627_v50  ;;  %vm3956_vm9 = vcmp.eq.f32.partialorder %v3955_v59, 8.507059e+37  ;;  %9073 = vmatpush.bf16.msrb.mxu3 %v9052_v51 }
 0x643   : > { %16429 = vst [vmem:[#allocation91_spill] sm:$0xff] %v12361_v31  ;;  %v9331_v53 = vpop.eup %9330  ;;  %v3279_v57 = vmul.f32 1.442695, %v3175_v5  ;;  %8832 = vmatmul.msk.bf16.gmra.mxu1 %vm1287_vm2, %v2834_v11  ;;  %4954 = vmatmul.bf16.gmra.mxu2 %v4830_v43  ;;  %v3950_v62 = vadd.f32 %v9327_v23, %v3949_v30  ;;  %v16430_v11 = vld [vmem:[#allocation80_spill] sm:$0xff]  ;;  %v3970_v13 = vand.u32 2147483647, %v12347_v40 }
 0x644   : > { %v9333_v17 = vpop.eup %9332  ;;  %v12365_v3 = vadd.f32 1.0, %v9331_v53  ;;  %v4631_v34 = vpop.f32.mrf.mxu3  ;;  %v1636_v5 = vmul.f32 1.442695, %v16430_v11  ;;  %v1801_v43 = vsel %vm1585_vm11, %v1737_v36, %v16424_v9  ;;  %v16453_v31 = vld [vmem:[#allocation148_spill] sm:$0xff] }
 0x645   : > { %9336 = vpow2.f32 %v3279_v57  ;;  %v3954_v63 = vsel %vm3953_vm8, %v9327_v23, %v3950_v62  ;;  %v3962_v16 = vmul.f32 %v9333_v17, %v12347_v40  ;;  %v3972_v23 = vand.u32 2147483648, %v12347_v40 }
 0x646   : > { %9338 = vrcp.f32 %v12365_v3  ;;  %v2727_v33 = vpop.f32.mrf.mxu2  ;;  %v3959_v37 = vsel %vm3956_vm9, %v3958_v44, %v3954_v63  ;;  %v9335_v59 = vpop.eup %9334  ;;  %vm3967_vm10 = vweird.f32 %v9333_v17  ;;  %v4632_v57 = vadd.f32 %v4631_v34, %v11394_v48 }
 0x647   : > { %7734 = vrot.lane.b32.xlu1 %v3959_v37, %s10314_s25  ;;  %v3963_v20 = vsub.f32 1.0, %v3962_v16  ;;  %9340 = vpow2.f32 %v1636_v5  ;;  %vm3968_vm13 = vmor %vm3966_vm12, %vm3967_vm10  ;;  %vm3971_vm14 = vcmp.eq.f32.partialorder %v3970_v13, 8.507059e+37  ;;  %v3973_v9 = vor.u32 1.1754944e-38, %v3972_v23  ;;  %v16432_v5 = vld [vmem:[#allocation82_spill] sm:$0xff] }
 0x648   : > { %v3077_v6 = vpop.f32.mrf.mxu1  ;;  %v1741_v36 = vmul.f32 %v9335_v59, %v11722_v7  ;;  %v4773_v40 = vmax.f32 %v4632_v57, 0.0  ;;  %vm3981_vm0 = vweird.f32 %v12365_v3 }
 0x649   : > { %v3176_v18 = vsub.f32 0.0, %v3077_v6  ;;  %v7707_v30 = vpop.permute.xlu0 %7706  ;;  %v3964_v53 = vmul.f32 %v9333_v17, %v3963_v20 }
 0x64a   : > { %v12383_v62 = vsel %vm1866_vm3, %v1801_v43, %v7707_v30 }
 0x64b   : > { %16431 = vst [vmem:[#allocation93_spill] sm:$0xff] %v12383_v62  ;;  %v9337_v44 = vpop.eup %9336  ;;  %v3281_v63 = vmul.f32 1.442695, %v3176_v18  ;;  %v3965_v16 = vadd.f32 %v9333_v17, %v3964_v53  ;;  %v1638_v18 = vmul.f32 1.442695, %v16432_v5  ;;  %v2800_v53 = vmax.f32 %v2727_v33, 0.0 }
 0x64c   : > { %v9339_v37 = vpop.eup %9338  ;;  %v12386_v51 = vadd.f32 1.0, %v9337_v44  ;;  %v4633_v6 = vpop.f32.mrf.mxu3 }
 0x64d   : > { %9342 = vpow2.f32 %v3281_v63  ;;  %v4634_v48 = vadd.f32 %v4633_v6, %v11403_v46  ;;  %v3969_v34 = vsel %vm3968_vm13, %v9333_v17, %v3965_v16  ;;  %v3977_v20 = vmul.f32 %v9339_v37, %v12365_v3  ;;  %v9341_v57 = vpop.eup %9340 }
 0x64e   : > { %9344 = vrcp.f32 %v12386_v51  ;;  %v2729_v43 = vpop.f32.mrf.mxu2  ;;  %v3974_v30 = vsel %vm3971_vm14, %v3973_v9, %v3969_v34  ;;  %v1805_v46 = vsel %vm1585_vm11, %v1741_v36, %v16428_v24  ;;  %vm3982_vm15 = vweird.f32 %v9339_v37  ;;  %v10197_v9 = vld [vmem:[%s10468_s13 + $0x78] sm:$0xff] }
 0x64f   : > { %v4774_v44 = vmax.f32 %v4634_v48, 0.0  ;;  %v2801_v13 = vmax.f32 %v2729_v43, 0.0  ;;  %7736 = vrot.lane.b32.xlu0 %v3974_v30, %s10314_s25  ;;  %v3978_v23 = vsub.f32 1.0, %v3977_v20  ;;  %v3985_v17 = vand.u32 2147483647, %v12365_v3  ;;  %vm3983_vm1 = vmor %vm3981_vm0, %vm3982_vm15 }
 0x650   : > { %v3080_v59 = vpop.f32.mrf.mxu1  ;;  %v3987_v63 = vand.u32 2147483648, %v12365_v3  ;;  %9346 = vpow2.f32 %v1638_v18  ;;  %vm3996_vm6 = vweird.f32 %v12386_v51 }
 0x651   : > { %v2835_v16 = vpack.c.bf16 %v2801_v13, %v2800_v53  ;;  %v3177_v6 = vsub.f32 0.0, %v3080_v59  ;;  %4675 = vmatmul.bf16.gmra.mxu3 %v10197_v9  ;;  %v7715_v33 = vpop.permute.xlu2 %7714  ;;  %v4831_v48 = vpack.c.bf16 %v4774_v44, %v4773_v40  ;;  %v3979_v34 = vmul.f32 %v9339_v37, %v3978_v23 }
 0x652   : > { %v12401_v20 = vsel %vm1866_vm3, %v1805_v46, %v7715_v33  ;;  %v3988_v40 = vor.u32 1.1754944e-38, %v3987_v63  ;;  %v1739_v44 = vmul.f32 %v9341_v57, %v11683_v32  ;;  %vm3986_vm4 = vcmp.eq.f32.partialorder %v3985_v17, 8.507059e+37 }
 0x653   : > { %16433 = vst [vmem:[#allocation59_spill] sm:$0xff] %v12401_v20  ;;  %v9343_v43 = vpop.eup %9342  ;;  %v3283_v30 = vmul.f32 1.442695, %v3177_v6  ;;  %8833 = vmatmul.msk.bf16.gmra.mxu1 %vm1287_vm2, %v2835_v16  ;;  %4959 = vmatmul.bf16.gmra.mxu2 %v4831_v48  ;;  %v3980_v24 = vadd.f32 %v9339_v37, %v3979_v34  ;;  %v16434_v16 = vld [vmem:[#allocation14_spill] sm:$0xff]  ;;  %v4000_v33 = vand.u32 2147483647, %v12386_v51 }
 0x654   : > { %v9345_v36 = vpop.eup %9344  ;;  %v12405_v53 = vadd.f32 1.0, %v9343_v43  ;;  %v4636_v13 = vpop.f32.mrf.mxu3  ;;  %v1646_v3 = vmul.f32 1.442695, %v16434_v16  ;;  %v4002_v63 = vand.u32 2147483648, %v12386_v51 }
 0x655   : > { %9348 = vpow2.f32 %v3283_v30  ;;  %v3984_v23 = vsel %vm3983_vm1, %v9339_v37, %v3980_v24  ;;  %v3992_v18 = vmul.f32 %v9345_v36, %v12386_v51  ;;  %v1803_v37 = vsel %vm1585_vm11, %v1739_v44, %v16430_v11 }
 0x656   : > { %9350 = vrcp.f32 %v12405_v53  ;;  %v2732_v59 = vpop.f32.mrf.mxu2  ;;  %v3989_v46 = vsel %vm3986_vm4, %v3988_v40, %v3984_v23  ;;  %v9347_v57 = vpop.eup %9346  ;;  %vm3997_vm5 = vweird.f32 %v9345_v36  ;;  %v4637_v43 = vadd.f32 %v4636_v13, %v11412_v1 }
 0x657   : > { %7738 = vrot.lane.b32.xlu2 %v3989_v46, %s10314_s25  ;;  %v3993_v6 = vsub.f32 1.0, %v3992_v18  ;;  %9352 = vpow2.f32 %v1646_v3  ;;  %v1740_v46 = vmul.f32 %v9347_v57, %v11648_v42  ;;  %vm3998_vm7 = vmor %vm3996_vm6, %vm3997_vm5  ;;  %vm4001_vm8 = vcmp.eq.f32.partialorder %v4000_v33, 8.507059e+37  ;;  %v16436_v3 = vld [vmem:[#allocation86_spill] sm:$0xff] }
 0x658   : > { %v3082_v9 = vpop.f32.mrf.mxu1  ;;  %v4003_v44 = vor.u32 1.1754944e-38, %v4002_v63  ;;  %v4775_v51 = vmax.f32 %v4637_v43, 0.0  ;;  %v4015_v63 = vand.u32 2147483647, %v12405_v53  ;;  %vm4011_vm10 = vweird.f32 %v12405_v53 }
 0x659   : > { %v3178_v48 = vsub.f32 0.0, %v3082_v9  ;;  %v7711_v17 = vpop.permute.xlu1 %7710  ;;  %v3994_v34 = vmul.f32 %v9345_v36, %v3993_v6 }
 0x65a   : > { %v12420_v30 = vsel %vm1866_vm3, %v1803_v37, %v7711_v17  ;;  %v2802_v17 = vmax.f32 %v2732_v59, 0.0  ;;  %vm4016_vm13 = vcmp.eq.f32.partialorder %v4015_v63, 8.507059e+37 }
 0x65b   : > { %16435 = vst [vmem:[#allocation66_spill] sm:$0xff] %v12420_v30  ;;  %v9349_v24 = vpop.eup %9348  ;;  %v3285_v40 = vmul.f32 1.442695, %v3178_v48  ;;  %v3995_v23 = vadd.f32 %v9345_v36, %v3994_v34  ;;  %v1642_v48 = vmul.f32 1.442695, %v16436_v3 }
 0x65c   : > { %v9351_v18 = vpop.eup %9350  ;;  %v12424_v9 = vadd.f32 1.0, %v9349_v24  ;;  %v4638_v11 = vpop.f32.mrf.mxu3 }
 0x65d   : > { %9354 = vpow2.f32 %v3285_v40  ;;  %v4639_v1 = vadd.f32 %v4638_v11, %v11421_v35  ;;  %v3999_v13 = vsel %vm3998_vm7, %v9345_v36, %v3995_v23  ;;  %v4007_v6 = vmul.f32 %v9351_v18, %v12405_v53  ;;  %v9353_v43 = vpop.eup %9352 }
 0x65e   : > { %9356 = vrcp.f32 %v12424_v9  ;;  %v2734_v37 = vpop.f32.mrf.mxu2  ;;  %v4004_v57 = vsel %vm4001_vm8, %v4003_v44, %v3999_v13  ;;  %v1804_v35 = vsel %vm1585_vm11, %v1740_v46, %v16432_v5  ;;  %vm4012_vm9 = vweird.f32 %v9351_v18  ;;  %v10198_v44 = vld [vmem:[%s10468_s13 + $0x80] sm:$0xff] }
 0x65f   : > { %v4776_v34 = vmax.f32 %v4639_v1, 0.0  ;;  %v2803_v24 = vmax.f32 %v2734_v37, 0.0  ;;  %7740 = vrot.lane.b32.xlu1 %v4004_v57, %s10314_s25  ;;  %v4008_v33 = vsub.f32 1.0, %v4007_v6  ;;  %v4017_v40 = vand.u32 2147483648, %v12405_v53  ;;  %vm4013_vm12 = vmor %vm4011_vm10, %vm4012_vm9 }
 0x660   : > { %v3085_v36 = vpop.f32.mrf.mxu1  ;;  %9358 = vpow2.f32 %v1642_v48  ;;  %vm4026_vm15 = vweird.f32 %v12424_v9 }
 0x661   : > { %v2836_v23 = vpack.c.bf16 %v2803_v24, %v2802_v17  ;;  %v3179_v11 = vsub.f32 0.0, %v3085_v36  ;;  %4680 = vmatmul.bf16.gmra.mxu3 %v10198_v44  ;;  %v7713_v59 = vpop.permute.xlu0 %7712  ;;  %v4832_v1 = vpack.c.bf16 %v4776_v34, %v4775_v51  ;;  %v4009_v13 = vmul.f32 %v9351_v18, %v4008_v33 }
 0x662   : > { %v12438_v6 = vsel %vm1866_vm3, %v1804_v35, %v7713_v59  ;;  %v1744_v17 = vmul.f32 %v9353_v43, %v11740_v8  ;;  %v4018_v51 = vor.u32 1.1754944e-38, %v4017_v40  ;;  %v4030_v44 = vand.u32 2147483647, %v12424_v9 }
 0x663   : > { %16437 = vst [vmem:[#allocation95_spill] sm:$0xff] %v12438_v6  ;;  %v9355_v37 = vpop.eup %9354  ;;  %v3287_v5 = vmul.f32 1.442695, %v3179_v11  ;;  %8834 = vmatmul.msk.bf16.gmra.mxu1 %vm1287_vm2, %v2836_v23  ;;  %4964 = vmatmul.bf16.gmra.mxu2 %v4832_v1  ;;  %v4010_v46 = vadd.f32 %v9351_v18, %v4009_v13  ;;  %v16438_v23 = vld [vmem:[#allocation88_spill] sm:$0xff]  ;;  %v4032_v59 = vand.u32 2147483648, %v12424_v9 }
 0x664   : > { %v9357_v57 = vpop.eup %9356  ;;  %v12443_v24 = vadd.f32 1.0, %v9355_v37  ;;  %v4641_v36 = vpop.f32.mrf.mxu3  ;;  %v1644_v53 = vmul.f32 1.442695, %v16438_v23  ;;  %v1808_v63 = vsel %vm1585_vm11, %v1744_v17, %v16434_v16  ;;  %v16439_v37 = vld [vmem:[#allocation104_spill] sm:$0xff]  ;;  %vm4031_vm1 = vcmp.eq.f32.partialorder %v4030_v44, 8.507059e+37  ;;  %v16442_v17 = vld [vmem:[#allocation105_spill] sm:$0xff] }
 0x665   : > { %9360 = vpow2.f32 %v3287_v5  ;;  %v4014_v34 = vsel %vm4013_vm12, %v9351_v18, %v4010_v46  ;;  %v4022_v48 = vmul.f32 %v9357_v57, %v12424_v9  ;;  %vm4027_vm14 = vweird.f32 %v9357_v57 }
 0x666   : > { %9362 = vrcp.f32 %v12443_v24  ;;  %v2737_v33 = vpop.f32.mrf.mxu2  ;;  %v4019_v35 = vsel %vm4016_vm13, %v4018_v51, %v4014_v34  ;;  %v9359_v40 = vpop.eup %9358  ;;  %v4642_v5 = vadd.f32 %v4641_v36, %v16439_v37  ;;  %vm4028_vm0 = vmor %vm4026_vm15, %vm4027_vm14  ;;  %v4033_v16 = vor.u32 1.1754944e-38, %v4032_v59 }
 0x667   : > { %7742 = vrot.lane.b32.xlu0 %v4019_v35, %s10314_s25  ;;  %v4023_v43 = vsub.f32 1.0, %v4022_v48  ;;  %9364 = vpow2.f32 %v1644_v53  ;;  %v16443_v53 = vld [vmem:[#allocation17_spill] sm:$0xff]  ;;  %v4045_v59 = vand.u32 2147483647, %v12443_v24  ;;  %vm4041_vm5 = vweird.f32 %v12443_v24 }
 0x668   : > { %v3087_v11 = vpop.f32.mrf.mxu1  ;;  %v4777_v9 = vmax.f32 %v4642_v5, 0.0 }
 0x669   : > { %v3180_v1 = vsub.f32 0.0, %v3087_v11  ;;  %v7721_v18 = vpop.permute.xlu2 %7720  ;;  %v4024_v13 = vmul.f32 %v9357_v57, %v4023_v43  ;;  %v16441_v11 = vld [vmem:[#allocation144_spill] sm:$0xff]  ;;  %vm4046_vm7 = vcmp.eq.f32.partialorder %v4045_v59, 8.507059e+37 }
 0x66a   : > { %v12457_v46 = vsel %vm1866_vm3, %v1808_v63, %v7721_v18  ;;  %v1742_v20 = vmul.f32 %v9359_v40, %v16441_v11 }
 0x66b   : > { %16440 = vst [vmem:[#allocation97_spill] sm:$0xff] %v12457_v46  ;;  %v9361_v51 = vpop.eup %9360  ;;  %v3289_v34 = vmul.f32 1.442695, %v3180_v1  ;;  %v4025_v48 = vadd.f32 %v9357_v57, %v4024_v13  ;;  %v1652_v1 = vmul.f32 1.442695, %v16443_v53  ;;  %v2804_v13 = vmax.f32 %v2737_v33, 0.0 }
 0x66c   : > { %v9363_v35 = vpop.eup %9362  ;;  %v12461_v30 = vadd.f32 1.0, %v9361_v51  ;;  %v4643_v49 = vpop.f32.mrf.mxu3 }
 0x66d   : > { %9366 = vpow2.f32 %v3289_v34  ;;  %v4644_v36 = vadd.f32 %v4643_v49, %v16442_v17  ;;  %v4029_v43 = vsel %vm4028_vm0, %v9357_v57, %v4025_v48  ;;  %v4037_v18 = vmul.f32 %v9363_v35, %v12443_v24  ;;  %v9365_v5 = vpop.eup %9364 }
 0x66e   : > { %9368 = vrcp.f32 %v12461_v30  ;;  %v2739_v63 = vpop.f32.mrf.mxu2  ;;  %v4034_v40 = vsel %vm4031_vm1, %v4033_v16, %v4029_v43  ;;  %v1806_v49 = vsel %vm1585_vm11, %v1742_v20, %v16436_v3  ;;  %vm4042_vm4 = vweird.f32 %v9363_v35  ;;  %v10199_v16 = vld [vmem:[%s10468_s13 + $0x88] sm:$0xff] }
 0x66f   : > { %v4778_v37 = vmax.f32 %v4644_v36, 0.0  ;;  %v2805_v51 = vmax.f32 %v2739_v63, 0.0  ;;  %7744 = vrot.lane.b32.xlu2 %v4034_v40, %s10314_s25  ;;  %v4038_v44 = vsub.f32 1.0, %v4037_v18  ;;  %v4047_v34 = vand.u32 2147483648, %v12443_v24  ;;  %vm4043_vm6 = vmor %vm4041_vm5, %vm4042_vm4 }
 0x670   : > { %v3090_v57 = vpop.f32.mrf.mxu1  ;;  %9370 = vpow2.f32 %v1652_v1  ;;  %vm4056_vm8 = vweird.f32 %v12461_v30 }
 0x671   : > { %v2837_v48 = vpack.c.bf16 %v2805_v51, %v2804_v13  ;;  %v3181_v17 = vsub.f32 0.0, %v3090_v57  ;;  %4685 = vmatmul.bf16.gmra.mxu3 %v10199_v16  ;;  %v7717_v33 = vpop.permute.xlu1 %7716  ;;  %v4833_v36 = vpack.c.bf16 %v4778_v37, %v4777_v9  ;;  %v4039_v43 = vmul.f32 %v9363_v35, %v4038_v44  ;;  %v16445_v37 = vld [vmem:[#allocation138_spill] sm:$0xff] }
 0x672   : > { %v12475_v18 = vsel %vm1866_vm3, %v1806_v49, %v7717_v33  ;;  %v4048_v9 = vor.u32 1.1754944e-38, %v4047_v34  ;;  %v1743_v44 = vmul.f32 %v9365_v5, %v16445_v37  ;;  %v4062_v34 = vand.u32 2147483648, %v12461_v30 }
 0x673   : > { %16444 = vst [vmem:[#allocation63_spill] sm:$0xff] %v12475_v18  ;;  %v9367_v63 = vpop.eup %9366  ;;  %v3291_v20 = vmul.f32 1.442695, %v3181_v17  ;;  %8835 = vmatmul.msk.bf16.gmra.mxu1 %vm1287_vm2, %v2837_v48  ;;  %4969 = vmatmul.bf16.gmra.mxu2 %v4833_v36  ;;  %v4040_v3 = vadd.f32 %v9363_v35, %v4039_v43  ;;  %v16446_v17 = vld [vmem:[#allocation15_spill] sm:$0xff]  ;;  %v4060_v36 = vand.u32 2147483647, %v12461_v30 }
 0x674   : > { %v9369_v40 = vpop.eup %9368  ;;  %v12479_v13 = vadd.f32 1.0, %v9367_v63  ;;  %v4646_v51 = vpop.f32.mrf.mxu3  ;;  %v1648_v24 = vmul.f32 1.442695, %v16446_v17 }
 0x675   : > { %9372 = vpow2.f32 %v3291_v20  ;;  %v4044_v49 = vsel %vm4043_vm6, %v9363_v35, %v4040_v3  ;;  %v4052_v1 = vmul.f32 %v9369_v40, %v12461_v30  ;;  %v1807_v35 = vsel %vm1585_vm11, %v1743_v44, %v16438_v23  ;;  %v16447_v20 = vld [vmem:[#allocation106_spill] sm:$0xff] }
 0x676   : > { %9374 = vrcp.f32 %v12479_v13  ;;  %v4930_v57 = vpop.f32.mrf.mxu2  ;;  %v4049_v48 = vsel %vm4046_vm7, %v4048_v9, %v4044_v49  ;;  %v9371_v5 = vpop.eup %9370  ;;  %vm4057_vm2 = vweird.f32 %v9369_v40  ;;  %v4647_v3 = vadd.f32 %v4646_v51, %v16447_v20  ;;  %v16450_v51 = vld [vmem:[#allocation107_spill] sm:$0xff] }
 0x677   : > { %7746 = vrot.lane.b32.xlu1 %v4049_v48, %s10314_s25  ;;  %v4053_v16 = vsub.f32 1.0, %v4052_v1  ;;  %9376 = vpow2.f32 %v1648_v24  ;;  %vm4058_vm9 = vmor %vm4056_vm8, %vm4057_vm2  ;;  %vm4061_vm10 = vcmp.eq.f32.partialorder %v4060_v36, 8.507059e+37  ;;  %v4063_v44 = vor.u32 1.1754944e-38, %v4062_v34  ;;  %v16451_v24 = vld [vmem:[#allocation16_spill] sm:$0xff] }
 0x678   : > { %v3092_v33 = vpop.f32.mrf.mxu1  ;;  %v4779_v30 = vmax.f32 %v4647_v3, 0.0  ;;  %v5090_v20 = vmax.f32 %v4930_v57, 0.0  ;;  %vm4071_vm13 = vweird.f32 %v12479_v13 }
 0x679   : > { %v3182_v43 = vsub.f32 0.0, %v3092_v33  ;;  %v7719_v59 = vpop.permute.xlu0 %7718  ;;  %v4054_v63 = vmul.f32 %v9369_v40, %v4053_v16  ;;  %v16449_v33 = vld [vmem:[#allocation153_spill] sm:$0xff] }
 0x67a   : > { %v12494_v9 = vsel %vm1866_vm3, %v1807_v35, %v7719_v59  ;;  %v1747_v18 = vmul.f32 %v9371_v5, %v16449_v33  ;;  %v16461_v33 = vld [vmem:[#allocation156_spill] sm:$0xff] }
 0x67b   : > { %16448 = vst [vmem:[#allocation65_spill] sm:$0xff] %v12494_v9  ;;  %v9373_v49 = vpop.eup %9372  ;;  %v3293_v1 = vmul.f32 1.442695, %v3182_v43  ;;  %v4055_v48 = vadd.f32 %v9369_v40, %v4054_v63  ;;  %v1650_v43 = vmul.f32 1.442695, %v16451_v24 }
 0x67c   : > { %v9375_v46 = vpop.eup %9374  ;;  %v12498_v6 = vadd.f32 1.0, %v9373_v49  ;;  %v4648_v23 = vpop.f32.mrf.mxu3 }
 0x67d   : > { %9378 = vpow2.f32 %v3293_v1  ;;  %v4649_v16 = vadd.f32 %v4648_v23, %v16450_v51  ;;  %v4059_v35 = vsel %vm4058_vm9, %v9369_v40, %v4055_v48  ;;  %v4067_v59 = vmul.f32 %v9375_v46, %v12479_v13  ;;  %v9377_v3 = vpop.eup %9376 }
 0x67e   : > { %9380 = vrcp.f32 %v12498_v6  ;;  %v4932_v63 = vpop.f32.mrf.mxu2  ;;  %v4064_v5 = vsel %vm4061_vm10, %v4063_v44, %v4059_v35  ;;  %v1811_v40 = vsel %vm1585_vm11, %v1747_v18, %v16443_v53  ;;  %vm4072_vm12 = vweird.f32 %v9375_v46  ;;  %v10200_v44 = vld [vmem:[%s10468_s13 + $0x90] sm:$0xff] }
 0x67f   : > { %v4780_v49 = vmax.f32 %v4649_v16, 0.0  ;;  %v5091_v9 = vmax.f32 %v4932_v63, 0.0  ;;  %7748 = vrot.lane.b32.xlu0 %v4064_v5, %s10314_s25  ;;  %v4068_v36 = vsub.f32 1.0, %v4067_v59  ;;  %v4075_v1 = vand.u32 2147483647, %v12479_v13  ;;  %vm4073_vm14 = vmor %vm4071_vm13, %vm4072_vm12 }
 0x680   : > { %v3095_v34 = vpop.f32.mrf.mxu1  ;;  %v4077_v48 = vand.u32 2147483648, %v12479_v13  ;;  %9382 = vpow2.f32 %v1650_v43  ;;  %vm4086_vm1 = vweird.f32 %v12498_v6 }
 0x681   : > { %v5154_v23 = vpack.c.bf16 %v5091_v9, %v5090_v20  ;;  %v3183_v51 = vsub.f32 0.0, %v3095_v34  ;;  %4690 = vmatmul.bf16.gmra.mxu3 %v10200_v44  ;;  %v7727_v57 = vpop.permute.xlu2 %7726  ;;  %v4834_v16 = vpack.c.bf16 %v4780_v49, %v4779_v30  ;;  %v4069_v35 = vmul.f32 %v9375_v46, %v4068_v36 }
 0x682   : > { %v12512_v59 = vsel %vm1866_vm3, %v1811_v40, %v7727_v57  ;;  %v1745_v9 = vmul.f32 %v9377_v3, %v16453_v31  ;;  %v4078_v30 = vor.u32 1.1754944e-38, %v4077_v48  ;;  %vm4076_vm15 = vcmp.eq.f32.partialorder %v4075_v1, 8.507059e+37 }
 0x683   : > { %16452 = vst [vmem:[#allocation99_spill] sm:$0xff] %v12512_v59  ;;  %v9379_v63 = vpop.eup %9378  ;;  %v3295_v5 = vmul.f32 1.442695, %v3183_v51  ;;  %4974 = vmatmul.bf16.gmra.mxu2 %v4834_v16  ;;  %5258 = vmatmul.bf16.vlgmr.msra.gmra.mxu1 %v5154_v23  ;;  %v4070_v53 = vadd.f32 %v9375_v46, %v4069_v35  ;;  %v16454_v23 = vld [vmem:[#allocation20_spill] sm:$0xff]  ;;  %v4090_v44 = vand.u32 2147483647, %v12498_v6 }
 0x684   : > { %v9381_v18 = vpop.eup %9380  ;;  %v12516_v20 = vadd.f32 1.0, %v9379_v63  ;;  %v4651_v34 = vpop.f32.mrf.mxu3  ;;  %v1658_v13 = vmul.f32 1.442695, %v16454_v23  ;;  %v4092_v57 = vand.u32 2147483648, %v12498_v6  ;;  %v16455_v63 = vld [vmem:[#allocation108_spill] sm:$0xff] }
 0x685   : > { %9384 = vpow2.f32 %v3295_v5  ;;  %v4074_v49 = vsel %vm4073_vm14, %v9375_v46, %v4070_v53  ;;  %v4082_v43 = vmul.f32 %v9381_v18, %v12498_v6  ;;  %v1809_v46 = vsel %vm1585_vm11, %v1745_v9, %v16446_v17 }
 0x686   : > { %9386 = vrcp.f32 %v12516_v20  ;;  %v4935_v36 = vpop.f32.mrf.mxu2  ;;  %v4079_v40 = vsel %vm4076_vm15, %v4078_v30, %v4074_v49  ;;  %v9383_v48 = vpop.eup %9382  ;;  %vm4087_vm0 = vweird.f32 %v9381_v18  ;;  %v4652_v5 = vadd.f32 %v4651_v34, %v16455_v63  ;;  %v16458_v34 = vld [vmem:[#allocation109_spill] sm:$0xff] }
 0x687   : > { %7750 = vrot.lane.b32.xlu2 %v4079_v40, %s10314_s25  ;;  %v4083_v3 = vsub.f32 1.0, %v4082_v43  ;;  %9388 = vpow2.f32 %v1658_v13  ;;  %vm4088_vm4 = vmor %vm4086_vm1, %vm4087_vm0  ;;  %vm4091_vm5 = vcmp.eq.f32.partialorder %v4090_v44, 8.507059e+37  ;;  %v4093_v9 = vor.u32 1.1754944e-38, %v4092_v57  ;;  %v16459_v13 = vld [vmem:[#allocation18_spill] sm:$0xff] }
 0x688   : > { %v3097_v51 = vpop.f32.mrf.mxu1  ;;  %v4781_v6 = vmax.f32 %v4652_v5, 0.0  ;;  %v5092_v63 = vmax.f32 %v4935_v36, 0.0  ;;  %vm4101_vm7 = vweird.f32 %v12516_v20 }
 0x689   : > { %v3184_v16 = vsub.f32 0.0, %v3097_v51  ;;  %v7723_v1 = vpop.permute.xlu1 %7722  ;;  %v4084_v35 = vmul.f32 %v9381_v18, %v4083_v3  ;;  %v16457_v51 = vld [vmem:[#allocation142_spill] sm:$0xff] }
 0x68a   : > { %v12530_v53 = vsel %vm1866_vm3, %v1809_v46, %v7723_v1  ;;  %v1746_v59 = vmul.f32 %v9383_v48, %v16457_v51 }
 0x68b   : > { %16456 = vst [vmem:[#allocation100_spill] sm:$0xff] %v12530_v53  ;;  %v9385_v30 = vpop.eup %9384  ;;  %v3297_v49 = vmul.f32 1.442695, %v3184_v16  ;;  %v4085_v43 = vadd.f32 %v9381_v18, %v4084_v35  ;;  %v1654_v16 = vmul.f32 1.442695, %v16459_v13 }
 0x68c   : > { %v9387_v40 = vpop.eup %9386  ;;  %v12534_v62 = vadd.f32 1.0, %v9385_v30  ;;  %v4653_v17 = vpop.f32.mrf.mxu3 }
 0x68d   : > { %9390 = vpow2.f32 %v3297_v49  ;;  %v4654_v3 = vadd.f32 %v4653_v17, %v16458_v34  ;;  %v4089_v46 = vsel %vm4088_vm4, %v9381_v18, %v4085_v43  ;;  %v4097_v1 = vmul.f32 %v9387_v40, %v12516_v20  ;;  %v9389_v5 = vpop.eup %9388 }
 0x68e   : > { %9392 = vrcp.f32 %v12534_v62  ;;  %v4937_v35 = vpop.f32.mrf.mxu2  ;;  %v4094_v48 = vsel %vm4091_vm5, %v4093_v9, %v4089_v46  ;;  %v1810_v18 = vsel %vm1585_vm11, %v1746_v59, %v16451_v24  ;;  %vm4102_vm6 = vweird.f32 %v9387_v40  ;;  %v10201_v9 = vld [vmem:[%s10468_s13 + $0x98] sm:$0xff] }
 0x68f   : > { %v4782_v30 = vmax.f32 %v4654_v3, 0.0  ;;  %v5093_v53 = vmax.f32 %v4937_v35, 0.0  ;;  %7752 = vrot.lane.b32.xlu1 %v4094_v48, %s10314_s25  ;;  %v4098_v44 = vsub.f32 1.0, %v4097_v1  ;;  %v4105_v49 = vand.u32 2147483647, %v12516_v20  ;;  %vm4103_vm2 = vmor %vm4101_vm7, %vm4102_vm6 }
 0x690   : > { %v3100_v57 = vpop.f32.mrf.mxu1  ;;  %v4107_v43 = vand.u32 2147483648, %v12516_v20  ;;  %9394 = vpow2.f32 %v1654_v16  ;;  %vm4116_vm10 = vweird.f32 %v12534_v62 }
 0x691   : > { %v5155_v17 = vpack.c.bf16 %v5093_v53, %v5092_v63  ;;  %v3185_v34 = vsub.f32 0.0, %v3100_v57  ;;  %4695 = vmatmul.bf16.gmra.mxu3 %v10201_v9  ;;  %v7725_v36 = vpop.permute.xlu0 %7724  ;;  %v4835_v3 = vpack.c.bf16 %v4782_v30, %v4781_v6  ;;  %v4099_v46 = vmul.f32 %v9387_v40, %v4098_v44 }
 0x692   : > { %v12548_v1 = vsel %vm1866_vm3, %v1810_v18, %v7725_v36  ;;  %v1750_v53 = vmul.f32 %v9389_v5, %v16461_v33  ;;  %v4108_v6 = vor.u32 1.1754944e-38, %v4107_v43  ;;  %vm4106_vm8 = vcmp.eq.f32.partialorder %v4105_v49, 8.507059e+37 }
 0x693   : > { %16460 = vst [vmem:[#allocation72_spill] sm:$0xff] %v12548_v1  ;;  %v9391_v35 = vpop.eup %9390  ;;  %v3299_v48 = vmul.f32 1.442695, %v3185_v34  ;;  %4979 = vmatmul.bf16.gmra.mxu2 %v4835_v3  ;;  %5263 = vmatmul.bf16.gmra.mxu1 %v5155_v17  ;;  %v4100_v24 = vadd.f32 %v9387_v40, %v4099_v46  ;;  %v16462_v17 = vld [vmem:[#allocation19_spill] sm:$0xff]  ;;  %v4120_v9 = vand.u32 2147483647, %v12534_v62 }
 0x694   : > { %v9393_v59 = vpop.eup %9392  ;;  %v12552_v63 = vadd.f32 1.0, %v9391_v35  ;;  %v4656_v57 = vpop.f32.mrf.mxu3  ;;  %v1656_v20 = vmul.f32 1.442695, %v16462_v17  ;;  %v4122_v36 = vand.u32 2147483648, %v12534_v62  ;;  %v1814_v49 = vsel %vm1585_vm11, %v1750_v53, %v16454_v23  ;;  %v16463_v35 = vld [vmem:[#allocation110_spill] sm:$0xff]  ;;  %v16466_v53 = vld [vmem:[#allocation111_spill] sm:$0xff] }
 0x695   : > { %9396 = vpow2.f32 %v3299_v48  ;;  %v4104_v30 = vsel %vm4103_vm2, %v9387_v40, %v4100_v24  ;;  %v4112_v16 = vmul.f32 %v9393_v59, %v12534_v62  ;;  %vm4117_vm9 = vweird.f32 %v9393_v59 }
 0x696   : > { %9398 = vrcp.f32 %v12552_v63  ;;  %v4940_v44 = vpop.f32.mrf.mxu2  ;;  %v4109_v18 = vsel %vm4106_vm8, %v4108_v6, %v4104_v30  ;;  %v9395_v43 = vpop.eup %9394  ;;  %v4657_v48 = vadd.f32 %v4656_v57, %v16463_v35  ;;  %vm4118_vm12 = vmor %vm4116_vm10, %vm4117_vm9  ;;  %vm4121_vm13 = vcmp.eq.f32.partialorder %v4120_v9, 8.507059e+37 }
 0x697   : > { %7754 = vrot.lane.b32.xlu0 %v4109_v18, %s10314_s25  ;;  %v4113_v5 = vsub.f32 1.0, %v4112_v16  ;;  %9400 = vpow2.f32 %v1656_v20  ;;  %v4123_v23 = vor.u32 1.1754944e-38, %v4122_v36  ;;  %v16467_v20 = vld [vmem:[#allocation23_spill] sm:$0xff]  ;;  %vm4131_vm15 = vweird.f32 %v12552_v63 }
 0x698   : > { %v3102_v34 = vpop.f32.mrf.mxu1  ;;  %v4783_v62 = vmax.f32 %v4657_v48, 0.0 }
 0x699   : > { %v3186_v3 = vsub.f32 0.0, %v3102_v34  ;;  %v7733_v40 = vpop.permute.xlu2 %7732  ;;  %v4114_v46 = vmul.f32 %v9393_v59, %v4113_v5  ;;  %v16465_v34 = vld [vmem:[#allocation151_spill] sm:$0xff] }
 0x69a   : > { %v12566_v24 = vsel %vm1866_vm3, %v1814_v49, %v7733_v40  ;;  %v1748_v1 = vmul.f32 %v9395_v43, %v16465_v34 }
 0x69b   : > { %16464 = vst [vmem:[#allocation68_spill] sm:$0xff] %v12566_v24  ;;  %v9397_v6 = vpop.eup %9396  ;;  %v3301_v30 = vmul.f32 1.442695, %v3186_v3  ;;  %v4115_v16 = vadd.f32 %v9393_v59, %v4114_v46  ;;  %v1664_v3 = vmul.f32 1.442695, %v16467_v20  ;;  %v5094_v46 = vmax.f32 %v4940_v44, 0.0 }
 0x69c   : > { %v9399_v18 = vpop.eup %9398  ;;  %v12570_v33 = vadd.f32 1.0, %v9397_v6  ;;  %v4658_v51 = vpop.f32.mrf.mxu3  ;;  %v16469_v24 = vld [vmem:[#allocation146_spill] sm:$0xff] }
 0x69d   : > { %9402 = vpow2.f32 %v3301_v30  ;;  %v4659_v57 = vadd.f32 %v4658_v51, %v16466_v53  ;;  %v4119_v5 = vsel %vm4118_vm12, %v9393_v59, %v4115_v16  ;;  %v4127_v40 = vmul.f32 %v9399_v18, %v12552_v63  ;;  %v9401_v48 = vpop.eup %9400 }
 0x69e   : > { %9404 = vrcp.f32 %v12570_v33  ;;  %v4942_v49 = vpop.f32.mrf.mxu2  ;;  %v4124_v43 = vsel %vm4121_vm13, %v4123_v23, %v4119_v5  ;;  %v1812_v51 = vsel %vm1585_vm11, %v1748_v1, %v16459_v13  ;;  %vm4132_vm14 = vweird.f32 %v9399_v18  ;;  %v10202_v23 = vld [vmem:[%s10468_s13 + $0xa0] sm:$0xff] }
 0x69f   : > { %v4784_v35 = vmax.f32 %v4659_v57, 0.0  ;;  %v5095_v6 = vmax.f32 %v4942_v49, 0.0  ;;  %7756 = vrot.lane.b32.xlu2 %v4124_v43, %s10314_s25  ;;  %v4128_v9 = vsub.f32 1.0, %v4127_v40  ;;  %v4135_v59 = vand.u32 2147483647, %v12552_v63  ;;  %vm4133_vm0 = vmor %vm4131_vm15, %vm4132_vm14 }
 0x6a0   : > { %v3105_v36 = vpop.f32.mrf.mxu1  ;;  %v4137_v30 = vand.u32 2147483648, %v12552_v63  ;;  %9406 = vpow2.f32 %v1664_v3  ;;  %vm4146_vm5 = vweird.f32 %v12570_v33 }
 0x6a1   : > { %v5156_v16 = vpack.c.bf16 %v5095_v6, %v5094_v46  ;;  %v3187_v53 = vsub.f32 0.0, %v3105_v36  ;;  %4700 = vmatmul.bf16.gmra.mxu3 %v10202_v23  ;;  %v7729_v44 = vpop.permute.xlu1 %7728  ;;  %v4836_v57 = vpack.c.bf16 %v4784_v35, %v4783_v62  ;;  %v4129_v5 = vmul.f32 %v9399_v18, %v4128_v9 }
 0x6a2   : > { %v12584_v40 = vsel %vm1866_vm3, %v1812_v51, %v7729_v44  ;;  %v1749_v46 = vmul.f32 %v9401_v48, %v16469_v24  ;;  %v4138_v62 = vor.u32 1.1754944e-38, %v4137_v30  ;;  %vm4136_vm1 = vcmp.eq.f32.partialorder %v4135_v59, 8.507059e+37 }
 0x6a3   : > { %16468 = vst [vmem:[#allocation101_spill] sm:$0xff] %v12584_v40  ;;  %v9403_v49 = vpop.eup %9402  ;;  %v3303_v43 = vmul.f32 1.442695, %v3187_v53  ;;  %4984 = vmatmul.bf16.gmra.mxu2 %v4836_v57  ;;  %5268 = vmatmul.bf16.gmra.mxu1 %v5156_v16  ;;  %v4130_v13 = vadd.f32 %v9399_v18, %v4129_v5  ;;  %v16470_v16 = vld [vmem:[#allocation21_spill] sm:$0xff]  ;;  %v4150_v23 = vand.u32 2147483647, %v12570_v33 }
 0x6a4   : > { %v9405_v1 = vpop.eup %9404  ;;  %v12588_v6 = vadd.f32 1.0, %v9403_v49  ;;  %v4661_v36 = vpop.f32.mrf.mxu3  ;;  %v1660_v63 = vmul.f32 1.442695, %v16470_v16  ;;  %v4152_v44 = vand.u32 2147483648, %v12570_v33  ;;  %v16471_v49 = vld [vmem:[#allocation112_spill] sm:$0xff] }
 0x6a5   : > { %9408 = vpow2.f32 %v3303_v43  ;;  %v4134_v35 = vsel %vm4133_vm0, %v9399_v18, %v4130_v13  ;;  %v4142_v3 = vmul.f32 %v9405_v1, %v12570_v33  ;;  %v1813_v18 = vsel %vm1585_vm11, %v1749_v46, %v16462_v17 }
 0x6a6   : > { %9410 = vrcp.f32 %v12588_v6  ;;  %v4945_v9 = vpop.f32.mrf.mxu2  ;;  %v4139_v51 = vsel %vm4136_vm1, %v4138_v62, %v4134_v35  ;;  %v9407_v30 = vpop.eup %9406  ;;  %vm4147_vm4 = vweird.f32 %v9405_v1  ;;  %v4662_v43 = vadd.f32 %v4661_v36, %v16471_v49  ;;  %v16474_v36 = vld [vmem:[#allocation113_spill] sm:$0xff] }
 0x6a7   : > { %7758 = vrot.lane.b32.xlu1 %v4139_v51, %s10314_s25  ;;  %v4143_v48 = vsub.f32 1.0, %v4142_v3  ;;  %9412 = vpow2.f32 %v1660_v63  ;;  %vm4148_vm6 = vmor %vm4146_vm5, %vm4147_vm4  ;;  %vm4151_vm7 = vcmp.eq.f32.partialorder %v4150_v23, 8.507059e+37  ;;  %v4153_v46 = vor.u32 1.1754944e-38, %v4152_v44  ;;  %v16475_v63 = vld [vmem:[#allocation22_spill] sm:$0xff] }
 0x6a8   : > { %v3107_v53 = vpop.f32.mrf.mxu1  ;;  %v4785_v33 = vmax.f32 %v4662_v43, 0.0  ;;  %v5096_v49 = vmax.f32 %v4945_v9, 0.0  ;;  %vm4161_vm8 = vweird.f32 %v12588_v6 }
 0x6a9   : > { %v3188_v57 = vsub.f32 0.0, %v3107_v53  ;;  %v7731_v59 = vpop.permute.xlu0 %7730  ;;  %v4144_v5 = vmul.f32 %v9405_v1, %v4143_v48  ;;  %v16473_v53 = vld [vmem:[#allocation159_spill] sm:$0xff] }
 0x6aa   : > { %v12602_v13 = vsel %vm1866_vm3, %v1813_v18, %v7731_v59  ;;  %v1753_v40 = vmul.f32 %v9407_v30, %v16473_v53  ;;  %v16477_v53 = vld [vmem:[#allocation154_spill] sm:$0xff] }
 0x6ab   : > { %16472 = vst [vmem:[#allocation70_spill] sm:$0xff] %v12602_v13  ;;  %v9409_v62 = vpop.eup %9408  ;;  %v3305_v35 = vmul.f32 1.442695, %v3188_v57  ;;  %v4145_v3 = vadd.f32 %v9405_v1, %v4144_v5  ;;  %v1662_v57 = vmul.f32 1.442695, %v16475_v63 }
 0x6ac   : > { %v9411_v51 = vpop.eup %9410  ;;  %v12606_v24 = vadd.f32 1.0, %v9409_v62  ;;  %v4663_v17 = vpop.f32.mrf.mxu3 }
 0x6ad   : > { %9414 = vpow2.f32 %v3305_v35  ;;  %v4664_v48 = vadd.f32 %v4663_v17, %v16474_v36  ;;  %v4149_v18 = vsel %vm4148_vm6, %v9405_v1, %v4145_v3  ;;  %v4157_v59 = vmul.f32 %v9411_v51, %v12588_v6  ;;  %v9413_v43 = vpop.eup %9412 }
 0x6ae   : > { %9416 = vrcp.f32 %v12606_v24  ;;  %v4947_v5 = vpop.f32.mrf.mxu2  ;;  %v4154_v30 = vsel %vm4151_vm7, %v4153_v46, %v4149_v18  ;;  %v1817_v1 = vsel %vm1585_vm11, %v1753_v40, %v16467_v20  ;;  %vm4162_vm2 = vweird.f32 %v9411_v51  ;;  %v10203_v46 = vld [vmem:[%s10468_s13 + $0xa8] sm:$0xff] }
 0x6af   : > { %v4786_v62 = vmax.f32 %v4664_v48, 0.0  ;;  %v5097_v13 = vmax.f32 %v4947_v5, 0.0  ;;  %7760 = vrot.lane.b32.xlu0 %v4154_v30, %s10314_s25  ;;  %v4158_v23 = vsub.f32 1.0, %v4157_v59  ;;  %v4165_v35 = vand.u32 2147483647, %v12588_v6  ;;  %vm4163_vm9 = vmor %vm4161_vm8, %vm4162_vm2 }
 0x6b0   : > { %v3110_v44 = vpop.f32.mrf.mxu1  ;;  %v4167_v3 = vand.u32 2147483648, %v12588_v6  ;;  %9418 = vpow2.f32 %v1662_v57  ;;  %vm4176_vm13 = vweird.f32 %v12606_v24 }
 0x6b1   : > { %v5157_v17 = vpack.c.bf16 %v5097_v13, %v5096_v49  ;;  %v3189_v36 = vsub.f32 0.0, %v3110_v44  ;;  %4705 = vmatmul.bf16.gmra.mxu3 %v10203_v46  ;;  %v7739_v9 = vpop.permute.xlu2 %7738  ;;  %v4837_v48 = vpack.c.bf16 %v4786_v62, %v4785_v33  ;;  %v4159_v18 = vmul.f32 %v9411_v51, %v4158_v23 }
 0x6b2   : > { %v12620_v59 = vsel %vm1866_vm3, %v1817_v1, %v7739_v9  ;;  %v1751_v13 = vmul.f32 %v9413_v43, %v16477_v53  ;;  %v4168_v33 = vor.u32 1.1754944e-38, %v4167_v3  ;;  %vm4166_vm10 = vcmp.eq.f32.partialorder %v4165_v35, 8.507059e+37 }
 0x6b3   : > { %16476 = vst [vmem:[#allocation78_spill] sm:$0xff] %v12620_v59  ;;  %v9415_v5 = vpop.eup %9414  ;;  %v3307_v30 = vmul.f32 1.442695, %v3189_v36  ;;  %4989 = vmatmul.bf16.gmra.mxu2 %v4837_v48  ;;  %5273 = vmatmul.bf16.gmra.mxu1 %v5157_v17  ;;  %v4160_v20 = vadd.f32 %v9411_v51, %v4159_v18  ;;  %v16478_v17 = vld [vmem:[#allocation26_spill] sm:$0xff]  ;;  %v4180_v46 = vand.u32 2147483647, %v12606_v24 }
 0x6b4   : > { %v9417_v40 = vpop.eup %9416  ;;  %v12624_v49 = vadd.f32 1.0, %v9415_v5  ;;  %v4666_v44 = vpop.f32.mrf.mxu3  ;;  %v1670_v6 = vmul.f32 1.442695, %v16478_v17  ;;  %v4182_v9 = vand.u32 2147483648, %v12606_v24  ;;  %v16479_v5 = vld [vmem:[#allocation114_spill] sm:$0xff] }
 0x6b5   : > { %9420 = vpow2.f32 %v3307_v30  ;;  %v4164_v62 = vsel %vm4163_vm9, %v9411_v51, %v4160_v20  ;;  %v4172_v57 = vmul.f32 %v9417_v40, %v12606_v24  ;;  %v1815_v51 = vsel %vm1585_vm11, %v1751_v13, %v16470_v16 }
 0x6b6   : > { %9422 = vrcp.f32 %v12624_v49  ;;  %v4950_v23 = vpop.f32.mrf.mxu2  ;;  %v4169_v1 = vsel %vm4166_vm10, %v4168_v33, %v4164_v62  ;;  %v9419_v3 = vpop.eup %9418  ;;  %vm4177_vm12 = vweird.f32 %v9417_v40  ;;  %v4667_v30 = vadd.f32 %v4666_v44, %v16479_v5  ;;  %v16482_v44 = vld [vmem:[#allocation115_spill] sm:$0xff] }
 0x6b7   : > { %7762 = vrot.lane.b32.xlu2 %v4169_v1, %s10314_s25  ;;  %v4173_v43 = vsub.f32 1.0, %v4172_v57  ;;  %9424 = vpow2.f32 %v1670_v6  ;;  %vm4178_vm14 = vmor %vm4176_vm13, %vm4177_vm12  ;;  %vm4181_vm15 = vcmp.eq.f32.partialorder %v4180_v46, 8.507059e+37  ;;  %v4183_v13 = vor.u32 1.1754944e-38, %v4182_v9  ;;  %v16483_v6 = vld [vmem:[#allocation24_spill] sm:$0xff] }
 0x6b8   : > { %v3112_v36 = vpop.f32.mrf.mxu1  ;;  %v4787_v24 = vmax.f32 %v4667_v30, 0.0  ;;  %v5098_v5 = vmax.f32 %v4950_v23, 0.0  ;;  %vm4191_vm1 = vweird.f32 %v12624_v49 }
 0x6b9   : > { %v3190_v48 = vsub.f32 0.0, %v3112_v36  ;;  %v7735_v35 = vpop.permute.xlu1 %7734  ;;  %v4174_v18 = vmul.f32 %v9417_v40, %v4173_v43  ;;  %v16481_v36 = vld [vmem:[#allocation149_spill] sm:$0xff] }
 0x6ba   : > { %v12638_v20 = vsel %vm1866_vm3, %v1815_v51, %v7735_v35  ;;  %v1752_v59 = vmul.f32 %v9419_v3, %v16481_v36  ;;  %v16485_v36 = vld [vmem:[#allocation67_spill] sm:$0xff] }
 0x6bb   : > { %16480 = vst [vmem:[#allocation74_spill] sm:$0xff] %v12638_v20  ;;  %v9421_v33 = vpop.eup %9420  ;;  %v3309_v62 = vmul.f32 1.442695, %v3190_v48  ;;  %v4175_v57 = vadd.f32 %v9417_v40, %v4174_v18  ;;  %v1666_v48 = vmul.f32 1.442695, %v16483_v6 }
 0x6bc   : > { %v9423_v1 = vpop.eup %9422  ;;  %v12642_v53 = vadd.f32 1.0, %v9421_v33  ;;  %v4668_v16 = vpop.f32.mrf.mxu3 }
 0x6bd   : > { %9426 = vpow2.f32 %v3309_v62  ;;  %v4669_v43 = vadd.f32 %v4668_v16, %v16482_v44  ;;  %v4179_v51 = vsel %vm4178_vm14, %v9417_v40, %v4175_v57  ;;  %v4187_v35 = vmul.f32 %v9423_v1, %v12624_v49  ;;  %v9425_v30 = vpop.eup %9424 }
 0x6be   : > { %9428 = vrcp.f32 %v12642_v53  ;;  %v4952_v18 = vpop.f32.mrf.mxu2  ;;  %v4184_v3 = vsel %vm4181_vm15, %v4183_v13, %v4179_v51  ;;  %v1816_v40 = vsel %vm1585_vm11, %v1752_v59, %v16475_v63  ;;  %vm4192_vm0 = vweird.f32 %v9423_v1  ;;  %v10204_v13 = vld [vmem:[%s10468_s13 + $0xb0] sm:$0xff] }
 0x6bf   : > { %v4788_v33 = vmax.f32 %v4669_v43, 0.0  ;;  %v5099_v20 = vmax.f32 %v4952_v18, 0.0  ;;  %7764 = vrot.lane.b32.xlu1 %v4184_v3, %s10314_s25  ;;  %v4188_v46 = vsub.f32 1.0, %v4187_v35  ;;  %v4195_v62 = vand.u32 2147483647, %v12624_v49  ;;  %vm4193_vm4 = vmor %vm4191_vm1, %vm4192_vm0 }
 0x6c0   : > { %v3115_v9 = vpop.f32.mrf.mxu1  ;;  %v4197_v57 = vand.u32 2147483648, %v12624_v49  ;;  %9430 = vpow2.f32 %v1666_v48  ;;  %vm4206_vm7 = vweird.f32 %v12642_v53 }
 0x6c1   : > { %v5158_v16 = vpack.c.bf16 %v5099_v20, %v5098_v5  ;;  %v3191_v44 = vsub.f32 0.0, %v3115_v9  ;;  %4710 = vmatmul.bf16.gmra.mxu3 %v10204_v13  ;;  %v7737_v23 = vpop.permute.xlu0 %7736  ;;  %v4838_v43 = vpack.c.bf16 %v4788_v33, %v4787_v24  ;;  %v4189_v51 = vmul.f32 %v9423_v1, %v4188_v46 }
 0x6c2   : > { %v12656_v35 = vsel %vm1866_vm3, %v1816_v40, %v7737_v23  ;;  %v1756_v20 = vmul.f32 %v9425_v30, %v16485_v36  ;;  %v4198_v24 = vor.u32 1.1754944e-38, %v4197_v57  ;;  %vm4196_vm5 = vcmp.eq.f32.partialorder %v4195_v62, 8.507059e+37 }
 0x6c3   : > { %16484 = vst [vmem:[#allocation76_spill] sm:$0xff] %v12656_v35  ;;  %v9427_v18 = vpop.eup %9426  ;;  %v3311_v3 = vmul.f32 1.442695, %v3191_v44  ;;  %4994 = vmatmul.bf16.gmra.mxu2 %v4838_v43  ;;  %5278 = vmatmul.bf16.gmra.mxu1 %v5158_v16  ;;  %v4190_v63 = vadd.f32 %v9423_v1, %v4189_v51  ;;  %v4210_v30 = vand.u32 2147483647, %v12642_v53  ;;  %v4212_v44 = vand.u32 2147483648, %v12642_v53 }
 0x6c4   : > { %v9429_v59 = vpop.eup %9428  ;;  %v12660_v5 = vadd.f32 1.0, %v9427_v18  ;;  %v4671_v9 = vpop.f32.mrf.mxu3  ;;  %v16486_v43 = vld [vmem:[#allocation116_spill] sm:$0xff] }
 0x6c5   : > { %9432 = vpow2.f32 %v3311_v3  ;;  %v4194_v33 = vsel %vm4193_vm4, %v9423_v1, %v4190_v63  ;;  %v4202_v48 = vmul.f32 %v9429_v59, %v12642_v53  ;;  %v1820_v1 = vsel %vm1585_vm11, %v1756_v20, %v16478_v17  ;;  %v16489_v20 = vld [vmem:[#allocation117_spill] sm:$0xff] }
 0x6c6   : > { %9434 = vrcp.f32 %v12660_v5  ;;  %v4955_v46 = vpop.f32.mrf.mxu2  ;;  %v4199_v40 = vsel %vm4196_vm5, %v4198_v24, %v4194_v33  ;;  %v9431_v13 = vpop.eup %9430  ;;  %vm4207_vm6 = vweird.f32 %v9429_v59  ;;  %v4672_v51 = vadd.f32 %v4671_v9, %v16486_v43 }
 0x6c7   : > { %7766 = vrot.lane.b32.xlu0 %v4199_v40, %s10314_s25  ;;  %v4203_v49 = vsub.f32 1.0, %v4202_v48  ;;  %v16488_v48 = vld [vmem:[#allocation157_spill] sm:$0xff]  ;;  %vm4208_vm2 = vmor %vm4206_vm7, %vm4207_vm6  ;;  %vm4211_vm8 = vcmp.eq.f32.partialorder %v4210_v30, 8.507059e+37  ;;  %v4213_v17 = vor.u32 1.1754944e-38, %v4212_v44  ;;  %v4227_v44 = vand.u32 2147483648, %v12660_v5 }
 0x6c8   : > { %v3117_v16 = vpop.f32.mrf.mxu1  ;;  %v1754_v40 = vmul.f32 %v9431_v13, %v16488_v48  ;;  %vm4221_vm10 = vweird.f32 %v12660_v5 }
 0x6c9   : > { %v3192_v23 = vsub.f32 0.0, %v3117_v16  ;;  %v7745_v57 = vpop.permute.xlu2 %7744  ;;  %v4204_v62 = vmul.f32 %v9429_v59, %v4203_v49 }
 0x6ca   : > { %v12673_v18 = vsel %vm1866_vm3, %v1820_v1, %v7745_v57 }
 0x6cb   : > { %16487 = vst [vmem:[#allocation102_spill] sm:$0xff] %v12673_v18  ;;  %v9433_v3 = vpop.eup %9432  ;;  %v3313_v63 = vmul.f32 1.442695, %v3192_v23  ;;  %v4205_v24 = vadd.f32 %v9429_v59, %v4204_v62  ;;  %v4789_v23 = vmax.f32 %v4672_v51, 0.0  ;;  %v5100_v62 = vmax.f32 %v4955_v46, 0.0 }
 0x6cc   : > { %v9435_v33 = vpop.eup %9434  ;;  %v12677_v16 = vadd.f32 1.0, %v9433_v3  ;;  %v4673_v35 = vpop.f32.mrf.mxu3 }
 0x6cd   : > { %9436 = vpow2.f32 %v3313_v63  ;;  %v4674_v9 = vadd.f32 %v4673_v35, %v16489_v20  ;;  %v4209_v49 = vsel %vm4208_vm2, %v9429_v59, %v4205_v24  ;;  %v4217_v57 = vmul.f32 %v9435_v33, %v12660_v5  ;;  %v10205_v24 = vld [vmem:[%s10468_s13 + $0xb8] sm:$0xff] }
 0x6ce   : > { %9438 = vrcp.f32 %v12677_v16  ;;  %v4957_v53 = vpop.f32.mrf.mxu2  ;;  %v4214_v1 = vsel %vm4211_vm8, %v4213_v17, %v4209_v49  ;;  %v1818_v35 = vsel %vm1585_vm11, %v1754_v40, %v16483_v6  ;;  %vm4222_vm9 = vweird.f32 %v9435_v33 }
 0x6cf   : > { %v4790_v13 = vmax.f32 %v4674_v9, 0.0  ;;  %v5101_v43 = vmax.f32 %v4957_v53, 0.0  ;;  %7768 = vrot.lane.b32.xlu2 %v4214_v1, %s10314_s25  ;;  %v4218_v3 = vsub.f32 1.0, %v4217_v57  ;;  %v4225_v59 = vand.u32 2147483647, %v12660_v5  ;;  %v16491_v53 = vld [vmem:[#allocation25_spill] sm:$0xff]  ;;  %vm4223_vm12 = vmor %vm4221_vm10, %vm4222_vm9 }
 0x6d0   : > { %v3120_v30 = vpop.f32.mrf.mxu1  ;;  %v1668_v1 = vmul.f32 1.442695, %v16491_v53  ;;  %vm4236_vm15 = vweird.f32 %v12677_v16 }
 0x6d1   : > { %v5159_v63 = vpack.c.bf16 %v5101_v43, %v5100_v62  ;;  %v3193_v51 = vsub.f32 0.0, %v3120_v30  ;;  %4715 = vmatmul.bf16.gmra.mxu3 %v10205_v24  ;;  %v7741_v46 = vpop.permute.xlu1 %7740  ;;  %v4839_v17 = vpack.c.bf16 %v4790_v13, %v4789_v23  ;;  %v4219_v20 = vmul.f32 %v9435_v33, %v4218_v3  ;;  %v16492_v62 = vld [vmem:[#allocation27_spill] sm:$0xff] }
 0x6d2   : > { %v12690_v9 = vsel %vm1866_vm3, %v1818_v35, %v7741_v46  ;;  %v1672_v43 = vmul.f32 1.442695, %v16492_v62  ;;  %v4228_v23 = vor.u32 1.1754944e-38, %v4227_v44  ;;  %vm4226_vm13 = vcmp.eq.f32.partialorder %v4225_v59, 8.507059e+37 }
 0x6d3   : > { %16490 = vst [vmem:[#allocation103_spill] sm:$0xff] %v12690_v9  ;;  %v9437_v49 = vpop.eup %9436  ;;  %v3315_v57 = vmul.f32 1.442695, %v3193_v51  ;;  %4999 = vmatmul.bf16.gmra.mxu2 %v4839_v17  ;;  %5283 = vmatmul.bf16.gmra.mxu1 %v5159_v63  ;;  %v4220_v6 = vadd.f32 %v9435_v33, %v4219_v20  ;;  %v16493_v63 = vld [vmem:[#allocation28_spill] sm:$0xff]  ;;  %v4240_v20 = vand.u32 2147483647, %v12677_v16 }
 0x6d4   : > { %v9439_v40 = vpop.eup %9438  ;;  %v12695_v30 = vadd.f32 1.0, %v9437_v49  ;;  %v4676_v24 = vpop.f32.mrf.mxu3  ;;  %v1674_v51 = vmul.f32 1.442695, %v16493_v63  ;;  %v4242_v44 = vand.u32 2147483648, %v12677_v16  ;;  %v16494_v49 = vld [vmem:[#allocation118_spill] sm:$0xff] }
 0x6d5   : > { %9440 = vpow2.f32 %v3315_v57  ;;  %v4224_v13 = vsel %vm4223_vm12, %v9435_v33, %v4220_v6  ;;  %v4232_v3 = vmul.f32 %v9439_v40, %v12677_v16  ;;  %vm4237_vm14 = vweird.f32 %v9439_v40 }
 0x6d6   : > { %9442 = vrcp.f32 %v12695_v30  ;;  %v4960_v35 = vpop.f32.mrf.mxu2  ;;  %v4229_v5 = vsel %vm4226_vm13, %v4228_v23, %v4224_v13  ;;  %v4677_v57 = vadd.f32 %v4676_v24, %v16494_v49  ;;  %vm4238_vm0 = vmor %vm4236_vm15, %vm4237_vm14  ;;  %vm4241_vm1 = vcmp.eq.f32.partialorder %v4240_v20, 8.507059e+37 }
 0x6d7   : > { %7770 = vrot.lane.b32.xlu1 %v4229_v5, %s10314_s25  ;;  %v4233_v46 = vsub.f32 1.0, %v4232_v3  ;;  %9444 = vpow2.f32 %v1668_v1  ;;  %v16495_v1 = vld [vmem:[#allocation29_spill] sm:$0xff]  ;;  %v5102_v34 = vmax.f32 %v4960_v35, 0.0  ;;  %vm4251_vm5 = vweird.f32 %v12695_v30 }
 0x6d8   : > { %v3122_v17 = vpop.f32.mrf.mxu1  ;;  %9446 = vpow2.f32 %v1672_v43  ;;  %v1676_v3 = vmul.f32 1.442695, %v16495_v1  ;;  %v4243_v43 = vor.u32 1.1754944e-38, %v4242_v44  ;;  %v4791_v49 = vmax.f32 %v4677_v57, 0.0 }
 0x6d9   : > { %v3194_v33 = vsub.f32 0.0, %v3122_v17  ;;  %v4234_v59 = vmul.f32 %v9439_v40, %v4233_v46  ;;  %9448 = vpow2.f32 %v1674_v51  ;;  %v16496_v46 = vld [vmem:[#allocation121_spill] sm:$0xff] }
 0x6db   : > { %v9441_v6 = vpop.eup %9440  ;;  %v3317_v23 = vmul.f32 1.442695, %v3194_v33  ;;  %v4235_v13 = vadd.f32 %v9439_v40, %v4234_v59  ;;  %v16497_v59 = vld [vmem:[#allocation30_spill] sm:$0xff] }
 0x6dc   : > { %v12706_v5 = vpop.eup %9442  ;;  %v12709_v18 = vadd.f32 1.0, %v9441_v6  ;;  %v4678_v9 = vpop.f32.mrf.mxu3  ;;  %v1678_v16 = vmul.f32 1.442695, %v16497_v59 }
 0x6dd   : > { %9450 = vpow2.f32 %v3317_v23  ;;  %v4679_v17 = vadd.f32 %v4678_v9, %v16496_v46  ;;  %v4239_v24 = vsel %vm4238_vm0, %v9439_v40, %v4235_v13  ;;  %v4247_v51 = vmul.f32 %v12706_v5, %v12695_v30  ;;  %v9445_v33 = vpop.eup %9444 }
 0x6de   : > { %9452 = vrcp.f32 %v12709_v18  ;;  %v4962_v36 = vpop.f32.mrf.mxu2  ;;  %v4244_v6 = vsel %vm4241_vm1, %v4243_v43, %v4239_v24  ;;  %v9447_v48 = vpop.eup %9446  ;;  %vm4252_vm4 = vweird.f32 %v12706_v5  ;;  %v4255_v23 = vand.u32 2147483647, %v12695_v30  ;;  %v16499_v24 = vld [vmem:[#allocation160_spill] sm:$0xff] }
 0x6df   : > { %v4792_v20 = vmax.f32 %v4679_v17, 0.0  ;;  %v5103_v44 = vmax.f32 %v4962_v36, 0.0  ;;  %7772 = vrot.lane.b32.xlu0 %v4244_v6, %s10314_s25  ;;  %v4248_v9 = vsub.f32 1.0, %v4247_v51  ;;  %9454 = vpow2.f32 %v1676_v3  ;;  %v9449_v46 = vpop.eup %9448  ;;  %v16498_v36 = vld [vmem:[#allocation152_spill] sm:$0xff]  ;;  %vm4253_vm6 = vmor %vm4251_vm5, %vm4252_vm4 }
 0x6e0   : > { %v3125_v40 = vpop.f32.mrf.mxu1  ;;  %v4257_v13 = vand.u32 2147483648, %v12695_v30  ;;  %v1755_v17 = vmul.f32 %v9445_v33, %v16498_v36  ;;  %v1757_v51 = vmul.f32 %v9447_v48, %v16499_v24  ;;  %9456 = vpow2.f32 %v1678_v16  ;;  %v16500_v6 = vld [vmem:[#allocation32_spill] sm:$0xff]  ;;  %v16503_v30 = vld [vmem:[#allocation155_spill] sm:$0xff]  ;;  %v16505_v36 = vld [vmem:[#allocation46_spill] sm:$0xff] }
 0x6e1   : > { %v5160_v57 = vpack.c.bf16 %v5103_v44, %v5102_v34  ;;  %v3195_v31 = vsub.f32 0.0, %v3125_v40  ;;  %4720 = vmatmul.bf16.gmra.mxu3 %v10206_v14  ;;  %v4840_v43 = vpack.c.bf16 %v4792_v20, %v4791_v49  ;;  %v4249_v35 = vmul.f32 %v12706_v5, %v4248_v9  ;;  %v16501_v14 = vld [vmem:[#allocation34_spill] sm:$0xff]  ;;  %v12776_v50 = vpop.permute.xlu2 %7750 }
 0x6e2   : > { %v1680_v8 = vmul.f32 1.442695, %v16500_v6  ;;  %v1682_v49 = vmul.f32 1.442695, %v16501_v14  ;;  %v16502_v20 = vld [vmem:[#allocation38_spill] sm:$0xff]  ;;  %v4258_v48 = vor.u32 1.1754944e-38, %v4257_v13  ;;  %v12748_v13 = vsel %vm1585_vm11, %v1757_v51, %v16492_v62 }
 0x6e3   : > { %v9451_v3 = vpop.eup %9450  ;;  %v3319_v52 = vmul.f32 1.442695, %v3195_v31  ;;  %5004 = vmatmul.bf16.gmra.mxu2 %v4840_v43  ;;  %5288 = vmatmul.bf16.gmra.mxu1 %v5160_v57  ;;  %v4250_v37 = vadd.f32 %v12706_v5, %v4249_v35  ;;  %v1686_v44 = vmul.f32 1.442695, %v16502_v20  ;;  %vm4256_vm7 = vcmp.eq.f32.partialorder %v4255_v23, 8.507059e+37  ;;  %v16504_v43 = vld [vmem:[#allocation42_spill] sm:$0xff] }
 0x6e4   : > { %v9453_v34 = vpop.eup %9452  ;;  %v12729_v9 = vadd.f32 1.0, %v9451_v3  ;;  %v4681_v33 = vpop.f32.mrf.mxu3  ;;  %v1758_v57 = vmul.f32 %v9449_v46, %v16503_v30  ;;  %v1690_v35 = vmul.f32 1.442695, %v16504_v43  ;;  %v1694_v39 = vmul.f32 1.442695, %v16505_v36 }
 0x6e5   : > { %9458 = vpow2.f32 %v3319_v52  ;;  %v4254_v31 = vsel %vm4253_vm6, %v12706_v5, %v4250_v37  ;;  %v4262_v16 = vmul.f32 %v9453_v34, %v12709_v18  ;;  %v9455_v40 = vpop.eup %9454  ;;  %v12742_v52 = vsel %vm1585_vm11, %v1755_v17, %v16491_v53 }
 0x6e6   : > { %9460 = vrcp.f32 %v12729_v9  ;;  %v4965_v3 = vpop.f32.mrf.mxu2  ;;  %v4259_v24 = vsel %vm4256_vm7, %v4258_v48, %v4254_v31  ;;  %v9457_v5 = vpop.eup %9456  ;;  %v4272_v46 = vand.u32 2147483648, %v12709_v18  ;;  %vm4267_vm2 = vweird.f32 %v9453_v34 }
 0x6e7   : > { %9462 = vpow2.f32 %v1680_v8  ;;  %7774 = vrot.lane.b32.xlu2 %v4259_v24, %s10314_s25  ;;  %v4263_v37 = vsub.f32 1.0, %v4262_v16  ;;  %v4270_v8 = vand.u32 2147483647, %v12709_v18  ;;  %v12752_v48 = vpop.permute.xlu0 %7742  ;;  %v16506_v24 = vld [vmem:[#allocation164_spill] sm:$0xff]  ;;  %v1822_v62 = vsel %vm1585_vm11, %v1758_v57, %v16493_v63 }
 0x6e8   : > { %9464 = vpow2.f32 %v1682_v49  ;;  %v3127_v23 = vpop.f32.mrf.mxu1  ;;  %v12755_v31 = vmul.f32 %v9455_v40, %v16506_v24  ;;  %v16507_v49 = vld [vmem:[#allocation123_spill] sm:$0xff]  ;;  %vm4266_vm8 = vweird.f32 %v12709_v18  ;;  %v16510_v18 = vld [vmem:[#allocation54_spill] sm:$0xff]  ;;  %vm4281_vm13 = vweird.f32 %v12729_v9 }
 0x6e9   : > { %9466 = vpow2.f32 %v1686_v44  ;;  %v3196_v53 = vsub.f32 0.0, %v3127_v23  ;;  %v4264_v17 = vmul.f32 %v9453_v34, %v4263_v37  ;;  %v4682_v16 = vadd.f32 %v4681_v33, %v16507_v49  ;;  %v16508_v37 = vld [vmem:[#allocation50_spill] sm:$0xff]  ;;  %vm4268_vm9 = vmor %vm4266_vm8, %vm4267_vm2  ;;  %v16509_v49 = vld [vmem:[#allocation125_spill] sm:$0xff] }
 0x6ea   : > { %9468 = vpow2.f32 %v1690_v35  ;;  %v1698_v23 = vmul.f32 1.442695, %v16508_v37  ;;  %vm4271_vm10 = vcmp.eq.f32.partialorder %v4270_v8, 8.507059e+37  ;;  %v4273_v33 = vor.u32 1.1754944e-38, %v4272_v46 }
 0x6eb   : > { %v9459_v51 = vpop.eup %9458  ;;  %9470 = vpow2.f32 %v1694_v39  ;;  %v3321_v30 = vmul.f32 1.442695, %v3196_v53  ;;  %v4265_v11 = vadd.f32 %v9453_v34, %v4264_v17  ;;  %v1702_v17 = vmul.f32 1.442695, %v16510_v18 }
 0x6ec   : > { %v12762_v44 = vpop.eup %9460  ;;  %v12765_v7 = vadd.f32 1.0, %v9459_v51  ;;  %v4683_v40 = vpop.f32.mrf.mxu3  ;;  %v4793_v24 = vmax.f32 %v4682_v16, 0.0  ;;  %v5104_v8 = vmax.f32 %v4965_v3, 0.0  ;;  %v10207_v3 = vld [vmem:[%s10468_s13 + $0xc8] sm:$0xff] }
 0x6ed   : > { %v9463_v35 = vpop.eup %9462  ;;  %9472 = vpow2.f32 %v3321_v30  ;;  %v4684_v63 = vadd.f32 %v4683_v40, %v16509_v49  ;;  %v4269_v57 = vsel %vm4268_vm9, %v9453_v34, %v4265_v11  ;;  %v4277_v39 = vmul.f32 %v12762_v44, %v12729_v9 }
 0x6ee   : > { %v9465_v53 = vpop.eup %9464  ;;  %9474 = vrcp.f32 %v12765_v7  ;;  %v4967_v51 = vpop.f32.mrf.mxu2  ;;  %v4274_v42 = vsel %vm4271_vm10, %v4273_v33, %v4269_v57  ;;  %vm4282_vm12 = vweird.f32 %v12762_v44  ;;  %v4285_v40 = vand.u32 2147483647, %v12729_v9 }
 0x6ef   : > { %v9467_v32 = vpop.eup %9466  ;;  %v4794_v46 = vmax.f32 %v4684_v63, 0.0  ;;  %v5105_v25 = vmax.f32 %v4967_v51, 0.0  ;;  %7776 = vrot.lane.b32.xlu1 %v4274_v42, %s10314_s25  ;;  %v4278_v30 = vsub.f32 1.0, %v4277_v39  ;;  %9476 = vpow2.f32 %v1698_v23  ;;  %v16511_v39 = vld [vmem:[#allocation162_spill] sm:$0xff]  ;;  %vm4283_vm14 = vmor %vm4281_vm13, %vm4282_vm12 }
 0x6f0   : > { %v9469_v11 = vpop.eup %9468  ;;  %v3130_v34 = vpop.f32.mrf.mxu1  ;;  %v4287_v49 = vand.u32 2147483648, %v12729_v9  ;;  %v1760_v23 = vmul.f32 %v9457_v5, %v16511_v39  ;;  %v1761_v15 = vmul.f32 %v9463_v35, %v16512_v2  ;;  %9478 = vpow2.f32 %v1702_v17  ;;  %v16516_v5 = vld [vmem:[#allocation58_spill] sm:$0xff] }
 0x6f1   : > { %v9471_v16 = vpop.eup %9470  ;;  %v5161_v33 = vpack.c.bf16 %v5105_v25, %v5104_v8  ;;  %v3197_v57 = vsub.f32 0.0, %v3130_v34  ;;  %4725 = vmatmul.bf16.gmra.mxu3 %v10207_v3  ;;  %v7749_v63 = vpop.permute.xlu0 %7748  ;;  %v4841_v51 = vpack.c.bf16 %v4794_v46, %v4793_v24  ;;  %v4279_v42 = vmul.f32 %v12762_v44, %v4278_v30  ;;  %v16515_v8 = vld [vmem:[#allocation161_spill] sm:$0xff]  ;;  %v16517_v9 = vld [vmem:[#allocation62_spill] sm:$0xff] }
 0x6f2   : > { %v12783_v21 = vsel %vm1866_vm3, %v1822_v62, %v7749_v63  ;;  %v1762_v22 = vmul.f32 %v9465_v53, %v16514_v26  ;;  %v1764_v46 = vmul.f32 %v9467_v32, %v16515_v8  ;;  %v1706_v30 = vmul.f32 1.442695, %v16516_v5 }
 0x6f3   : > { %16513 = vst [vmem:[#allocation84_spill] sm:$0xff] %v12783_v21  ;;  %v9473_v47 = vpop.eup %9472  ;;  %v3323_v56 = vmul.f32 1.442695, %v3197_v57  ;;  %5009 = vmatmul.bf16.gmra.mxu2 %v4841_v51  ;;  %5293 = vmatmul.bf16.gmra.mxu1 %v5161_v33  ;;  %v4280_v25 = vadd.f32 %v12762_v44, %v4279_v42  ;;  %v4288_v62 = vor.u32 1.1754944e-38, %v4287_v49  ;;  %vm4286_vm15 = vcmp.eq.f32.partialorder %v4285_v40, 8.507059e+37  ;;  %v16518_v49 = vld [vmem:[#allocation71_spill] sm:$0xff] }
 0x6f4   : > { %v9475_v24 = vpop.eup %9474  ;;  %v12790_v35 = vadd.f32 1.0, %v9473_v47  ;;  %v4686_v17 = vpop.f32.mrf.mxu3  ;;  %v1710_v57 = vmul.f32 1.442695, %v16517_v9  ;;  %v12801_v47 = vsel %vm1585_vm11, %v12755_v31, %v16495_v1  ;;  %v1824_v40 = vsel %vm1585_vm11, %v1760_v23, %v16497_v59 }
 0x6f5   : > { %9480 = vpow2.f32 %v3323_v56  ;;  %v4284_v53 = vsel %vm4283_vm14, %v12762_v44, %v4280_v25  ;;  %v4292_v34 = vmul.f32 %v9475_v24, %v12765_v7  ;;  %v9477_v33 = vpop.eup %9476  ;;  %v1826_v56 = vsel %vm1585_vm11, %v1762_v22, %v16501_v14  ;;  %v12824_v59 = vpop.permute.xlu1 %7746 }
 0x6f6   : > { %9482 = vrcp.f32 %v12790_v35  ;;  %v4970_v32 = vpop.f32.mrf.mxu2  ;;  %v4289_v3 = vsel %vm4286_vm15, %v4288_v62, %v4284_v53  ;;  %v12814_v1 = vsel %vm1585_vm11, %v1761_v15, %v16500_v6  ;;  %v9479_v31 = vpop.eup %9478  ;;  %v1766_v63 = vmul.f32 %v9469_v11, %v16518_v49  ;;  %v16519_v11 = vld [vmem:[#allocation166_spill] sm:$0xff] }
 0x6f7   : > { %7778 = vrot.lane.b32.xlu0 %v4289_v3, %s10314_s25  ;;  %v4293_v44 = vsub.f32 1.0, %v4292_v34  ;;  %v4300_v42 = vand.u32 2147483647, %v12765_v7  ;;  %v4302_v25 = vand.u32 2147483648, %v12765_v7  ;;  %v12822_v22 = vsel %vm1585_vm11, %v1764_v46, %v16502_v20 }
 0x6f8   : > { %v3132_v51 = vpop.f32.mrf.mxu1  ;;  %9484 = vpow2.f32 %v1706_v30  ;;  %vm4297_vm0 = vweird.f32 %v9475_v24  ;;  %v1768_v6 = vmul.f32 %v9471_v16, %v11887_v38  ;;  %v1770_v62 = vmul.f32 %v9477_v33, %v16519_v11 }
 0x6f9   : > { %v3198_v14 = vsub.f32 0.0, %v3132_v51  ;;  %v7757_v23 = vpop.permute.xlu2 %7756  ;;  %v4294_v15 = vmul.f32 %v9475_v24, %v4293_v44  ;;  %9486 = vpow2.f32 %v1710_v57  ;;  %v1772_v3 = vmul.f32 %v9479_v31, %v11894_v27  ;;  %v16521_v44 = vld [vmem:[#allocation127_spill] sm:$0xff]  ;;  %v16522_v57 = vld [vmem:[#allocation130_spill] sm:$0xff] }
 0x6fa   : > { %v12829_v53 = vsel %vm1866_vm3, %v1826_v56, %v7757_v23  ;;  %vm4296_vm1 = vweird.f32 %v12765_v7  ;;  %v4687_v21 = vadd.f32 %v4686_v17, %v16521_v44  ;;  %vm4301_vm5 = vcmp.eq.f32.partialorder %v4300_v42, 8.507059e+37 }
 0x6fb   : > { %16520 = vst [vmem:[#allocation80_spill] sm:$0xff] %v12829_v53  ;;  %v9481_v34 = vpop.eup %9480  ;;  %v3325_v20 = vmul.f32 1.442695, %v3198_v14  ;;  %v4295_v46 = vadd.f32 %v9475_v24, %v4294_v15  ;;  %vm4298_vm4 = vmor %vm4296_vm1, %vm4297_vm0  ;;  %v4303_v33 = vor.u32 1.1754944e-38, %v4302_v25  ;;  %v12845_v15 = vsel %vm1585_vm11, %v1768_v6, %v16505_v36 }
 0x6fc   : > { %v12833_v30 = vpop.eup %9482  ;;  %v12835_v51 = vadd.f32 1.0, %v9481_v34  ;;  %v4688_v16 = vpop.f32.mrf.mxu3  ;;  %v12850_v17 = vsel %vm1585_vm11, %v1766_v63, %v16504_v43  ;;  %v4795_v44 = vmax.f32 %v4687_v21, 0.0  ;;  %v4315_v36 = vand.u32 2147483647, %v12790_v35  ;;  %v10208_v21 = vld [vmem:[%s10468_s13 + $0xd0] sm:$0xff] }
 0x6fd   : > { %9488 = vpow2.f32 %v3325_v20  ;;  %v4689_v56 = vadd.f32 %v4688_v16, %v16522_v57  ;;  %v4299_v23 = vsel %vm4298_vm4, %v9475_v24, %v4295_v46  ;;  %v4307_v31 = vmul.f32 %v12833_v30, %v12790_v35 }
 0x6fe   : > { %9490 = vrcp.f32 %v12835_v51  ;;  %v4972_v7 = vpop.f32.mrf.mxu2  ;;  %v4304_v14 = vsel %vm4301_vm5, %v4303_v33, %v4299_v23  ;;  %v9485_v42 = vpop.eup %9484  ;;  %v5106_v24 = vmax.f32 %v4970_v32, 0.0  ;;  %v12859_v6 = vsel %vm1585_vm11, %v1770_v62, %v16508_v37 }
 0x6ff   : > { %v4796_v25 = vmax.f32 %v4689_v56, 0.0  ;;  %v5107_v34 = vmax.f32 %v4972_v7, 0.0  ;;  %7780 = vrot.lane.b32.xlu2 %v4304_v14, %s10314_s25  ;;  %v4308_v20 = vsub.f32 1.0, %v4307_v31  ;;  %v9487_v46 = vpop.eup %9486  ;;  %v12864_v43 = vsel %vm1585_vm11, %v1772_v3, %v16510_v18  ;;  %v16524_v31 = vld [vmem:[#allocation168_spill] sm:$0xff] }
 0x700   : > { %v12853_v16 = vpop.f32.mrf.mxu1  ;;  %v4317_v56 = vand.u32 2147483648, %v12790_v35  ;;  %vm4312_vm6 = vweird.f32 %v12833_v30  ;;  %v1774_v3 = vmul.f32 %v9485_v42, %v11932_v55  ;;  %v1776_v7 = vmul.f32 %v9487_v46, %v16524_v31 }
 0x701   : > { %v5162_v32 = vpack.c.bf16 %v5107_v34, %v5106_v24  ;;  %v5483_v63 = vsub.f32 0.0, %v12853_v16  ;;  %v6763_v33 = vand.u32 2147483647, %v12853_v16  ;;  %4730 = vmatmul.bf16.gmra.mxu3 %v10208_v21  ;;  %v7753_v57 = vpop.permute.xlu1 %7752  ;;  %v4842_v37 = vpack.c.bf16 %v4796_v25, %v4795_v44 }
 0x702   : > { %v12871_v23 = vsel %vm1866_vm3, %v1824_v40, %v7753_v57  ;;  %v4309_v62 = vmul.f32 %v12833_v30, %v4308_v20  ;;  %vm4311_vm7 = vweird.f32 %v12790_v35  ;;  %vm4316_vm2 = vcmp.eq.f32.partialorder %v4315_v36, 8.507059e+37 }
 0x703   : > { %16523 = vst [vmem:[#allocation82_spill] sm:$0xff] %v12871_v23  ;;  %v9489_v18 = vpop.eup %9488  ;;  %v5547_v14 = vmul.f32 1.442695, %v5483_v63  ;;  %v6827_v24 = vsub.f32 0.0, %v6763_v33  ;;  %5298 = vmatmul.bf16.gmra.mxu1 %v5162_v32  ;;  %5014 = vmatmul.bf16.gmra.mxu2 %v4842_v37  ;;  %vm4313_vm8 = vmor %vm4311_vm7, %vm4312_vm6  ;;  %v4318_v42 = vor.u32 1.1754944e-38, %v4317_v56  ;;  %v4332_v33 = vand.u32 2147483648, %v12835_v51 }
 0x704   : > { %v12877_v34 = vpop.eup %9490  ;;  %v12879_v21 = vadd.f32 1.0, %v9489_v18  ;;  %v4691_v40 = vpop.f32.mrf.mxu3  ;;  %v4310_v25 = vadd.f32 %v12833_v30, %v4309_v62  ;;  %v4330_v63 = vand.u32 2147483647, %v12835_v51  ;;  %v7275_v35 = vmul.f32 1.442695, %v12853_v16 }
 0x705   : > { %9492 = vpow2.f32 %v5547_v14  ;;  %v6891_v20 = vmul.f32 1.442695, %v6827_v24  ;;  %v4322_v46 = vmul.f32 %v12877_v34, %v12835_v51  ;;  %v12895_v57 = vsel %vm1585_vm11, %v1774_v3, %v16516_v5 }
 0x706   : > { %9494 = vrcp.f32 %v12879_v21  ;;  %v4975_v44 = vpop.f32.mrf.mxu2  ;;  %v4314_v32 = vsel %vm4313_vm8, %v12833_v30, %v4310_v25  ;;  %v12900_v56 = vsel %vm1866_vm3, %v12742_v52, %v12752_v48  ;;  %v12905_v30 = vsel %vm1866_vm3, %v12801_v47, %v12776_v50 }
 0x707   : > { %9496 = vpow2.f32 %v6891_v20  ;;  %v4319_v36 = vsel %vm4316_vm2, %v4318_v42, %v4314_v32  ;;  %16525 = vst [vmem:[#allocation14_spill] sm:$0xff] %v12900_v56  ;;  %v4323_v62 = vsub.f32 1.0, %v4322_v46  ;;  %v12913_v5 = vsel %vm1585_vm11, %v1776_v7, %v16517_v9  ;;  %v16529_v9 = vld [vmem:[#allocation133_spill] sm:$0xff]  ;;  %v12928_v42 = vpop.f32.mrf.mxu0 }
 0x708   : > { %16526 = vst [vmem:[#allocation86_spill] sm:$0xff] %v12905_v30  ;;  %7782 = vrot.lane.b32.xlu1 %v4319_v36, %s10314_s25  ;;  %v12908_v37 = vpop.f32.mrf.mxu1  ;;  %vm4326_vm9 = vweird.f32 %v12835_v51  ;;  %vm4327_vm10 = vweird.f32 %v12877_v34  ;;  %vm12921_vm12 = vcmp.eq.f32.partialorder %v4330_v63, 8.507059e+37  ;;  %v4333_v3 = vor.u32 1.1754944e-38, %v4332_v33 }
 0x709   : > { %v5484_v52 = vsub.f32 0.0, %v12908_v37  ;;  %v6764_v48 = vand.u32 2147483647, %v12908_v37  ;;  %v4324_v50 = vmul.f32 %v12877_v34, %v4323_v62  ;;  %9498 = vpow2.f32 %v7275_v35  ;;  %v16530_v35 = vld [vmem:[#allocation137_spill] sm:$0xff]  ;;  %vm4328_vm13 = vmor %vm4326_vm9, %vm4327_vm10 }
 0x70a   : > { %v4692_v7 = vadd.f32 %v4691_v40, %v16529_v9  ;;  %v5108_v32 = vmax.f32 %v4975_v44, 0.0  ;;  %v7277_v36 = vmul.f32 1.442695, %v12908_v37  ;;  %vm4341_vm14 = vweird.f32 %v12879_v21 }
 0x70b   : > { %v9493_v14 = vpop.eup %9492  ;;  %v5549_v24 = vmul.f32 1.442695, %v5484_v52  ;;  %v6828_v25 = vsub.f32 0.0, %v6764_v48  ;;  %v4325_v62 = vadd.f32 %v12877_v34, %v4324_v50  ;;  %v4345_v50 = vand.u32 2147483647, %v12879_v21 }
 0x70c   : > { %v12926_v20 = vpop.eup %9494  ;;  %v12930_v46 = vadd.f32 1.0, %v9493_v14  ;;  %v4693_v63 = vpop.f32.mrf.mxu3  ;;  %v4797_v51 = vmax.f32 %v4692_v7, 0.0  ;;  %vm7467_vm4 = vcmp.le.s32.totalorder %v16352_v28, 3 }
 0x70d   : > { %v9497_v18 = vpop.eup %9496  ;;  %9500 = vpow2.f32 %v5549_v24  ;;  %v6893_v33 = vmul.f32 1.442695, %v6828_v25  ;;  %v4694_v53 = vadd.f32 %v4693_v63, %v16530_v35  ;;  %v4337_v40 = vmul.f32 %v12926_v20, %v12879_v21 }
 0x70e   : > { %9502 = vrcp.f32 %v12930_v46  ;;  %v7019_v44 = vadd.f32 1.0, %v9497_v18  ;;  %v4977_v52 = vpop.f32.mrf.mxu2  ;;  %v4329_v48 = vsel %vm4328_vm13, %v12877_v34, %v4325_v62  ;;  %v4347_v18 = vand.u32 2147483648, %v12879_v21 }
 0x70f   : > { %9504 = vpow2.f32 %v6893_v33  ;;  %v4798_v14 = vmax.f32 %v4694_v53, 0.0  ;;  %v5109_v9 = vmax.f32 %v4977_v52, 0.0  ;;  %v4334_v24 = vsel %vm12921_vm12, %v4333_v3, %v4329_v48  ;;  %v9499_v35 = vpop.eup %9498  ;;  %v10209_v33 = vld [vmem:[%s10468_s13 + $0xd8] sm:$0xff] }
 0x710   : > { %9506 = vlog2.f32 %v7019_v44  ;;  %7784 = vrot.lane.b32.xlu0 %v4334_v24, %s10314_s25  ;;  %v12947_v25 = vpop.f32.mrf.mxu1  ;;  %v4338_v63 = vsub.f32 1.0, %v4337_v40  ;;  %vm4342_vm15 = vweird.f32 %v12926_v20  ;;  %vm12957_vm0 = vcmp.eq.f32.partialorder %v4345_v50, 8.507059e+37 }
 0x711   : > { %9508 = vpow2.f32 %v7277_v36  ;;  %v5163_v34 = vpack.c.bf16 %v5109_v9, %v5108_v32  ;;  %v5485_v62 = vsub.f32 0.0, %v12947_v25  ;;  %v6765_v53 = vand.u32 2147483647, %v12947_v25  ;;  %4735 = vmatmul.bf16.gmra.mxu3 %v10209_v33  ;;  %vm12972_vm1 = vmor %vm4341_vm14, %vm4342_vm15  ;;  %v12979_v33 = vpop.f32.mrf.mxu0  ;;  %v13042_v56 = vpop.permute.xlu2 %7762 }
 0x712   : > { %v4843_v47 = vpack.c.bf16 %v4798_v14, %v4797_v51  ;;  %v4339_v3 = vmul.f32 %v12926_v20, %v4338_v63  ;;  %v4348_v24 = vor.u32 1.1754944e-38, %v4347_v18  ;;  %v5748_v51 = vand.u32 2147483647, %v12930_v46  ;;  %16542 = vst [vmem:[#allocation88_spill] sm:$0xff] %v13042_v56 }
 0x713   : > { %v9501_v7 = vpop.eup %9500  ;;  %v5551_v44 = vmul.f32 1.442695, %v5485_v62  ;;  %v6829_v52 = vsub.f32 0.0, %v6765_v53  ;;  %5303 = vmatmul.bf16.gmra.mxu1 %v5163_v34  ;;  %v7279_v34 = vmul.f32 1.442695, %v12947_v25  ;;  %vm5744_vm5 = vweird.f32 %v12930_v46 }
 0x714   : > { %v12961_v36 = vpop.eup %9502  ;;  %v12963_v48 = vadd.f32 1.0, %v9501_v7  ;;  %5019 = vmatmul.bf16.gmra.mxu2 %v4843_v47  ;;  %v4696_v14 = vpop.f32.mrf.mxu3  ;;  %v4340_v9 = vadd.f32 %v12926_v20, %v4339_v3  ;;  %v16535_v47 = vld [vmem:[#allocation141_spill] sm:$0xff]  ;;  %v5750_v50 = vand.u32 2147483648, %v12930_v46  ;;  %vm13003_vm6 = vcmp.eq.f32.partialorder %v5748_v51, 8.507059e+37 }
 0x715   : > { %v9505_v63 = vpop.eup %9504  ;;  %9510 = vpow2.f32 %v5551_v44  ;;  %v6895_v62 = vmul.f32 1.442695, %v6829_v52  ;;  %v5740_v53 = vmul.f32 %v12961_v36, %v12930_v46  ;;  %v12983_v3 = vadd.f32 %v4696_v14, %v16535_v47  ;;  %v16536_v44 = vld [vmem:[#allocation119_spill] sm:$0xff] }
 0x716   : > { %v9507_v18 = vpop.eup %9506  ;;  %9512 = vrcp.f32 %v12963_v48  ;;  %v4980_v7 = vpop.f32.mrf.mxu2  ;;  %v4344_v21 = vsel %vm12972_vm1, %v12926_v20, %v4340_v9  ;;  %v12989_v52 = vmul.f32 %v9499_v35, %v16536_v44  ;;  %v7020_v31 = vadd.f32 1.0, %v9505_v63  ;;  %v10210_v63 = vld [vmem:[%s10468_s13 + $0xe0] sm:$0xff] }
 0x717   : > { %v9509_v40 = vpop.eup %9508  ;;  %9514 = vpow2.f32 %v6895_v62  ;;  %v7084_v30 = vmul.f32 0.6931472, %v9507_v18  ;;  %v4349_v14 = vsel %vm12957_vm0, %v4348_v24, %v4344_v21  ;;  %v5741_v55 = vsub.f32 1.0, %v5740_v53  ;;  %v12998_v20 = vpop.permute.xlu0 %7754  ;;  %v16539_v62 = vld [vmem:[#allocation122_spill] sm:$0xff] }
 0x718   : > { %v12995_v47 = vpop.f32.mrf.mxu1  ;;  %9516 = vpow2.f32 %v7279_v34  ;;  %7786 = vrot.lane.b32.xlu2 %v4349_v14, %s10314_s25  ;;  %v4799_v32 = vmax.f32 %v12983_v3, 0.0  ;;  %vm5745_vm7 = vweird.f32 %v12961_v36  ;;  %v13011_v53 = vmul.f32 %v9509_v40, %v16539_v62  ;;  %v16541_v62 = vld [vmem:[#allocation145_spill] sm:$0xff]  ;;  %s10315_s25 = smov 24  }
 0x719   : > { %v5486_v35 = vsub.f32 0.0, %v12995_v47  ;;  %v6766_v9 = vand.u32 2147483647, %v12995_v47  ;;  %v5742_v24 = vmul.f32 %v12961_v36, %v5741_v55  ;;  %v5110_v18 = vmax.f32 %v4980_v7, 0.0  ;;  %vm5746_vm2 = vmor %vm5744_vm5, %vm5745_vm7 }
 0x71a   : > { %9518 = vlog2.f32 %v7020_v31  ;;  %v16540_v51 = vmax.f32 %v12853_v16, 0.0  ;;  %v5751_v11 = vor.u32 1.1754944e-38, %v5750_v50  ;;  %v7281_v40 = vmul.f32 1.442695, %v12995_v47 }
 0x71b   : > { %v9511_v34 = vpop.eup %9510  ;;  %v5553_v21 = vmul.f32 1.442695, %v5486_v35  ;;  %v6830_v44 = vsub.f32 0.0, %v6766_v9  ;;  %v5743_v55 = vadd.f32 %v12961_v36, %v5742_v24  ;;  %v5763_v35 = vand.u32 2147483647, %v12963_v48 }
 0x71c   : > { %v13013_v14 = vpop.eup %9512  ;;  %v7211_v23 = vadd.f32 %v7084_v30, %v16540_v51  ;;  %v13017_v27 = vadd.f32 1.0, %v9511_v34  ;;  %v4698_v3 = vpop.f32.mrf.mxu3  ;;  %vm5759_vm9 = vweird.f32 %v12963_v48 }
 0x71d   : > { %v9515_v38 = vpop.eup %9514  ;;  %9520 = vpow2.f32 %v5553_v21  ;;  %v4699_v7 = vadd.f32 %v4698_v3, %v16541_v62  ;;  %v5755_v16 = vmul.f32 %v13013_v14, %v12963_v48  ;;  %v5747_v50 = vsel %vm5746_vm2, %v12961_v36, %v5743_v55  ;;  %v13035_v51 = vpop.f32.mrf.mxu0 }
 0x71e   : > { %9522 = vrcp.f32 %v13017_v27  ;;  %v7021_v31 = vadd.f32 1.0, %v9515_v38  ;;  %v4982_v30 = vpop.f32.mrf.mxu2  ;;  %v13031_v9 = vpop.eup %9516  ;;  %v6897_v24 = vmul.f32 1.442695, %v6830_v44  ;;  %v5752_v46 = vsel %vm13003_vm6, %v5751_v11, %v5747_v50 }
 0x71f   : > { %v4800_v34 = vmax.f32 %v4699_v7, 0.0  ;;  %v5111_v21 = vmax.f32 %v4982_v30, 0.0  ;;  %v7468_v38 = vsel %vm7467_vm4, %v5752_v46, %v7211_v23  ;;  %v5756_v36 = vsub.f32 1.0, %v5755_v16 }
 0x720   : > { %9524 = vlog2.f32 %v7021_v31  ;;  %v13037_v3 = vpop.f32.mrf.mxu1  ;;  %v5765_v55 = vand.u32 2147483648, %v12963_v48  ;;  %v9519_v62 = vpop.eup %9518  ;;  %v7532_v23 = vsel %vm1585_vm11, %v12989_v52, %v7468_v38  ;;  %vm5760_vm8 = vweird.f32 %v13013_v14 }
 0x721   : > { %9526 = vpow2.f32 %v7281_v40  ;;  %v5164_v44 = vpack.c.bf16 %v5111_v21, %v5110_v18  ;;  %v5487_v7 = vsub.f32 0.0, %v13037_v3  ;;  %v6767_v11 = vand.u32 2147483647, %v13037_v3  ;;  %4740 = vmatmul.bf16.gmra.mxu3 %v10210_v63  ;;  %v7761_v31 = vpop.permute.xlu0 %7760  ;;  %7916 = vrot.lane.b32.xlu1 %v7532_v23, %s10315_s25  ;;  %vm13076_vm12 = vmor %vm5759_vm9, %vm5760_vm8 }
 0x722   : > { %v7283_v30 = vmul.f32 1.442695, %v13037_v3  ;;  %v13053_v16 = vsel %vm1866_vm3, %v12822_v22, %v7761_v31  ;;  %v4844_v50 = vpack.c.bf16 %v4800_v34, %v4799_v32  ;;  %9528 = vpow2.f32 %v6897_v24 }
 0x723   : > { %16543 = vst [vmem:[#allocation104_spill] sm:$0xff] %v13053_v16  ;;  %v9521_v40 = vpop.eup %9520  ;;  %v5555_v18 = vmul.f32 1.442695, %v5487_v7  ;;  %v6831_v21 = vsub.f32 0.0, %v6767_v11  ;;  %5308 = vmatmul.bf16.gmra.mxu1 %v5164_v44  ;;  %v5757_v46 = vmul.f32 %v13013_v14, %v5756_v36  ;;  %v7086_v22 = vmul.f32 0.6931472, %v9519_v62 }
 0x724   : > { %v13057_v63 = vpop.eup %9522  ;;  %v13059_v56 = vadd.f32 1.0, %v9521_v40  ;;  %9530 = vpow2.f32 %v7283_v30  ;;  %5024 = vmatmul.bf16.gmra.mxu2 %v4844_v50  ;;  %v4701_v52 = vpop.f32.mrf.mxu3  ;;  %vm13068_vm10 = vcmp.eq.f32.partialorder %v5763_v35, 8.507059e+37  ;;  %v5766_v11 = vor.u32 1.1754944e-38, %v5765_v55 }
 0x725   : > { %9532 = vpow2.f32 %v5555_v18  ;;  %v6899_v32 = vmul.f32 1.442695, %v6831_v21  ;;  %v13063_v24 = vadd.f32 %v4701_v52, %v12928_v42  ;;  %v5758_v34 = vadd.f32 %v13013_v14, %v5757_v46  ;;  %v13089_v21 = vpop.permute.xlu1 %7758 }
 0x726   : > { %v9525_v38 = vpop.eup %9524  ;;  %9534 = vrcp.f32 %v13059_v56  ;;  %v4985_v36 = vpop.f32.mrf.mxu2  ;;  %v5770_v62 = vmul.f32 %v13057_v63, %v13017_v27  ;;  %vm5774_vm13 = vweird.f32 %v13017_v27  ;;  %v5778_v31 = vand.u32 2147483647, %v13017_v27  ;;  %16549 = vst [vmem:[#allocation105_spill] sm:$0xff] %v13089_v21 }
 0x727   : > { %v13074_v7 = vpop.eup %9526  ;;  %9536 = vpow2.f32 %v6899_v32  ;;  %v7088_v48 = vmul.f32 0.6931472, %v9525_v38  ;;  %v5762_v30 = vsel %vm13076_vm12, %v13013_v14, %v5758_v34  ;;  %v16548_v23 = vmax.f32 %v12908_v37, 0.0  ;;  %v13104_v34 = vpop.f32.mrf.mxu0 }
 0x728   : > { %v13082_v35 = vpop.f32.mrf.mxu1  ;;  %v5771_v40 = vsub.f32 1.0, %v5770_v62  ;;  %v9529_v18 = vpop.eup %9528  ;;  %v4801_v55 = vmax.f32 %v13063_v24, 0.0  ;;  %v5112_v46 = vmax.f32 %v4985_v36, 0.0  ;;  %v5767_v37 = vsel %vm13068_vm10, %v5766_v11, %v5762_v30 }
 0x729   : > { %v7212_v50 = vadd.f32 %v7086_v22, %v16548_v23  ;;  %v5488_v52 = vsub.f32 0.0, %v13082_v35  ;;  %v6768_v32 = vand.u32 2147483647, %v13082_v35  ;;  %v7769_v38 = vpop.permute.xlu2 %7768  ;;  %vm5775_vm14 = vweird.f32 %v13057_v63 }
 0x72a   : > { %v13094_v16 = vpop.eup %9530  ;;  %v13098_v14 = vsel %vm1866_vm3, %v12845_v15, %v7769_v38  ;;  %v5772_v22 = vmul.f32 %v13057_v63, %v5771_v40  ;;  %v5780_v23 = vand.u32 2147483648, %v13017_v27  ;;  %vm13117_vm15 = vcmp.eq.f32.partialorder %v5778_v31, 8.507059e+37  ;;  %vm5776_vm0 = vmor %vm5774_vm13, %vm5775_vm14 }
 0x72b   : > { %16550 = vst [vmem:[#allocation17_spill] sm:$0xff] %v13098_v14  ;;  %v9533_v24 = vpop.eup %9532  ;;  %v5557_v36 = vmul.f32 1.442695, %v5488_v52  ;;  %v6832_v62 = vsub.f32 0.0, %v6768_v32  ;;  %v7469_v42 = vsel %vm7467_vm4, %v5767_v37, %v7212_v50  ;;  %v7285_v50 = vmul.f32 1.442695, %v13082_v35 }
 0x72c   : > { %v13109_v21 = vpop.eup %9534  ;;  %v13111_v15 = vadd.f32 1.0, %v9533_v24  ;;  %v7533_v44 = vsel %vm1585_vm11, %v13011_v53, %v7469_v42  ;;  %v4703_v11 = vpop.f32.mrf.mxu3  ;;  %v5773_v30 = vadd.f32 %v13057_v63, %v5772_v22  ;;  %v5781_v53 = vor.u32 1.1754944e-38, %v5780_v23 }
 0x72d   : > { %v9537_v52 = vpop.eup %9536  ;;  %9538 = vpow2.f32 %v5557_v36  ;;  %7918 = vrot.lane.b32.xlu0 %v7533_v44, %s10315_s25  ;;  %v4704_v32 = vadd.f32 %v4703_v11, %v12979_v33  ;;  %v16553_v38 = vmax.f32 %v12947_v25, 0.0  ;;  %v6901_v22 = vmul.f32 1.442695, %v6832_v62 }
 0x72e   : > { %v7023_v37 = vadd.f32 1.0, %v9537_v52  ;;  %v4987_v24 = vpop.f32.mrf.mxu2  ;;  %v5777_v36 = vsel %vm5776_vm0, %v13057_v63, %v5773_v30  ;;  %9540 = vrcp.f32 %v13111_v15  ;;  %v7405_v25 = vmul.f32 %v13031_v9, %v11559_v0  ;;  %v10211_v30 = vld [vmem:[%s10468_s13 + $0xe8] sm:$0xff] }
 0x72f   : > { %v7213_v31 = vadd.f32 %v7088_v48, %v16553_v38  ;;  %v4802_v42 = vmax.f32 %v4704_v32, 0.0  ;;  %v5113_v44 = vmax.f32 %v4987_v24, 0.0  ;;  %v5782_v33 = vsel %vm13117_vm15, %v5781_v53, %v5777_v36 }
 0x730   : > { %9542 = vlog2.f32 %v7023_v37  ;;  %v13134_v27 = vpop.f32.mrf.mxu1  ;;  %v5785_v62 = vmul.f32 %v13109_v21, %v13059_v56  ;;  %vm5789_vm1 = vweird.f32 %v13059_v56  ;;  %vm5790_vm5 = vweird.f32 %v13109_v21 }
 0x731   : > { %v7470_v48 = vsel %vm7467_vm4, %v5782_v33, %v7213_v31  ;;  %9544 = vpow2.f32 %v7285_v50  ;;  %v5165_v63 = vpack.c.bf16 %v5113_v44, %v5112_v46  ;;  %v5489_v23 = vsub.f32 0.0, %v13134_v27  ;;  %4745 = vmatmul.bf16.gmra.mxu3 %v10211_v30  ;;  %v7765_v40 = vpop.permute.xlu1 %7764  ;;  %v13158_v44 = vpop.f32.mrf.mxu0  ;;  %vm13197_vm7 = vmor %vm5789_vm1, %vm5790_vm5 }
 0x732   : > { %v6769_v11 = vand.u32 2147483647, %v13134_v27  ;;  %v7287_v52 = vmul.f32 1.442695, %v13134_v27  ;;  %v13148_v0 = vsel %vm1866_vm3, %v12850_v17, %v7765_v40  ;;  %v7534_v9 = vsel %vm1585_vm11, %v7405_v25, %v7470_v48 }
 0x733   : > { %16554 = vst [vmem:[#allocation15_spill] sm:$0xff] %v13148_v0  ;;  %v4845_v32 = vpack.c.bf16 %v4802_v42, %v4801_v55  ;;  %v9539_v53 = vpop.eup %9538  ;;  %9546 = vpow2.f32 %v6901_v22  ;;  %v5559_v46 = vmul.f32 1.442695, %v5489_v23  ;;  %7920 = vrot.lane.b32.xlu2 %v7534_v9, %s10315_s25  ;;  %5313 = vmatmul.bf16.gmra.mxu1 %v5165_v63  ;;  %v5786_v38 = vsub.f32 1.0, %v5785_v62 }
 0x734   : > { %v6833_v50 = vsub.f32 0.0, %v6769_v11  ;;  %v7022_v31 = vadd.f32 1.0, %v9529_v18  ;;  %v13153_v37 = vadd.f32 1.0, %v9539_v53  ;;  %9548 = vpow2.f32 %v7287_v52  ;;  %v4706_v24 = vpop.f32.mrf.mxu3  ;;  %v13156_v36 = vpop.eup %9540 }
 0x735   : > { %5029 = vmatmul.bf16.gmra.mxu2 %v4845_v32  ;;  %v5793_v17 = vand.u32 2147483647, %v13059_v56  ;;  %9550 = vpow2.f32 %v5559_v46  ;;  %v5787_v22 = vmul.f32 %v13109_v21, %v5786_v38  ;;  %v5795_v42 = vand.u32 2147483648, %v13059_v56  ;;  %v16557_v46 = vld [vmem:[#allocation120_spill] sm:$0xff] }
 0x736   : > { %v6903_v55 = vmul.f32 1.442695, %v6833_v50  ;;  %v9543_v33 = vpop.eup %9542  ;;  %v13165_v18 = vsel %vm1866_vm3, %v12748_v13, %v12824_v59  ;;  %v6702_v25 = vmax.f32 %v12995_v47, 0.0  ;;  %9552 = vrcp.f32 %v13153_v37  ;;  %v4990_v62 = vpop.f32.mrf.mxu2 }
 0x737   : > { %v4707_v48 = vadd.f32 %v4706_v24, %v13035_v51  ;;  %v13170_v63 = vpop.eup %9544  ;;  %v6703_v23 = vmax.f32 %v13037_v3, 0.0  ;;  %v7092_v11 = vmul.f32 0.6931472, %v9543_v33  ;;  %v5788_v13 = vadd.f32 %v13109_v21, %v5787_v22 }
 0x738   : > { %9554 = vpow2.f32 %v6903_v55  ;;  %v13174_v30 = vpop.f32.mrf.mxu1  ;;  %v5800_v59 = vmul.f32 %v13156_v36, %v13111_v15  ;;  %vm13184_vm6 = vcmp.eq.f32.partialorder %v5793_v17, 8.507059e+37  ;;  %v5796_v52 = vor.u32 1.1754944e-38, %v5795_v42 }
 0x739   : > { %9556 = vlog2.f32 %v7022_v31  ;;  %v13180_v47 = vpop.eup %9546  ;;  %v5490_v51 = vsub.f32 0.0, %v13174_v30  ;;  %v6770_v3 = vand.u32 2147483647, %v13174_v30  ;;  %v4803_v32 = vmax.f32 %v4707_v48, 0.0 }
 0x73a   : > { %v13188_v9 = vpop.eup %9548  ;;  %v5114_v53 = vmax.f32 %v4990_v62, 0.0  ;;  %v7406_v50 = vmul.f32 %v13074_v7, %v16557_v46  ;;  %v5801_v38 = vsub.f32 1.0, %v5800_v59  ;;  %v7215_v24 = vadd.f32 %v7092_v11, %v6703_v23 }
 0x73b   : > { %v9551_v31 = vpop.eup %9550  ;;  %v5561_v55 = vmul.f32 1.442695, %v5490_v51  ;;  %v6834_v22 = vsub.f32 0.0, %v6770_v3  ;;  %v7289_v33 = vmul.f32 1.442695, %v13174_v30  ;;  %v5792_v7 = vsel %vm13197_vm7, %v13109_v21, %v5788_v13 }
 0x73c   : > { %v13201_v42 = vpop.eup %9552  ;;  %v4708_v48 = vpop.f32.mrf.mxu3  ;;  %v5802_v62 = vmul.f32 %v13156_v36, %v5801_v38  ;;  %vm5804_vm2 = vweird.f32 %v13111_v15  ;;  %vm5805_vm8 = vweird.f32 %v13156_v36  ;;  %v13209_v11 = vadd.f32 1.0, %v9551_v31 }
 0x73d   : > { %9558 = vpow2.f32 %v5561_v55  ;;  %v6905_v56 = vmul.f32 1.442695, %v6834_v22  ;;  %v4709_v59 = vadd.f32 %v4708_v48, %v13104_v34  ;;  %v5808_v21 = vand.u32 2147483647, %v13111_v15  ;;  %v13215_v38 = vpop.f32.mrf.mxu0  ;;  %vm13221_vm9 = vmor %vm5804_vm2, %vm5805_vm8 }
 0x73e   : > { %v9555_v23 = vpop.eup %9554  ;;  %v4992_v46 = vpop.f32.mrf.mxu2  ;;  %v5803_v17 = vadd.f32 %v13156_v36, %v5802_v62  ;;  %v5810_v13 = vand.u32 2147483648, %v13111_v15  ;;  %v5797_v55 = vsel %vm13184_vm6, %v5796_v52, %v5792_v7  ;;  %vm5820_vm12 = vweird.f32 %v13201_v42 }
 0x73f   : > { %v9557_v51 = vpop.eup %9556  ;;  %v7025_v3 = vadd.f32 1.0, %v9555_v23  ;;  %9560 = vpow2.f32 %v6905_v56  ;;  %v4804_v31 = vmax.f32 %v4709_v59, 0.0  ;;  %v5115_v0 = vmax.f32 %v4992_v46, 0.0 }
 0x740   : > { %v7090_v14 = vmul.f32 0.6931472, %v9557_v51  ;;  %v13227_v22 = vpop.f32.mrf.mxu1  ;;  %v5807_v48 = vsel %vm13221_vm9, %v13156_v36, %v5803_v17  ;;  %v5811_v62 = vor.u32 1.1754944e-38, %v5810_v13  ;;  %v10212_v51 = vld [vmem:[%s10468_s13 + $0xf0] sm:$0xff]  ;;  %vm5809_vm10 = vcmp.eq.f32.partialorder %v5808_v21, 8.507059e+37 }
 0x741   : > { %9562 = vlog2.f32 %v7025_v3  ;;  %v4846_v56 = vpack.c.bf16 %v4804_v31, %v4803_v32  ;;  %v5166_v59 = vpack.c.bf16 %v5115_v0, %v5114_v53  ;;  %v5491_v15 = vsub.f32 0.0, %v13227_v22  ;;  %4750 = vmatmul.bf16.gmra.mxu3 %v10212_v51 }
 0x742   : > { %v7214_v23 = vadd.f32 %v7090_v14, %v6702_v25  ;;  %9564 = vpow2.f32 %v7289_v33  ;;  %v6771_v3 = vand.u32 2147483647, %v13227_v22  ;;  %v7291_v40 = vmul.f32 1.442695, %v13227_v22 }
 0x743   : > { %v9559_v52 = vpop.eup %9558  ;;  %9566 = vrcp.f32 %v13209_v11  ;;  %v5563_v7 = vmul.f32 1.442695, %v5491_v15  ;;  %v5812_v14 = vsel %vm5809_vm10, %v5811_v62, %v5807_v48  ;;  %5318 = vmatmul.bf16.gmra.mxu1 %v5166_v59  ;;  %v7407_v53 = vmul.f32 %v13094_v16, %v11543_v60  ;;  %v10213_v48 = vld [vmem:[%s10468_s13 + $0xf8] sm:$0xff]  ;;  %s8463_s13 = sshll.u32 %s10464_s22, 9 }
 0x744   : > { %v7471_v36 = vsel %vm7467_vm4, %v5797_v55, %v7214_v23  ;;  %v13239_v0 = vadd.f32 1.0, %v9559_v52  ;;  %v6835_v32 = vsub.f32 0.0, %v6771_v3  ;;  %v4711_v33 = vpop.f32.mrf.mxu3  ;;  %v13248_v17 = vsel %vm1866_vm3, %v12814_v1, %v12998_v20  ;;  %s13703_s15 = scalar_lea.vmem [#allocation5], %s8463_s13 }
 0x745   : > { %v7535_v25 = vsel %vm1585_vm11, %v7406_v50, %v7471_v36  ;;  %5034 = vmatmul.bf16.gmra.mxu2 %v4846_v56  ;;  %v9561_v46 = vpop.eup %9560  ;;  %9568 = vpow2.f32 %v7291_v40  ;;  %v7472_v21 = vsel %vm7467_vm4, %v5812_v14, %v7215_v24  ;;  %v5815_v50 = vmul.f32 %v13201_v42, %v13153_v37  ;;  %s8379_s17 = sshll.u32 %s13703_s15, 4  ;;  %s8380_s17 = int_to_ptr.vmem [resolvable:$true] %s8379_s17 }
 0x746   : > { %7922 = vrot.lane.b32.xlu1 %v7535_v25, %s10315_s25  ;;  %v6704_v60 = vmax.f32 %v13082_v35, 0.0  ;;  %9570 = vpow2.f32 %v5563_v7  ;;  %v6907_v16 = vmul.f32 1.442695, %v6835_v32  ;;  %v7536_v31 = vsel %vm1585_vm11, %v7407_v53, %v7472_v21  ;;  %v13258_v34 = vpop.f32.mrf.mxu2  ;;  %v13286_v53 = vpop.permute.xlu0 %7766 }
 0x747   : > { %v9563_v13 = vpop.eup %9562  ;;  %v7024_v1 = vadd.f32 1.0, %v13180_v47  ;;  %v6705_v20 = vmax.f32 %v13134_v27, 0.0  ;;  %9572 = vrcp.f32 %v13239_v0  ;;  %7924 = vrot.lane.b32.xlu0 %v7536_v31, %s10315_s25  ;;  %v5816_v24 = vsub.f32 1.0, %v5815_v50  ;;  %v13273_v47 = vpop.f32.mrf.mxu0 }
 0x748   : > { %v13264_v55 = vpop.eup %9564  ;;  %v6707_v62 = vmax.f32 %v13227_v22, 0.0  ;;  %9574 = vpow2.f32 %v6907_v16  ;;  %v4712_v23 = vadd.f32 %v4711_v33, %v13158_v44  ;;  %v13269_v56 = vpop.f32.mrf.mxu1  ;;  %v7096_v27 = vmul.f32 0.6931472, %v9563_v13 }
 0x749   : > { %v13271_v59 = vpop.eup %9566  ;;  %v13275_v15 = vadd.f32 1.0, %v9561_v46  ;;  %v5492_v51 = vsub.f32 0.0, %v13269_v56  ;;  %v6772_v3 = vand.u32 2147483647, %v13269_v56  ;;  %v7293_v40 = vmul.f32 1.442695, %v13269_v56 }
 0x74a   : > { %v5817_v52 = vmul.f32 %v13201_v42, %v5816_v24  ;;  %v5823_v44 = vand.u32 2147483647, %v13153_v37  ;;  %v5825_v25 = vand.u32 2147483648, %v13153_v37  ;;  %9576 = vlog2.f32 %v7024_v1 }
 0x74b   : > { %v13283_v36 = vpop.eup %9568  ;;  %v5565_v7 = vmul.f32 1.442695, %v5492_v51  ;;  %v6836_v14 = vsub.f32 0.0, %v6772_v3  ;;  %v4805_v33 = vmax.f32 %v4712_v23, 0.0  ;;  %v5116_v46 = vmax.f32 %v13258_v34, 0.0 }
 0x74c   : > { %v9571_v32 = vpop.eup %9570  ;;  %v5818_v21 = vadd.f32 %v13201_v42, %v5817_v52  ;;  %vm5819_vm13 = vweird.f32 %v13153_v37  ;;  %v4713_v50 = vpop.f32.mrf.mxu3  ;;  %v13293_v16 = vadd.f32 %v7096_v27, %v6705_v20  ;;  %vm5824_vm15 = vcmp.eq.f32.partialorder %v5823_v44, 8.507059e+37 }
 0x74d   : > { %v13291_v13 = vpop.eup %9572  ;;  %9578 = vpow2.f32 %v5565_v7  ;;  %v6909_v31 = vmul.f32 1.442695, %v6836_v14  ;;  %vm13297_vm14 = vmor %vm5819_vm13, %vm5820_vm12  ;;  %v4714_v24 = vadd.f32 %v4713_v50, %v13215_v38  ;;  %v5830_v27 = vmul.f32 %v13271_v59, %v13209_v11 }
 0x74e   : > { %v9575_v34 = vpop.eup %9574  ;;  %v5822_v37 = vsel %vm13297_vm14, %v13201_v42, %v5818_v21  ;;  %v4997_v20 = vpop.f32.mrf.mxu2  ;;  %9580 = vpow2.f32 %v7293_v40  ;;  %v5826_v3 = vor.u32 1.1754944e-38, %v5825_v25  ;;  %v13308_v7 = vadd.f32 1.0, %v9571_v32 }
 0x74f   : > { %v7027_v51 = vadd.f32 1.0, %v9575_v34  ;;  %v4806_v52 = vmax.f32 %v4714_v24, 0.0  ;;  %9582 = vpow2.f32 %v6909_v31  ;;  %v5117_v38 = vmax.f32 %v4997_v20, 0.0  ;;  %v13312_v42 = vpop.permute.xlu2 %7774  ;;  %v13318_v24 = vpop.f32.mrf.mxu0 }
 0x750   : > { %v13310_v14 = vpop.f32.mrf.mxu1  ;;  %v5831_v50 = vsub.f32 1.0, %v5830_v27  ;;  %v9577_v23 = vpop.eup %9576  ;;  %16564 = vst [vmem:[#allocation106_spill] sm:$0xff] %v13312_v42  ;;  %v5827_v44 = vsel %vm5824_vm15, %v5826_v3, %v5822_v37  ;;  %vm5835_vm0 = vweird.f32 %v13271_v59  ;;  %v5838_v27 = vand.u32 2147483647, %v13209_v11 }
 0x751   : > { %9584 = vlog2.f32 %v7027_v51  ;;  %v4847_v21 = vpack.c.bf16 %v4806_v52, %v4805_v33  ;;  %v5493_v1 = vsub.f32 0.0, %v13310_v14  ;;  %4755 = vmatmul.bf16.gmra.mxu3 %v10213_v48  ;;  %v7094_v40 = vmul.f32 0.6931472, %v9577_v23  ;;  %v7773_v37 = vpop.permute.xlu0 %7772 }
 0x752   : > { %v5167_v25 = vpack.c.bf16 %v5117_v38, %v5116_v46  ;;  %v6773_v32 = vand.u32 2147483647, %v13310_v14  ;;  %v5832_v20 = vmul.f32 %v13271_v59, %v5831_v50  ;;  %v5840_v33 = vand.u32 2147483648, %v13209_v11 }
 0x753   : > { %v9579_v31 = vpop.eup %9578  ;;  %v5567_v34 = vmul.f32 1.442695, %v5493_v1  ;;  %9586 = vrcp.f32 %v13308_v7  ;;  %v7216_v48 = vadd.f32 %v7094_v40, %v6704_v60  ;;  %v7408_v46 = vmul.f32 %v13170_v63, %v11549_v54 }
 0x754   : > { %v6837_v23 = vsub.f32 0.0, %v6773_v32  ;;  %5323 = vmatmul.bf16.gmra.mxu1 %v5167_v25  ;;  %v4716_v51 = vpop.f32.mrf.mxu3  ;;  %v13328_v3 = vpop.eup %9580  ;;  %v7295_v52 = vmul.f32 1.442695, %v13310_v14  ;;  %v5833_v38 = vadd.f32 %v13271_v59, %v5832_v20  ;;  %vm5834_vm1 = vweird.f32 %v13209_v11  ;;  %v16565_v32 = vld [vmem:[#allocation124_spill] sm:$0xff] }
 0x755   : > { %5039 = vmatmul.bf16.gmra.mxu2 %v4847_v21  ;;  %9588 = vpow2.f32 %v5567_v34  ;;  %v9583_v50 = vpop.eup %9582  ;;  %v13333_v35 = vadd.f32 1.0, %v9579_v31  ;;  %v7473_v54 = vsel %vm7467_vm4, %v5827_v44, %v7216_v48  ;;  %vm5836_vm5 = vmor %vm5834_vm1, %vm5835_vm0  ;;  %v5841_v60 = vor.u32 1.1754944e-38, %v5840_v33  ;;  %v13354_v48 = vpop.permute.xlu1 %7770 }
 0x756   : > { %v6911_v63 = vmul.f32 1.442695, %v6837_v23  ;;  %v13339_v21 = vpop.f32.mrf.mxu2  ;;  %v7537_v40 = vsel %vm1585_vm11, %v7408_v46, %v7473_v54  ;;  %v5837_v25 = vsel %vm5836_vm5, %v13271_v59, %v5833_v38  ;;  %vm5839_vm6 = vcmp.eq.f32.partialorder %v5838_v27, 8.507059e+37 }
 0x757   : > { %v9585_v1 = vpop.eup %9584  ;;  %v13346_v11 = vsel %vm1866_vm3, %v12859_v6, %v7773_v37  ;;  %7926 = vrot.lane.b32.xlu2 %v7537_v40, %s10315_s25  ;;  %v5842_v44 = vsel %vm5839_vm6, %v5841_v60, %v5837_v25  ;;  %v7409_v31 = vmul.f32 %v13188_v9, %v16565_v32  ;;  %v4717_v34 = vadd.f32 %v4716_v51, %v13273_v47  ;;  %v13378_v25 = vpop.f32.mrf.mxu0 }
 0x758   : > { %9590 = vpow2.f32 %v6911_v63  ;;  %v13352_v20 = vpop.f32.mrf.mxu1  ;;  %v7100_v33 = vmul.f32 0.6931472, %v9585_v1  ;;  %v7474_v6 = vsel %vm7467_vm4, %v5842_v44, %v13293_v16  ;;  %v5845_v38 = vmul.f32 %v13291_v13, %v13239_v0 }
 0x759   : > { %9592 = vpow2.f32 %v7295_v52  ;;  %v5494_v59 = vsub.f32 0.0, %v13352_v20  ;;  %v7781_v27 = vpop.permute.xlu2 %7780  ;;  %v13360_v46 = vpop.eup %9586  ;;  %v7538_v47 = vsel %vm1585_vm11, %v7409_v31, %v7474_v6  ;;  %v6774_v23 = vand.u32 2147483647, %v13352_v20 }
 0x75a   : > { %9594 = vrcp.f32 %v13333_v35  ;;  %7928 = vrot.lane.b32.xlu1 %v7538_v47, %s10315_s25  ;;  %v7297_v16 = vmul.f32 1.442695, %v13352_v20  ;;  %v13371_v52 = vsel %vm1866_vm3, %v12895_v57, %v7781_v27  ;;  %v13375_v54 = vadd.f32 1.0, %v9583_v50 }
 0x75b   : > { %v9589_v37 = vpop.eup %9588  ;;  %v5569_v51 = vmul.f32 1.442695, %v5494_v59  ;;  %16566 = vst [vmem:[#allocation107_spill] sm:$0xff] %v13371_v52  ;;  %v4807_v63 = vmax.f32 %v4717_v34, 0.0  ;;  %v5118_v60 = vmax.f32 %v13339_v21, 0.0  ;;  %v6838_v1 = vsub.f32 0.0, %v6774_v23 }
 0x75c   : > { %v4718_v40 = vpop.f32.mrf.mxu3  ;;  %v13382_v44 = vadd.f32 %v7100_v33, %v6707_v62  ;;  %v5846_v32 = vsub.f32 1.0, %v5845_v38  ;;  %v13385_v6 = vadd.f32 1.0, %v9589_v37  ;;  %vm5849_vm7 = vweird.f32 %v13239_v0 }
 0x75d   : > { %9596 = vpow2.f32 %v5569_v51  ;;  %v6913_v50 = vmul.f32 1.442695, %v6838_v1  ;;  %v4719_v21 = vadd.f32 %v4718_v40, %v13318_v24  ;;  %vm5850_vm2 = vweird.f32 %v13291_v13 }
 0x75e   : > { %v9591_v31 = vpop.eup %9590  ;;  %v5002_v34 = vpop.f32.mrf.mxu2  ;;  %9598 = vpow2.f32 %v7297_v16  ;;  %v5847_v22 = vmul.f32 %v13291_v13, %v5846_v32  ;;  %v5860_v37 = vmul.f32 %v13360_v46, %v13308_v7  ;;  %v5855_v51 = vand.u32 2147483648, %v13239_v0  ;;  %vm13416_vm8 = vmor %vm5849_vm7, %vm5850_vm2 }
 0x75f   : > { %v13389_v59 = vpop.eup %9592  ;;  %v7029_v27 = vadd.f32 1.0, %v9591_v31  ;;  %9600 = vpow2.f32 %v6913_v50  ;;  %v4808_v33 = vmax.f32 %v4719_v21, 0.0  ;;  %v5119_v47 = vmax.f32 %v5002_v34, 0.0 }
 0x760   : > { %v13393_v62 = vpop.eup %9594  ;;  %v13395_v23 = vpop.f32.mrf.mxu1  ;;  %v5848_v24 = vadd.f32 %v13291_v13, %v5847_v22  ;;  %v5853_v50 = vand.u32 2147483647, %v13239_v0  ;;  %v5861_v22 = vsub.f32 1.0, %v5860_v37  ;;  %vm5865_vm9 = vweird.f32 %v13360_v46 }
 0x761   : > { %9602 = vlog2.f32 %v7029_v27  ;;  %v5495_v16 = vsub.f32 0.0, %v13395_v23  ;;  %v7777_v38 = vpop.permute.xlu1 %7776  ;;  %v4848_v1 = vpack.c.bf16 %v4808_v33, %v4807_v63  ;;  %v5168_v40 = vpack.c.bf16 %v5119_v47, %v5118_v60 }
 0x762   : > { %9604 = vlog2.f32 %v13275_v15  ;;  %v6775_v32 = vand.u32 2147483647, %v13395_v23  ;;  %v13408_v34 = vsel %vm1866_vm3, %v12864_v43, %v7777_v38  ;;  %v7410_v63 = vmul.f32 %v13264_v55, %v11582_v41 }
 0x763   : > { %v9597_v31 = vpop.eup %9596  ;;  %9606 = vrcp.f32 %v13385_v6  ;;  %v5571_v21 = vmul.f32 1.442695, %v5495_v16  ;;  %16567 = vst [vmem:[#allocation16_spill] sm:$0xff] %v13408_v34  ;;  %v5852_v47 = vsel %vm13416_vm8, %v13291_v13, %v5848_v24  ;;  %v5856_v16 = vor.u32 1.1754944e-38, %v5855_v51 }
 0x764   : > { %v13410_v27 = vadd.f32 1.0, %v9597_v31  ;;  %v6839_v60 = vsub.f32 0.0, %v6775_v32  ;;  %5328 = vmatmul.bf16.gmra.mxu1 %v5168_v40  ;;  %v4721_v33 = vpop.f32.mrf.mxu3  ;;  %v13422_v43 = vpop.eup %9598  ;;  %v5862_v31 = vmul.f32 %v13360_v46, %v5861_v22  ;;  %v5868_v41 = vand.u32 2147483647, %v13308_v7 }
 0x765   : > { %5044 = vmatmul.bf16.gmra.mxu2 %v4848_v1  ;;  %9608 = vpow2.f32 %v5571_v21  ;;  %v9601_v0 = vpop.eup %9600  ;;  %v5870_v55 = vand.u32 2147483648, %v13308_v7  ;;  %v4506_v40 = vpop.f32.mrf.mxu0  ;;  %vm5854_vm10 = vcmp.eq.f32.partialorder %v5853_v50, 8.507059e+37  ;;  %v7299_v24 = vmul.f32 1.442695, %v13395_v23 }
 0x766   : > { %v6915_v38 = vmul.f32 1.442695, %v6839_v60  ;;  %v13431_v37 = vpop.f32.mrf.mxu2  ;;  %9610 = vrcp.f32 %v13410_v27  ;;  %v5857_v32 = vsel %vm5854_vm10, %v5856_v16, %v5852_v47  ;;  %v5863_v21 = vadd.f32 %v13360_v46, %v5862_v31 }
 0x767   : > { %v9603_v1 = vpop.eup %9602  ;;  %vm5864_vm12 = vweird.f32 %v13308_v7  ;;  %v13442_v22 = vadd.f32 1.0, %v9601_v0  ;;  %v5871_v50 = vor.u32 1.1754944e-38, %v5870_v55  ;;  %vm5869_vm14 = vcmp.eq.f32.partialorder %v5868_v41, 8.507059e+37 }
 0x768   : > { %v9605_v51 = vpop.eup %9604  ;;  %9612 = vpow2.f32 %v6915_v38  ;;  %v13438_v15 = vpop.f32.mrf.mxu1  ;;  %vm5866_vm13 = vmor %vm5864_vm12, %vm5865_vm9  ;;  %v7411_v16 = vmul.f32 %v13283_v36, %v11563_v10  ;;  %v7104_v31 = vmul.f32 0.6931472, %v9603_v1  ;;  %v16570_v0 = vmax.f32 %v13174_v30, 0.0 }
 0x769   : > { %v13440_v60 = vpop.eup %9606  ;;  %v7098_v57 = vmul.f32 0.6931472, %v9605_v51  ;;  %v5496_v13 = vsub.f32 0.0, %v13438_v15  ;;  %v5867_v47 = vsel %vm5866_vm13, %v13360_v46, %v5863_v21  ;;  %v6776_v7 = vand.u32 2147483647, %v13438_v15 }
 0x76a   : > { %v5872_v51 = vsel %vm5869_vm14, %v5871_v50, %v5867_v47  ;;  %v4722_v46 = vadd.f32 %v4721_v33, %v13378_v25  ;;  %v5120_v25 = vmax.f32 %v13431_v37, 0.0  ;;  %vm5880_vm15 = vweird.f32 %v13393_v62 }
 0x76b   : > { %v9609_v38 = vpop.eup %9608  ;;  %v7218_v9 = vadd.f32 %v7098_v57, %v16570_v0  ;;  %v5573_v52 = vmul.f32 1.442695, %v5496_v13  ;;  %v7476_v55 = vsel %vm7467_vm4, %v5872_v51, %v13382_v44  ;;  %v6840_v41 = vsub.f32 0.0, %v6776_v7 }
 0x76c   : > { %v13453_v34 = vadd.f32 1.0, %v9609_v38  ;;  %v4723_v21 = vpop.f32.mrf.mxu3  ;;  %v13459_v10 = vpop.eup %9610  ;;  %v7540_v30 = vsel %vm1585_vm11, %v7411_v16, %v7476_v55  ;;  %v5875_v57 = vmul.f32 %v13393_v62, %v13333_v35  ;;  %v4809_v47 = vmax.f32 %v4722_v46, 0.0 }
 0x76d   : > { %v7475_v36 = vsel %vm7467_vm4, %v5857_v32, %v7218_v9  ;;  %9614 = vpow2.f32 %v5573_v52  ;;  %7932 = vrot.lane.b32.xlu2 %v7540_v30, %s10315_s25  ;;  %v6917_v33 = vmul.f32 1.442695, %v6840_v41  ;;  %v16571_v9 = vmax.f32 %v13310_v14, 0.0  ;;  %v4509_v37 = vpop.f32.mrf.mxu0 }
 0x76e   : > { %v9613_v1 = vpop.eup %9612  ;;  %v7539_v44 = vsel %vm1585_vm11, %v7410_v63, %v7475_v36  ;;  %9616 = vpow2.f32 %v7299_v24  ;;  %v5007_v13 = vpop.f32.mrf.mxu2  ;;  %v5876_v50 = vsub.f32 1.0, %v5875_v57  ;;  %v7301_v24 = vmul.f32 1.442695, %v13438_v15 }
 0x76f   : > { %v13473_v32 = vadd.f32 %v7104_v31, %v16571_v9  ;;  %7930 = vrot.lane.b32.xlu0 %v7539_v44, %s10315_s25  ;;  %9618 = vrcp.f32 %v13453_v34  ;;  %v7031_v52 = vadd.f32 1.0, %v9613_v1  ;;  %v4724_v7 = vadd.f32 %v4723_v21, %v4506_v40 }
 0x770   : > { %9620 = vpow2.f32 %v6917_v33  ;;  %v13479_v16 = vpop.f32.mrf.mxu1  ;;  %v5877_v14 = vmul.f32 %v13393_v62, %v5876_v50  ;;  %vm5879_vm0 = vweird.f32 %v13333_v35  ;;  %v5885_v38 = vand.u32 2147483648, %v13333_v35 }
 0x771   : > { %9622 = vlog2.f32 %v7031_v52  ;;  %v5121_v31 = vmax.f32 %v5007_v13, 0.0  ;;  %v5883_v55 = vand.u32 2147483647, %v13333_v35  ;;  %v4810_v46 = vmax.f32 %v4724_v7, 0.0  ;;  %vm13493_vm1 = vmor %vm5879_vm0, %vm5880_vm15 }
 0x772   : > { %9624 = vlog2.f32 %v13375_v54  ;;  %v5878_v51 = vadd.f32 %v13393_v62, %v5877_v14  ;;  %v5497_v41 = vsub.f32 0.0, %v13479_v16  ;;  %v6777_v54 = vand.u32 2147483647, %v13479_v16 }
 0x773   : > { %v9615_v0 = vpop.eup %9614  ;;  %9626 = vpow2.f32 %v7301_v24  ;;  %v5169_v21 = vpack.c.bf16 %v5121_v31, %v5120_v25  ;;  %v7412_v44 = vmul.f32 %v13328_v3, %v11603_v4  ;;  %v4849_v33 = vpack.c.bf16 %v4810_v46, %v4809_v47 }
 0x774   : > { %v13489_v36 = vpop.eup %9616  ;;  %v13491_v30 = vadd.f32 1.0, %v9615_v0  ;;  %v4726_v57 = vpop.f32.mrf.mxu3  ;;  %v5882_v35 = vsel %vm13493_vm1, %v13393_v62, %v5878_v51  ;;  %v5575_v13 = vmul.f32 1.442695, %v5497_v41  ;;  %v5886_v52 = vor.u32 1.1754944e-38, %v5885_v38 }
 0x775   : > { %v13498_v1 = vpop.eup %9618  ;;  %v6841_v50 = vsub.f32 0.0, %v6777_v54  ;;  %v5890_v25 = vmul.f32 %v13440_v60, %v13385_v6  ;;  %5333 = vmatmul.bf16.gmra.mxu1 %v5169_v21  ;;  %vm5884_vm5 = vcmp.eq.f32.partialorder %v5883_v55, 8.507059e+37  ;;  %v6713_v62 = vmax.f32 %v13479_v16, 0.0  ;;  %5049 = vmatmul.bf16.gmra.mxu2 %v4849_v33  ;;  %v4511_v54 = vpop.f32.mrf.mxu0 }
 0x776   : > { %v9621_v9 = vpop.eup %9620  ;;  %9628 = vrcp.f32 %v13491_v30  ;;  %v13508_v24 = vpop.f32.mrf.mxu2  ;;  %v7303_v4 = vmul.f32 1.442695, %v13479_v16  ;;  %v5887_v7 = vsel %vm5884_vm5, %v5886_v52, %v5882_v35  ;;  %v5898_v41 = vand.u32 2147483647, %v13385_v6 }
 0x777   : > { %v9623_v14 = vpop.eup %9622  ;;  %9630 = vpow2.f32 %v5575_v13  ;;  %v6919_v31 = vmul.f32 1.442695, %v6841_v50  ;;  %v5891_v38 = vsub.f32 1.0, %v5890_v25  ;;  %v13514_v51 = vadd.f32 1.0, %v9621_v9 }
 0x778   : > { %v9625_v3 = vpop.eup %9624  ;;  %v7108_v47 = vmul.f32 0.6931472, %v9623_v14  ;;  %v13512_v0 = vpop.f32.mrf.mxu1  ;;  %v5900_v55 = vand.u32 2147483648, %v13385_v6  ;;  %vm5894_vm6 = vweird.f32 %v13385_v6  ;;  %vm5895_vm7 = vweird.f32 %v13440_v60 }
 0x779   : > { %v7102_v46 = vmul.f32 0.6931472, %v9625_v3  ;;  %v13518_v40 = vpop.eup %9626  ;;  %9632 = vpow2.f32 %v6919_v31  ;;  %v5892_v21 = vmul.f32 %v13440_v60, %v5891_v38  ;;  %v16574_v35 = vmax.f32 %v13395_v23, 0.0  ;;  %vm5896_vm8 = vmor %vm5894_vm6, %vm5895_vm7 }
 0x77a   : > { %v16575_v13 = vmax.f32 %v13269_v56, 0.0  ;;  %9634 = vpow2.f32 %v7303_v4  ;;  %v7413_v52 = vmul.f32 %v13389_v59, %v11595_v61  ;;  %vm13534_vm2 = vcmp.eq.f32.partialorder %v5898_v41, 8.507059e+37 }
 0x77b   : > { %v13525_v33 = vadd.f32 %v7108_v47, %v16574_v35  ;;  %v5893_v25 = vadd.f32 %v13440_v60, %v5892_v21  ;;  %v4727_v3 = vadd.f32 %v4726_v57, %v4509_v37  ;;  %v5498_v23 = vsub.f32 0.0, %v13512_v0 }
 0x77c   : > { %v7220_v9 = vadd.f32 %v7102_v46, %v16575_v13  ;;  %v13531_v50 = vpop.eup %9628  ;;  %v4728_v47 = vpop.f32.mrf.mxu3  ;;  %v5901_v61 = vor.u32 1.1754944e-38, %v5900_v55  ;;  %v6778_v59 = vand.u32 2147483647, %v13512_v0  ;;  %v7305_v4 = vmul.f32 1.442695, %v13512_v0 }
 0x77d   : > { %v9631_v31 = vpop.eup %9630  ;;  %v5897_v37 = vsel %vm5896_vm8, %v13440_v60, %v5893_v25  ;;  %v5577_v57 = vmul.f32 1.442695, %v5498_v23  ;;  %v5905_v55 = vmul.f32 %v13459_v10, %v13410_v27  ;;  %v4811_v60 = vmax.f32 %v4727_v3, 0.0 }
 0x77e   : > { %v7477_v56 = vsel %vm7467_vm4, %v5887_v7, %v7220_v9  ;;  %v13547_v46 = vadd.f32 1.0, %v9631_v31  ;;  %v5012_v41 = vpop.f32.mrf.mxu2  ;;  %v5902_v6 = vsel %vm13534_vm2, %v5901_v61, %v5897_v37  ;;  %v6842_v7 = vsub.f32 0.0, %v6778_v59  ;;  %v13566_v31 = vpop.permute.xlu0 %7778 }
 0x77f   : > { %v7541_v38 = vsel %vm1585_vm11, %v7412_v44, %v7477_v56  ;;  %9636 = vpow2.f32 %v7305_v4  ;;  %v9633_v21 = vpop.eup %9632  ;;  %v7478_v44 = vsel %vm7467_vm4, %v5902_v6, %v13473_v32  ;;  %v5122_v35 = vmax.f32 %v13508_v24, 0.0  ;;  %16578 = vst [vmem:[#allocation20_spill] sm:$0xff] %v13566_v31  ;;  %v13580_v37 = vpop.f32.mrf.mxu0 }
 0x780   : > { %7934 = vrot.lane.b32.xlu1 %v7541_v38, %s10315_s25  ;;  %9638 = vrcp.f32 %v13547_v46  ;;  %v13560_v13 = vpop.f32.mrf.mxu1  ;;  %v13562_v9 = vpop.eup %9634  ;;  %v7033_v25 = vadd.f32 1.0, %v9633_v21  ;;  %v7542_v14 = vsel %vm1585_vm11, %v7413_v52, %v7478_v44  ;;  %v6921_v23 = vmul.f32 1.442695, %v6842_v7 }
 0x781   : > { %9640 = vpow2.f32 %v5577_v57  ;;  %7936 = vrot.lane.b32.xlu0 %v7542_v14, %s10315_s25  ;;  %v5906_v32 = vsub.f32 1.0, %v5905_v55  ;;  %v5913_v3 = vand.u32 2147483647, %v13410_v27  ;;  %v5915_v24 = vand.u32 2147483648, %v13410_v27 }
 0x782   : > { %9642 = vlog2.f32 %v13442_v22  ;;  %v4729_v61 = vadd.f32 %v4728_v47, %v4511_v54  ;;  %v5123_v59 = vmax.f32 %v5012_v41, 0.0  ;;  %vm5909_vm9 = vweird.f32 %v13410_v27 }
 0x783   : > { %9644 = vlog2.f32 %v7033_v25  ;;  %v5907_v52 = vmul.f32 %v13459_v10, %v5906_v32  ;;  %vm5910_vm10 = vweird.f32 %v13459_v10  ;;  %v7414_v22 = vmul.f32 %v13422_v43, %v11576_v29 }
 0x784   : > { %9646 = vpow2.f32 %v6921_v23  ;;  %v13576_v4 = vpop.f32.mrf.mxu3  ;;  %v4812_v57 = vmax.f32 %v4729_v61, 0.0  ;;  %v5170_v6 = vpack.c.bf16 %v5123_v59, %v5122_v35  ;;  %v5499_v54 = vsub.f32 0.0, %v13560_v13  ;;  %vm13594_vm12 = vmor %vm5909_vm9, %vm5910_vm10 }
 0x785   : > { %v13578_v38 = vpop.eup %9636  ;;  %v5908_v41 = vadd.f32 %v13459_v10, %v5907_v52  ;;  %v6779_v7 = vand.u32 2147483647, %v13560_v13  ;;  %v7307_v55 = vmul.f32 1.442695, %v13560_v13  ;;  %v5920_v21 = vmul.f32 %v13498_v1, %v13453_v34 }
 0x786   : > { %v13585_v47 = vpop.eup %9638  ;;  %vm13598_vm13 = vcmp.eq.f32.partialorder %v5913_v3, 8.507059e+37  ;;  %v5916_v35 = vor.u32 1.1754944e-38, %v5915_v24  ;;  %v4850_v25 = vpack.c.bf16 %v4812_v57, %v4811_v60  ;;  %v5579_v14 = vmul.f32 1.442695, %v5499_v54  ;;  %5338 = vmatmul.bf16.gmra.mxu1 %v5170_v6  ;;  %v13602_v23 = vpop.f32.mrf.mxu2 }
 0x787   : > { %v9641_v44 = vpop.eup %9640  ;;  %v5912_v27 = vsel %vm13594_vm12, %v13459_v10, %v5908_v41  ;;  %v6843_v59 = vsub.f32 0.0, %v6779_v7  ;;  %9648 = vpow2.f32 %v7307_v55  ;;  %v5921_v24 = vsub.f32 1.0, %v5920_v21  ;;  %v7785_v10 = vpop.permute.xlu0 %7784 }
 0x788   : > { %v9643_v32 = vpop.eup %9642  ;;  %v13604_v61 = vadd.f32 1.0, %v9641_v44  ;;  %v13609_v52 = vpop.f32.mrf.mxu1  ;;  %9650 = vpow2.f32 %v5579_v14  ;;  %vm5925_vm14 = vweird.f32 %v13498_v1  ;;  %5054 = vmatmul.bf16.gmra.mxu2 %v4850_v25  ;;  %v5917_v6 = vsel %vm13598_vm13, %v5916_v35, %v5912_v27 }
 0x789   : > { %v9645_v3 = vpop.eup %9644  ;;  %v7106_v56 = vmul.f32 0.6931472, %v9643_v32  ;;  %v6923_v54 = vmul.f32 1.442695, %v6843_v59  ;;  %v5928_v44 = vand.u32 2147483647, %v13453_v34  ;;  %v13615_v41 = vpop.permute.xlu2 %7786  ;;  %v5922_v21 = vmul.f32 %v13498_v1, %v5921_v24 }
 0x78a   : > { %v9647_v60 = vpop.eup %9646  ;;  %v7112_v57 = vmul.f32 0.6931472, %v9645_v3  ;;  %16583 = vst [vmem:[#allocation108_spill] sm:$0xff] %v13615_v41  ;;  %9652 = vrcp.f32 %v13604_v61  ;;  %v16584_v7 = vmax.f32 %v13352_v20, 0.0  ;;  %v5930_v29 = vand.u32 2147483648, %v13453_v34  ;;  %v4516_v3 = vpop.f32.mrf.mxu0 }
 0x78b   : > { %v13622_v25 = vadd.f32 1.0, %v9647_v60  ;;  %9654 = vpow2.f32 %v6923_v54  ;;  %vm5924_vm15 = vweird.f32 %v13453_v34  ;;  %v5923_v20 = vadd.f32 %v13498_v1, %v5922_v21 }
 0x78c   : > { %v7222_v55 = vadd.f32 %v7106_v56, %v16584_v7  ;;  %v13628_v35 = vadd.f32 %v7112_v57, %v6713_v62  ;;  %v13635_v56 = vsel %vm1866_vm3, %v12913_v5, %v7785_v10  ;;  %v4733_v32 = vpop.f32.mrf.mxu3  ;;  %vm5926_vm0 = vmor %vm5924_vm15, %vm5925_vm14  ;;  %vm5929_vm1 = vcmp.eq.f32.partialorder %v5928_v44, 8.507059e+37 }
 0x78d   : > { %16585 = vst [vmem:[#allocation109_spill] sm:$0xff] %v13635_v56  ;;  %v13637_v27 = vpop.eup %9648  ;;  %v5931_v34 = vor.u32 1.1754944e-38, %v5930_v29  ;;  %v5500_v16 = vsub.f32 0.0, %v13609_v52  ;;  %v5927_v5 = vsel %vm5926_vm0, %v13498_v1, %v5923_v20  ;;  %v7415_v24 = vmul.f32 %v13489_v36, %v11618_v19 }
 0x78e   : > { %v7479_v14 = vsel %vm7467_vm4, %v5917_v6, %v7222_v55  ;;  %v9651_v62 = vpop.eup %9650  ;;  %v6780_v60 = vand.u32 2147483647, %v13609_v52  ;;  %v5017_v57 = vpop.f32.mrf.mxu2  ;;  %v13654_v44 = vadd.f32 %v13576_v4, %v13580_v37  ;;  %v5935_v55 = vmul.f32 %v13531_v50, %v13491_v30 }
 0x78f   : > { %v7543_v59 = vsel %vm1585_vm11, %v7414_v22, %v7479_v14  ;;  %v7309_v22 = vmul.f32 1.442695, %v13609_v52  ;;  %v13650_v6 = vadd.f32 1.0, %v9651_v62  ;;  %v5932_v54 = vsel %vm5929_vm1, %v5931_v34, %v5927_v5  ;;  %v13676_v62 = vpop.permute.xlu1 %7782 }
 0x790   : > { %7938 = vrot.lane.b32.xlu2 %v7543_v59, %s10315_s25  ;;  %v5581_v10 = vmul.f32 1.442695, %v5500_v16  ;;  %v13656_v7 = vpop.f32.mrf.mxu1  ;;  %v13658_v1 = vpop.eup %9652  ;;  %v7480_v19 = vsel %vm7467_vm4, %v5932_v54, %v13525_v33  ;;  %v6844_v36 = vsub.f32 0.0, %v6780_v60  ;;  %v5124_v37 = vmax.f32 %v13602_v23, 0.0  ;;  %16586 = vst [vmem:[#allocation18_spill] sm:$0xff] %v13676_v62 }
 0x791   : > { %9656 = vpow2.f32 %v7309_v22  ;;  %v9655_v21 = vpop.eup %9654  ;;  %v7544_v4 = vsel %vm1585_vm11, %v7415_v24, %v7480_v19  ;;  %v5936_v20 = vsub.f32 1.0, %v5935_v55  ;;  %v7921_v59 = vpop.permute.xlu2 %7920  ;;  %v4813_v34 = vmax.f32 %v13654_v44, 0.0  ;;  %v16587_v24 = vld [vmem:[#allocation81_spill] sm:$0xff] }
 0x792   : > { %9658 = vrcp.f32 %v13650_v6  ;;  %v7035_v14 = vadd.f32 1.0, %v9655_v21  ;;  %7940 = vrot.lane.b32.xlu1 %v7544_v4, %s10315_s25  ;;  %v6925_v33 = vmul.f32 1.442695, %v6844_v36  ;;  %vm5940_vm5 = vweird.f32 %v13531_v50  ;;  %v16597_v21 = vld [vmem:[#allocation75_spill] sm:$0xff] }
 0x793   : > { %9660 = vpow2.f32 %v5581_v10  ;;  %v5943_v16 = vand.u32 2147483647, %v13491_v30  ;;  %v5937_v23 = vmul.f32 %v13531_v50, %v5936_v20  ;;  %vm8172_vm6 = vcmask 195584  }
 0x794   : > { %9662 = vlog2.f32 %v13514_v51  ;;  %vm8237_vm7 = vcmask 261120   ;;  %vm5939_vm2 = vweird.f32 %v13491_v30  ;;  %v5945_v5 = vand.u32 2147483648, %v13491_v30  ;;  %v13687_v19 = vpop.f32.mrf.mxu3 }
 0x795   : > { %9664 = vlog2.f32 %v7035_v14  ;;  %v8175_v60 = vsel %vm8172_vm6, %v16587_v24, %v7921_v59  ;;  %v5938_v54 = vadd.f32 %v13531_v50, %v5937_v23  ;;  %v4734_v44 = vadd.f32 %v4733_v32, %v4516_v3  ;;  %vm13695_vm8 = vmor %vm5939_vm2, %vm5940_vm5 }
 0x796   : > { %9666 = vpow2.f32 %v6925_v33  ;;  %v8240_v51 = vsel %vm8237_vm7, %v8175_v60, 0.0  ;;  %v5125_v10 = vmax.f32 %v5017_v57, 0.0  ;;  %vm13699_vm9 = vcmp.eq.f32.partialorder %v5943_v16, 8.507059e+37  ;;  %v4519_v33 = vpop.f32.mrf.mxu0 }
 0x797   : > { %v13683_v22 = vpop.eup %9656  ;;  %v13689_v36 = vpop.f32.mrf.mxu2  ;;  %8304 = vst [vmem:[%s13703_s15 + $0x10] sm:$0xff] %v8240_v51  ;;  %v5501_v32 = vsub.f32 0.0, %v13656_v7  ;;  %v6781_v3 = vand.u32 2147483647, %v13656_v7  ;;  %v5950_v57 = vmul.f32 %v13585_v47, %v13547_v46  ;;  %v5942_v20 = vsel %vm13695_vm8, %v13531_v50, %v5938_v54 }
 0x798   : > { %v13691_v55 = vpop.eup %9658  ;;  %v13710_v4 = vpop.f32.mrf.mxu1  ;;  %v4814_v59 = vmax.f32 %v4734_v44, 0.0  ;;  %v5171_v16 = vpack.c.bf16 %v5125_v10, %v5124_v37  ;;  %v7311_v23 = vmul.f32 1.442695, %v13656_v7  ;;  %v5946_v51 = vor.u32 1.1754944e-38, %v5945_v5 }
 0x799   : > { %v9661_v14 = vpop.eup %9660  ;;  %v5583_v29 = vmul.f32 1.442695, %v5501_v32  ;;  %v6845_v43 = vsub.f32 0.0, %v6781_v3  ;;  %v5951_v56 = vsub.f32 1.0, %v5950_v57  ;;  %v16592_v54 = vmax.f32 %v13438_v15, 0.0  ;;  %v7917_v10 = vpop.permute.xlu1 %7916  ;;  %v16596_v32 = vld [vmem:[#allocation79_spill] sm:$0xff] }
 0x79a   : > { %v9663_v24 = vpop.eup %9662  ;;  %v13716_v60 = vadd.f32 1.0, %v9661_v14  ;;  %v4851_v62 = vpack.c.bf16 %v4814_v59, %v4813_v34  ;;  %9668 = vpow2.f32 %v7311_v23  ;;  %5343 = vmatmul.bf16.gmra.mxu1 %v5171_v16  ;;  %v5947_v50 = vsel %vm13699_vm9, %v5946_v51, %v5942_v20 }
 0x79b   : > { %v9665_v63 = vpop.eup %9664  ;;  %v7110_v41 = vmul.f32 0.6931472, %v9663_v24  ;;  %v6927_v37 = vmul.f32 1.442695, %v6845_v43  ;;  %v7416_v5 = vmul.f32 %v13518_v40, %v11606_v45  ;;  %v5952_v34 = vmul.f32 %v13585_v47, %v5951_v56 }
 0x79c   : > { %v9667_v42 = vpop.eup %9666  ;;  %v7116_v31 = vmul.f32 0.6931472, %v9665_v63  ;;  %9670 = vrcp.f32 %v13716_v60  ;;  %5059 = vmatmul.bf16.gmra.mxu2 %v4851_v62  ;;  %v6717_v30 = vmax.f32 %v13656_v7, 0.0  ;;  %vm5955_vm10 = vweird.f32 %v13585_v47  ;;  %v4738_v20 = vpop.f32.mrf.mxu3 }
 0x79d   : > { %v7224_v44 = vadd.f32 %v7110_v41, %v16592_v54  ;;  %9672 = vpow2.f32 %v5583_v29  ;;  %v5958_v63 = vand.u32 2147483647, %v13547_v46  ;;  %v5953_v15 = vadd.f32 %v13585_v47, %v5952_v34 }
 0x79e   : > { %9674 = vpow2.f32 %v6927_v37  ;;  %vm5954_vm12 = vweird.f32 %v13547_v46  ;;  %v5960_v45 = vand.u32 2147483648, %v13547_v46  ;;  %v16593_v41 = vmax.f32 %v13560_v13, 0.0 }
 0x79f   : > { %v7481_v43 = vsel %vm7467_vm4, %v5947_v50, %v7224_v44  ;;  %v13734_v40 = vpop.f32.mrf.mxu2  ;;  %v13740_v29 = vadd.f32 1.0, %v9667_v42  ;;  %vm13744_vm13 = vmor %vm5954_vm12, %vm5955_vm10  ;;  %v8173_v3 = vsel %vm8172_vm6, %v16596_v32, %v7917_v10  ;;  %vm5959_vm14 = vcmp.eq.f32.partialorder %v5958_v63, 8.507059e+37  ;;  %v4521_v50 = vpop.f32.mrf.mxu0 }
 0x7a0   : > { %v13738_v56 = vadd.f32 %v7116_v31, %v16593_v41  ;;  %v7545_v62 = vsel %vm1585_vm11, %v7416_v5, %v7481_v43  ;;  %v13750_v46 = vpop.f32.mrf.mxu1  ;;  %v13752_v57 = vpop.eup %9668  ;;  %v5957_v42 = vsel %vm13744_vm13, %v13585_v47, %v5953_v15  ;;  %v5961_v13 = vor.u32 1.1754944e-38, %v5960_v45 }
 0x7a1   : > { %7942 = vrot.lane.b32.xlu0 %v7545_v62, %s10315_s25  ;;  %v7417_v31 = vmul.f32 %v13562_v9, %v11587_v58  ;;  %v8238_v14 = vsel %vm8237_vm7, %v8173_v3, 0.0  ;;  %v4737_v16 = vadd.f32 %v13687_v19, %v4519_v33  ;;  %v5502_v23 = vsub.f32 0.0, %v13710_v4  ;;  %v7919_v63 = vpop.permute.xlu0 %7918 }
 0x7a2   : > { %v13761_v59 = vpop.eup %9670  ;;  %8302 = vst [vmem:[%s13703_s15] sm:$0xff] %v8238_v14  ;;  %v6782_v24 = vand.u32 2147483647, %v13710_v4  ;;  %v5962_v47 = vsel %vm5959_vm14, %v5961_v13, %v5957_v42  ;;  %v5126_v37 = vmax.f32 %v13689_v36, 0.0  ;;  %v7313_v58 = vmul.f32 1.442695, %v13710_v4 }
 0x7a3   : > { %v9673_v51 = vpop.eup %9672  ;;  %v5965_v9 = vmul.f32 %v13658_v1, %v13604_v61  ;;  %v7482_v19 = vsel %vm7467_vm4, %v5962_v47, %v13628_v35  ;;  %v5585_v33 = vmul.f32 1.442695, %v5502_v23  ;;  %v4815_v43 = vmax.f32 %v4737_v16, 0.0 }
 0x7a4   : > { %v9675_v54 = vpop.eup %9674  ;;  %v13771_v44 = vadd.f32 1.0, %v9673_v51  ;;  %v6846_v5 = vsub.f32 0.0, %v6782_v24  ;;  %v7546_v10 = vsel %vm1585_vm11, %v7417_v31, %v7482_v19  ;;  %9676 = vpow2.f32 %v7313_v58 }
 0x7a5   : > { %v7037_v34 = vadd.f32 1.0, %v9675_v54  ;;  %v5966_v36 = vsub.f32 1.0, %v5965_v9  ;;  %7944 = vrot.lane.b32.xlu2 %v7546_v10, %s10315_s25  ;;  %v6718_v15 = vmax.f32 %v13710_v4, 0.0  ;;  %vm5970_vm15 = vweird.f32 %v13658_v1  ;;  %v4741_v9 = vpop.f32.mrf.mxu3 }
 0x7a6   : > { %9678 = vrcp.f32 %v13771_v44  ;;  %v6929_v45 = vmul.f32 1.442695, %v6846_v5  ;;  %v5975_v41 = vand.u32 2147483648, %v13604_v61  ;;  %vm5969_vm0 = vweird.f32 %v13604_v61 }
 0x7a7   : > { %9680 = vlog2.f32 %v7037_v34  ;;  %v5967_v35 = vmul.f32 %v13658_v1, %v5966_v36  ;;  %v13784_v62 = vpop.f32.mrf.mxu2  ;;  %v8174_v32 = vsel %vm8172_vm6, %v16597_v21, %v7919_v63  ;;  %v4739_v3 = vadd.f32 %v4738_v20, %v4521_v50  ;;  %vm13794_vm1 = vmor %vm5969_vm0, %vm5970_vm15  ;;  %v4524_v34 = vpop.f32.mrf.mxu0 }
 0x7a8   : > { %9682 = vpow2.f32 %v5585_v33  ;;  %v13789_v42 = vpop.f32.mrf.mxu1  ;;  %v5973_v31 = vand.u32 2147483647, %v13604_v61  ;;  %v8239_v14 = vsel %vm8237_vm7, %v8174_v32, 0.0  ;;  %v5127_v24 = vmax.f32 %v13734_v40, 0.0 }
 0x7a9   : > { %9684 = vpow2.f32 %v6929_v45  ;;  %v5968_v13 = vadd.f32 %v13658_v1, %v5967_v35  ;;  %8303 = vst [vmem:[%s13703_s15 + $0x8] sm:$0xff] %v8239_v14  ;;  %v4816_v23 = vmax.f32 %v4739_v3, 0.0  ;;  %v5503_v20 = vsub.f32 0.0, %v13750_v46 }
 0x7aa   : > { %9686 = vlog2.f32 %v13622_v25  ;;  %v13802_v51 = vpop.eup %9676  ;;  %v5976_v50 = vor.u32 1.1754944e-38, %v5975_v41  ;;  %v7418_v47 = vmul.f32 %v13578_v38, %v11631_v12  ;;  %v6783_v58 = vand.u32 2147483647, %v13750_v46 }
 0x7ab   : > { %v5972_v61 = vsel %vm13794_vm1, %v13658_v1, %v5968_v13  ;;  %v4852_v54 = vpack.c.bf16 %v4816_v23, %v4815_v43  ;;  %v5172_v19 = vpack.c.bf16 %v5127_v24, %v5126_v37  ;;  %v5587_v40 = vmul.f32 1.442695, %v5503_v20 }
 0x7ac   : > { %v13810_v25 = vpop.eup %9678  ;;  %v7315_v33 = vmul.f32 1.442695, %v13750_v46  ;;  %vm5974_vm5 = vcmp.eq.f32.partialorder %v5973_v31, 8.507059e+37  ;;  %v6719_v10 = vmax.f32 %v13750_v46, 0.0  ;;  %v6847_v1 = vsub.f32 0.0, %v6783_v58 }
 0x7ad   : > { %v9681_v5 = vpop.eup %9680  ;;  %v5980_v36 = vmul.f32 %v13691_v55, %v13650_v6  ;;  %v5977_v63 = vsel %vm5974_vm5, %v5976_v50, %v5972_v61  ;;  %9688 = vpow2.f32 %v5587_v40  ;;  %v5988_v45 = vand.u32 2147483647, %v13650_v6  ;;  %5064 = vmatmul.bf16.gmra.mxu2 %v4852_v54  ;;  %5348 = vmatmul.bf16.gmra.mxu1 %v5172_v19  ;;  %v16602_v61 = vld [vmem:[#allocation129_spill] sm:$0xff] }
 0x7ae   : > { %v9683_v12 = vpop.eup %9682  ;;  %v7120_v38 = vmul.f32 0.6931472, %v9681_v5  ;;  %v6931_v35 = vmul.f32 1.442695, %v6847_v1  ;;  %v5990_v21 = vand.u32 2147483648, %v13650_v6  ;;  %9690 = vpow2.f32 %v7315_v33  ;;  %v16604_v40 = vld [vmem:[#allocation41_spill] sm:$0xff] }
 0x7af   : > { %v9685_v37 = vpop.eup %9684  ;;  %v13817_v43 = vadd.f32 1.0, %v9683_v12  ;;  %v5981_v41 = vsub.f32 1.0, %v5980_v36  ;;  %v13820_v32 = vpop.f32.mrf.mxu2  ;;  %vm5984_vm2 = vweird.f32 %v13650_v6  ;;  %vm5985_vm8 = vweird.f32 %v13691_v55 }
 0x7b0   : > { %v9687_v3 = vpop.eup %9686  ;;  %v7038_v13 = vadd.f32 1.0, %v9685_v37  ;;  %v13824_v31 = vpop.f32.mrf.mxu1  ;;  %v13828_v14 = vadd.f32 %v7120_v38, %v6717_v30  ;;  %vm13831_vm9 = vcmp.eq.f32.partialorder %v5988_v45, 8.507059e+37  ;;  %v5991_v20 = vor.u32 1.1754944e-38, %v5990_v21  ;;  %vm5986_vm10 = vmor %vm5984_vm2, %vm5985_vm8 }
 0x7b1   : > { %v7114_v16 = vmul.f32 0.6931472, %v9687_v3  ;;  %v5982_v23 = vmul.f32 %v13691_v55, %v5981_v41  ;;  %9692 = vrcp.f32 %v13817_v43  ;;  %v7419_v50 = vmul.f32 %v13637_v27, %v16602_v61  ;;  %v7927_v58 = vpop.permute.xlu2 %7926  ;;  %v4743_v37 = vpop.f32.mrf.mxu3 }
 0x7b2   : > { %v5504_v54 = vsub.f32 0.0, %v13789_v42  ;;  %v16603_v7 = vmax.f32 %v13512_v0, 0.0  ;;  %9694 = vpow2.f32 %v6931_v35  ;;  %v8178_v33 = vsel %vm8172_vm6, %v16604_v40, %v7927_v58 }
 0x7b3   : > { %v5983_v19 = vadd.f32 %v13691_v55, %v5982_v23  ;;  %v9689_v5 = vpop.eup %9688  ;;  %9696 = vlog2.f32 %v7038_v13  ;;  %v8243_v27 = vsel %vm8237_vm7, %v8178_v33, 0.0  ;;  %v13849_v1 = vadd.f32 %v4741_v9, %v4524_v34 }
 0x7b4   : > { %v7226_v30 = vadd.f32 %v7114_v16, %v16603_v7  ;;  %v5589_v36 = vmul.f32 1.442695, %v5504_v54  ;;  %v13853_v12 = vadd.f32 1.0, %v9689_v5  ;;  %8307 = vst [vmem:[%s13703_s15 + $0x28] sm:$0xff] %v8243_v27  ;;  %v6784_v45 = vand.u32 2147483647, %v13789_v42  ;;  %v13858_v35 = vpop.eup %9690 }
 0x7b5   : > { %v5987_v38 = vsel %vm5986_vm10, %v13691_v55, %v5983_v19  ;;  %v7317_v34 = vmul.f32 1.442695, %v13789_v42  ;;  %v5128_v41 = vmax.f32 %v13784_v62, 0.0  ;;  %v5995_v3 = vmul.f32 %v13761_v59, %v13716_v60 }
 0x7b6   : > { %v7483_v0 = vsel %vm7467_vm4, %v5977_v63, %v7226_v30  ;;  %v5992_v9 = vsel %vm13831_vm9, %v5991_v20, %v5987_v38  ;;  %9698 = vpow2.f32 %v5589_v36  ;;  %v4526_v63 = vpop.f32.mrf.mxu0  ;;  %v6848_v21 = vsub.f32 0.0, %v6784_v45  ;;  %v16606_v38 = vld [vmem:[#allocation126_spill] sm:$0xff] }
 0x7b7   : > { %v7547_v6 = vsel %vm1585_vm11, %v7418_v47, %v7483_v0  ;;  %v7484_v55 = vsel %vm7467_vm4, %v5992_v9, %v13738_v56  ;;  %v13872_v13 = vpop.eup %9692  ;;  %9700 = vrcp.f32 %v13853_v12  ;;  %v4817_v23 = vmax.f32 %v13849_v1, 0.0 }
 0x7b8   : > { %7946 = vrot.lane.b32.xlu1 %v7547_v6, %s10315_s25  ;;  %v7923_v47 = vpop.permute.xlu1 %7922  ;;  %v7548_v16 = vsel %vm1585_vm11, %v7419_v50, %v7484_v55  ;;  %v6720_v24 = vmax.f32 %v13789_v42, 0.0  ;;  %v13879_v20 = vpop.f32.mrf.mxu2  ;;  %v6933_v61 = vmul.f32 1.442695, %v6848_v21  ;;  %9702 = vpow2.f32 %v7317_v34  ;;  %v16605_v50 = vld [vmem:[#allocation35_spill] sm:$0xff] }
 0x7b9   : > { %v13881_v56 = vpop.f32.mrf.mxu1  ;;  %v9695_v62 = vpop.eup %9694  ;;  %7948 = vrot.lane.b32.xlu0 %v7548_v16, %s10315_s25  ;;  %v5996_v58 = vsub.f32 1.0, %v5995_v3  ;;  %vm5999_vm12 = vweird.f32 %v13716_v60  ;;  %vm6000_vm13 = vweird.f32 %v13761_v59  ;;  %9704 = vlog2.f32 %v13740_v29 }
 0x7ba   : > { %v13885_v54 = vpop.eup %9696  ;;  %v7039_v7 = vadd.f32 1.0, %v9695_v62  ;;  %v8176_v30 = vsel %vm8172_vm6, %v16605_v50, %v7923_v47  ;;  %9706 = vpow2.f32 %v6933_v61  ;;  %v6003_v40 = vand.u32 2147483647, %v13716_v60  ;;  %vm13909_vm14 = vmor %vm5999_vm12, %vm6000_vm13  ;;  %v4746_v16 = vpop.f32.mrf.mxu3 }
 0x7bb   : > { %v5997_v19 = vmul.f32 %v13761_v59, %v5996_v58  ;;  %v6005_v33 = vand.u32 2147483648, %v13716_v60  ;;  %v8241_v27 = vsel %vm8237_vm7, %v8176_v30, 0.0  ;;  %v4744_v1 = vadd.f32 %v4743_v37, %v4526_v63 }
 0x7bc   : > { %v9699_v5 = vpop.eup %9698  ;;  %9708 = vlog2.f32 %v7039_v7  ;;  %v5129_v36 = vmax.f32 %v13820_v32, 0.0  ;;  %v7420_v45 = vmul.f32 %v13683_v22, %v16606_v38  ;;  %8305 = vst [vmem:[%s13703_s15 + $0x18] sm:$0xff] %v8241_v27  ;;  %v5505_v6 = vsub.f32 0.0, %v13824_v31 }
 0x7bd   : > { %v13896_v0 = vadd.f32 1.0, %v9699_v5  ;;  %v5998_v29 = vadd.f32 %v13761_v59, %v5997_v19  ;;  %v13903_v9 = vpop.eup %9700  ;;  %v4818_v32 = vmax.f32 %v4744_v1, 0.0  ;;  %v6785_v63 = vand.u32 2147483647, %v13824_v31  ;;  %v7925_v5 = vpop.permute.xlu0 %7924 }
 0x7be   : > { %v5173_v34 = vpack.c.bf16 %v5129_v36, %v5128_v41  ;;  %v7319_v55 = vmul.f32 1.442695, %v13824_v31  ;;  %v13915_v22 = vpop.eup %9702  ;;  %v6006_v3 = vor.u32 1.1754944e-38, %v6005_v33  ;;  %v5591_v47 = vmul.f32 1.442695, %v5505_v6  ;;  %v4529_v30 = vpop.f32.mrf.mxu0 }
 0x7bf   : > { %v6002_v21 = vsel %vm13909_vm14, %v13761_v59, %v5998_v29  ;;  %v6010_v60 = vmul.f32 %v13810_v25, %v13771_v44  ;;  %v9705_v62 = vpop.eup %9704  ;;  %9710 = vrcp.f32 %v13896_v0  ;;  %vm6004_vm15 = vcmp.eq.f32.partialorder %v6003_v40, 8.507059e+37 }
 0x7c0   : > { %v4853_v41 = vpack.c.bf16 %v4818_v32, %v4817_v23  ;;  %v6849_v61 = vsub.f32 0.0, %v6785_v63  ;;  %5353 = vmatmul.bf16.gmra.mxu1 %v5173_v34  ;;  %v13923_v58 = vpop.f32.mrf.mxu2  ;;  %v9707_v50 = vpop.eup %9706  ;;  %v6007_v59 = vsel %vm6004_vm15, %v6006_v3, %v6002_v21  ;;  %v7118_v19 = vmul.f32 0.6931472, %v9705_v62  ;;  %v16610_v32 = vld [vmem:[#allocation39_spill] sm:$0xff] }
 0x7c1   : > { %v13925_v7 = vpop.f32.mrf.mxu1  ;;  %9712 = vpow2.f32 %v5591_v47  ;;  %v6011_v33 = vsub.f32 1.0, %v6010_v60  ;;  %v7040_v1 = vadd.f32 1.0, %v9707_v50  ;;  %vm6015_vm0 = vweird.f32 %v13810_v25 }
 0x7c2   : > { %v9709_v27 = vpop.eup %9708  ;;  %v6935_v36 = vmul.f32 1.442695, %v6849_v61  ;;  %9714 = vpow2.f32 %v7319_v55  ;;  %5069 = vmatmul.bf16.gmra.mxu2 %v4853_v41  ;;  %v16609_v23 = vmax.f32 %v13609_v52, 0.0  ;;  %v6018_v38 = vand.u32 2147483647, %v13771_v44  ;;  %v16611_v61 = vld [vmem:[#allocation135_spill] sm:$0xff] }
 0x7c3   : > { %v6012_v29 = vmul.f32 %v13810_v25, %v6011_v33  ;;  %v6020_v6 = vand.u32 2147483648, %v13771_v44  ;;  %9716 = vlog2.f32 %v7040_v1  ;;  %v6721_v37 = vmax.f32 %v13824_v31, 0.0  ;;  %v4748_v1 = vpop.f32.mrf.mxu3 }
 0x7c4   : > { %v7228_v40 = vadd.f32 %v7118_v19, %v16609_v23  ;;  %vm6014_vm1 = vweird.f32 %v13771_v44  ;;  %v8177_v34 = vsel %vm8172_vm6, %v16610_v32, %v7925_v5  ;;  %v13937_v63 = vmul.f32 0.6931472, %v9709_v27 }
 0x7c5   : > { %9718 = vpow2.f32 %v6935_v36  ;;  %v6013_v55 = vadd.f32 %v13810_v25, %v6012_v29  ;;  %v13942_v21 = vpop.eup %9710  ;;  %vm6016_vm5 = vmor %vm6014_vm1, %vm6015_vm0  ;;  %v6021_v44 = vor.u32 1.1754944e-38, %v6020_v6  ;;  %v8242_v47 = vsel %vm8237_vm7, %v8177_v34, 0.0 }
 0x7c6   : > { %v7485_v52 = vsel %vm7467_vm4, %v6007_v59, %v7228_v40  ;;  %v13949_v60 = vadd.f32 %v4746_v16, %v4529_v30  ;;  %vm6019_vm2 = vcmp.eq.f32.partialorder %v6018_v38, 8.507059e+37  ;;  %v7421_v50 = vmul.f32 %v13752_v57, %v16611_v61  ;;  %8306 = vst [vmem:[%s13703_s15 + $0x20] sm:$0xff] %v8242_v47  ;;  %v4531_v6 = vpop.f32.mrf.mxu0 }
 0x7c7   : > { %v7549_v3 = vsel %vm1585_vm11, %v7420_v45, %v7485_v52  ;;  %v9713_v62 = vpop.eup %9712  ;;  %v6017_v41 = vsel %vm6016_vm5, %v13810_v25, %v6013_v55  ;;  %v5506_v45 = vsub.f32 0.0, %v13881_v56  ;;  %v5130_v16 = vmax.f32 %v13879_v20, 0.0  ;;  %v7933_v52 = vpop.permute.xlu2 %7932 }
 0x7c8   : > { %7950 = vrot.lane.b32.xlu2 %v7549_v3, %s10315_s25  ;;  %v13957_v59 = vpop.eup %9714  ;;  %v13959_v19 = vadd.f32 1.0, %v9713_v62  ;;  %v6022_v33 = vsel %vm6019_vm2, %v6021_v44, %v6017_v41  ;;  %v6786_v30 = vand.u32 2147483647, %v13881_v56  ;;  %v7321_v27 = vmul.f32 1.442695, %v13881_v56  ;;  %v13969_v36 = vpop.f32.mrf.mxu2  ;;  %v16614_v41 = vld [vmem:[#allocation132_spill] sm:$0xff] }
 0x7c9   : > { %v7486_v25 = vsel %vm7467_vm4, %v6022_v33, %v13828_v14  ;;  %v5593_v5 = vmul.f32 1.442695, %v5506_v45  ;;  %v6025_v57 = vmul.f32 %v13872_v13, %v13817_v43  ;;  %v13971_v23 = vpop.eup %9716  ;;  %v4819_v40 = vmax.f32 %v13949_v60, 0.0  ;;  %v13977_v14 = vpop.f32.mrf.mxu1 }
 0x7ca   : > { %9720 = vrcp.f32 %v13959_v19  ;;  %v7550_v20 = vsel %vm1585_vm11, %v7421_v50, %v7486_v25  ;;  %v6850_v29 = vsub.f32 0.0, %v6786_v30  ;;  %vm6029_vm8 = vweird.f32 %v13817_v43  ;;  %v16615_v50 = vld [vmem:[#allocation49_spill] sm:$0xff] }
 0x7cb   : > { %v9719_v38 = vpop.eup %9718  ;;  %7952 = vrot.lane.b32.xlu1 %v7550_v20, %s10315_s25  ;;  %9722 = vpow2.f32 %v5593_v5  ;;  %v6026_v32 = vsub.f32 1.0, %v6025_v57  ;;  %v6033_v34 = vand.u32 2147483647, %v13817_v43  ;;  %vm6030_vm9 = vweird.f32 %v13872_v13 }
 0x7cc   : > { %v7041_v55 = vadd.f32 1.0, %v9719_v38  ;;  %v6937_v3 = vmul.f32 1.442695, %v6850_v29  ;;  %v6035_v44 = vand.u32 2147483648, %v13817_v43  ;;  %9724 = vpow2.f32 %v7321_v27  ;;  %vm6031_vm12 = vmor %vm6029_vm8, %vm6030_vm9  ;;  %v7929_v60 = vpop.permute.xlu1 %7928 }
 0x7cd   : > { %v6027_v47 = vmul.f32 %v13872_v13, %v6026_v32  ;;  %vm13985_vm10 = vcmp.eq.f32.partialorder %v6033_v34, 8.507059e+37  ;;  %v7122_v62 = vmul.f32 0.6931472, %v13885_v54  ;;  %v7422_v61 = vmul.f32 %v13802_v51, %v16614_v41 }
 0x7ce   : > { %9726 = vlog2.f32 %v7041_v55  ;;  %v8181_v45 = vsel %vm8172_vm6, %v16615_v50, %v7933_v52  ;;  %v4749_v33 = vadd.f32 %v4748_v1, %v4531_v6  ;;  %v6036_v25 = vor.u32 1.1754944e-38, %v6035_v44 }
 0x7cf   : > { %9728 = vpow2.f32 %v6937_v3  ;;  %v6028_v30 = vadd.f32 %v13872_v13, %v6027_v47  ;;  %v8246_v5 = vsel %vm8237_vm7, %v8181_v45, 0.0  ;;  %v7230_v51 = vadd.f32 %v7122_v62, %v6718_v15  ;;  %v4751_v3 = vpop.f32.mrf.mxu3  ;;  %v4534_v45 = vpop.f32.mrf.mxu0 }
 0x7d0   : > { %v13996_v27 = vpop.eup %9720  ;;  %8310 = vst [vmem:[%s13703_s15 + $0x40] sm:$0xff] %v8246_v5  ;;  %v4820_v54 = vmax.f32 %v4749_v33, 0.0  ;;  %v5131_v57 = vmax.f32 %v13923_v58, 0.0  ;;  %v5507_v1 = vsub.f32 0.0, %v13925_v7  ;;  %v6787_v38 = vand.u32 2147483647, %v13925_v7  ;;  %v14020_v44 = vpop.f32.mrf.mxu2 }
 0x7d1   : > { %v9723_v20 = vpop.eup %9722  ;;  %v6032_v29 = vsel %vm6031_vm12, %v13872_v13, %v6028_v30  ;;  %v7323_v6 = vmul.f32 1.442695, %v13925_v7  ;;  %v6040_v43 = vmul.f32 %v13903_v9, %v13853_v12  ;;  %v7231_v62 = vadd.f32 %v13937_v63, %v6719_v10  ;;  %v14028_v41 = vpop.f32.mrf.mxu1  ;;  %v16616_v5 = vld [vmem:[#allocation83_spill] sm:$0xff] }
 0x7d2   : > { %v14012_v32 = vadd.f32 1.0, %v9723_v20  ;;  %v6037_v4 = vsel %vm13985_vm10, %v6036_v25, %v6032_v29  ;;  %v4854_v15 = vpack.c.bf16 %v4820_v54, %v4819_v40  ;;  %v5174_v34 = vpack.c.bf16 %v5131_v57, %v5130_v16  ;;  %v14016_v58 = vpop.eup %9724 }
 0x7d3   : > { %v7487_v52 = vsel %vm7467_vm4, %v6037_v4, %v7230_v51  ;;  %v5595_v13 = vmul.f32 1.442695, %v5507_v1  ;;  %v6851_v55 = vsub.f32 0.0, %v6787_v38  ;;  %9730 = vpow2.f32 %v7323_v6  ;;  %v16617_v1 = vld [vmem:[#allocation128_spill] sm:$0xff] }
 0x7d4   : > { %v9727_v47 = vpop.eup %9726  ;;  %9732 = vrcp.f32 %v14012_v32  ;;  %v7551_v16 = vsel %vm1585_vm11, %v7422_v61, %v7487_v52  ;;  %v6041_v40 = vsub.f32 1.0, %v6040_v43  ;;  %5074 = vmatmul.bf16.gmra.mxu2 %v4854_v15  ;;  %5358 = vmatmul.bf16.gmra.mxu1 %v5174_v34  ;;  %v6722_v33 = vmax.f32 %v13881_v56, 0.0 }
 0x7d5   : > { %v9729_v50 = vpop.eup %9728  ;;  %7954 = vrot.lane.b32.xlu0 %v7551_v16, %s10315_s25  ;;  %9734 = vpow2.f32 %v5595_v13  ;;  %v6939_v46 = vmul.f32 1.442695, %v6851_v55  ;;  %vm6045_vm13 = vweird.f32 %v13903_v9  ;;  %v6048_v61 = vand.u32 2147483647, %v13853_v12 }
 0x7d6   : > { %v7042_v10 = vadd.f32 1.0, %v9729_v50  ;;  %v6042_v63 = vmul.f32 %v13903_v9, %v6041_v40  ;;  %v6050_v30 = vand.u32 2147483648, %v13853_v12  ;;  %v6723_v25 = vmax.f32 %v13925_v7, 0.0 }
 0x7d7   : > { %9736 = vpow2.f32 %v6939_v46  ;;  %vm6044_vm14 = vweird.f32 %v13853_v12  ;;  %v8179_v51 = vsel %vm8172_vm6, %v16616_v5, %v7929_v60  ;;  %v14040_v54 = vmul.f32 0.6931472, %v9727_v47  ;;  %v4536_v5 = vpop.f32.mrf.mxu0 }
 0x7d8   : > { %9738 = vlog2.f32 %v7042_v10  ;;  %v6043_v57 = vadd.f32 %v13903_v9, %v6042_v63  ;;  %v7423_v20 = vmul.f32 %v13858_v35, %v16617_v1  ;;  %vm6046_vm15 = vmor %vm6044_vm14, %vm6045_vm13  ;;  %v6051_v38 = vor.u32 1.1754944e-38, %v6050_v30  ;;  %v4753_v10 = vpop.f32.mrf.mxu3 }
 0x7d9   : > { %v14045_v29 = vpop.eup %9730  ;;  %v8244_v6 = vsel %vm8237_vm7, %v8179_v51, 0.0  ;;  %v4752_v43 = vadd.f32 %v4751_v3, %v4534_v45  ;;  %v5508_v12 = vsub.f32 0.0, %v13977_v14  ;;  %vm6049_vm0 = vcmp.eq.f32.partialorder %v6048_v61, 8.507059e+37  ;;  %v14071_v30 = vpop.f32.mrf.mxu1 }
 0x7da   : > { %v14049_v4 = vpop.eup %9732  ;;  %v6047_v15 = vsel %vm6046_vm15, %v13903_v9, %v6043_v57  ;;  %8308 = vst [vmem:[%s13703_s15 + $0x30] sm:$0xff] %v8244_v6  ;;  %v6788_v34 = vand.u32 2147483647, %v13977_v14  ;;  %v7325_v52 = vmul.f32 1.442695, %v13977_v14  ;;  %v5132_v55 = vmax.f32 %v13969_v36, 0.0  ;;  %v14064_v36 = vpop.f32.mrf.mxu2 }
 0x7db   : > { %v9735_v35 = vpop.eup %9734  ;;  %v6052_v13 = vsel %vm6049_vm0, %v6051_v38, %v6047_v15  ;;  %v5597_v47 = vmul.f32 1.442695, %v5508_v12  ;;  %v6055_v3 = vmul.f32 %v13942_v21, %v13896_v0  ;;  %v4821_v45 = vmax.f32 %v4752_v43, 0.0  ;;  %v16620_v15 = vld [vmem:[#allocation139_spill] sm:$0xff] }
 0x7dc   : > { %v14058_v16 = vadd.f32 1.0, %v9735_v35  ;;  %v7488_v40 = vsel %vm7467_vm4, %v6052_v13, %v7231_v62  ;;  %v6852_v9 = vsub.f32 0.0, %v6788_v34  ;;  %9740 = vpow2.f32 %v7325_v52 }
 0x7dd   : > { %v9737_v60 = vpop.eup %9736  ;;  %v7552_v50 = vsel %vm1585_vm11, %v7423_v20, %v7488_v40  ;;  %9742 = vpow2.f32 %v5597_v47  ;;  %v6056_v46 = vsub.f32 1.0, %v6055_v3  ;;  %vm6060_vm1 = vweird.f32 %v13942_v21 }
 0x7de   : > { %v14066_v63 = vpop.eup %9738  ;;  %9744 = vrcp.f32 %v14058_v16  ;;  %v7043_v61 = vadd.f32 1.0, %v9737_v60  ;;  %7956 = vrot.lane.b32.xlu2 %v7552_v50, %s10315_s25  ;;  %v6941_v62 = vmul.f32 1.442695, %v6852_v9  ;;  %v6063_v57 = vand.u32 2147483647, %v13896_v0 }
 0x7df   : > { %v6057_v51 = vmul.f32 %v13942_v21, %v6056_v46  ;;  %v6065_v1 = vand.u32 2147483648, %v13896_v0  ;;  %v7126_v20 = vmul.f32 0.6931472, %v13971_v23  ;;  %vm6059_vm5 = vweird.f32 %v13896_v0  ;;  %v16621_v23 = vld [vmem:[#allocation87_spill] sm:$0xff] }
 0x7e0   : > { %9746 = vlog2.f32 %v7043_v61  ;;  %v4754_v38 = vadd.f32 %v4753_v10, %v4536_v5  ;;  %v5133_v6 = vmax.f32 %v14020_v44, 0.0  ;;  %vm14080_vm2 = vcmp.eq.f32.partialorder %v6063_v57, 8.507059e+37  ;;  %vm6061_vm8 = vmor %vm6059_vm5, %vm6060_vm1  ;;  %v4756_v12 = vpop.f32.mrf.mxu3 }
 0x7e1   : > { %9748 = vpow2.f32 %v6941_v62  ;;  %v6058_v43 = vadd.f32 %v13942_v21, %v6057_v51  ;;  %v7424_v34 = vmul.f32 %v13915_v22, %v16620_v15  ;;  %v7931_v52 = vpop.permute.xlu0 %7930  ;;  %v6066_v0 = vor.u32 1.1754944e-38, %v6065_v1 }
 0x7e2   : > { %v14086_v35 = vpop.eup %9740  ;;  %v8180_v44 = vsel %vm8172_vm6, %v16621_v23, %v7931_v52  ;;  %v4822_v13 = vmax.f32 %v4754_v38, 0.0  ;;  %v5175_v47 = vpack.c.bf16 %v5133_v6, %v5132_v55  ;;  %v7232_v9 = vadd.f32 %v7126_v20, %v6720_v24  ;;  %v14110_v5 = vpop.f32.mrf.mxu2 }
 0x7e3   : > { %v9743_v3 = vpop.eup %9742  ;;  %v6062_v40 = vsel %vm6061_vm8, %v13942_v21, %v6058_v43  ;;  %v8245_v22 = vsel %vm8237_vm7, %v8180_v44, 0.0  ;;  %v5509_v60 = vsub.f32 0.0, %v14028_v41  ;;  %v6789_v55 = vand.u32 2147483647, %v14028_v41  ;;  %v14118_v20 = vpop.f32.mrf.mxu1 }
 0x7e4   : > { %v14097_v50 = vpop.eup %9744  ;;  %v14099_v46 = vadd.f32 1.0, %v9743_v3  ;;  %v6067_v10 = vsel %vm14080_vm2, %v6066_v0, %v6062_v40  ;;  %8309 = vst [vmem:[%s13703_s15 + $0x38] sm:$0xff] %v8245_v22  ;;  %v4855_v61 = vpack.c.bf16 %v4822_v13, %v4821_v45  ;;  %5363 = vmatmul.bf16.gmra.mxu1 %v5175_v47  ;;  %v7327_v21 = vmul.f32 1.442695, %v14028_v41  ;;  %v16622_v13 = vld [vmem:[#allocation90_spill] sm:$0xff] }
 0x7e5   : > { %v7489_v42 = vsel %vm7467_vm4, %v6067_v10, %v7232_v9  ;;  %v5599_v24 = vmul.f32 1.442695, %v5509_v60  ;;  %v6070_v62 = vmul.f32 %v13996_v27, %v13959_v19  ;;  %v7233_v57 = vadd.f32 %v14040_v54, %v6721_v37  ;;  %v16623_v9 = vld [vmem:[#allocation136_spill] sm:$0xff] }
 0x7e6   : > { %v9747_v51 = vpop.eup %9746  ;;  %9750 = vrcp.f32 %v14099_v46  ;;  %v7553_v45 = vsel %vm1585_vm11, %v7424_v34, %v7489_v42  ;;  %v6853_v1 = vsub.f32 0.0, %v6789_v55  ;;  %5079 = vmatmul.bf16.gmra.mxu2 %v4855_v61  ;;  %v6724_v6 = vmax.f32 %v13977_v14, 0.0  ;;  %v4539_v34 = vpop.f32.mrf.mxu0 }
 0x7e7   : > { %v9749_v38 = vpop.eup %9748  ;;  %7958 = vrot.lane.b32.xlu1 %v7553_v45, %s10315_s25  ;;  %9752 = vpow2.f32 %v5599_v24  ;;  %v6725_v43 = vmax.f32 %v14028_v41, 0.0  ;;  %v6071_v31 = vsub.f32 1.0, %v6070_v62  ;;  %vm6074_vm9 = vweird.f32 %v13959_v19 }
 0x7e8   : > { %v7044_v37 = vadd.f32 1.0, %v9749_v38  ;;  %v6943_v54 = vmul.f32 1.442695, %v6853_v1  ;;  %v6078_v15 = vand.u32 2147483647, %v13959_v19  ;;  %9754 = vpow2.f32 %v7327_v21 }
 0x7e9   : > { %v6072_v52 = vmul.f32 %v13996_v27, %v6071_v31  ;;  %vm6075_vm10 = vweird.f32 %v13996_v27  ;;  %v6080_v0 = vand.u32 2147483648, %v13959_v19  ;;  %v14128_v44 = vmul.f32 0.6931472, %v9747_v51 }
 0x7ea   : > { %v7939_v23 = vpop.permute.xlu2 %7938  ;;  %9756 = vlog2.f32 %v7044_v37  ;;  %v14132_v3 = vadd.f32 %v4756_v12, %v4539_v34  ;;  %v7425_v22 = vmul.f32 %v13957_v59, %v16623_v9  ;;  %vm6076_vm12 = vmor %vm6074_vm9, %vm6075_vm10  ;;  %vm6079_vm13 = vcmp.eq.f32.partialorder %v6078_v15, 8.507059e+37 }
 0x7eb   : > { %v8184_v47 = vsel %vm8172_vm6, %v16622_v13, %v7939_v23  ;;  %9758 = vpow2.f32 %v6943_v54  ;;  %v6073_v40 = vadd.f32 %v13996_v27, %v6072_v52  ;;  %v6081_v61 = vor.u32 1.1754944e-38, %v6080_v0  ;;  %v14158_v54 = vpop.f32.mrf.mxu2  ;;  %v14160_v15 = vpop.f32.mrf.mxu1 }
 0x7ec   : > { %v8249_v60 = vsel %vm8237_vm7, %v8184_v47, 0.0  ;;  %v14138_v10 = vpop.eup %9750  ;;  %v4823_v55 = vmax.f32 %v14132_v3, 0.0  ;;  %v5510_v42 = vsub.f32 0.0, %v14071_v30  ;;  %v6790_v62 = vand.u32 2147483647, %v14071_v30 }
 0x7ed   : > { %8313 = vst [vmem:[%s13703_s15 + $0x58] sm:$0xff] %v8249_v60  ;;  %v9753_v24 = vpop.eup %9752  ;;  %v6077_v21 = vsel %vm6076_vm12, %v13996_v27, %v6073_v40  ;;  %v7329_v59 = vmul.f32 1.442695, %v14071_v30  ;;  %v6085_v51 = vmul.f32 %v14049_v4, %v14012_v32  ;;  %v5134_v1 = vmax.f32 %v14064_v36, 0.0  ;;  %v4758_v40 = vpop.f32.mrf.mxu3 }
 0x7ee   : > { %v14150_v45 = vadd.f32 1.0, %v9753_v24  ;;  %v6082_v19 = vsel %vm6079_vm13, %v6081_v61, %v6077_v21  ;;  %v5601_v38 = vmul.f32 1.442695, %v5510_v42  ;;  %v14153_v31 = vpop.eup %9754  ;;  %v6854_v37 = vsub.f32 0.0, %v6790_v62  ;;  %v4541_v61 = vpop.f32.mrf.mxu0  ;;  %v16626_v24 = vld [vmem:[#allocation131_spill] sm:$0xff]  ;;  %v16627_v62 = vld [vmem:[#allocation85_spill] sm:$0xff] }
 0x7ef   : > { %v7490_v12 = vsel %vm7467_vm4, %v6082_v19, %v7233_v57  ;;  %v6086_v27 = vsub.f32 1.0, %v6085_v51  ;;  %vm6089_vm14 = vweird.f32 %v14012_v32  ;;  %9760 = vpow2.f32 %v7329_v59 }
 0x7f0   : > { %v14162_v34 = vpop.eup %9756  ;;  %v7554_v52 = vsel %vm1585_vm11, %v7425_v22, %v7490_v12  ;;  %vm6090_vm15 = vweird.f32 %v14049_v4  ;;  %v6093_v36 = vand.u32 2147483647, %v14012_v32  ;;  %9762 = vpow2.f32 %v5601_v38 }
 0x7f1   : > { %v9759_v0 = vpop.eup %9758  ;;  %7960 = vrot.lane.b32.xlu0 %v7554_v52, %s10315_s25  ;;  %v6945_v57 = vmul.f32 1.442695, %v6854_v37  ;;  %v6087_v23 = vmul.f32 %v14049_v4, %v6086_v27  ;;  %v6095_v13 = vand.u32 2147483648, %v14012_v32  ;;  %9764 = vrcp.f32 %v14150_v45  ;;  %vm6091_vm1 = vmor %vm6089_vm14, %vm6090_vm15 }
 0x7f2   : > { %v7935_v47 = vpop.permute.xlu1 %7934  ;;  %v7045_v9 = vadd.f32 1.0, %v9759_v0  ;;  %vm14172_vm0 = vcmp.eq.f32.partialorder %v6093_v36, 8.507059e+37  ;;  %v7130_v60 = vmul.f32 0.6931472, %v14066_v63  ;;  %v7426_v21 = vmul.f32 %v14016_v58, %v16626_v24 }
 0x7f3   : > { %9766 = vpow2.f32 %v6945_v57  ;;  %v6088_v42 = vadd.f32 %v14049_v4, %v6087_v23  ;;  %v8182_v59 = vsel %vm8172_vm6, %v16627_v62, %v7935_v47  ;;  %v6096_v51 = vor.u32 1.1754944e-38, %v6095_v13  ;;  %v14203_v23 = vpop.f32.mrf.mxu2  ;;  %v14205_v13 = vpop.f32.mrf.mxu1 }
 0x7f4   : > { %9768 = vlog2.f32 %v7045_v9  ;;  %v8247_v19 = vsel %vm8237_vm7, %v8182_v59, 0.0  ;;  %v4759_v63 = vadd.f32 %v4758_v40, %v4541_v61  ;;  %v7234_v12 = vadd.f32 %v7130_v60, %v6722_v33  ;;  %v7937_v24 = vpop.permute.xlu0 %7936 }
 0x7f5   : > { %v6092_v38 = vsel %vm6091_vm1, %v14049_v4, %v6088_v42  ;;  %8311 = vst [vmem:[%s13703_s15 + $0x48] sm:$0xff] %v8247_v19  ;;  %v5135_v58 = vmax.f32 %v14110_v5, 0.0  ;;  %v5511_v37 = vsub.f32 0.0, %v14118_v20  ;;  %v14193_v27 = vpop.eup %9760  ;;  %v6791_v36 = vand.u32 2147483647, %v14118_v20  ;;  %v16628_v19 = vld [vmem:[#allocation89_spill] sm:$0xff] }
 0x7f6   : > { %v6097_v32 = vsel %vm14172_vm0, %v6096_v51, %v6092_v38  ;;  %v4824_v52 = vmax.f32 %v4759_v63, 0.0  ;;  %v7331_v0 = vmul.f32 1.442695, %v14118_v20  ;;  %v9763_v57 = vpop.eup %9762  ;;  %v6100_v5 = vmul.f32 %v14097_v50, %v14058_v16 }
 0x7f7   : > { %v7491_v56 = vsel %vm7467_vm4, %v6097_v32, %v7234_v12  ;;  %v5176_v33 = vpack.c.bf16 %v5135_v58, %v5134_v1  ;;  %v5603_v4 = vmul.f32 1.442695, %v5511_v37  ;;  %v14207_v47 = vpop.eup %9764  ;;  %v14209_v40 = vadd.f32 1.0, %v9763_v57  ;;  %v16629_v58 = vld [vmem:[#allocation143_spill] sm:$0xff] }
 0x7f8   : > { %v7555_v9 = vsel %vm1585_vm11, %v7426_v21, %v7491_v56  ;;  %v4856_v22 = vpack.c.bf16 %v4824_v52, %v4823_v55  ;;  %v6855_v60 = vsub.f32 0.0, %v6791_v36  ;;  %v7235_v61 = vadd.f32 %v14128_v44, %v6723_v25 }
 0x7f9   : > { %v9767_v1 = vpop.eup %9766  ;;  %7962 = vrot.lane.b32.xlu2 %v7555_v9, %s10315_s25  ;;  %9770 = vpow2.f32 %v5603_v4  ;;  %v6101_v42 = vsub.f32 1.0, %v6100_v5  ;;  %vm6105_vm5 = vweird.f32 %v14097_v50  ;;  %5368 = vmatmul.bf16.gmra.mxu1 %v5176_v33  ;;  %v6108_v55 = vand.u32 2147483647, %v14058_v16 }
 0x7fa   : > { %v9769_v62 = vpop.eup %9768  ;;  %9772 = vrcp.f32 %v14209_v40  ;;  %v7046_v21 = vadd.f32 1.0, %v9767_v1  ;;  %v6947_v3 = vmul.f32 1.442695, %v6855_v60  ;;  %5084 = vmatmul.bf16.gmra.mxu2 %v4856_v22  ;;  %v6110_v25 = vand.u32 2147483648, %v14058_v16 }
 0x7fb   : > { %v7136_v59 = vmul.f32 0.6931472, %v9769_v62  ;;  %9774 = vpow2.f32 %v7331_v0  ;;  %v6102_v7 = vmul.f32 %v14097_v50, %v6101_v42  ;;  %v6726_v44 = vmax.f32 %v14071_v30, 0.0  ;;  %v14245_v33 = vpop.f32.mrf.mxu2 }
 0x7fc   : > { %9776 = vlog2.f32 %v7046_v21  ;;  %v6727_v51 = vmax.f32 %v14118_v20, 0.0  ;;  %v8183_v63 = vsel %vm8172_vm6, %v16628_v19, %v7937_v24  ;;  %vm6104_vm2 = vweird.f32 %v14058_v16 }
 0x7fd   : > { %9778 = vpow2.f32 %v6947_v3  ;;  %v6103_v38 = vadd.f32 %v14097_v50, %v6102_v7  ;;  %vm6109_vm8 = vcmp.eq.f32.partialorder %v6108_v55, 8.507059e+37  ;;  %vm6106_vm9 = vmor %vm6104_vm2, %vm6105_vm5  ;;  %v6111_v12 = vor.u32 1.1754944e-38, %v6110_v25 }
 0x7fe   : > { %v7427_v37 = vmul.f32 %v14045_v29, %v16629_v58  ;;  %v8248_v32 = vsel %vm8237_vm7, %v8183_v63, 0.0  ;;  %v5512_v52 = vsub.f32 0.0, %v14160_v15  ;;  %v14238_v0 = vadd.f32 %v7136_v59, %v6725_v43  ;;  %v14247_v29 = vpop.f32.mrf.mxu1  ;;  %v16633_v58 = vld [vmem:[#allocation92_spill] sm:$0xff] }
 0x7ff   : > { %v9771_v36 = vpop.eup %9770  ;;  %v6107_v57 = vsel %vm6106_vm9, %v14097_v50, %v6103_v38  ;;  %8312 = vst [vmem:[%s13703_s15 + $0x50] sm:$0xff] %v8248_v32  ;;  %v6792_v16 = vand.u32 2147483647, %v14160_v15  ;;  %v6115_v56 = vmul.f32 %v14138_v10, %v14099_v46  ;;  %v5136_v9 = vmax.f32 %v14158_v54, 0.0  ;;  %v7945_v21 = vpop.permute.xlu2 %7944  ;;  %v16632_v38 = vld [vmem:[#allocation140_spill] sm:$0xff] }
 0x800   : > { %v14249_v4 = vpop.eup %9772  ;;  %v6112_v5 = vsel %vm6109_vm8, %v6111_v12, %v6107_v57  ;;  %v5605_v41 = vmul.f32 1.442695, %v5512_v52  ;;  %v7333_v43 = vmul.f32 1.442695, %v14160_v15  ;;  %v14255_v50 = vadd.f32 1.0, %v9771_v36 }
 0x801   : > { %v14253_v22 = vpop.eup %9774  ;;  %v7492_v60 = vsel %vm7467_vm4, %v6112_v5, %v7235_v61  ;;  %v6856_v1 = vsub.f32 0.0, %v6792_v16  ;;  %v6116_v42 = vsub.f32 1.0, %v6115_v56  ;;  %vm6119_vm10 = vweird.f32 %v14099_v46 }
 0x802   : > { %v14259_v24 = vpop.eup %9776  ;;  %v7556_v62 = vsel %vm1585_vm11, %v7427_v37, %v7492_v60  ;;  %vm6120_vm12 = vweird.f32 %v14138_v10  ;;  %v6123_v54 = vand.u32 2147483647, %v14099_v46  ;;  %9780 = vpow2.f32 %v5605_v41 }
 0x803   : > { %v9779_v3 = vpop.eup %9778  ;;  %7964 = vrot.lane.b32.xlu1 %v7556_v62, %s10315_s25  ;;  %v6949_v55 = vmul.f32 1.442695, %v6856_v1  ;;  %v6117_v61 = vmul.f32 %v14138_v10, %v6116_v42  ;;  %v6125_v59 = vand.u32 2147483648, %v14099_v46  ;;  %9782 = vpow2.f32 %v7333_v43  ;;  %vm6121_vm14 = vmor %vm6119_vm10, %vm6120_vm12  ;;  %v14291_v56 = vpop.f32.mrf.mxu2 }
 0x804   : > { %v7047_v7 = vadd.f32 1.0, %v9779_v3  ;;  %vm14269_vm13 = vcmp.eq.f32.partialorder %v6123_v54, 8.507059e+37  ;;  %v7134_v19 = vmul.f32 0.6931472, %v14162_v34  ;;  %v7428_v12 = vmul.f32 %v14086_v35, %v16632_v38 }
 0x805   : > { %9784 = vpow2.f32 %v6949_v55  ;;  %v6118_v63 = vadd.f32 %v14138_v10, %v6117_v61  ;;  %v8187_v37 = vsel %vm8172_vm6, %v16633_v58, %v7945_v21  ;;  %v6126_v32 = vor.u32 1.1754944e-38, %v6125_v59  ;;  %v7941_v61 = vpop.permute.xlu1 %7940  ;;  %v16638_v58 = vld [vmem:[#allocation55_spill] sm:$0xff] }
 0x806   : > { %9786 = vlog2.f32 %v7047_v7  ;;  %v8252_v52 = vsel %vm8237_vm7, %v8187_v37, 0.0  ;;  %v5137_v34 = vmax.f32 %v14203_v23, 0.0  ;;  %v7236_v57 = vadd.f32 %v7134_v19, %v6724_v6  ;;  %v14293_v5 = vpop.f32.mrf.mxu1  ;;  %v16636_v37 = vld [vmem:[#allocation45_spill] sm:$0xff] }
 0x807   : > { %v6122_v36 = vsel %vm6121_vm14, %v14138_v10, %v6118_v63  ;;  %8316 = vst [vmem:[%s13703_s15 + $0x70] sm:$0xff] %v8252_v52  ;;  %v5513_v35 = vsub.f32 0.0, %v14205_v13  ;;  %v6793_v16 = vand.u32 2147483647, %v14205_v13  ;;  %v7335_v23 = vmul.f32 1.442695, %v14205_v13 }
 0x808   : > { %v6127_v46 = vsel %vm14269_vm13, %v6126_v32, %v6122_v36  ;;  %v5177_v41 = vpack.c.bf16 %v5137_v34, %v5136_v9  ;;  %v6130_v10 = vmul.f32 %v14207_v47, %v14150_v45  ;;  %v9781_v14 = vpop.eup %9780  ;;  %9788 = vrcp.f32 %v14255_v50  ;;  %v16637_v36 = vld [vmem:[#allocation134_spill] sm:$0xff] }
 0x809   : > { %v7493_v6 = vsel %vm7467_vm4, %v6127_v46, %v7236_v57  ;;  %v5607_v43 = vmul.f32 1.442695, %v5513_v35  ;;  %v6857_v60 = vsub.f32 0.0, %v6793_v16  ;;  %v14303_v1 = vpop.eup %9782  ;;  %v14305_v42 = vadd.f32 1.0, %v9781_v14 }
 0x80a   : > { %v7557_v9 = vsel %vm1585_vm11, %v7428_v12, %v7493_v6  ;;  %9790 = vpow2.f32 %v7335_v23  ;;  %v6131_v62 = vsub.f32 1.0, %v6130_v10  ;;  %5373 = vmatmul.bf16.gmra.mxu1 %v5177_v41  ;;  %v6728_v21 = vmax.f32 %v14160_v15, 0.0 }
 0x80b   : > { %v9785_v54 = vpop.eup %9784  ;;  %7966 = vrot.lane.b32.xlu0 %v7557_v9, %s10315_s25  ;;  %9792 = vpow2.f32 %v5607_v43  ;;  %v6951_v3 = vmul.f32 1.442695, %v6857_v60  ;;  %v6138_v55 = vand.u32 2147483647, %v14150_v45  ;;  %vm6135_vm15 = vweird.f32 %v14207_v47  ;;  %v14345_v60 = vpop.f32.mrf.mxu2 }
 0x80c   : > { %v9787_v59 = vpop.eup %9786  ;;  %v7048_v7 = vadd.f32 1.0, %v9785_v54  ;;  %v6132_v25 = vmul.f32 %v14207_v47, %v6131_v62  ;;  %v6140_v19 = vand.u32 2147483648, %v14150_v45  ;;  %v6729_v38 = vmax.f32 %v14205_v13, 0.0 }
 0x80d   : > { %v7140_v63 = vmul.f32 0.6931472, %v9787_v59  ;;  %9794 = vpow2.f32 %v6951_v3  ;;  %vm6134_vm0 = vweird.f32 %v14150_v45  ;;  %vm14319_vm1 = vcmp.eq.f32.partialorder %v6138_v55, 8.507059e+37 }
 0x80e   : > { %9796 = vrcp.f32 %v14305_v42  ;;  %v6133_v12 = vadd.f32 %v14207_v47, %v6132_v25  ;;  %v8185_v32 = vsel %vm8172_vm6, %v16636_v37, %v7941_v61  ;;  %v14325_v52 = vpop.eup %9788  ;;  %vm6136_vm5 = vmor %vm6134_vm0, %vm6135_vm15  ;;  %v6141_v34 = vor.u32 1.1754944e-38, %v6140_v19 }
 0x80f   : > { %v7429_v57 = vmul.f32 %v14153_v31, %v16637_v36  ;;  %v8250_v45 = vsel %vm8237_vm7, %v8185_v32, 0.0  ;;  %v5514_v35 = vsub.f32 0.0, %v14247_v29  ;;  %9798 = vlog2.f32 %v7048_v7 }
 0x810   : > { %v14331_v16 = vpop.eup %9790  ;;  %v6137_v46 = vsel %vm6136_vm5, %v14207_v47, %v6133_v12  ;;  %8314 = vst [vmem:[%s13703_s15 + $0x60] sm:$0xff] %v8250_v45  ;;  %v6794_v41 = vand.u32 2147483647, %v14247_v29  ;;  %v7337_v23 = vmul.f32 1.442695, %v14247_v29  ;;  %v14339_v14 = vadd.f32 %v7140_v63, %v6727_v51  ;;  %v14347_v47 = vpop.f32.mrf.mxu1 }
 0x811   : > { %v9793_v10 = vpop.eup %9792  ;;  %v6142_v31 = vsel %vm14319_vm1, %v6141_v34, %v6137_v46  ;;  %v5609_v6 = vmul.f32 1.442695, %v5514_v35  ;;  %v6145_v43 = vmul.f32 %v14249_v4, %v14209_v40  ;;  %v5138_v3 = vmax.f32 %v14245_v33, 0.0 }
 0x812   : > { %v14349_v9 = vadd.f32 1.0, %v9793_v10  ;;  %v7494_v62 = vsel %vm7467_vm4, %v6142_v31, %v14238_v0  ;;  %v6858_v20 = vsub.f32 0.0, %v6794_v41  ;;  %9800 = vpow2.f32 %v7337_v23 }
 0x813   : > { %v9795_v51 = vpop.eup %9794  ;;  %v7558_v54 = vsel %vm1585_vm11, %v7429_v57, %v7494_v62  ;;  %9802 = vpow2.f32 %v5609_v6  ;;  %v6146_v55 = vsub.f32 1.0, %v6145_v43  ;;  %v7943_v61 = vpop.permute.xlu0 %7942  ;;  %vm6150_vm2 = vweird.f32 %v14249_v4  ;;  %v16641_v62 = vld [vmem:[#allocation147_spill] sm:$0xff] }
 0x814   : > { %v14357_v59 = vpop.eup %9796  ;;  %v7049_v7 = vadd.f32 1.0, %v9795_v51  ;;  %7968 = vrot.lane.b32.xlu2 %v7558_v54, %s10315_s25  ;;  %v6953_v25 = vmul.f32 1.442695, %v6858_v20  ;;  %v6153_v0 = vand.u32 2147483647, %v14209_v40  ;;  %9804 = vrcp.f32 %v14349_v9  ;;  %v14391_v6 = vpop.f32.mrf.mxu2 }
 0x815   : > { %v6147_v19 = vmul.f32 %v14249_v4, %v6146_v55  ;;  %v6155_v63 = vand.u32 2147483648, %v14209_v40  ;;  %v7138_v33 = vmul.f32 0.6931472, %v14259_v24  ;;  %v14366_v12 = vpop.eup %9798  ;;  %vm6149_vm8 = vweird.f32 %v14209_v40 }
 0x816   : > { %9806 = vlog2.f32 %v7049_v7  ;;  %v8186_v37 = vsel %vm8172_vm6, %v16638_v58, %v7943_v61  ;;  %v5139_v32 = vmax.f32 %v14291_v56, 0.0  ;;  %vm14373_vm9 = vcmp.eq.f32.partialorder %v6153_v0, 8.507059e+37  ;;  %vm6151_vm10 = vmor %vm6149_vm8, %vm6150_vm2 }
 0x817   : > { %9808 = vpow2.f32 %v6953_v25  ;;  %v6148_v34 = vadd.f32 %v14249_v4, %v6147_v19  ;;  %v6156_v57 = vor.u32 1.1754944e-38, %v6155_v63  ;;  %v7238_v40 = vadd.f32 %v7138_v33, %v6726_v44 }
 0x818   : > { %v14377_v24 = vpop.eup %9800  ;;  %v8251_v45 = vsel %vm8237_vm7, %v8186_v37, 0.0  ;;  %v5178_v35 = vpack.c.bf16 %v5139_v32, %v5138_v3  ;;  %v5515_v56 = vsub.f32 0.0, %v14293_v5  ;;  %v6795_v23 = vand.u32 2147483647, %v14293_v5  ;;  %v14393_v30 = vpop.f32.mrf.mxu1 }
 0x819   : > { %v9803_v46 = vpop.eup %9802  ;;  %v6152_v41 = vsel %vm6151_vm10, %v14249_v4, %v6148_v34  ;;  %8315 = vst [vmem:[%s13703_s15 + $0x68] sm:$0xff] %v8251_v45  ;;  %v7339_v10 = vmul.f32 1.442695, %v14293_v5  ;;  %v6160_v31 = vmul.f32 %v14325_v52, %v14255_v50  ;;  %v7430_v4 = vmul.f32 %v14193_v27, %v16641_v62 }
 0x81a   : > { %v14395_v44 = vadd.f32 1.0, %v9803_v46  ;;  %v6157_v43 = vsel %vm14373_vm9, %v6156_v57, %v6152_v41  ;;  %v5611_v20 = vmul.f32 1.442695, %v5515_v56  ;;  %5378 = vmatmul.bf16.gmra.mxu1 %v5178_v35  ;;  %v14401_v51 = vpop.eup %9804  ;;  %v6859_v3 = vsub.f32 0.0, %v6795_v23 }
 0x81b   : > { %v7495_v54 = vsel %vm7467_vm4, %v6157_v43, %v7238_v40  ;;  %9810 = vpow2.f32 %v7339_v10  ;;  %v6161_v55 = vsub.f32 1.0, %v6160_v31  ;;  %v6730_v7 = vmax.f32 %v14247_v29, 0.0  ;;  %v16642_v40 = vld [vmem:[#allocation144_spill] sm:$0xff]  ;;  %v16643_v31 = vld [vmem:[#allocation53_spill] sm:$0xff] }
 0x81c   : > { %v9807_v61 = vpop.eup %9806  ;;  %9812 = vrcp.f32 %v14395_v44  ;;  %v7559_v25 = vsel %vm1585_vm11, %v7430_v4, %v7495_v54  ;;  %v6168_v27 = vand.u32 2147483647, %v14255_v50  ;;  %v6955_v63 = vmul.f32 1.442695, %v6859_v3 }
 0x81d   : > { %v9809_v0 = vpop.eup %9808  ;;  %v7144_v19 = vmul.f32 0.6931472, %v9807_v61  ;;  %7970 = vrot.lane.b32.xlu1 %v7559_v25, %s10315_s25  ;;  %v6162_v33 = vmul.f32 %v14325_v52, %v6161_v55  ;;  %vm6165_vm12 = vweird.f32 %v14325_v52  ;;  %9814 = vpow2.f32 %v5611_v20 }
 0x81e   : > { %v6731_v58 = vmax.f32 %v14293_v5, 0.0  ;;  %vm6164_vm13 = vweird.f32 %v14255_v50  ;;  %v6170_v37 = vand.u32 2147483648, %v14255_v50  ;;  %v7050_v32 = vadd.f32 1.0, %v9809_v0 }
 0x81f   : > { %9816 = vpow2.f32 %v6955_v63  ;;  %v6163_v34 = vadd.f32 %v14325_v52, %v6162_v33  ;;  %vm6169_vm14 = vcmp.eq.f32.partialorder %v6168_v27, 8.507059e+37  ;;  %v14419_v36 = vadd.f32 %v7144_v19, %v6729_v38  ;;  %vm6166_vm15 = vmor %vm6164_vm13, %vm6165_vm12  ;;  %v14440_v54 = vpop.f32.mrf.mxu2 }
 0x820   : > { %v6171_v57 = vor.u32 1.1754944e-38, %v6170_v37  ;;  %v7431_v45 = vmul.f32 %v14253_v22, %v16642_v40  ;;  %v5516_v35 = vsub.f32 0.0, %v14347_v47  ;;  %v6796_v41 = vand.u32 2147483647, %v14347_v47  ;;  %v14442_v3 = vpop.f32.mrf.mxu1  ;;  %v16646_v40 = vld [vmem:[#allocation138_spill] sm:$0xff] }
 0x821   : > { %v14424_v56 = vpop.eup %9810  ;;  %v6167_v50 = vsel %vm6166_vm15, %v14325_v52, %v6163_v34  ;;  %v7341_v23 = vmul.f32 1.442695, %v14347_v47  ;;  %v6175_v13 = vmul.f32 %v14357_v59, %v14305_v42  ;;  %v5140_v43 = vmax.f32 %v14345_v60, 0.0 }
 0x822   : > { %v7951_v46 = vpop.permute.xlu2 %7950  ;;  %v14431_v38 = vpop.eup %9812  ;;  %v6172_v10 = vsel %vm6169_vm14, %v6171_v57, %v6167_v50  ;;  %v5613_v62 = vmul.f32 1.442695, %v5516_v35  ;;  %9818 = vlog2.f32 %v7050_v32  ;;  %v6860_v20 = vsub.f32 0.0, %v6796_v41 }
 0x823   : > { %v8190_v22 = vsel %vm8172_vm6, %v16643_v31, %v7951_v46  ;;  %v7496_v52 = vsel %vm7467_vm4, %v6172_v10, %v14339_v14  ;;  %v9815_v55 = vpop.eup %9814  ;;  %v6176_v60 = vsub.f32 1.0, %v6175_v13  ;;  %vm6179_vm0 = vweird.f32 %v14305_v42 }
 0x824   : > { %v8255_v4 = vsel %vm8237_vm7, %v8190_v22, 0.0  ;;  %v7560_v61 = vsel %vm1585_vm11, %v7431_v45, %v7496_v52  ;;  %9820 = vpow2.f32 %v5613_v62  ;;  %v6957_v14 = vmul.f32 1.442695, %v6860_v20 }
 0x825   : > { %8319 = vst [vmem:[%s13703_s15 + $0x88] sm:$0xff] %v8255_v4  ;;  %v9817_v25 = vpop.eup %9816  ;;  %7972 = vrot.lane.b32.xlu0 %v7560_v61, %s10315_s25  ;;  %9822 = vpow2.f32 %v7341_v23  ;;  %v6183_v27 = vand.u32 2147483647, %v14305_v42  ;;  %v6185_v0 = vand.u32 2147483648, %v14305_v42  ;;  %v6177_v63 = vmul.f32 %v14357_v59, %v6176_v60 }
 0x826   : > { %v7051_v19 = vadd.f32 1.0, %v9817_v25  ;;  %vm6180_vm1 = vweird.f32 %v14357_v59  ;;  %v7142_v33 = vmul.f32 0.6931472, %v14366_v12  ;;  %v14454_v37 = vadd.f32 1.0, %v9815_v55 }
 0x827   : > { %9824 = vpow2.f32 %v6957_v14  ;;  %vm14456_vm5 = vcmp.eq.f32.partialorder %v6183_v27, 8.507059e+37  ;;  %v6186_v34 = vor.u32 1.1754944e-38, %v6185_v0  ;;  %v6178_v57 = vadd.f32 %v14357_v59, %v6177_v63  ;;  %vm6181_vm2 = vmor %vm6179_vm0, %vm6180_vm1  ;;  %v14485_v20 = vpop.f32.mrf.mxu2 }
 0x828   : > { %9826 = vlog2.f32 %v7051_v19  ;;  %v7432_v45 = vmul.f32 %v14303_v1, %v16646_v40  ;;  %v5141_v35 = vmax.f32 %v14391_v6, 0.0  ;;  %v14464_v50 = vpop.eup %9818  ;;  %v7240_v12 = vadd.f32 %v7142_v33, %v6728_v21  ;;  %v16647_v6 = vld [vmem:[#allocation47_spill] sm:$0xff] }
 0x829   : > { %v5517_v41 = vsub.f32 0.0, %v14393_v30  ;;  %v6797_v23 = vand.u32 2147483647, %v14393_v30  ;;  %v7343_v13 = vmul.f32 1.442695, %v14393_v30  ;;  %v6182_v1 = vsel %vm6181_vm2, %v14357_v59, %v6178_v57 }
 0x82a   : > { %v7947_v46 = vpop.permute.xlu1 %7946  ;;  %v9821_v10 = vpop.eup %9820  ;;  %v5179_v22 = vpack.c.bf16 %v5141_v35, %v5140_v43  ;;  %v6190_v42 = vmul.f32 %v14401_v51, %v14349_v9  ;;  %v6187_v62 = vsel %vm14456_vm5, %v6186_v34, %v6182_v1  ;;  %9828 = vrcp.f32 %v14454_v37 }
 0x82b   : > { %v8188_v31 = vsel %vm8172_vm6, %v16647_v6, %v7947_v46  ;;  %v14478_v15 = vpop.eup %9822  ;;  %v14480_v21 = vadd.f32 1.0, %v9821_v10  ;;  %v5615_v4 = vmul.f32 1.442695, %v5517_v41  ;;  %v7497_v59 = vsel %vm7467_vm4, %v6187_v62, %v7240_v12  ;;  %v14491_v61 = vpop.f32.mrf.mxu1  ;;  %v16649_v41 = vld [vmem:[#allocation150_spill] sm:$0xff] }
 0x82c   : > { %v8253_v52 = vsel %vm8237_vm7, %v8188_v31, 0.0  ;;  %v6861_v43 = vsub.f32 0.0, %v6797_v23  ;;  %v6191_v55 = vsub.f32 1.0, %v6190_v42  ;;  %5383 = vmatmul.bf16.gmra.mxu1 %v5179_v22  ;;  %v6732_v25 = vmax.f32 %v14347_v47, 0.0  ;;  %v7949_v27 = vpop.permute.xlu0 %7948 }
 0x82d   : > { %8317 = vst [vmem:[%s13703_s15 + $0x78] sm:$0xff] %v8253_v52  ;;  %v9825_v60 = vpop.eup %9824  ;;  %v7561_v14 = vsel %vm1585_vm11, %v7432_v45, %v7497_v59  ;;  %9830 = vpow2.f32 %v7343_v13  ;;  %vm6195_vm8 = vweird.f32 %v14401_v51  ;;  %vm6194_vm9 = vweird.f32 %v14349_v9  ;;  %v16648_v45 = vld [vmem:[#allocation51_spill] sm:$0xff] }
 0x82e   : > { %v9827_v0 = vpop.eup %9826  ;;  %v7052_v19 = vadd.f32 1.0, %v9825_v60  ;;  %7974 = vrot.lane.b32.xlu2 %v7561_v14, %s10315_s25  ;;  %9832 = vpow2.f32 %v5615_v4  ;;  %v6959_v63 = vmul.f32 1.442695, %v6861_v43  ;;  %v6192_v33 = vmul.f32 %v14401_v51, %v6191_v55  ;;  %vm6196_vm10 = vmor %vm6194_vm9, %vm6195_vm8 }
 0x82f   : > { %9834 = vrcp.f32 %v14480_v21  ;;  %v6198_v32 = vand.u32 2147483647, %v14349_v9  ;;  %v6200_v34 = vand.u32 2147483648, %v14349_v9  ;;  %v7148_v57 = vmul.f32 0.6931472, %v9827_v0 }
 0x830   : > { %9836 = vlog2.f32 %v7052_v19  ;;  %v6193_v40 = vadd.f32 %v14401_v51, %v6192_v33  ;;  %v8189_v35 = vsel %vm8172_vm6, %v16648_v45, %v7949_v27  ;;  %v6733_v12 = vmax.f32 %v14393_v30, 0.0  ;;  %v14511_v13 = vpop.eup %9828  ;;  %v14523_v62 = vpop.f32.mrf.mxu2 }
 0x831   : > { %9838 = vpow2.f32 %v6959_v63  ;;  %v6201_v46 = vor.u32 1.1754944e-38, %v6200_v34  ;;  %v7433_v23 = vmul.f32 %v14331_v16, %v16649_v41  ;;  %vm6199_vm12 = vcmp.eq.f32.partialorder %v6198_v32, 8.507059e+37 }
 0x832   : > { %v6197_v9 = vsel %vm6196_vm10, %v14401_v51, %v6193_v40  ;;  %v8254_v10 = vsel %vm8237_vm7, %v8189_v35, 0.0  ;;  %v5518_v1 = vsub.f32 0.0, %v14442_v3  ;;  %v6798_v22 = vand.u32 2147483647, %v14442_v3  ;;  %v16652_v35 = vld [vmem:[#allocation61_spill] sm:$0xff] }
 0x833   : > { %v14516_v6 = vpop.eup %9830  ;;  %v6202_v31 = vsel %vm6199_vm12, %v6201_v46, %v6197_v9  ;;  %8318 = vst [vmem:[%s13703_s15 + $0x80] sm:$0xff] %v8254_v10  ;;  %v7345_v42 = vmul.f32 1.442695, %v14442_v3  ;;  %v6205_v16 = vmul.f32 %v14431_v38, %v14395_v44  ;;  %v14527_v51 = vadd.f32 %v7148_v57, %v6731_v58  ;;  %v14533_v55 = vpop.f32.mrf.mxu1 }
 0x834   : > { %v9833_v52 = vpop.eup %9832  ;;  %v7498_v4 = vsel %vm7467_vm4, %v6202_v31, %v14419_v36  ;;  %v5142_v59 = vmax.f32 %v14440_v54, 0.0  ;;  %v5617_v43 = vmul.f32 1.442695, %v5518_v1  ;;  %v6734_v5 = vmax.f32 %v14442_v3, 0.0 }
 0x835   : > { %v14535_v60 = vpop.eup %9834  ;;  %v14537_v14 = vadd.f32 1.0, %v9833_v52  ;;  %v7562_v27 = vsel %vm1585_vm11, %v7433_v23, %v7498_v4  ;;  %v6862_v58 = vsub.f32 0.0, %v6798_v22  ;;  %v6206_v36 = vsub.f32 1.0, %v6205_v16 }
 0x836   : > { %v14542_v0 = vpop.eup %9836  ;;  %7976 = vrot.lane.b32.xlu1 %v7562_v27, %s10315_s25  ;;  %9840 = vpow2.f32 %v5617_v43  ;;  %vm6209_vm13 = vweird.f32 %v14395_v44  ;;  %v6213_v54 = vand.u32 2147483647, %v14395_v44  ;;  %vm6210_vm14 = vweird.f32 %v14431_v38  ;;  %v16653_v27 = vld [vmem:[#allocation148_spill] sm:$0xff] }
 0x837   : > { %v9839_v19 = vpop.eup %9838  ;;  %v6961_v63 = vmul.f32 1.442695, %v6862_v58  ;;  %9842 = vpow2.f32 %v7345_v42  ;;  %v6215_v33 = vand.u32 2147483648, %v14395_v44  ;;  %v6207_v34 = vmul.f32 %v14431_v38, %v6206_v36  ;;  %vm6211_vm0 = vmor %vm6209_vm13, %vm6210_vm14 }
 0x838   : > { %9844 = vrcp.f32 %v14537_v14  ;;  %v7053_v32 = vadd.f32 1.0, %v9839_v19  ;;  %v7146_v57 = vmul.f32 0.6931472, %v14464_v50  ;;  %v7957_v40 = vpop.permute.xlu2 %7956  ;;  %vm14552_vm15 = vcmp.eq.f32.partialorder %v6213_v54, 8.507059e+37  ;;  %v14574_v43 = vpop.f32.mrf.mxu2 }
 0x839   : > { %9846 = vpow2.f32 %v6961_v63  ;;  %v8193_v46 = vsel %vm8172_vm6, %v16652_v35, %v7957_v40  ;;  %v5143_v41 = vmax.f32 %v14485_v20, 0.0  ;;  %v6208_v23 = vadd.f32 %v14431_v38, %v6207_v34 }
 0x83a   : > { %9848 = vlog2.f32 %v7053_v32  ;;  %v8258_v9 = vsel %vm8237_vm7, %v8193_v46, 0.0  ;;  %v5519_v10 = vsub.f32 0.0, %v14491_v61  ;;  %v6216_v50 = vor.u32 1.1754944e-38, %v6215_v33 }
 0x83b   : > { %8322 = vst [vmem:[%s13703_s15 + $0xa0] sm:$0xff] %v8258_v9  ;;  %v5180_v1 = vpack.c.bf16 %v5143_v41, %v5142_v59  ;;  %v6799_v31 = vand.u32 2147483647, %v14491_v61  ;;  %v7347_v22 = vmul.f32 1.442695, %v14491_v61  ;;  %v6212_v42 = vsel %vm6211_vm0, %v14431_v38, %v6208_v23  ;;  %v16654_v23 = vld [vmem:[#allocation94_spill] sm:$0xff] }
 0x83c   : > { %v9841_v20 = vpop.eup %9840  ;;  %v7242_v16 = vadd.f32 %v7146_v57, %v6730_v7  ;;  %v5619_v52 = vmul.f32 1.442695, %v5519_v10  ;;  %v6220_v4 = vmul.f32 %v14511_v13, %v14454_v37  ;;  %v6217_v59 = vsel %vm14552_vm15, %v6216_v50, %v6212_v42  ;;  %v16655_v50 = vld [vmem:[#allocation142_spill] sm:$0xff] }
 0x83d   : > { %v14576_v44 = vpop.eup %9842  ;;  %v7434_v58 = vmul.f32 %v14377_v24, %v16653_v27  ;;  %v6735_v36 = vmax.f32 %v14491_v61, 0.0  ;;  %v6863_v38 = vsub.f32 0.0, %v6799_v31  ;;  %5388 = vmatmul.bf16.gmra.mxu1 %v5180_v1  ;;  %v14583_v29 = vpop.f32.mrf.mxu1  ;;  %v14587_v54 = vadd.f32 1.0, %v9841_v20 }
 0x83e   : > { %v14585_v7 = vpop.eup %9844  ;;  %v7499_v19 = vsel %vm7467_vm4, %v6217_v59, %v7242_v16  ;;  %9850 = vpow2.f32 %v5619_v52  ;;  %v6221_v63 = vsub.f32 1.0, %v6220_v4  ;;  %v7953_v33 = vpop.permute.xlu1 %7952  ;;  %v6228_v57 = vand.u32 2147483647, %v14454_v37 }
 0x83f   : > { %v9847_v32 = vpop.eup %9846  ;;  %v7563_v24 = vsel %vm1585_vm11, %v7434_v58, %v7499_v19  ;;  %v6963_v34 = vmul.f32 1.442695, %v6863_v38  ;;  %9852 = vpow2.f32 %v7347_v22  ;;  %vm6225_vm1 = vweird.f32 %v14511_v13 }
 0x840   : > { %v9849_v40 = vpop.eup %9848  ;;  %v7054_v45 = vadd.f32 1.0, %v9847_v32  ;;  %7978 = vrot.lane.b32.xlu0 %v7563_v24, %s10315_s25  ;;  %v6222_v35 = vmul.f32 %v14511_v13, %v6221_v63  ;;  %v6230_v46 = vand.u32 2147483648, %v14454_v37  ;;  %vm6224_vm5 = vweird.f32 %v14454_v37 }
 0x841   : > { %v7152_v41 = vmul.f32 0.6931472, %v9849_v40  ;;  %9854 = vpow2.f32 %v6963_v34  ;;  %v8191_v9 = vsel %vm8172_vm6, %v16654_v23, %v7953_v33  ;;  %v7435_v1 = vmul.f32 %v14424_v56, %v16655_v50  ;;  %vm6226_vm2 = vmor %vm6224_vm5, %vm6225_vm1 }
 0x842   : > { %9856 = vrcp.f32 %v14587_v54  ;;  %v6223_v10 = vadd.f32 %v14511_v13, %v6222_v35  ;;  %v8256_v31 = vsel %vm8237_vm7, %v8191_v9, 0.0  ;;  %vm6229_vm8 = vcmp.eq.f32.partialorder %v6228_v57, 8.507059e+37 }
 0x843   : > { %9858 = vlog2.f32 %v7054_v45  ;;  %v6231_v22 = vor.u32 1.1754944e-38, %v6230_v46  ;;  %8320 = vst [vmem:[%s13703_s15 + $0x90] sm:$0xff] %v8256_v31  ;;  %v5520_v20 = vsub.f32 0.0, %v14533_v55  ;;  %v14610_v42 = vadd.f32 %v7152_v41, %v6733_v12 }
 0x844   : > { %v9851_v37 = vpop.eup %9850  ;;  %v6227_v16 = vsel %vm6226_vm2, %v14511_v13, %v6223_v10  ;;  %v6800_v52 = vand.u32 2147483647, %v14533_v55  ;;  %v6235_v56 = vmul.f32 %v14535_v60, %v14480_v21  ;;  %v5144_v27 = vmax.f32 %v14523_v62, 0.0  ;;  %v16658_v10 = vld [vmem:[#allocation98_spill] sm:$0xff] }
 0x845   : > { %v14616_v4 = vpop.eup %9852  ;;  %v6232_v59 = vsel %vm6229_vm8, %v6231_v22, %v6227_v16  ;;  %v5621_v58 = vmul.f32 1.442695, %v5520_v20  ;;  %v7349_v38 = vmul.f32 1.442695, %v14533_v55  ;;  %v14620_v19 = vadd.f32 1.0, %v9851_v37  ;;  %v14625_v63 = vpop.f32.mrf.mxu2  ;;  %v16659_v22 = vld [vmem:[#allocation153_spill] sm:$0xff] }
 0x846   : > { %v7500_v30 = vsel %vm7467_vm4, %v6232_v59, %v14527_v51  ;;  %v6864_v12 = vsub.f32 0.0, %v6800_v52  ;;  %v6236_v13 = vsub.f32 1.0, %v6235_v56  ;;  %vm6239_vm9 = vweird.f32 %v14480_v21  ;;  %v14632_v34 = vpop.f32.mrf.mxu1 }
 0x847   : > { %v9855_v33 = vpop.eup %9854  ;;  %v7564_v32 = vsel %vm1585_vm11, %v7435_v1, %v7500_v30  ;;  %vm6240_vm10 = vweird.f32 %v14535_v60  ;;  %v6243_v62 = vand.u32 2147483647, %v14480_v21  ;;  %v7955_v24 = vpop.permute.xlu0 %7954  ;;  %9860 = vpow2.f32 %v5621_v58 }
 0x848   : > { %v14634_v57 = vpop.eup %9856  ;;  %v7055_v51 = vadd.f32 1.0, %v9855_v33  ;;  %7980 = vrot.lane.b32.xlu2 %v7564_v32, %s10315_s25  ;;  %v6965_v40 = vmul.f32 1.442695, %v6864_v12  ;;  %v6237_v45 = vmul.f32 %v14535_v60, %v6236_v13  ;;  %9862 = vpow2.f32 %v7349_v38  ;;  %vm6241_vm13 = vmor %vm6239_vm9, %vm6240_vm10 }
 0x849   : > { %v14638_v35 = vpop.eup %9858  ;;  %vm14640_vm12 = vcmp.eq.f32.partialorder %v6243_v62, 8.507059e+37  ;;  %v6245_v41 = vand.u32 2147483648, %v14480_v21  ;;  %v7150_v23 = vmul.f32 0.6931472, %v14542_v0  ;;  %v8192_v50 = vsel %vm8172_vm6, %v16658_v10, %v7955_v24 }
 0x84a   : > { %9864 = vlog2.f32 %v7055_v51  ;;  %v6238_v9 = vadd.f32 %v14535_v60, %v6237_v45  ;;  %v5145_v1 = vmax.f32 %v14574_v43, 0.0  ;;  %v7436_v20 = vmul.f32 %v14478_v15, %v16659_v22 }
 0x84b   : > { %9866 = vpow2.f32 %v6965_v40  ;;  %v6246_v31 = vor.u32 1.1754944e-38, %v6245_v41  ;;  %v8257_v0 = vsel %vm8237_vm7, %v8192_v50, 0.0  ;;  %v7244_v16 = vadd.f32 %v7150_v23, %v6732_v25  ;;  %v16662_v50 = vld [vmem:[#allocation151_spill] sm:$0xff] }
 0x84c   : > { %v6242_v37 = vsel %vm6241_vm13, %v14535_v60, %v6238_v9  ;;  %8321 = vst [vmem:[%s13703_s15 + $0x98] sm:$0xff] %v8257_v0  ;;  %v5181_v52 = vpack.c.bf16 %v5145_v1, %v5144_v27  ;;  %v5521_v43 = vsub.f32 0.0, %v14583_v29  ;;  %v6801_v21 = vand.u32 2147483647, %v14583_v29 }
 0x84d   : > { %v6247_v56 = vsel %vm14640_vm12, %v6246_v31, %v6242_v37  ;;  %v7351_v59 = vmul.f32 1.442695, %v14583_v29  ;;  %v6250_v15 = vmul.f32 %v14585_v7, %v14537_v14  ;;  %v9861_v58 = vpop.eup %9860  ;;  %9868 = vrcp.f32 %v14620_v19  ;;  %v14682_v51 = vpop.f32.mrf.mxu2 }
 0x84e   : > { %v6736_v47 = vmax.f32 %v14533_v55, 0.0  ;;  %v7501_v25 = vsel %vm7467_vm4, %v6247_v56, %v7244_v16  ;;  %v5623_v60 = vmul.f32 1.442695, %v5521_v43  ;;  %5393 = vmatmul.bf16.gmra.mxu1 %v5181_v52  ;;  %v14672_v27 = vpop.eup %9862  ;;  %v14674_v38 = vadd.f32 1.0, %v9861_v58  ;;  %v16663_v52 = vld [vmem:[#allocation93_spill] sm:$0xff] }
 0x84f   : > { %v7565_v30 = vsel %vm1585_vm11, %v7436_v20, %v7501_v25  ;;  %v6737_v12 = vmax.f32 %v14583_v29, 0.0  ;;  %v6865_v13 = vsub.f32 0.0, %v6801_v21  ;;  %v6251_v32 = vsub.f32 1.0, %v6250_v15 }
 0x850   : > { %v9865_v33 = vpop.eup %9864  ;;  %7982 = vrot.lane.b32.xlu1 %v7565_v30, %s10315_s25  ;;  %9870 = vpow2.f32 %v5623_v60  ;;  %v6258_v62 = vand.u32 2147483647, %v14537_v14  ;;  %v6260_v24 = vand.u32 2147483648, %v14537_v14  ;;  %vm6254_vm14 = vweird.f32 %v14537_v14 }
 0x851   : > { %v9867_v40 = vpop.eup %9866  ;;  %v7156_v45 = vmul.f32 0.6931472, %v9865_v33  ;;  %v6967_v46 = vmul.f32 1.442695, %v6865_v13  ;;  %9872 = vpow2.f32 %v7351_v59  ;;  %v14685_v41 = vpop.f32.mrf.mxu1  ;;  %v6252_v9 = vmul.f32 %v14585_v7, %v6251_v32 }
 0x852   : > { %9874 = vrcp.f32 %v14674_v38  ;;  %v7056_v23 = vadd.f32 1.0, %v9867_v40  ;;  %vm6255_vm15 = vweird.f32 %v14585_v7  ;;  %vm14690_vm0 = vcmp.eq.f32.partialorder %v6258_v62, 8.507059e+37 }
 0x853   : > { %9876 = vpow2.f32 %v6967_v46  ;;  %v7437_v1 = vmul.f32 %v14516_v6, %v16662_v50  ;;  %v7963_v31 = vpop.permute.xlu2 %7962  ;;  %v5522_v22 = vsub.f32 0.0, %v14632_v34  ;;  %v14697_v20 = vpop.eup %9868  ;;  %v14701_v0 = vadd.f32 %v7156_v45, %v6735_v36  ;;  %vm6256_vm1 = vmor %vm6254_vm14, %vm6255_vm15 }
 0x854   : > { %v6253_v37 = vadd.f32 %v14585_v7, %v6252_v9  ;;  %v6261_v16 = vor.u32 1.1754944e-38, %v6260_v24  ;;  %v8196_v43 = vsel %vm8172_vm6, %v16663_v52, %v7963_v31  ;;  %v6802_v21 = vand.u32 2147483647, %v14632_v34 }
 0x855   : > { %v8261_v6 = vsel %vm8237_vm7, %v8196_v43, 0.0  ;;  %v5625_v56 = vmul.f32 1.442695, %v5522_v22  ;;  %v6265_v59 = vmul.f32 %v14634_v57, %v14587_v54  ;;  %9878 = vlog2.f32 %v7056_v23 }
 0x856   : > { %v9871_v61 = vpop.eup %9870  ;;  %v6257_v36 = vsel %vm6256_vm1, %v14585_v7, %v6253_v37  ;;  %8325 = vst [vmem:[%s13703_s15 + $0xb8] sm:$0xff] %v8261_v6  ;;  %v5146_v15 = vmax.f32 %v14625_v63, 0.0  ;;  %v7353_v58 = vmul.f32 1.442695, %v14632_v34  ;;  %v6866_v30 = vsub.f32 0.0, %v6802_v21 }
 0x857   : > { %v14716_v25 = vpop.eup %9872  ;;  %v14718_v14 = vadd.f32 1.0, %v9871_v61  ;;  %v6262_v60 = vsel %vm14690_vm0, %v6261_v16, %v6257_v36  ;;  %9880 = vpow2.f32 %v5625_v56  ;;  %v6266_v33 = vsub.f32 1.0, %v6265_v59  ;;  %v14738_v10 = vpop.f32.mrf.mxu2 }
 0x858   : > { %v14722_v13 = vpop.eup %9874  ;;  %v7502_v7 = vsel %vm7467_vm4, %v6262_v60, %v14610_v42  ;;  %vm6270_vm5 = vweird.f32 %v14634_v57  ;;  %v6273_v63 = vand.u32 2147483647, %v14587_v54  ;;  %v6969_v24 = vmul.f32 1.442695, %v6866_v30 }
 0x859   : > { %v9877_v32 = vpop.eup %9876  ;;  %v7566_v62 = vsel %vm1585_vm11, %v7437_v1, %v7502_v7  ;;  %9882 = vpow2.f32 %v7353_v58  ;;  %v6275_v40 = vand.u32 2147483648, %v14587_v54  ;;  %v7959_v45 = vpop.permute.xlu1 %7958  ;;  %v6267_v42 = vmul.f32 %v14634_v57, %v6266_v33  ;;  %v16666_v1 = vld [vmem:[#allocation96_spill] sm:$0xff] }
 0x85a   : > { %v14732_v46 = vpop.f32.mrf.mxu1  ;;  %9884 = vrcp.f32 %v14718_v14  ;;  %v7057_v23 = vadd.f32 1.0, %v9877_v32  ;;  %7984 = vrot.lane.b32.xlu0 %v7566_v62, %s10315_s25  ;;  %v7154_v9 = vmul.f32 0.6931472, %v14638_v35  ;;  %vm6269_vm2 = vweird.f32 %v14587_v54  ;;  %v16667_v54 = vld [vmem:[#allocation146_spill] sm:$0xff] }
 0x85b   : > { %9886 = vpow2.f32 %v6969_v24  ;;  %vm14741_vm8 = vcmp.eq.f32.partialorder %v6273_v63, 8.507059e+37  ;;  %v8194_v31 = vsel %vm8172_vm6, %v16666_v1, %v7959_v45  ;;  %v14747_v22 = vpop.eup %9878  ;;  %v6268_v37 = vadd.f32 %v14634_v57, %v6267_v42  ;;  %vm6271_vm9 = vmor %vm6269_vm2, %vm6270_vm5 }
 0x85c   : > { %9888 = vlog2.f32 %v7057_v23  ;;  %v6276_v16 = vor.u32 1.1754944e-38, %v6275_v40  ;;  %v8259_v35 = vsel %vm8237_vm7, %v8194_v31, 0.0  ;;  %v7438_v43 = vmul.f32 %v14576_v44, %v16667_v54 }
 0x85d   : > { %v9881_v52 = vpop.eup %9880  ;;  %8323 = vst [vmem:[%s13703_s15 + $0xa8] sm:$0xff] %v8259_v35  ;;  %v5147_v6 = vmax.f32 %v14682_v51, 0.0  ;;  %v5523_v56 = vsub.f32 0.0, %v14685_v41  ;;  %v6803_v21 = vand.u32 2147483647, %v14685_v41  ;;  %v6272_v61 = vsel %vm6271_vm9, %v14634_v57, %v6268_v37 }
 0x85e   : > { %v14759_v59 = vadd.f32 1.0, %v9881_v52  ;;  %v7246_v36 = vadd.f32 %v7154_v9, %v6734_v5  ;;  %v6280_v58 = vmul.f32 %v14697_v20, %v14620_v19  ;;  %v6277_v44 = vsel %vm14741_vm8, %v6276_v16, %v6272_v61  ;;  %v16668_v16 = vld [vmem:[#allocation91_spill] sm:$0xff] }
 0x85f   : > { %v14766_v60 = vpop.eup %9882  ;;  %v5182_v51 = vpack.c.bf16 %v5147_v6, %v5146_v15  ;;  %v5627_v30 = vmul.f32 1.442695, %v5523_v56  ;;  %v6867_v7 = vsub.f32 0.0, %v6803_v21  ;;  %v6738_v57 = vmax.f32 %v14632_v34, 0.0  ;;  %v5077_v52 = vpop.f32.mrf.mxu2 }
 0x860   : > { %v14770_v33 = vpop.eup %9884  ;;  %9890 = vrcp.f32 %v14759_v59  ;;  %v7503_v3 = vsel %vm7467_vm4, %v6277_v44, %v7246_v36  ;;  %v6281_v5 = vsub.f32 1.0, %v6280_v58  ;;  %v7355_v15 = vmul.f32 1.442695, %v14685_v41 }
 0x861   : > { %v9887_v63 = vpop.eup %9886  ;;  %v7567_v32 = vsel %vm1585_vm11, %v7438_v43, %v7503_v3  ;;  %9892 = vpow2.f32 %v5627_v30  ;;  %v6971_v62 = vmul.f32 1.442695, %v6867_v7  ;;  %5398 = vmatmul.bf16.gmra.mxu1 %v5182_v51  ;;  %vm6285_vm10 = vweird.f32 %v14697_v20  ;;  %v16669_v43 = vld [vmem:[#allocation156_spill] sm:$0xff] }
 0x862   : > { %v9889_v24 = vpop.eup %9888  ;;  %v7058_v40 = vadd.f32 1.0, %v9887_v63  ;;  %7986 = vrot.lane.b32.xlu2 %v7567_v32, %s10315_s25  ;;  %v6282_v45 = vmul.f32 %v14697_v20, %v6281_v5  ;;  %v6288_v23 = vand.u32 2147483647, %v14620_v19  ;;  %v14783_v42 = vpop.f32.mrf.mxu1  ;;  %v6739_v50 = vmax.f32 %v14685_v41, 0.0 }
 0x863   : > { %v7160_v9 = vmul.f32 0.6931472, %v9889_v24  ;;  %9894 = vpow2.f32 %v6971_v62  ;;  %v6290_v1 = vand.u32 2147483648, %v14620_v19  ;;  %v7961_v31 = vpop.permute.xlu0 %7960  ;;  %vm6284_vm12 = vweird.f32 %v14620_v19 }
 0x864   : > { %9896 = vlog2.f32 %v7058_v40  ;;  %v6283_v37 = vadd.f32 %v14697_v20, %v6282_v45  ;;  %v8195_v35 = vsel %vm8172_vm6, %v16668_v16, %v7961_v31  ;;  %vm6286_vm13 = vmor %vm6284_vm12, %vm6285_vm10  ;;  %v7439_v6 = vmul.f32 %v14616_v4, %v16669_v43  ;;  %v16670_v16 = vld [vmem:[#allocation154_spill] sm:$0xff] }
 0x865   : > { %9898 = vpow2.f32 %v7355_v15  ;;  %v6291_v54 = vor.u32 1.1754944e-38, %v6290_v1  ;;  %v8260_v56 = vsel %vm8237_vm7, %v8195_v35, 0.0  ;;  %vm6289_vm14 = vcmp.eq.f32.partialorder %v6288_v23, 8.507059e+37 }
 0x866   : > { %v14794_v21 = vpop.eup %9890  ;;  %v6287_v61 = vsel %vm6286_vm13, %v14697_v20, %v6283_v37  ;;  %8324 = vst [vmem:[%s13703_s15 + $0xb0] sm:$0xff] %v8260_v56  ;;  %v5524_v19 = vsub.f32 0.0, %v14732_v46  ;;  %v6804_v36 = vand.u32 2147483647, %v14732_v46  ;;  %v14802_v44 = vadd.f32 %v7160_v9, %v6737_v12 }
 0x867   : > { %v9893_v58 = vpop.eup %9892  ;;  %v6292_v51 = vsel %vm6289_vm14, %v6291_v54, %v6287_v61  ;;  %v7357_v4 = vmul.f32 1.442695, %v14732_v46  ;;  %v6295_v30 = vmul.f32 %v14722_v13, %v14674_v38  ;;  %v5148_v7 = vmax.f32 %v14738_v10, 0.0 }
 0x868   : > { %v7504_v20 = vsel %vm7467_vm4, %v6292_v51, %v14701_v0  ;;  %v5629_v3 = vmul.f32 1.442695, %v5524_v19  ;;  %v6868_v5 = vsub.f32 0.0, %v6804_v36  ;;  %v6740_v12 = vmax.f32 %v14732_v46, 0.0  ;;  %v16671_v36 = vld [vmem:[#allocation95_spill] sm:$0xff] }
 0x869   : > { %v9895_v63 = vpop.eup %9894  ;;  %v7568_v29 = vsel %vm1585_vm11, %v7439_v6, %v7504_v20  ;;  %v6296_v32 = vsub.f32 1.0, %v6295_v30  ;;  %vm6299_vm15 = vweird.f32 %v14674_v38  ;;  %9900 = vpow2.f32 %v7357_v4  ;;  %v14835_v61 = vpop.f32.mrf.mxu2 }
 0x86a   : > { %v9897_v62 = vpop.eup %9896  ;;  %v7059_v15 = vadd.f32 1.0, %v9895_v63  ;;  %7988 = vrot.lane.b32.xlu1 %v7568_v29, %s10315_s25  ;;  %v6973_v24 = vmul.f32 1.442695, %v6868_v5  ;;  %v6303_v0 = vand.u32 2147483647, %v14674_v38  ;;  %9902 = vpow2.f32 %v5629_v3  ;;  %v14825_v31 = vpop.f32.mrf.mxu1 }
 0x86b   : > { %v14817_v10 = vpop.eup %9898  ;;  %v6297_v40 = vmul.f32 %v14722_v13, %v6296_v32  ;;  %vm6300_vm0 = vweird.f32 %v14722_v13  ;;  %v6305_v45 = vand.u32 2147483648, %v14674_v38  ;;  %v7162_v23 = vmul.f32 0.6931472, %v9897_v62 }
 0x86c   : > { %v14822_v9 = vadd.f32 1.0, %v9893_v58  ;;  %9904 = vlog2.f32 %v7059_v15  ;;  %v7158_v1 = vmul.f32 0.6931472, %v14747_v22  ;;  %vm6304_vm1 = vcmp.eq.f32.partialorder %v6303_v0, 8.507059e+37  ;;  %vm6301_vm5 = vmor %vm6299_vm15, %vm6300_vm0 }
 0x86d   : > { %9906 = vpow2.f32 %v6973_v24  ;;  %v6298_v37 = vadd.f32 %v14722_v13, %v6297_v40  ;;  %v7440_v35 = vmul.f32 %v14672_v27, %v16670_v16  ;;  %v6306_v54 = vor.u32 1.1754944e-38, %v6305_v45 }
 0x86e   : > { %v7248_v43 = vadd.f32 %v7158_v1, %v6736_v47  ;;  %v7969_v6 = vpop.permute.xlu2 %7968  ;;  %v5149_v56 = vmax.f32 %v5077_v52, 0.0  ;;  %v5525_v22 = vsub.f32 0.0, %v14783_v42  ;;  %v6805_v27 = vand.u32 2147483647, %v14783_v42 }
 0x86f   : > { %v6302_v19 = vsel %vm6301_vm5, %v14722_v13, %v6298_v37  ;;  %v8199_v58 = vsel %vm8172_vm6, %v16671_v36, %v7969_v6  ;;  %v7359_v38 = vmul.f32 1.442695, %v14783_v42  ;;  %v14842_v51 = vpop.eup %9900  ;;  %9908 = vrcp.f32 %v14822_v9  ;;  %v16672_v37 = vld [vmem:[#allocation57_spill] sm:$0xff] }
 0x870   : > { %v6307_v55 = vsel %vm6304_vm1, %v6306_v54, %v6302_v19  ;;  %v8264_v47 = vsel %vm8237_vm7, %v8199_v58, 0.0  ;;  %v5183_v4 = vpack.c.bf16 %v5149_v56, %v5148_v7  ;;  %v5631_v52 = vmul.f32 1.442695, %v5525_v22  ;;  %v9903_v30 = vpop.eup %9902  ;;  %v16673_v6 = vld [vmem:[#allocation149_spill] sm:$0xff] }
 0x871   : > { %v7505_v13 = vsel %vm7467_vm4, %v6307_v55, %v7248_v43  ;;  %8328 = vst [vmem:[%s13703_s15 + $0xd0] sm:$0xff] %v8264_v47  ;;  %v6869_v20 = vsub.f32 0.0, %v6805_v27  ;;  %v6310_v3 = vmul.f32 %v14770_v33, %v14718_v14  ;;  %v14853_v63 = vadd.f32 %v7162_v23, %v6738_v57  ;;  %v5082_v27 = vpop.f32.mrf.mxu2 }
 0x872   : > { %v9905_v5 = vpop.eup %9904  ;;  %v14855_v29 = vadd.f32 1.0, %v9903_v30  ;;  %v7569_v7 = vsel %vm1585_vm11, %v7440_v35, %v7505_v13  ;;  %9910 = vpow2.f32 %v5631_v52  ;;  %5403 = vmatmul.bf16.gmra.mxu1 %v5183_v4  ;;  %v6741_v34 = vmax.f32 %v14783_v42, 0.0 }
 0x873   : > { %v9907_v32 = vpop.eup %9906  ;;  %v7164_v62 = vmul.f32 0.6931472, %v9905_v5  ;;  %7990 = vrot.lane.b32.xlu0 %v7569_v7, %s10315_s25  ;;  %v6975_v15 = vmul.f32 1.442695, %v6869_v20  ;;  %9912 = vpow2.f32 %v7359_v38  ;;  %v6311_v24 = vsub.f32 1.0, %v6310_v3 }
 0x874   : > { %9914 = vrcp.f32 %v14855_v29  ;;  %v7060_v0 = vadd.f32 1.0, %v9907_v32  ;;  %v6320_v57 = vand.u32 2147483648, %v14718_v14  ;;  %vm6315_vm2 = vweird.f32 %v14770_v33 }
 0x875   : > { %9916 = vpow2.f32 %v6975_v15  ;;  %v6312_v40 = vmul.f32 %v14770_v33, %v6311_v24  ;;  %v6318_v45 = vand.u32 2147483647, %v14718_v14  ;;  %v7965_v23 = vpop.permute.xlu1 %7964  ;;  %v14868_v1 = vadd.f32 %v7164_v62, %v6739_v50  ;;  %v14875_v54 = vpop.eup %9908 }
 0x876   : > { %9918 = vlog2.f32 %v7060_v0  ;;  %vm6314_vm8 = vweird.f32 %v14718_v14  ;;  %v8197_v16 = vsel %vm8172_vm6, %v16672_v37, %v7965_v23  ;;  %v14873_v35 = vpop.f32.mrf.mxu1  ;;  %v7441_v56 = vmul.f32 %v14716_v25, %v16673_v6 }
 0x877   : > { %v6313_v43 = vadd.f32 %v14770_v33, %v6312_v40  ;;  %v8262_v22 = vsel %vm8237_vm7, %v8197_v16, 0.0  ;;  %v5526_v41 = vsub.f32 0.0, %v14825_v31  ;;  %vm6316_vm9 = vmor %vm6314_vm8, %vm6315_vm2  ;;  %v6321_v19 = vor.u32 1.1754944e-38, %v6320_v57  ;;  %v16674_v40 = vld [vmem:[#allocation66_spill] sm:$0xff] }
 0x878   : > { %v9911_v50 = vpop.eup %9910  ;;  %8326 = vst [vmem:[%s13703_s15 + $0xc0] sm:$0xff] %v8262_v22  ;;  %v6806_v14 = vand.u32 2147483647, %v14825_v31  ;;  %v7361_v36 = vmul.f32 1.442695, %v14825_v31  ;;  %v6325_v58 = vmul.f32 %v14794_v21, %v14759_v59  ;;  %vm6319_vm10 = vcmp.eq.f32.partialorder %v6318_v45, 8.507059e+37 }
 0x879   : > { %v14887_v38 = vpop.eup %9912  ;;  %v14889_v55 = vadd.f32 1.0, %v9911_v50  ;;  %v6317_v25 = vsel %vm6316_vm9, %v14770_v33, %v6313_v43  ;;  %v5633_v47 = vmul.f32 1.442695, %v5526_v41  ;;  %v5150_v30 = vmax.f32 %v14835_v61, 0.0 }
 0x87a   : > { %v14892_v4 = vpop.eup %9914  ;;  %v6322_v52 = vsel %vm6319_vm10, %v6321_v19, %v6317_v25  ;;  %v6870_v13 = vsub.f32 0.0, %v6806_v14  ;;  %v6326_v20 = vsub.f32 1.0, %v6325_v58  ;;  %v6742_v7 = vmax.f32 %v14825_v31, 0.0  ;;  %v16675_v25 = vld [vmem:[#allocation159_spill] sm:$0xff] }
 0x87b   : > { %v9917_v3 = vpop.eup %9916  ;;  %v7506_v5 = vsel %vm7467_vm4, %v6322_v52, %v14802_v44  ;;  %9920 = vpow2.f32 %v7361_v36  ;;  %v6333_v32 = vand.u32 2147483647, %v14759_v59  ;;  %vm6330_vm12 = vweird.f32 %v14794_v21 }
 0x87c   : > { %v9919_v33 = vpop.eup %9918  ;;  %v7061_v62 = vadd.f32 1.0, %v9917_v3  ;;  %v7570_v15 = vsel %vm1585_vm11, %v7441_v56, %v7506_v5  ;;  %9922 = vpow2.f32 %v5633_v47  ;;  %v6977_v24 = vmul.f32 1.442695, %v6870_v13 }
 0x87d   : > { %9924 = vrcp.f32 %v14889_v55  ;;  %7992 = vrot.lane.b32.xlu2 %v7570_v15, %s10315_s25  ;;  %v6327_v61 = vmul.f32 %v14794_v21, %v6326_v20  ;;  %v6335_v44 = vand.u32 2147483648, %v14759_v59  ;;  %v7967_v0 = vpop.permute.xlu0 %7966  ;;  %v7166_v57 = vmul.f32 0.6931472, %v9919_v33 }
 0x87e   : > { %9926 = vlog2.f32 %v7061_v62  ;;  %v8198_v45 = vsel %vm8172_vm6, %v16674_v40, %v7967_v0  ;;  %v5151_v23 = vmax.f32 %v5082_v27, 0.0  ;;  %v14909_v37 = vpop.f32.mrf.mxu1  ;;  %vm6329_vm13 = vweird.f32 %v14759_v59  ;;  %v16678_v0 = vld [vmem:[#allocation157_spill] sm:$0xff] }
 0x87f   : > { %9928 = vpow2.f32 %v6977_v24  ;;  %v6328_v16 = vadd.f32 %v14794_v21, %v6327_v61  ;;  %vm6334_vm14 = vcmp.eq.f32.partialorder %v6333_v32, 8.507059e+37  ;;  %vm6331_vm15 = vmor %vm6329_vm13, %vm6330_vm12  ;;  %v6336_v43 = vor.u32 1.1754944e-38, %v6335_v44 }
 0x880   : > { %v8263_v6 = vsel %vm8237_vm7, %v8198_v45, 0.0  ;;  %v5184_v56 = vpack.c.bf16 %v5151_v23, %v5150_v30  ;;  %v5527_v22 = vsub.f32 0.0, %v14873_v35  ;;  %v6807_v19 = vand.u32 2147483647, %v14873_v35 }
 0x881   : > { %v14915_v41 = vpop.eup %9920  ;;  %v6332_v50 = vsel %vm6331_vm15, %v14794_v21, %v6328_v16  ;;  %8327 = vst [vmem:[%s13703_s15 + $0xc8] sm:$0xff] %v8263_v6  ;;  %v7363_v14 = vmul.f32 1.442695, %v14873_v35  ;;  %v6340_v59 = vmul.f32 %v14875_v54, %v14822_v9  ;;  %v14925_v58 = vadd.f32 %v7166_v57, %v6740_v12  ;;  %v14929_v21 = vpop.f32.mrf.mxu2 }
 0x882   : > { %v9923_v36 = vpop.eup %9922  ;;  %v6337_v27 = vsel %vm6334_vm14, %v6336_v43, %v6332_v50  ;;  %v7442_v47 = vmul.f32 %v14766_v60, %v16675_v25  ;;  %v5635_v52 = vmul.f32 1.442695, %v5527_v22  ;;  %5408 = vmatmul.bf16.gmra.mxu1 %v5184_v56  ;;  %v6743_v46 = vmax.f32 %v14873_v35, 0.0 }
 0x883   : > { %v14931_v30 = vpop.eup %9924  ;;  %v14933_v13 = vadd.f32 1.0, %v9923_v36  ;;  %v7507_v20 = vsel %vm7467_vm4, %v6337_v27, %v14853_v63  ;;  %v6871_v12 = vsub.f32 0.0, %v6807_v19  ;;  %v6341_v60 = vsub.f32 1.0, %v6340_v59 }
 0x884   : > { %v9927_v3 = vpop.eup %9926  ;;  %v7571_v5 = vsel %vm1585_vm11, %v7442_v47, %v7507_v20  ;;  %9930 = vpow2.f32 %v5635_v52  ;;  %v6348_v32 = vand.u32 2147483647, %v14822_v9  ;;  %vm6345_vm0 = vweird.f32 %v14875_v54 }
 0x885   : > { %v9929_v33 = vpop.eup %9928  ;;  %7994 = vrot.lane.b32.xlu1 %v7571_v5, %s10315_s25  ;;  %v6979_v62 = vmul.f32 1.442695, %v6871_v12  ;;  %9932 = vpow2.f32 %v7363_v14  ;;  %v6350_v63 = vand.u32 2147483648, %v14822_v9  ;;  %v7168_v15 = vmul.f32 0.6931472, %v9927_v3 }
 0x886   : > { %9934 = vrcp.f32 %v14933_v13  ;;  %v7062_v24 = vadd.f32 1.0, %v9929_v33  ;;  %v6342_v61 = vmul.f32 %v14875_v54, %v6341_v60  ;;  %vm6344_vm1 = vweird.f32 %v14822_v9  ;;  %v16679_v9 = vld [vmem:[#allocation65_spill] sm:$0xff] }
 0x887   : > { %9936 = vpow2.f32 %v6979_v62  ;;  %vm14948_vm5 = vcmp.eq.f32.partialorder %v6348_v32, 8.507059e+37  ;;  %v7443_v57 = vmul.f32 %v14817_v10, %v16678_v0  ;;  %v14954_v40 = vpop.f32.mrf.mxu1  ;;  %v6351_v23 = vor.u32 1.1754944e-38, %v6350_v63  ;;  %vm6346_vm2 = vmor %vm6344_vm1, %vm6345_vm0  ;;  %v16680_v63 = vld [vmem:[#allocation152_spill] sm:$0xff] }
 0x888   : > { %9938 = vlog2.f32 %v7062_v24  ;;  %v6343_v45 = vadd.f32 %v14875_v54, %v6342_v61  ;;  %v7975_v16 = vpop.permute.xlu2 %7974  ;;  %v5528_v43 = vsub.f32 0.0, %v14909_v37  ;;  %v6808_v56 = vand.u32 2147483647, %v14909_v37 }
 0x889   : > { %v8202_v6 = vsel %vm8172_vm6, %v16679_v9, %v7975_v16  ;;  %v7365_v10 = vmul.f32 1.442695, %v14909_v37  ;;  %v6355_v22 = vmul.f32 %v14892_v4, %v14855_v29  ;;  %v14968_v19 = vadd.f32 %v7168_v15, %v6741_v34  ;;  %v5087_v12 = vpop.f32.mrf.mxu2 }
 0x88a   : > { %v9931_v50 = vpop.eup %9930  ;;  %v6347_v14 = vsel %vm6346_vm2, %v14875_v54, %v6343_v45  ;;  %v8267_v59 = vsel %vm8237_vm7, %v8202_v6, 0.0  ;;  %v5637_v36 = vmul.f32 1.442695, %v5528_v43  ;;  %v6872_v52 = vsub.f32 0.0, %v6808_v56  ;;  %v16681_v45 = vld [vmem:[#allocation59_spill] sm:$0xff] }
 0x88b   : > { %v14972_v27 = vpop.eup %9932  ;;  %v14974_v25 = vadd.f32 1.0, %v9931_v50  ;;  %v6352_v47 = vsel %vm14948_vm5, %v6351_v23, %v6347_v14  ;;  %8331 = vst [vmem:[%s13703_s15 + $0xe8] sm:$0xff] %v8267_v59  ;;  %9940 = vpow2.f32 %v7365_v10  ;;  %v5152_v34 = vmax.f32 %v14929_v21, 0.0 }
 0x88c   : > { %v14979_v20 = vpop.eup %9934  ;;  %v7508_v42 = vsel %vm7467_vm4, %v6352_v47, %v14868_v1  ;;  %9942 = vpow2.f32 %v5637_v36  ;;  %v6356_v54 = vsub.f32 1.0, %v6355_v22  ;;  %v6981_v60 = vmul.f32 1.442695, %v6872_v52 }
 0x88d   : > { %v9937_v3 = vpop.eup %9936  ;;  %9944 = vrcp.f32 %v14974_v25  ;;  %v7572_v5 = vsel %vm1585_vm11, %v7443_v57, %v7508_v42  ;;  %vm6360_vm8 = vweird.f32 %v14892_v4  ;;  %v6363_v21 = vand.u32 2147483647, %v14855_v29 }
 0x88e   : > { %v9939_v32 = vpop.eup %9938  ;;  %v7063_v33 = vadd.f32 1.0, %v9937_v3  ;;  %7996 = vrot.lane.b32.xlu0 %v7572_v5, %s10315_s25  ;;  %v6357_v1 = vmul.f32 %v14892_v4, %v6356_v54  ;;  %v6365_v62 = vand.u32 2147483648, %v14855_v29  ;;  %9946 = vpow2.f32 %v6981_v60 }
 0x88f   : > { %vm6359_vm9 = vweird.f32 %v14855_v29  ;;  %v7444_v15 = vmul.f32 %v14842_v51, %v16680_v63  ;;  %v7971_v24 = vpop.permute.xlu1 %7970  ;;  %v5153_v61 = vmax.f32 %v5087_v12, 0.0  ;;  %v14996_v44 = vpop.f32.mrf.mxu1  ;;  %v7170_v0 = vmul.f32 0.6931472, %v9939_v32  ;;  %v16682_v63 = vld [vmem:[#allocation63_spill] sm:$0xff] }
 0x890   : > { %9948 = vlog2.f32 %v7063_v33  ;;  %v6358_v57 = vadd.f32 %v14892_v4, %v6357_v1  ;;  %v8200_v23 = vsel %vm8172_vm6, %v16681_v45, %v7971_v24  ;;  %vm6361_vm10 = vmor %vm6359_vm9, %vm6360_vm8  ;;  %v6366_v29 = vor.u32 1.1754944e-38, %v6365_v62 }
 0x891   : > { %v15001_v16 = vpop.eup %9940  ;;  %v8265_v51 = vsel %vm8237_vm7, %v8200_v23, 0.0  ;;  %v5185_v43 = vpack.c.bf16 %v5153_v61, %v5152_v34  ;;  %v5529_v9 = vsub.f32 0.0, %v14954_v40  ;;  %vm6364_vm12 = vcmp.eq.f32.partialorder %v6363_v21, 8.507059e+37 }
 0x892   : > { %v9943_v6 = vpop.eup %9942  ;;  %v6362_v56 = vsel %vm6361_vm10, %v14892_v4, %v6358_v57  ;;  %8329 = vst [vmem:[%s13703_s15 + $0xd8] sm:$0xff] %v8265_v51  ;;  %v6809_v10 = vand.u32 2147483647, %v14954_v40  ;;  %v7367_v22 = vmul.f32 1.442695, %v14954_v40  ;;  %v6370_v47 = vmul.f32 %v14931_v30, %v14889_v55 }
 0x893   : > { %v15011_v50 = vpop.eup %9944  ;;  %v15013_v14 = vadd.f32 1.0, %v9943_v6  ;;  %v6367_v59 = vsel %vm6364_vm12, %v6366_v29, %v6362_v56  ;;  %v5639_v36 = vmul.f32 1.442695, %v5529_v9  ;;  %5413 = vmatmul.bf16.vlgmr.msrb.gmra.mxu3 %v5185_v43  ;;  %v6744_v52 = vmax.f32 %v14909_v37, 0.0 }
 0x894   : > { %v7509_v4 = vsel %vm7467_vm4, %v6367_v59, %v14925_v58  ;;  %v6873_v42 = vsub.f32 0.0, %v6809_v10  ;;  %9950 = vpow2.f32 %v7367_v22  ;;  %v9947_v34 = vpop.eup %9946  ;;  %v15023_v54 = vadd.f32 %v7170_v0, %v6742_v7  ;;  %v16683_v0 = vld [vmem:[#allocation67_spill] sm:$0xff] }
 0x895   : > { %9952 = vrcp.f32 %v15013_v14  ;;  %v7573_v12 = vsel %vm1585_vm11, %v7444_v15, %v7509_v4  ;;  %v6371_v3 = vsub.f32 1.0, %v6370_v47  ;;  %v7064_v60 = vadd.f32 1.0, %v9947_v34 }
 0x896   : > { %v9949_v5 = vpop.eup %9948  ;;  %7998 = vrot.lane.b32.xlu2 %v7573_v12, %s10315_s25  ;;  %9954 = vpow2.f32 %v5639_v36  ;;  %v6745_v58 = vmax.f32 %v14954_v40, 0.0  ;;  %v6983_v32 = vmul.f32 1.442695, %v6873_v42  ;;  %vm6375_vm13 = vweird.f32 %v14931_v30 }
 0x897   : > { %v6372_v33 = vmul.f32 %v14931_v30, %v6371_v3  ;;  %v6378_v31 = vand.u32 2147483647, %v14889_v55  ;;  %v6380_v7 = vand.u32 2147483648, %v14889_v55  ;;  %v7973_v1 = vpop.permute.xlu0 %7972  ;;  %v15034_v21 = vpop.f32.mrf.mxu1  ;;  %v7172_v62 = vmul.f32 0.6931472, %v9949_v5 }
 0x898   : > { %9956 = vlog2.f32 %v7064_v60  ;;  %v8201_v15 = vsel %vm8172_vm6, %v16682_v63, %v7973_v1  ;;  %v5530_v24 = vsub.f32 0.0, %v14996_v44  ;;  %vm6374_vm14 = vweird.f32 %v14889_v55 }
 0x899   : > { %9958 = vpow2.f32 %v6983_v32  ;;  %v6373_v61 = vadd.f32 %v14931_v30, %v6372_v33  ;;  %v7445_v57 = vmul.f32 %v14887_v38, %v16683_v0  ;;  %vm6376_vm15 = vmor %vm6374_vm14, %vm6375_vm13  ;;  %v6381_v23 = vor.u32 1.1754944e-38, %v6380_v7  ;;  %v16684_v7 = vld [vmem:[#allocation160_spill] sm:$0xff] }
 0x89a   : > { %v15043_v45 = vpop.eup %9950  ;;  %v8266_v29 = vsel %vm8237_vm7, %v8201_v15, 0.0  ;;  %v5641_v51 = vmul.f32 1.442695, %v5530_v24  ;;  %v6810_v43 = vand.u32 2147483647, %v14996_v44  ;;  %vm6379_vm0 = vcmp.eq.f32.partialorder %v6378_v31, 8.507059e+37 }
 0x89b   : > { %v15047_v9 = vpop.eup %9952  ;;  %v6377_v6 = vsel %vm6376_vm15, %v14931_v30, %v6373_v61  ;;  %8330 = vst [vmem:[%s13703_s15 + $0xe0] sm:$0xff] %v8266_v29  ;;  %v7369_v55 = vmul.f32 1.442695, %v14996_v44  ;;  %v6385_v38 = vmul.f32 %v14979_v20, %v14933_v13  ;;  %v15056_v10 = vadd.f32 %v7172_v62, %v6743_v46 }
 0x89c   : > { %v9955_v56 = vpop.eup %9954  ;;  %v6382_v22 = vsel %vm6379_vm0, %v6381_v23, %v6377_v6  ;;  %v6746_v59 = vmax.f32 %v14996_v44, 0.0  ;;  %v6874_v36 = vsub.f32 0.0, %v6810_v43  ;;  %9960 = vpow2.f32 %v5641_v51 }
 0x89d   : > { %v15059_v47 = vadd.f32 1.0, %v9955_v56  ;;  %v7510_v30 = vsel %vm7467_vm4, %v6382_v22, %v14968_v19  ;;  %v6386_v4 = vsub.f32 1.0, %v6385_v38  ;;  %9962 = vpow2.f32 %v7369_v55 }
 0x89e   : > { %v9957_v42 = vpop.eup %9956  ;;  %v7574_v34 = vsel %vm1585_vm11, %v7445_v57, %v7510_v30  ;;  %v6985_v12 = vmul.f32 1.442695, %v6874_v36  ;;  %v6395_v35 = vand.u32 2147483648, %v14933_v13  ;;  %vm6390_vm1 = vweird.f32 %v14979_v20  ;;  %v16685_v57 = vld [vmem:[#allocation72_spill] sm:$0xff] }
 0x89f   : > { %v9959_v46 = vpop.eup %9958  ;;  %9964 = vrcp.f32 %v15059_v47  ;;  %8000 = vrot.lane.b32.xlu1 %v7574_v34, %s10315_s25  ;;  %v6387_v3 = vmul.f32 %v14979_v20, %v6386_v4  ;;  %v6393_v19 = vand.u32 2147483647, %v14933_v13  ;;  %v15072_v5 = vpop.f32.mrf.mxu1  ;;  %v7174_v60 = vmul.f32 0.6931472, %v9957_v42 }
 0x8a0   : > { %v7065_v32 = vadd.f32 1.0, %v9959_v46  ;;  %9966 = vpow2.f32 %v6985_v12  ;;  %vm6389_vm5 = vweird.f32 %v14933_v13  ;;  %v6396_v31 = vor.u32 1.1754944e-38, %v6395_v35 }
 0x8a1   : > { %v6388_v33 = vadd.f32 %v14979_v20, %v6387_v3  ;;  %v7446_v1 = vmul.f32 %v14915_v41, %v16684_v7  ;;  %v5531_v62 = vsub.f32 0.0, %v15034_v21  ;;  %vm6391_vm2 = vmor %vm6389_vm5, %vm6390_vm1  ;;  %v6811_v15 = vand.u32 2147483647, %v15034_v21  ;;  %v16687_v7 = vld [vmem:[#allocation97_spill] sm:$0xff] }
 0x8a2   : > { %9968 = vlog2.f32 %v7065_v32  ;;  %v7981_v63 = vpop.permute.xlu2 %7980  ;;  %v7371_v24 = vmul.f32 1.442695, %v15034_v21  ;;  %v6400_v61 = vmul.f32 %v15011_v50, %v14974_v25  ;;  %v9961_v13 = vpop.eup %9960  ;;  %vm6394_vm8 = vcmp.eq.f32.partialorder %v6393_v19, 8.507059e+37 }
 0x8a3   : > { %v6392_v0 = vsel %vm6391_vm2, %v14979_v20, %v6388_v33  ;;  %v8205_v41 = vsel %vm8172_vm6, %v16685_v57, %v7981_v63  ;;  %v5643_v23 = vmul.f32 1.442695, %v5531_v62  ;;  %v15086_v29 = vpop.eup %9962  ;;  %v15090_v51 = vadd.f32 %v7174_v60, %v6744_v52  ;;  %v16686_v60 = vld [vmem:[#allocation155_spill] sm:$0xff] }
 0x8a4   : > { %v6397_v43 = vsel %vm6394_vm8, %v6396_v31, %v6392_v0  ;;  %v8270_v6 = vsel %vm8237_vm7, %v8205_v41, 0.0  ;;  %v6875_v55 = vsub.f32 0.0, %v6811_v15  ;;  %v6747_v56 = vmax.f32 %v15034_v21, 0.0 }
 0x8a5   : > { %v15093_v38 = vpop.eup %9964  ;;  %v7511_v20 = vsel %vm7467_vm4, %v6397_v43, %v15023_v54  ;;  %8334 = vst [vmem:[%s13703_s15 + $0x100] sm:$0xff] %v8270_v6  ;;  %9970 = vpow2.f32 %v7371_v24  ;;  %v6401_v22 = vsub.f32 1.0, %v6400_v61  ;;  %vm6405_vm9 = vweird.f32 %v15011_v50 }
 0x8a6   : > { %v9967_v36 = vpop.eup %9966  ;;  %v7575_v37 = vsel %vm1585_vm11, %v7446_v1, %v7511_v20  ;;  %9972 = vpow2.f32 %v5643_v23  ;;  %v6987_v52 = vmul.f32 1.442695, %v6875_v55  ;;  %v6408_v54 = vand.u32 2147483647, %v14974_v25 }
 0x8a7   : > { %v7066_v30 = vadd.f32 1.0, %v9967_v36  ;;  %8002 = vrot.lane.b32.xlu0 %v7575_v37, %s10315_s25  ;;  %v6402_v4 = vmul.f32 %v15011_v50, %v6401_v22  ;;  %v6410_v42 = vand.u32 2147483648, %v14974_v25  ;;  %v15107_v12 = vadd.f32 1.0, %v9961_v13 }
 0x8a8   : > { %v9969_v34 = vpop.eup %9968  ;;  %9974 = vpow2.f32 %v6987_v52  ;;  %vm6404_vm10 = vweird.f32 %v14974_v25  ;;  %v7977_v35 = vpop.permute.xlu1 %7976  ;;  %v5532_v46 = vsub.f32 0.0, %v15072_v5  ;;  %v7447_v32 = vmul.f32 %v14972_v27, %v16686_v60 }
 0x8a9   : > { %v7176_v3 = vmul.f32 0.6931472, %v9969_v34  ;;  %9976 = vlog2.f32 %v7066_v30  ;;  %v6403_v19 = vadd.f32 %v15011_v50, %v6402_v4  ;;  %v15114_v33 = vpop.f32.mrf.mxu1  ;;  %vm6406_vm12 = vmor %vm6404_vm10, %vm6405_vm9  ;;  %v6411_v31 = vor.u32 1.1754944e-38, %v6410_v42 }
 0x8aa   : > { %v8203_v25 = vsel %vm8172_vm6, %v16687_v7, %v7977_v35  ;;  %v5645_v1 = vmul.f32 1.442695, %v5532_v46  ;;  %v6812_v62 = vand.u32 2147483647, %v15072_v5  ;;  %vm6409_vm13 = vcmp.eq.f32.partialorder %v6408_v54, 8.507059e+37 }
 0x8ab   : > { %v15121_v63 = vpop.eup %9970  ;;  %v6407_v15 = vsel %vm6406_vm12, %v15011_v50, %v6403_v19  ;;  %v8268_v24 = vsel %vm8237_vm7, %v8203_v25, 0.0  ;;  %v7373_v27 = vmul.f32 1.442695, %v15072_v5  ;;  %v6415_v57 = vmul.f32 %v15047_v9, %v15013_v14 }
 0x8ac   : > { %v9973_v61 = vpop.eup %9972  ;;  %v6412_v13 = vsel %vm6409_vm13, %v6411_v31, %v6407_v15  ;;  %8332 = vst [vmem:[%s13703_s15 + $0xf0] sm:$0xff] %v8268_v24  ;;  %9978 = vpow2.f32 %v5645_v1  ;;  %v6876_v0 = vsub.f32 0.0, %v6812_v62  ;;  %v6748_v23 = vmax.f32 %v15072_v5, 0.0  ;;  %v16691_v31 = vld [vmem:[#allocation100_spill] sm:$0xff] }
 0x8ad   : > { %9980 = vrcp.f32 %v15107_v12  ;;  %v15130_v41 = vadd.f32 1.0, %v9973_v61  ;;  %v7512_v50 = vsel %vm7467_vm4, %v6412_v13, %v15056_v10  ;;  %v6416_v20 = vsub.f32 1.0, %v6415_v57 }
 0x8ae   : > { %v9975_v43 = vpop.eup %9974  ;;  %v7576_v6 = vsel %vm1585_vm11, %v7447_v32, %v7512_v50  ;;  %v6989_v55 = vmul.f32 1.442695, %v6876_v0  ;;  %9982 = vpow2.f32 %v7373_v27  ;;  %v6423_v37 = vand.u32 2147483647, %v15013_v14 }
 0x8af   : > { %v9977_v22 = vpop.eup %9976  ;;  %9984 = vrcp.f32 %v15130_v41  ;;  %v7067_v36 = vadd.f32 1.0, %v9975_v43  ;;  %8004 = vrot.lane.b32.xlu2 %v7576_v6, %s10315_s25  ;;  %v6425_v52 = vand.u32 2147483648, %v15013_v14  ;;  %v15144_v10 = vadd.f32 %v7176_v3, %v6745_v58  ;;  %v16690_v58 = vld [vmem:[#allocation164_spill] sm:$0xff] }
 0x8b0   : > { %9986 = vpow2.f32 %v6989_v55  ;;  %v6417_v30 = vmul.f32 %v15047_v9, %v6416_v20  ;;  %vm6420_vm14 = vweird.f32 %v15047_v9  ;;  %v7178_v4 = vmul.f32 0.6931472, %v9977_v22 }
 0x8b1   : > { %9988 = vlog2.f32 %v7067_v36  ;;  %vm6419_vm15 = vweird.f32 %v15013_v14  ;;  %v5533_v54 = vsub.f32 0.0, %v15114_v33  ;;  %v15150_v42 = vpop.f32.mrf.mxu1  ;;  %vm15153_vm0 = vcmp.eq.f32.partialorder %v6423_v37, 8.507059e+37 }
 0x8b2   : > { %v9979_v34 = vpop.eup %9978  ;;  %v6418_v35 = vadd.f32 %v15047_v9, %v6417_v30  ;;  %v7448_v46 = vmul.f32 %v15001_v16, %v16690_v58  ;;  %v7979_v3 = vpop.permute.xlu0 %7978  ;;  %v6813_v19 = vand.u32 2147483647, %v15114_v33  ;;  %vm6421_vm1 = vmor %vm6419_vm15, %vm6420_vm14  ;;  %v6426_v32 = vor.u32 1.1754944e-38, %v6425_v52 }
 0x8b3   : > { %v15160_v60 = vpop.eup %9980  ;;  %v15162_v14 = vadd.f32 1.0, %v9979_v34  ;;  %v8204_v7 = vsel %vm8172_vm6, %v16691_v31, %v7979_v3  ;;  %v5647_v25 = vmul.f32 1.442695, %v5533_v54  ;;  %v6430_v24 = vmul.f32 %v15093_v38, %v15059_v47 }
 0x8b4   : > { %v15166_v1 = vpop.eup %9982  ;;  %v6422_v62 = vsel %vm6421_vm1, %v15047_v9, %v6418_v35  ;;  %v8269_v16 = vsel %vm8237_vm7, %v8204_v7, 0.0  ;;  %v6877_v15 = vsub.f32 0.0, %v6813_v19  ;;  %v15176_v61 = vadd.f32 %v7178_v4, %v6746_v59 }
 0x8b5   : > { %v15172_v27 = vpop.eup %9984  ;;  %9990 = vrcp.f32 %v15162_v14  ;;  %v6427_v13 = vsel %vm15153_vm0, %v6426_v32, %v6422_v62  ;;  %8333 = vst [vmem:[%s13703_s15 + $0xf8] sm:$0xff] %v8269_v16  ;;  %v7375_v9 = vmul.f32 1.442695, %v15114_v33  ;;  %v6431_v43 = vsub.f32 1.0, %v6430_v24  ;;  %v16694_v16 = vld [vmem:[#allocation70_spill] sm:$0xff] }
 0x8b6   : > { %v9987_v0 = vpop.eup %9986  ;;  %v7513_v57 = vsel %vm7467_vm4, %v6427_v13, %v15090_v51  ;;  %9992 = vpow2.f32 %v5647_v25  ;;  %v6991_v50 = vmul.f32 1.442695, %v6877_v15  ;;  %vm6435_vm5 = vweird.f32 %v15093_v38 }
 0x8b7   : > { %v9989_v6 = vpop.eup %9988  ;;  %v7068_v44 = vadd.f32 1.0, %v9987_v0  ;;  %v7577_v59 = vsel %vm1585_vm11, %v7448_v46, %v7513_v57  ;;  %v6438_v55 = vand.u32 2147483647, %v15059_v47  ;;  %v6432_v22 = vmul.f32 %v15093_v38, %v6431_v43 }
 0x8b8   : > { %v7180_v20 = vmul.f32 0.6931472, %v9989_v6  ;;  %8006 = vrot.lane.b32.xlu1 %v7577_v59, %s10315_s25  ;;  %9994 = vpow2.f32 %v6991_v50  ;;  %v6440_v51 = vand.u32 2147483648, %v15059_v47  ;;  %v6749_v36 = vmax.f32 %v15114_v33, 0.0 }
 0x8b9   : > { %9996 = vlog2.f32 %v7068_v44  ;;  %vm6434_vm2 = vweird.f32 %v15059_v47  ;;  %v5534_v37 = vsub.f32 0.0, %v15150_v42  ;;  %v6433_v52 = vadd.f32 %v15093_v38, %v6432_v22 }
 0x8ba   : > { %9998 = vpow2.f32 %v7375_v9  ;;  %vm15197_vm8 = vcmp.eq.f32.partialorder %v6438_v55, 8.507059e+37  ;;  %v6441_v4 = vor.u32 1.1754944e-38, %v6440_v51  ;;  %v15201_v54 = vpop.f32.mrf.mxu1  ;;  %vm6436_vm9 = vmor %vm6434_vm2, %vm6435_vm5  ;;  %v6814_v47 = vand.u32 2147483647, %v15150_v42 }
 0x8bb   : > { %v15203_v34 = vpop.eup %9990  ;;  %v5649_v35 = vmul.f32 1.442695, %v5534_v37  ;;  %v7377_v40 = vmul.f32 1.442695, %v15150_v42  ;;  %v6445_v58 = vmul.f32 %v15160_v60, %v15107_v12  ;;  %v15213_v3 = vadd.f32 %v7180_v20, %v6747_v56 }
 0x8bc   : > { %v9993_v46 = vpop.eup %9992  ;;  %v6437_v19 = vsel %vm6436_vm9, %v15093_v38, %v6433_v52  ;;  %v7449_v32 = vmul.f32 %v15043_v45, %v16511_v39  ;;  %v7987_v31 = vpop.permute.xlu2 %7986  ;;  %v6750_v7 = vmax.f32 %v15150_v42, 0.0  ;;  %v6878_v39 = vsub.f32 0.0, %v6814_v47  ;;  %v16697_v52 = vld [vmem:[#allocation99_spill] sm:$0xff] }
 0x8bd   : > { %v15219_v25 = vadd.f32 1.0, %v9993_v46  ;;  %v6442_v62 = vsel %vm15197_vm8, %v6441_v4, %v6437_v19  ;;  %v8208_v15 = vsel %vm8172_vm6, %v16694_v16, %v7987_v31  ;;  %10000 = vpow2.f32 %v5649_v35 }
 0x8be   : > { %v9995_v21 = vpop.eup %9994  ;;  %v7514_v38 = vsel %vm7467_vm4, %v6442_v62, %v15144_v10  ;;  %v8273_v56 = vsel %vm8237_vm7, %v8208_v15, 0.0  ;;  %v6453_v45 = vand.u32 2147483647, %v15107_v12  ;;  %10002 = vpow2.f32 %v7377_v40 }
 0x8bf   : > { %v9997_v24 = vpop.eup %9996  ;;  %v7069_v13 = vadd.f32 1.0, %v9995_v21  ;;  %v7578_v9 = vsel %vm1585_vm11, %v7449_v32, %v7514_v38  ;;  %8337 = vst [vmem:[%s13703_s15 + $0x118] sm:$0xff] %v8273_v56  ;;  %v6446_v0 = vsub.f32 1.0, %v6445_v58  ;;  %10004 = vrcp.f32 %v15219_v25 }
 0x8c0   : > { %v15233_v57 = vpop.eup %9998  ;;  %8008 = vrot.lane.b32.xlu0 %v7578_v9, %s10315_s25  ;;  %v6993_v10 = vmul.f32 1.442695, %v6878_v39  ;;  %vm6449_vm10 = vweird.f32 %v15107_v12  ;;  %v6455_v50 = vand.u32 2147483648, %v15107_v12  ;;  %vm6450_vm12 = vweird.f32 %v15160_v60 }
 0x8c1   : > { %10006 = vlog2.f32 %v7069_v13  ;;  %v6447_v43 = vmul.f32 %v15160_v60, %v6446_v0  ;;  %v5535_v6 = vsub.f32 0.0, %v15201_v54  ;;  %v7182_v44 = vmul.f32 0.6931472, %v9997_v24  ;;  %vm6451_vm14 = vmor %vm6449_vm10, %vm6450_vm12 }
 0x8c2   : > { %10008 = vpow2.f32 %v6993_v10  ;;  %vm15242_vm13 = vcmp.eq.f32.partialorder %v6453_v45, 8.507059e+37  ;;  %v6456_v55 = vor.u32 1.1754944e-38, %v6455_v50  ;;  %v7983_v20 = vpop.permute.xlu1 %7982  ;;  %v15246_v22 = vpop.f32.mrf.mxu1  ;;  %v6815_v35 = vand.u32 2147483647, %v15201_v54 }
 0x8c3   : > { %v10001_v51 = vpop.eup %10000  ;;  %v6448_v37 = vadd.f32 %v15160_v60, %v6447_v43  ;;  %v8206_v30 = vsel %vm8172_vm6, %v16697_v52, %v7983_v20  ;;  %v5651_v4 = vmul.f32 1.442695, %v5535_v6  ;;  %v7379_v58 = vmul.f32 1.442695, %v15201_v54 }
 0x8c4   : > { %v15252_v47 = vadd.f32 1.0, %v10001_v51  ;;  %v8271_v40 = vsel %vm8237_vm7, %v8206_v30, 0.0  ;;  %v6460_v46 = vmul.f32 %v15172_v27, %v15130_v41  ;;  %v15260_v19 = vpop.eup %10002  ;;  %v7450_v31 = vmul.f32 %v15086_v29, %v16512_v2 }
 0x8c5   : > { %v6452_v32 = vsel %vm6451_vm14, %v15160_v60, %v6448_v37  ;;  %8335 = vst [vmem:[%s13703_s15 + $0x108] sm:$0xff] %v8271_v40  ;;  %10010 = vpow2.f32 %v5651_v4  ;;  %v6879_v62 = vsub.f32 0.0, %v6815_v35  ;;  %v15266_v16 = vpop.eup %10004  ;;  %v15270_v12 = vadd.f32 %v7182_v44, %v6748_v23  ;;  %v16700_v37 = vld [vmem:[#allocation101_spill] sm:$0xff] }
 0x8c6   : > { %10012 = vrcp.f32 %v15252_v47  ;;  %v6457_v15 = vsel %vm15242_vm13, %v6456_v55, %v6452_v32  ;;  %v6461_v21 = vsub.f32 1.0, %v6460_v46  ;;  %vm6465_vm15 = vweird.f32 %v15172_v27 }
 0x8c7   : > { %v10007_v38 = vpop.eup %10006  ;;  %v7515_v2 = vsel %vm7467_vm4, %v6457_v15, %v15176_v61  ;;  %v6995_v29 = vmul.f32 1.442695, %v6879_v62  ;;  %v6468_v60 = vand.u32 2147483647, %v15130_v41  ;;  %10014 = vpow2.f32 %v7379_v58 }
 0x8c8   : > { %v10009_v56 = vpop.eup %10008  ;;  %v7579_v5 = vsel %vm1585_vm11, %v7450_v31, %v7515_v2  ;;  %v6462_v23 = vmul.f32 %v15172_v27, %v6461_v21  ;;  %v6470_v39 = vand.u32 2147483648, %v15130_v41  ;;  %v7184_v45 = vmul.f32 0.6931472, %v10007_v38 }
 0x8c9   : > { %v7070_v24 = vadd.f32 1.0, %v10009_v56  ;;  %8010 = vrot.lane.b32.xlu2 %v7579_v5, %s10315_s25  ;;  %10016 = vpow2.f32 %v6995_v29  ;;  %vm6464_vm0 = vweird.f32 %v15130_v41  ;;  %vm15287_vm1 = vcmp.eq.f32.partialorder %v6468_v60, 8.507059e+37 }
 0x8ca   : > { %v6463_v61 = vadd.f32 %v15172_v27, %v6462_v23  ;;  %v7451_v9 = vmul.f32 %v15121_v63, %v16514_v26  ;;  %v5536_v0 = vsub.f32 0.0, %v15246_v22  ;;  %vm6466_vm5 = vmor %vm6464_vm0, %vm6465_vm15  ;;  %v6471_v50 = vor.u32 1.1754944e-38, %v6470_v39  ;;  %v16701_v39 = vld [vmem:[#allocation165_spill] sm:$0xff] }
 0x8cb   : > { %v10011_v10 = vpop.eup %10010  ;;  %10018 = vlog2.f32 %v7070_v24  ;;  %v6816_v43 = vand.u32 2147483647, %v15246_v22  ;;  %v7381_v41 = vmul.f32 1.442695, %v15246_v22  ;;  %v15298_v6 = vpop.f32.mrf.mxu1  ;;  %v6475_v20 = vmul.f32 %v15203_v34, %v15162_v14 }
 0x8cc   : > { %v15300_v44 = vpop.eup %10012  ;;  %v15302_v59 = vadd.f32 1.0, %v10011_v10  ;;  %v6467_v26 = vsel %vm6466_vm5, %v15172_v27, %v6463_v61  ;;  %v7985_v63 = vpop.permute.xlu0 %7984  ;;  %v5653_v55 = vmul.f32 1.442695, %v5536_v0  ;;  %v6751_v46 = vmax.f32 %v15201_v54, 0.0 }
 0x8cd   : > { %v6472_v51 = vsel %vm15287_vm1, %v6471_v50, %v6467_v26  ;;  %v8207_v52 = vsel %vm8172_vm6, %v16700_v37, %v7985_v63  ;;  %v6880_v30 = vsub.f32 0.0, %v6816_v43  ;;  %10020 = vpow2.f32 %v7381_v41  ;;  %v15311_v4 = vpop.eup %10014 }
 0x8ce   : > { %10022 = vrcp.f32 %v15302_v59  ;;  %v7516_v27 = vsel %vm7467_vm4, %v6472_v51, %v15213_v3  ;;  %v8272_v35 = vsel %vm8237_vm7, %v8207_v52, 0.0  ;;  %v6476_v40 = vsub.f32 1.0, %v6475_v20 }
 0x8cf   : > { %v10017_v58 = vpop.eup %10016  ;;  %v7580_v32 = vsel %vm1585_vm11, %v7451_v9, %v7516_v27  ;;  %8336 = vst [vmem:[%s13703_s15 + $0x110] sm:$0xff] %v8272_v35  ;;  %10024 = vpow2.f32 %v5653_v55  ;;  %v6997_v31 = vmul.f32 1.442695, %v6880_v30  ;;  %vm6480_vm2 = vweird.f32 %v15203_v34  ;;  %v16702_v27 = vld [vmem:[#allocation76_spill] sm:$0xff] }
 0x8d0   : > { %v7071_v62 = vadd.f32 1.0, %v10017_v58  ;;  %8012 = vrot.lane.b32.xlu1 %v7580_v32, %s10315_s25  ;;  %v6477_v15 = vmul.f32 %v15203_v34, %v6476_v40  ;;  %v6483_v3 = vand.u32 2147483647, %v15162_v14  ;;  %v15328_v38 = vadd.f32 %v7184_v45, %v6749_v36 }
 0x8d1   : > { %v10019_v21 = vpop.eup %10018  ;;  %10026 = vpow2.f32 %v6997_v31  ;;  %v6485_v2 = vand.u32 2147483648, %v15162_v14  ;;  %v5537_v29 = vsub.f32 0.0, %v15298_v6  ;;  %v6752_v60 = vmax.f32 %v15246_v22, 0.0 }
 0x8d2   : > { %10028 = vlog2.f32 %v7071_v62  ;;  %v6478_v56 = vadd.f32 %v15203_v34, %v6477_v15  ;;  %vm6479_vm8 = vweird.f32 %v15162_v14  ;;  %v7452_v33 = vmul.f32 %v15166_v1, %v16701_v39 }
 0x8d3   : > { %v15335_v5 = vpop.eup %10020  ;;  %vm6481_vm9 = vmor %vm6479_vm8, %vm6480_vm2  ;;  %v6486_v23 = vor.u32 1.1754944e-38, %v6485_v2  ;;  %v5655_v36 = vmul.f32 1.442695, %v5537_v29  ;;  %v6817_v45 = vand.u32 2147483647, %v15298_v6  ;;  %vm6484_vm10 = vcmp.eq.f32.partialorder %v6483_v3, 8.507059e+37  ;;  %v15346_v9 = vpop.f32.mrf.mxu1 }
 0x8d4   : > { %v15340_v24 = vpop.eup %10022  ;;  %v6482_v61 = vsel %vm6481_vm9, %v15203_v34, %v6478_v56  ;;  %v7383_v13 = vmul.f32 1.442695, %v15298_v6  ;;  %v6490_v14 = vmul.f32 %v15266_v16, %v15219_v25  ;;  %v7186_v10 = vmul.f32 0.6931472, %v10019_v21 }
 0x8d5   : > { %v10025_v0 = vpop.eup %10024  ;;  %v6487_v50 = vsel %vm6484_vm10, %v6486_v23, %v6482_v61  ;;  %10030 = vpow2.f32 %v5655_v36  ;;  %v6881_v1 = vsub.f32 0.0, %v6817_v45  ;;  %v6753_v34 = vmax.f32 %v15298_v6, 0.0 }
 0x8d6   : > { %v15348_v43 = vadd.f32 1.0, %v10025_v0  ;;  %v7517_v41 = vsel %vm7467_vm4, %v6487_v50, %v15270_v12  ;;  %v6491_v26 = vsub.f32 1.0, %v6490_v14  ;;  %10032 = vpow2.f32 %v7383_v13 }
 0x8d7   : > { %v10027_v63 = vpop.eup %10026  ;;  %v7581_v55 = vsel %vm1585_vm11, %v7452_v33, %v7517_v41  ;;  %v7993_v20 = vpop.permute.xlu2 %7992  ;;  %v6999_v51 = vmul.f32 1.442695, %v6881_v1  ;;  %v6498_v37 = vand.u32 2147483647, %v15219_v25  ;;  %vm6495_vm12 = vweird.f32 %v15266_v16  ;;  %v16705_v33 = vld [vmem:[#allocation68_spill] sm:$0xff] }
 0x8d8   : > { %v10029_v52 = vpop.eup %10028  ;;  %v7072_v30 = vadd.f32 1.0, %v10027_v63  ;;  %8014 = vrot.lane.b32.xlu0 %v7581_v55, %s10315_s25  ;;  %v8211_v12 = vsel %vm8172_vm6, %v16702_v27, %v7993_v20  ;;  %v6492_v35 = vmul.f32 %v15266_v16, %v6491_v26  ;;  %v15364_v40 = vadd.f32 %v7186_v10, %v6750_v7  ;;  %v16706_v27 = vld [vmem:[#allocation31_spill] sm:$0xff] }
 0x8d9   : > { %v8276_v58 = vsel %vm8237_vm7, %v8211_v12, 0.0  ;;  %10034 = vpow2.f32 %v6999_v51  ;;  %vm6494_vm13 = vweird.f32 %v15219_v25  ;;  %v7188_v32 = vmul.f32 0.6931472, %v10029_v52 }
 0x8da   : > { %10036 = vlog2.f32 %v7072_v30  ;;  %8340 = vst [vmem:[%s13703_s15 + $0x130] sm:$0xff] %v8276_v58  ;;  %v6493_v31 = vadd.f32 %v15266_v16, %v6492_v35  ;;  %v6500_v62 = vand.u32 2147483648, %v15219_v25  ;;  %vm15372_vm14 = vmor %vm6494_vm13, %vm6495_vm12  ;;  %vm6499_vm15 = vcmp.eq.f32.partialorder %v6498_v37, 8.507059e+37 }
 0x8db   : > { %v10031_v15 = vpop.eup %10030  ;;  %10038 = vrcp.f32 %v15348_v43  ;;  %v5538_v42 = vsub.f32 0.0, %v15346_v9  ;;  %v6818_v7 = vand.u32 2147483647, %v15346_v9  ;;  %v7453_v29 = vmul.f32 %v15233_v57, %v16515_v8 }
 0x8dc   : > { %v15378_v21 = vadd.f32 1.0, %v10031_v15  ;;  %v6497_v2 = vsel %vm15372_vm14, %v15266_v16, %v6493_v31  ;;  %v6501_v25 = vor.u32 1.1754944e-38, %v6500_v62  ;;  %v7989_v56 = vpop.permute.xlu1 %7988  ;;  %v15385_v23 = vpop.eup %10032  ;;  %v6505_v13 = vmul.f32 %v15300_v44, %v15252_v47 }
 0x8dd   : > { %v8209_v36 = vsel %vm8172_vm6, %v16705_v33, %v7989_v56  ;;  %v5657_v45 = vmul.f32 1.442695, %v5538_v42  ;;  %v6882_v61 = vsub.f32 0.0, %v6818_v7  ;;  %v15393_v14 = vadd.f32 %v7188_v32, %v6751_v46 }
 0x8de   : > { %v6502_v16 = vsel %vm6499_vm15, %v6501_v25, %v6497_v2  ;;  %v8274_v0 = vsel %vm8237_vm7, %v8209_v36, 0.0  ;;  %v7385_v8 = vmul.f32 1.442695, %v15346_v9  ;;  %v15397_v57 = vpop.f32.mrf.mxu1  ;;  %v6506_v41 = vsub.f32 1.0, %v6505_v13  ;;  %v16707_v25 = vld [vmem:[#allocation74_spill] sm:$0xff] }
 0x8df   : > { %v10035_v10 = vpop.eup %10034  ;;  %v7518_v50 = vsel %vm7467_vm4, %v6502_v16, %v15328_v38  ;;  %8338 = vst [vmem:[%s13703_s15 + $0x120] sm:$0xff] %v8274_v0  ;;  %10040 = vpow2.f32 %v5657_v45  ;;  %v7001_v1 = vmul.f32 1.442695, %v6882_v61  ;;  %vm6510_vm0 = vweird.f32 %v15300_v44 }
 0x8e0   : > { %v10037_v26 = vpop.eup %10036  ;;  %10042 = vrcp.f32 %v15378_v21  ;;  %v7073_v54 = vadd.f32 1.0, %v10035_v10  ;;  %v7582_v46 = vsel %vm1585_vm11, %v7453_v29, %v7518_v50  ;;  %v6507_v38 = vmul.f32 %v15300_v44, %v6506_v41 }
 0x8e1   : > { %v15407_v63 = vpop.eup %10038  ;;  %v7190_v55 = vmul.f32 0.6931472, %v10037_v26  ;;  %8016 = vrot.lane.b32.xlu2 %v7582_v46, %s10315_s25  ;;  %10044 = vpow2.f32 %v7001_v1  ;;  %v6513_v20 = vand.u32 2147483647, %v15252_v47  ;;  %v6754_v51 = vmax.f32 %v15346_v9, 0.0 }
 0x8e2   : > { %10046 = vlog2.f32 %v7073_v54  ;;  %v6515_v37 = vand.u32 2147483648, %v15252_v47  ;;  %v5539_v52 = vsub.f32 0.0, %v15397_v57  ;;  %v6508_v30 = vadd.f32 %v15300_v44, %v6507_v38 }
 0x8e3   : > { %10048 = vpow2.f32 %v7385_v8  ;;  %vm6509_vm1 = vweird.f32 %v15252_v47  ;;  %v7454_v12 = vmul.f32 %v15260_v19, %v16706_v27  ;;  %v6819_v32 = vand.u32 2147483647, %v15397_v57 }
 0x8e4   : > { %vm6511_vm5 = vmor %vm6509_vm1, %vm6510_vm0  ;;  %v6516_v35 = vor.u32 1.1754944e-38, %v6515_v37  ;;  %v5659_v58 = vmul.f32 1.442695, %v5539_v52  ;;  %v6520_v31 = vmul.f32 %v15340_v24, %v15302_v59  ;;  %v15426_v15 = vadd.f32 %v7190_v55, %v6752_v60 }
 0x8e5   : > { %v10041_v62 = vpop.eup %10040  ;;  %v6512_v47 = vsel %vm6511_vm5, %v15300_v44, %v6508_v30  ;;  %vm6514_vm2 = vcmp.eq.f32.partialorder %v6513_v20, 8.507059e+37  ;;  %v7991_v3 = vpop.permute.xlu0 %7990  ;;  %v7387_v19 = vmul.f32 1.442695, %v15397_v57  ;;  %v6883_v33 = vsub.f32 0.0, %v6819_v32 }
 0x8e6   : > { %v15430_v42 = vpop.eup %10042  ;;  %v15432_v7 = vadd.f32 1.0, %v10041_v62  ;;  %v6517_v2 = vsel %vm6514_vm2, %v6516_v35, %v6512_v47  ;;  %v8210_v29 = vsel %vm8172_vm6, %v16707_v25, %v7991_v3  ;;  %10050 = vpow2.f32 %v5659_v58  ;;  %v15436_v56 = vpop.f32.mrf.mxu1 }
 0x8e7   : > { %v10045_v22 = vpop.eup %10044  ;;  %v7519_v44 = vsel %vm7467_vm4, %v6517_v2, %v15364_v40  ;;  %v8275_v60 = vsel %vm8237_vm7, %v8210_v29, 0.0  ;;  %vm6525_vm8 = vweird.f32 %v15340_v24  ;;  %10052 = vpow2.f32 %v7387_v19  ;;  %v16708_v29 = vld [vmem:[#allocation14_spill] sm:$0xff] }
 0x8e8   : > { %v10047_v36 = vpop.eup %10046  ;;  %v7074_v45 = vadd.f32 1.0, %v10045_v22  ;;  %v7583_v61 = vsel %vm1585_vm11, %v7454_v12, %v7519_v44  ;;  %8339 = vst [vmem:[%s13703_s15 + $0x128] sm:$0xff] %v8275_v60  ;;  %v6521_v13 = vsub.f32 1.0, %v6520_v31  ;;  %10054 = vrcp.f32 %v15432_v7 }
 0x8e9   : > { %v15446_v16 = vpop.eup %10048  ;;  %v7192_v0 = vmul.f32 0.6931472, %v10047_v36  ;;  %8018 = vrot.lane.b32.xlu1 %v7583_v61, %s10315_s25  ;;  %v7003_v40 = vmul.f32 1.442695, %v6883_v33  ;;  %v6528_v8 = vand.u32 2147483647, %v15302_v59  ;;  %vm6524_vm9 = vweird.f32 %v15302_v59 }
 0x8ea   : > { %10056 = vlog2.f32 %v7074_v45  ;;  %v6522_v10 = vmul.f32 %v15340_v24, %v6521_v13  ;;  %v6530_v50 = vand.u32 2147483648, %v15302_v59  ;;  %v5540_v1 = vsub.f32 0.0, %v15436_v56  ;;  %vm6526_vm10 = vmor %vm6524_vm9, %vm6525_vm8 }
 0x8eb   : > { %v6755_v41 = vmax.f32 %v15397_v57, 0.0  ;;  %10058 = vpow2.f32 %v7003_v40  ;;  %v7455_v26 = vmul.f32 %v15311_v4, %v16518_v49  ;;  %v15460_v46 = vadd.f32 %v7192_v0, %v6753_v34 }
 0x8ec   : > { %v10051_v54 = vpop.eup %10050  ;;  %v6523_v55 = vadd.f32 %v15340_v24, %v6522_v10  ;;  %v5661_v38 = vmul.f32 1.442695, %v5540_v1  ;;  %v6820_v20 = vand.u32 2147483647, %v15436_v56  ;;  %vm6529_vm12 = vcmp.eq.f32.partialorder %v6528_v8, 8.507059e+37 }
 0x8ed   : > { %v15464_v37 = vadd.f32 1.0, %v10051_v54  ;;  %v6531_v59 = vor.u32 1.1754944e-38, %v6530_v50  ;;  %v6535_v49 = vmul.f32 %v15407_v63, %v15348_v43  ;;  %v15470_v4 = vpop.eup %10052  ;;  %v7389_v52 = vmul.f32 1.442695, %v15436_v56 }
 0x8ee   : > { %v6527_v6 = vsel %vm6526_vm10, %v15340_v24, %v6523_v55  ;;  %10060 = vpow2.f32 %v5661_v38  ;;  %v6884_v34 = vsub.f32 0.0, %v6820_v20  ;;  %v15474_v30 = vpop.eup %10054  ;;  %vm6540_vm13 = vweird.f32 %v15407_v63 }
 0x8ef   : > { %v6532_v12 = vsel %vm6529_vm12, %v6531_v59, %v6527_v6  ;;  %v6536_v35 = vsub.f32 1.0, %v6535_v49  ;;  %v6543_v58 = vand.u32 2147483647, %v15348_v43  ;;  %v15478_v32 = vpop.f32.mrf.mxu1  ;;  %10062 = vrcp.f32 %v15464_v37 }
 0x8f0   : > { %v10057_v31 = vpop.eup %10056  ;;  %v7520_v24 = vsel %vm7467_vm4, %v6532_v12, %v15393_v14  ;;  %v7999_v62 = vpop.permute.xlu2 %7998  ;;  %v7005_v47 = vmul.f32 1.442695, %v6884_v34  ;;  %v6545_v3 = vand.u32 2147483648, %v15348_v43  ;;  %v6756_v14 = vmax.f32 %v15436_v56, 0.0 }
 0x8f1   : > { %v10059_v19 = vpop.eup %10058  ;;  %v7194_v2 = vmul.f32 0.6931472, %v10057_v31  ;;  %v7584_v25 = vsel %vm1585_vm11, %v7455_v26, %v7520_v24  ;;  %v8214_v22 = vsel %vm8172_vm6, %v16708_v29, %v7999_v62  ;;  %v6537_v44 = vmul.f32 %v15407_v63, %v6536_v35  ;;  %v16709_v26 = vld [vmem:[#allocation163_spill] sm:$0xff] }
 0x8f2   : > { %v7075_v60 = vadd.f32 1.0, %v10059_v19  ;;  %8020 = vrot.lane.b32.xlu0 %v7584_v25, %s10315_s25  ;;  %v8279_v33 = vsel %vm8237_vm7, %v8214_v22, 0.0  ;;  %10064 = vpow2.f32 %v7005_v47  ;;  %vm6539_vm14 = vweird.f32 %v15348_v43 }
 0x8f3   : > { %8343 = vst [vmem:[%s13703_s15 + $0x148] sm:$0xff] %v8279_v33  ;;  %10066 = vpow2.f32 %v7389_v52  ;;  %v6538_v36 = vadd.f32 %v15407_v63, %v6537_v44  ;;  %vm6544_vm15 = vcmp.eq.f32.partialorder %v6543_v58, 8.507059e+37  ;;  %vm6541_vm0 = vmor %vm6539_vm14, %vm6540_vm13  ;;  %v6546_v61 = vor.u32 1.1754944e-38, %v6545_v3 }
 0x8f4   : > { %v10061_v45 = vpop.eup %10060  ;;  %10068 = vlog2.f32 %v7075_v60  ;;  %v5541_v13 = vsub.f32 0.0, %v15478_v32  ;;  %v6821_v0 = vand.u32 2147483647, %v15478_v32  ;;  %v15502_v40 = vadd.f32 %v7194_v2, %v6754_v51 }
 0x8f5   : > { %v15504_v8 = vadd.f32 1.0, %v10061_v45  ;;  %v6542_v10 = vsel %vm6541_vm0, %v15407_v63, %v6538_v36  ;;  %v6550_v43 = vmul.f32 %v15430_v42, %v15378_v21  ;;  %v15509_v50 = vpop.eup %10062  ;;  %v7456_v54 = vmul.f32 %v15335_v5, %v16709_v26  ;;  %v16710_v5 = vld [vmem:[#allocation78_spill] sm:$0xff]  ;;  %v16711_v45 = vld [vmem:[#allocation13_spill] sm:$0xff] }
 0x8f6   : > { %v6547_v1 = vsel %vm6544_vm15, %v6546_v61, %v6542_v10  ;;  %v5663_v55 = vmul.f32 1.442695, %v5541_v13  ;;  %v6885_v38 = vsub.f32 0.0, %v6821_v0  ;;  %v7391_v63 = vmul.f32 1.442695, %v15478_v32 }
 0x8f7   : > { %10070 = vrcp.f32 %v15504_v8  ;;  %v7521_v9 = vsel %vm7467_vm4, %v6547_v1, %v15426_v15  ;;  %v7995_v51 = vpop.permute.xlu1 %7994  ;;  %v6551_v20 = vsub.f32 1.0, %v6550_v43  ;;  %v15518_v59 = vpop.f32.mrf.mxu1  ;;  %vm6555_vm1 = vweird.f32 %v15430_v42 }
 0x8f8   : > { %v10065_v49 = vpop.eup %10064  ;;  %v7585_v6 = vsel %vm1585_vm11, %v7456_v54, %v7521_v9  ;;  %v8212_v34 = vsel %vm8172_vm6, %v16710_v5, %v7995_v51  ;;  %10072 = vpow2.f32 %v5663_v55  ;;  %v7007_v52 = vmul.f32 1.442695, %v6885_v38 }
 0x8f9   : > { %v15524_v12 = vpop.eup %10066  ;;  %v7076_v35 = vadd.f32 1.0, %v10065_v49  ;;  %8022 = vrot.lane.b32.xlu2 %v7585_v6, %s10315_s25  ;;  %v8277_v15 = vsel %vm8237_vm7, %v8212_v34, 0.0  ;;  %v6552_v58 = vmul.f32 %v15430_v42, %v6551_v20  ;;  %vm6554_vm5 = vweird.f32 %v15378_v21 }
 0x8fa   : > { %v10069_v31 = vpop.eup %10068  ;;  %8341 = vst [vmem:[%s13703_s15 + $0x138] sm:$0xff] %v8277_v15  ;;  %10074 = vpow2.f32 %v7007_v52  ;;  %v6558_v24 = vand.u32 2147483647, %v15378_v21  ;;  %v6560_v62 = vand.u32 2147483648, %v15378_v21  ;;  %v5542_v19 = vsub.f32 0.0, %v15518_v59  ;;  %vm6556_vm2 = vmor %vm6554_vm5, %vm6555_vm1 }
 0x8fb   : > { %v7196_v47 = vmul.f32 0.6931472, %v10069_v31  ;;  %10076 = vlog2.f32 %v7076_v35  ;;  %v6553_v3 = vadd.f32 %v15430_v42, %v6552_v58  ;;  %v6757_v2 = vmax.f32 %v15478_v32, 0.0 }
 0x8fc   : > { %10078 = vpow2.f32 %v7391_v63  ;;  %v6561_v25 = vor.u32 1.1754944e-38, %v6560_v62  ;;  %v6822_v29 = vand.u32 2147483647, %v15518_v59  ;;  %vm6559_vm8 = vcmp.eq.f32.partialorder %v6558_v24, 8.507059e+37 }
 0x8fd   : > { %v15538_v22 = vpop.eup %10070  ;;  %v6557_v44 = vsel %vm6556_vm2, %v15430_v42, %v6553_v3  ;;  %v5665_v60 = vmul.f32 1.442695, %v5542_v19  ;;  %v7393_v21 = vmul.f32 1.442695, %v15518_v59  ;;  %v7457_v61 = vmul.f32 %v15385_v23, %v16711_v45  ;;  %v16713_v19 = vld [vmem:[#allocation167_spill] sm:$0xff] }
 0x8fe   : > { %v10073_v33 = vpop.eup %10072  ;;  %v6562_v36 = vsel %vm6559_vm8, %v6561_v25, %v6557_v44  ;;  %v6886_v13 = vsub.f32 0.0, %v6822_v29  ;;  %v6565_v0 = vmul.f32 %v15474_v30, %v15432_v7  ;;  %v15548_v10 = vadd.f32 %v7196_v47, %v6755_v41 }
 0x8ff   : > { %v7522_v42 = vsel %vm7467_vm4, %v6562_v36, %v15460_v46  ;;  %10080 = vpow2.f32 %v5665_v60  ;;  %v6758_v43 = vmax.f32 %v15518_v59, 0.0  ;;  %v15554_v1 = vpop.f32.mrf.mxu1  ;;  %v15556_v55 = vadd.f32 1.0, %v10073_v33  ;;  %v16712_v46 = vld [vmem:[#allocation103_spill] sm:$0xff] }
 0x900   : > { %v10075_v54 = vpop.eup %10074  ;;  %v7586_v23 = vsel %vm1585_vm11, %v7457_v61, %v7522_v42  ;;  %v7997_v38 = vpop.permute.xlu0 %7996  ;;  %v7009_v57 = vmul.f32 1.442695, %v6886_v13  ;;  %v6566_v41 = vsub.f32 1.0, %v6565_v0  ;;  %10082 = vpow2.f32 %v7393_v21 }
 0x901   : > { %v10077_v9 = vpop.eup %10076  ;;  %v7077_v51 = vadd.f32 1.0, %v10075_v54  ;;  %8024 = vrot.lane.b32.xlu1 %v7586_v23, %s10315_s25  ;;  %v8213_v63 = vsel %vm8172_vm6, %v16712_v46, %v7997_v38  ;;  %v6573_v20 = vand.u32 2147483647, %v15432_v7  ;;  %vm6570_vm9 = vweird.f32 %v15474_v30 }
 0x902   : > { %v15564_v49 = vpop.eup %10078  ;;  %v8278_v6 = vsel %vm8237_vm7, %v8213_v63, 0.0  ;;  %10084 = vpow2.f32 %v7009_v57  ;;  %v6567_v5 = vmul.f32 %v15474_v30, %v6566_v41  ;;  %v7198_v34 = vmul.f32 0.6931472, %v10077_v9 }
 0x903   : > { %10086 = vlog2.f32 %v7077_v51  ;;  %8342 = vst [vmem:[%s13703_s15 + $0x140] sm:$0xff] %v8278_v6  ;;  %vm6569_vm10 = vweird.f32 %v15432_v7  ;;  %v6575_v52 = vand.u32 2147483648, %v15432_v7  ;;  %vm6574_vm12 = vcmp.eq.f32.partialorder %v6573_v20, 8.507059e+37 }
 0x904   : > { %10088 = vrcp.f32 %v15556_v55  ;;  %v6568_v35 = vadd.f32 %v15474_v30, %v6567_v5  ;;  %v5543_v15 = vsub.f32 0.0, %v15554_v1  ;;  %vm6571_vm13 = vmor %vm6569_vm10, %vm6570_vm9  ;;  %v6823_v24 = vand.u32 2147483647, %v15554_v1 }
 0x905   : > { %v10081_v58 = vpop.eup %10080  ;;  %v6576_v31 = vor.u32 1.1754944e-38, %v6575_v52  ;;  %v7395_v62 = vmul.f32 1.442695, %v15554_v1  ;;  %v6580_v47 = vmul.f32 %v15509_v50, %v15464_v37  ;;  %v7458_v25 = vmul.f32 %v15446_v16, %v16713_v19 }
 0x906   : > { %v15579_v3 = vadd.f32 1.0, %v10081_v58  ;;  %v6572_v7 = vsel %vm6571_vm13, %v15474_v30, %v6568_v35  ;;  %v5667_v29 = vmul.f32 1.442695, %v5543_v15  ;;  %v15584_v44 = vpop.eup %10082  ;;  %v15588_v60 = vadd.f32 %v7198_v34, %v6756_v14  ;;  %v16715_v35 = vld [vmem:[#allocation166_spill] sm:$0xff] }
 0x907   : > { %v6577_v21 = vsel %vm6574_vm12, %v6576_v31, %v6572_v7  ;;  %v6887_v33 = vsub.f32 0.0, %v6823_v24  ;;  %v6581_v36 = vsub.f32 1.0, %v6580_v47  ;;  %v6759_v30 = vmax.f32 %v15554_v1, 0.0  ;;  %v15597_v54 = vpop.f32.mrf.mxu1 }
 0x908   : > { %v10085_v45 = vpop.eup %10084  ;;  %v7523_v61 = vsel %vm7467_vm4, %v6577_v21, %v15502_v40  ;;  %10090 = vpow2.f32 %v7395_v62  ;;  %v6588_v16 = vand.u32 2147483647, %v15464_v37  ;;  %v16714_v40 = vld [vmem:[#allocation84_spill] sm:$0xff]  ;;  %vm6585_vm14 = vweird.f32 %v15509_v50 }
 0x909   : > { %v10087_v13 = vpop.eup %10086  ;;  %v7078_v0 = vadd.f32 1.0, %v10085_v45  ;;  %v7587_v56 = vsel %vm1585_vm11, %v7458_v25, %v7523_v61  ;;  %v8005_v14 = vpop.permute.xlu2 %8004  ;;  %10092 = vpow2.f32 %v5667_v29  ;;  %v7011_v42 = vmul.f32 1.442695, %v6887_v33 }
 0x90a   : > { %v15599_v23 = vpop.eup %10088  ;;  %10094 = vrcp.f32 %v15579_v3  ;;  %8026 = vrot.lane.b32.xlu0 %v7587_v56, %s10315_s25  ;;  %v8217_v38 = vsel %vm8172_vm6, %v16714_v40, %v8005_v14  ;;  %v6582_v57 = vmul.f32 %v15509_v50, %v6581_v36  ;;  %v7200_v41 = vmul.f32 0.6931472, %v10087_v13 }
 0x90b   : > { %10096 = vlog2.f32 %v7078_v0  ;;  %v8282_v9 = vsel %vm8237_vm7, %v8217_v38, 0.0  ;;  %v6590_v51 = vand.u32 2147483648, %v15464_v37  ;;  %vm6584_vm15 = vweird.f32 %v15464_v37 }
 0x90c   : > { %8346 = vst [vmem:[%s13703_s15 + $0x160] sm:$0xff] %v8282_v9  ;;  %10098 = vpow2.f32 %v7011_v42  ;;  %v6583_v46 = vadd.f32 %v15509_v50, %v6582_v57  ;;  %v5544_v63 = vsub.f32 0.0, %v15597_v54  ;;  %vm6586_vm0 = vmor %vm6584_vm15, %vm6585_vm14  ;;  %vm6589_vm1 = vcmp.eq.f32.partialorder %v6588_v16, 8.507059e+37  ;;  %v16716_v16 = vld [vmem:[#allocation102_spill] sm:$0xff] }
 0x90d   : > { %v6591_v20 = vor.u32 1.1754944e-38, %v6590_v51  ;;  %v6824_v6 = vand.u32 2147483647, %v15597_v54  ;;  %v7397_v5 = vmul.f32 1.442695, %v15597_v54  ;;  %v7459_v15 = vmul.f32 %v15470_v4, %v16715_v35 }
 0x90e   : > { %v15615_v34 = vpop.eup %10090  ;;  %v6587_v52 = vsel %vm6586_vm0, %v15509_v50, %v6583_v46  ;;  %v5669_v58 = vmul.f32 1.442695, %v5544_v63  ;;  %v6595_v37 = vmul.f32 %v15538_v22, %v15504_v8  ;;  %v15624_v24 = vadd.f32 %v7200_v41, %v6757_v2  ;;  %v16717_v46 = vld [vmem:[#allocation37_spill] sm:$0xff] }
 0x90f   : > { %v10093_v31 = vpop.eup %10092  ;;  %v6592_v62 = vsel %vm6589_vm1, %v6591_v20, %v6587_v52  ;;  %v6888_v47 = vsub.f32 0.0, %v6824_v6  ;;  %10100 = vpow2.f32 %v7397_v5  ;;  %v6603_v33 = vand.u32 2147483647, %v15504_v8  ;;  %v16718_v52 = vld [vmem:[#allocation73_spill] sm:$0xff] }
 0x910   : > { %v15626_v7 = vpop.eup %10094  ;;  %v15628_v25 = vadd.f32 1.0, %v10093_v31  ;;  %v7524_v4 = vsel %vm7467_vm4, %v6592_v62, %v15548_v10  ;;  %10102 = vpow2.f32 %v5669_v58  ;;  %v6596_v50 = vsub.f32 1.0, %v6595_v37 }
 0x911   : > { %v10097_v29 = vpop.eup %10096  ;;  %v7588_v21 = vsel %vm1585_vm11, %v7459_v15, %v7524_v4  ;;  %v8001_v32 = vpop.permute.xlu1 %8000  ;;  %v7013_v2 = vmul.f32 1.442695, %v6888_v47  ;;  %v6605_v36 = vand.u32 2147483648, %v15504_v8  ;;  %vm6600_vm5 = vweird.f32 %v15538_v22 }
 0x912   : > { %v10099_v45 = vpop.eup %10098  ;;  %v7202_v61 = vmul.f32 0.6931472, %v10097_v29  ;;  %8028 = vrot.lane.b32.xlu2 %v7588_v21, %s10315_s25  ;;  %v8215_v10 = vsel %vm8172_vm6, %v16716_v16, %v8001_v32  ;;  %v6597_v13 = vmul.f32 %v15538_v22, %v6596_v50  ;;  %v6760_v14 = vmax.f32 %v15597_v54, 0.0  ;;  %v16722_v54 = vld [vmem:[#allocation77_spill] sm:$0xff] }
 0x913   : > { %v7079_v0 = vadd.f32 1.0, %v10099_v45  ;;  %v8280_v56 = vsel %vm8237_vm7, %v8215_v10, 0.0  ;;  %10104 = vpow2.f32 %v7013_v2  ;;  %vm6599_vm2 = vweird.f32 %v15504_v8 }
 0x914   : > { %10106 = vrcp.f32 %v15628_v25  ;;  %8344 = vst [vmem:[%s13703_s15 + $0x150] sm:$0xff] %v8280_v56  ;;  %v6598_v42 = vadd.f32 %v15538_v22, %v6597_v13  ;;  %vm6604_vm8 = vcmp.eq.f32.partialorder %v6603_v33, 8.507059e+37  ;;  %v15652_v38 = vadd.f32 %v7202_v61, %v6758_v43  ;;  %vm6601_vm9 = vmor %vm6599_vm2, %vm6600_vm5 }
 0x915   : > { %v15648_v40 = vpop.eup %10100  ;;  %10108 = vlog2.f32 %v7079_v0  ;;  %v6606_v57 = vor.u32 1.1754944e-38, %v6605_v36  ;;  %v6610_v41 = vmul.f32 %v15599_v23, %v15556_v55  ;;  %v7460_v63 = vmul.f32 %v15524_v12, %v16717_v46 }
 0x916   : > { %v10103_v9 = vpop.eup %10102  ;;  %v6602_v51 = vsel %vm6601_vm9, %v15538_v22, %v6598_v42  ;;  %vm6614_vm10 = vweird.f32 %v15556_v55  ;;  %vm6615_vm12 = vweird.f32 %v15599_v23  ;;  %v15661_v8 = vpop.f32.mrf.mxu3  ;;  %v6618_v22 = vand.u32 2147483647, %v15556_v55 }
 0x917   : > { %v15663_v59 = vadd.f32 1.0, %v10103_v9  ;;  %v6607_v43 = vsel %vm6604_vm8, %v6606_v57, %v6602_v51  ;;  %v6611_v20 = vsub.f32 1.0, %v6610_v41  ;;  %v5545_v6 = vsub.f32 0.0, %v15661_v8  ;;  %vm6616_vm13 = vmor %vm6614_vm10, %vm6615_vm12  ;;  %v16719_v9 = vld [vmem:[#allocation33_spill] sm:$0xff] }
 0x918   : > { %v7525_v5 = vsel %vm7467_vm4, %v6607_v43, %v15588_v60  ;;  %v6620_v12 = vand.u32 2147483648, %v15556_v55  ;;  %v7461_v35 = vmul.f32 %v15564_v49, %v16718_v52  ;;  %v6825_v49 = vand.u32 2147483647, %v15661_v8 }
 0x919   : > { %v10105_v15 = vpop.eup %10104  ;;  %10110 = vrcp.f32 %v15663_v59  ;;  %v7589_v58 = vsel %vm1585_vm11, %v7460_v63, %v7525_v5  ;;  %v8003_v37 = vpop.permute.xlu0 %8002  ;;  %v6612_v31 = vmul.f32 %v15599_v23, %v6611_v20  ;;  %v5671_v62 = vmul.f32 1.442695, %v5545_v6 }
 0x91a   : > { %v15677_v47 = vpop.eup %10106  ;;  %v7080_v60 = vadd.f32 1.0, %v10105_v15  ;;  %8030 = vrot.lane.b32.xlu1 %v7589_v58, %s10315_s25  ;;  %v8216_v4 = vsel %vm8172_vm6, %v13165_v18, %v8003_v37  ;;  %v7399_v50 = vmul.f32 1.442695, %v15661_v8  ;;  %v6625_v2 = vmul.f32 %v15626_v7, %v15579_v3 }
 0x91b   : > { %v10109_v29 = vpop.eup %10108  ;;  %v8281_v21 = vsel %vm8237_vm7, %v8216_v4, 0.0  ;;  %v6613_v32 = vadd.f32 %v15599_v23, %v6612_v31  ;;  %10112 = vpow2.f32 %v5671_v62  ;;  %v6621_v18 = vor.u32 1.1754944e-38, %v6620_v12 }
 0x91c   : > { %v7204_v33 = vmul.f32 0.6931472, %v10109_v29  ;;  %10114 = vlog2.f32 %v7080_v60  ;;  %8345 = vst [vmem:[%s13703_s15 + $0x158] sm:$0xff] %v8281_v21  ;;  %v6889_v36 = vsub.f32 0.0, %v6825_v49  ;;  %vm6619_vm14 = vcmp.eq.f32.partialorder %v6618_v22, 8.507059e+37 }
 0x91d   : > { %v6617_v45 = vsel %vm6616_vm13, %v15599_v23, %v6613_v32  ;;  %v6626_v61 = vsub.f32 1.0, %v6625_v2  ;;  %vm6629_vm15 = vweird.f32 %v15579_v3  ;;  %10116 = vpow2.f32 %v7399_v50 }
 0x91e   : > { %v6622_v16 = vsel %vm6619_vm14, %v6621_v18, %v6617_v45  ;;  %v7015_v10 = vmul.f32 1.442695, %v6889_v36  ;;  %v6633_v13 = vand.u32 2147483647, %v15579_v3  ;;  %v15696_v0 = vpop.f32.mrf.mxu3  ;;  %vm6630_vm0 = vweird.f32 %v15626_v7 }
 0x91f   : > { %v15698_v56 = vpop.eup %10110  ;;  %v7526_v55 = vsel %vm7467_vm4, %v6622_v16, %v15624_v24  ;;  %v6627_v42 = vmul.f32 %v15626_v7, %v6626_v61  ;;  %v6635_v23 = vand.u32 2147483648, %v15579_v3  ;;  %v15708_v57 = vadd.f32 %v7204_v33, %v6759_v30  ;;  %vm6631_vm5 = vmor %vm6629_vm15, %vm6630_vm0 }
 0x920   : > { %v7590_v41 = vsel %vm1585_vm11, %v7461_v35, %v7526_v55  ;;  %10118 = vpow2.f32 %v7015_v10  ;;  %v7462_v51 = vmul.f32 %v15584_v44, %v16719_v9  ;;  %v6655_v24 = vmul.f32 %v15698_v56, %v15663_v59  ;;  %v16725_v55 = vld [vmem:[#allocation86_spill] sm:$0xff] }
 0x921   : > { %v10113_v63 = vpop.eup %10112  ;;  %8032 = vrot.lane.b32.xlu0 %v7590_v41, %s10315_s25  ;;  %v6628_v43 = vadd.f32 %v15626_v7, %v6627_v42  ;;  %vm15718_vm1 = vcmp.eq.f32.partialorder %v6633_v13, 8.507059e+37  ;;  %v5546_v1 = vsub.f32 0.0, %v15696_v0  ;;  %v6636_v44 = vor.u32 1.1754944e-38, %v6635_v23  ;;  %v16726_v41 = vld [vmem:[#allocation169_spill] sm:$0xff] }
 0x922   : > { %v10115_v30 = vpop.eup %10114  ;;  %v15723_v6 = vadd.f32 1.0, %v10113_v63  ;;  %v6826_v5 = vand.u32 2147483647, %v15696_v0  ;;  %v6640_v22 = vmul.f32 %v15677_v47, %v15628_v25  ;;  %v15732_v58 = vmul.f32 1.442695, %v15696_v0 }
 0x923   : > { %v7206_v12 = vmul.f32 0.6931472, %v10115_v30  ;;  %v8011_v52 = vpop.permute.xlu2 %8010  ;;  %v6632_v35 = vsel %vm6631_vm5, %v15626_v7, %v6628_v43  ;;  %v5673_v15 = vmul.f32 1.442695, %v5546_v1  ;;  %v15734_v37 = vpop.eup %10116  ;;  %vm6644_vm2 = vweird.f32 %v15628_v25 }
 0x924   : > { %v8220_v3 = vsel %vm8172_vm6, %v13248_v17, %v8011_v52  ;;  %10120 = vrcp.f32 %v15723_v6  ;;  %v6637_v31 = vsel %vm15718_vm1, %v6636_v44, %v6632_v35  ;;  %v6890_v62 = vsub.f32 0.0, %v6826_v5 }
 0x925   : > { %v8285_v60 = vsel %vm8237_vm7, %v8220_v3, 0.0  ;;  %v7527_v7 = vsel %vm7467_vm4, %v6637_v31, %v15652_v38  ;;  %10122 = vpow2.f32 %v5673_v15  ;;  %v7272_v49 = vadd.f32 %v7206_v12, %v6760_v14 }
 0x926   : > { %v10119_v4 = vpop.eup %10118  ;;  %8349 = vst [vmem:[%s13703_s15 + $0x178] sm:$0xff] %v8285_v60  ;;  %v7591_v17 = vsel %vm1585_vm11, %v7462_v51, %v7527_v7  ;;  %v7017_v50 = vmul.f32 1.442695, %v6890_v62  ;;  %v6641_v29 = vsub.f32 1.0, %v6640_v22  ;;  %vm6645_vm8 = vweird.f32 %v15677_v47 }
 0x927   : > { %v7081_v21 = vadd.f32 1.0, %v10119_v4  ;;  %8034 = vrot.lane.b32.xlu2 %v7591_v17, %s10315_s25  ;;  %v6648_v38 = vand.u32 2147483647, %v15628_v25  ;;  %v6650_v32 = vand.u32 2147483648, %v15628_v25  ;;  %v7463_v14 = vmul.f32 %v15615_v34, %v16722_v54  ;;  %vm6646_vm13 = vmor %vm6644_vm2, %vm6645_vm8  ;;  %v16727_v4 = vld [vmem:[#allocation82_spill] sm:$0xff] }
 0x928   : > { %10124 = vpow2.f32 %v7017_v50  ;;  %v6642_v2 = vmul.f32 %v15677_v47, %v6641_v29  ;;  %v6656_v33 = vsub.f32 1.0, %v6655_v24  ;;  %vm6659_vm10 = vweird.f32 %v15663_v59 }
 0x929   : > { %10126 = vlog2.f32 %v7081_v21  ;;  %vm15758_vm9 = vcmp.eq.f32.partialorder %v6648_v38, 8.507059e+37  ;;  %v6651_v36 = vor.u32 1.1754944e-38, %v6650_v32  ;;  %vm6660_vm12 = vweird.f32 %v15698_v56 }
 0x92a   : > { %v10121_v45 = vpop.eup %10120  ;;  %v8007_v61 = vpop.permute.xlu1 %8006  ;;  %v6643_v16 = vadd.f32 %v15677_v47, %v6642_v2  ;;  %v6657_v10 = vmul.f32 %v15698_v56, %v6656_v33  ;;  %v6663_v34 = vand.u32 2147483647, %v15663_v59  ;;  %v6665_v23 = vand.u32 2147483648, %v15663_v59  ;;  %vm6661_vm14 = vmor %vm6659_vm10, %vm6660_vm12  ;;  %v16728_v2 = vld [vmem:[#allocation168_spill] sm:$0xff] }
 0x92b   : > { %v10123_v13 = vpop.eup %10122  ;;  %v8218_v42 = vsel %vm8172_vm6, %v16725_v55, %v8007_v61  ;;  %v7464_v51 = vmul.f32 %v15648_v40, %v16726_v41  ;;  %v6670_v63 = vmul.f32 %v10121_v45, %v15723_v6  ;;  %vm6674_vm0 = vweird.f32 %v15723_v6 }
 0x92c   : > { %v8283_v24 = vsel %vm8237_vm7, %v8218_v42, 0.0  ;;  %v15778_v43 = vadd.f32 1.0, %v10123_v13  ;;  %v6647_v20 = vsel %vm6646_vm13, %v15677_v47, %v6643_v16  ;;  %v6658_v1 = vadd.f32 %v15698_v56, %v6657_v10  ;;  %v16730_v42 = vld [vmem:[#allocation104_spill] sm:$0xff] }
 0x92d   : > { %8347 = vst [vmem:[%s13703_s15 + $0x168] sm:$0xff] %v8283_v24  ;;  %v6652_v25 = vsel %vm15758_vm9, %v6651_v36, %v6647_v20  ;;  %vm6664_vm15 = vcmp.eq.f32.partialorder %v6663_v34, 8.507059e+37  ;;  %v6666_v30 = vor.u32 1.1754944e-38, %v6665_v23  ;;  %v6671_v40 = vsub.f32 1.0, %v6670_v63  ;;  %v16729_v36 = vld [vmem:[#allocation36_spill] sm:$0xff] }
 0x92e   : > { %v10125_v44 = vpop.eup %10124  ;;  %10128 = vrcp.f32 %v15778_v43  ;;  %v7528_v5 = vsel %vm7467_vm4, %v6652_v25, %v15708_v57  ;;  %v6662_v47 = vsel %vm6661_vm14, %v15698_v56, %v6658_v1  ;;  %vm6675_vm1 = vweird.f32 %v10121_v45  ;;  %v16731_v25 = vld [vmem:[#allocation43_spill] sm:$0xff] }
 0x92f   : > { %v10127_v22 = vpop.eup %10126  ;;  %v7082_v12 = vadd.f32 1.0, %v10125_v44  ;;  %v7592_v59 = vsel %vm1585_vm11, %v7463_v14, %v7528_v5  ;;  %v6667_v52 = vsel %vm6664_vm15, %v6666_v30, %v6662_v47  ;;  %v6672_v35 = vmul.f32 %v10121_v45, %v6671_v40  ;;  %vm6676_vm5 = vmor %vm6674_vm0, %vm6675_vm1  ;;  %v16732_v40 = vld [vmem:[#allocation44_spill] sm:$0xff] }
 0x930   : > { %v7208_v15 = vmul.f32 0.6931472, %v10127_v22  ;;  %8036 = vrot.lane.b32.xlu1 %v7592_v59, %s10315_s25  ;;  %v7529_v3 = vsel %vm7467_vm4, %v6667_v52, %v7272_v49  ;;  %v6678_v57 = vand.u32 2147483647, %v15723_v6  ;;  %v6680_v62 = vand.u32 2147483648, %v15723_v6  ;;  %v16733_v22 = vld [vmem:[#allocation80_spill] sm:$0xff] }
 0x931   : > { %10130 = vlog2.f32 %v7082_v12  ;;  %v7593_v56 = vsel %vm1585_vm11, %v7464_v51, %v7529_v3  ;;  %v6673_v31 = vadd.f32 %v10121_v45, %v6672_v35  ;;  %v6761_v60 = vmax.f32 %v15661_v8, 0.0  ;;  %v16734_v35 = vld [vmem:[#allocation40_spill] sm:$0xff] }
 0x932   : > { %v8009_v7 = vpop.permute.xlu0 %8008  ;;  %8038 = vrot.lane.b32.xlu0 %v7593_v56, %s10315_s25  ;;  %v6681_v50 = vor.u32 1.1754944e-38, %v6680_v62  ;;  %vm6679_vm2 = vcmp.eq.f32.partialorder %v6678_v57, 8.507059e+37  ;;  %10132 = vpow2.f32 %v15732_v58  ;;  %v7465_v6 = vmul.f32 %v15734_v37, %v16728_v2  ;;  %v16735_v57 = vld [vmem:[#allocation105_spill] sm:$0xff] }
 0x933   : > { %v8219_v49 = vsel %vm8172_vm6, %v16727_v4, %v8009_v7  ;;  %v6677_v17 = vsel %vm6676_vm5, %v10121_v45, %v6673_v31  ;;  %v7273_v21 = vadd.f32 %v7208_v15, %v6761_v60  ;;  %v1684_v45 = vmul.f32 1.442695, %v16729_v36 }
 0x934   : > { %v10129_v29 = vpop.eup %10128  ;;  %v8284_v38 = vsel %vm8237_vm7, %v8219_v49, 0.0  ;;  %v6682_v8 = vsel %vm6679_vm2, %v6681_v50, %v6677_v17  ;;  %v6695_v61 = vand.u32 2147483648, %v15778_v43  ;;  %v6693_v37 = vand.u32 2147483647, %v15778_v43 }
 0x935   : > { %v6685_v32 = vmul.f32 %v10129_v29, %v15778_v43  ;;  %8348 = vst [vmem:[%s13703_s15 + $0x170] sm:$0xff] %v8284_v38  ;;  %v7530_v54 = vsel %vm7467_vm4, %v6682_v8, %v7273_v21  ;;  %vm6690_vm8 = vweird.f32 %v10129_v29  ;;  %v6762_v34 = vmax.f32 %v15696_v0, 0.0 }
 0x936   : > { %v7594_v33 = vsel %vm1585_vm11, %v7465_v6, %v7530_v54  ;;  %vm6689_vm9 = vweird.f32 %v15778_v43  ;;  %10134 = vpow2.f32 %v1684_v45  ;;  %v6696_v51 = vor.u32 1.1754944e-38, %v6695_v61 }
 0x937   : > { %v10131_v14 = vpop.eup %10130  ;;  %v6686_v18 = vsub.f32 1.0, %v6685_v32  ;;  %8040 = vrot.lane.b32.xlu2 %v7594_v33, %s10315_s25  ;;  %vm6691_vm10 = vmor %vm6689_vm9, %vm6690_vm8  ;;  %vm6694_vm12 = vcmp.eq.f32.partialorder %v6693_v37, 8.507059e+37  ;;  %v1692_v44 = vmul.f32 1.442695, %v16732_v40  ;;  %v1688_v15 = vmul.f32 1.442695, %v16734_v35 }
 0x938   : > { %v7210_v58 = vmul.f32 0.6931472, %v10131_v14  ;;  %v10133_v10 = vpop.eup %10132  ;;  %v16736_v32 = vld [vmem:[#allocation88_spill] sm:$0xff]  ;;  %v16737_v14 = vld [vmem:[#allocation15_spill] sm:$0xff] }
 0x939   : > { %v6687_v16 = vmul.f32 %v10129_v29, %v6686_v18  ;;  %v7466_v0 = vmul.f32 %v10133_v10, %v16731_v25  ;;  %10136 = vpow2.f32 %v1692_v44  ;;  %v16738_v18 = vld [vmem:[#allocation48_spill] sm:$0xff] }
 0x93a   : > { %v7274_v63 = vadd.f32 %v7210_v58, %v6762_v34  ;;  %10138 = vpow2.f32 %v1688_v15 }
 0x93b   : > { %v8017_v13 = vpop.permute.xlu2 %8016  ;;  %v6688_v55 = vadd.f32 %v10129_v29, %v6687_v16  ;;  %v16739_v16 = vld [vmem:[#allocation56_spill] sm:$0xff] }
 0x93c   : > { %v8223_v23 = vsel %vm8172_vm6, %v16730_v42, %v8017_v13  ;;  %v10135_v5 = vpop.eup %10134  ;;  %v1704_v37 = vmul.f32 1.442695, %v16739_v16  ;;  %v16740_v13 = vld [vmem:[#allocation17_spill] sm:$0xff] }
 0x93d   : > { %v8288_v24 = vsel %vm8237_vm7, %v8223_v23, 0.0  ;;  %v6692_v20 = vsel %vm6691_vm10, %v10129_v29, %v6688_v55  ;;  %v1763_v52 = vmul.f32 %v10135_v5, %v16701_v39 }
 0x93e   : > { %8352 = vst [vmem:[%s13703_s15 + $0x190] sm:$0xff] %v8288_v24  ;;  %v6697_v1 = vsel %vm6694_vm12, %v6696_v51, %v6692_v20 }
 0x93f   : > { %v7531_v30 = vsel %vm7467_vm4, %v6697_v1, %v7274_v63  ;;  %v1827_v3 = vsel %vm1585_vm11, %v1763_v52, %v16729_v36  ;;  %v10137_v62 = vpop.eup %10136  ;;  %v1696_v36 = vmul.f32 1.442695, %v16738_v18 }
 0x940   : > { %v7595_v43 = vsel %vm1585_vm11, %v7466_v0, %v7531_v30  ;;  %v8157_v56 = vsel %vm1866_vm3, %v1827_v3, %v16735_v57  ;;  %v1767_v39 = vmul.f32 %v10137_v62, %v16709_v26  ;;  %v10139_v49 = vpop.eup %10138  ;;  %v16744_v57 = vld [vmem:[#allocation60_spill] sm:$0xff] }
 0x941   : > { %8042 = vrot.lane.b32.xlu1 %v7595_v43, %s10315_s25  ;;  %v1765_v38 = vmul.f32 %v10139_v49, %v16706_v27  ;;  %10140 = vpow2.f32 %v1696_v36  ;;  %v16750_v36 = vld [vmem:[#allocation108_spill] sm:$0xff] }
 0x942   : > { %v8013_v47 = vpop.permute.xlu1 %8012  ;;  %v1831_v4 = vsel %vm1585_vm11, %v1767_v39, %v16732_v40  ;;  %10142 = vpow2.f32 %v1704_v37  ;;  %v16742_v40 = vld [vmem:[#allocation20_spill] sm:$0xff] }
 0x943   : > { %v8221_v12 = vsel %vm8172_vm6, %v16733_v22, %v8013_v47  ;;  %v8161_v17 = vsel %vm1866_vm3, %v1831_v4, %v13286_v53  ;;  %v1829_v26 = vsel %vm1585_vm11, %v1765_v38, %v16734_v35 }
 0x944   : > { %v8286_v59 = vsel %vm8237_vm7, %v8221_v12, 0.0  ;;  %v8159_v8 = vsel %vm1866_vm3, %v1829_v26, %v16736_v32  ;;  %v16748_v32 = vld [vmem:[#allocation107_spill] sm:$0xff] }
 0x945   : > { %8350 = vst [vmem:[%s13703_s15 + $0x180] sm:$0xff] %v8286_v59  ;;  %v16743_v59 = vld [vmem:[#allocation106_spill] sm:$0xff] }
 0x947   : > { %v10141_v34 = vpop.eup %10140 }
 0x948   : > { %v1769_v23 = vmul.f32 %v10141_v34, %v16713_v19  ;;  %v10143_v51 = vpop.eup %10142 }
 0x949   : > { %v1773_v20 = vmul.f32 %v10143_v51, %v16719_v9 }
 0x94a   : > { %v8015_v31 = vpop.permute.xlu0 %8014  ;;  %v1833_v24 = vsel %vm1585_vm11, %v1769_v23, %v16738_v18 }
 0x94b   : > { %v8222_v60 = vsel %vm8172_vm6, %v8157_v56, %v8015_v31  ;;  %v8163_v1 = vsel %vm1866_vm3, %v1833_v24, %v13354_v48  ;;  %v1837_v43 = vsel %vm1585_vm11, %v1773_v20, %v16739_v16  ;;  %v1708_v56 = vmul.f32 1.442695, %v16744_v57 }
 0x94c   : > { %v8287_v7 = vsel %vm8237_vm7, %v8222_v60, 0.0  ;;  %v8167_v44 = vsel %vm1866_vm3, %v1837_v43, %v16742_v40  ;;  %v16745_v60 = vld [vmem:[#allocation109_spill] sm:$0xff] }
 0x94d   : > { %8351 = vst [vmem:[%s13703_s15 + $0x188] sm:$0xff] %v8287_v7  ;;  %v16746_v7 = vld [vmem:[#allocation16_spill] sm:$0xff] }
 0x953   : > { %v8023_v50 = vpop.permute.xlu2 %8022 }
 0x954   : > { %v8226_v29 = vsel %vm8172_vm6, %v8161_v17, %v8023_v50 }
 0x955   : > { %v8291_v21 = vsel %vm8237_vm7, %v8226_v29, 0.0  ;;  %v16747_v29 = vld [vmem:[#allocation64_spill] sm:$0xff] }
 0x956   : > { %8355 = vst [vmem:[%s13703_s15 + $0x1a8] sm:$0xff] %v8291_v21  ;;  %v1712_v21 = vmul.f32 1.442695, %v16747_v29 }
 0x95b   : > { %v8019_v2 = vpop.permute.xlu1 %8018 }
 0x95c   : > { %v8224_v6 = vsel %vm8172_vm6, %v8159_v8, %v8019_v2  ;;  %v16749_v2 = vld [vmem:[#allocation18_spill] sm:$0xff] }
 0x95d   : > { %v8289_v53 = vsel %vm8237_vm7, %v8224_v6, 0.0 }
 0x95e   : > { %8353 = vst [vmem:[%s13703_s15 + $0x198] sm:$0xff] %v8289_v53 }
 0x964   : > { %v8021_v54 = vpop.permute.xlu0 %8020 }
 0x965   : > { %v8225_v27 = vsel %vm8172_vm6, %v16737_v14, %v8021_v54 }
 0x966   : > { %v8290_v33 = vsel %vm8237_vm7, %v8225_v27, 0.0 }
 0x967   : > { %8354 = vst [vmem:[%s13703_s15 + $0x1a0] sm:$0xff] %v8290_v33 }
 0x96c   : > { %v8029_v45 = vpop.permute.xlu2 %8028 }
 0x96d   : > { %v8229_v61 = vsel %vm8172_vm6, %v13346_v11, %v8029_v45  ;;  %v16741_v11 = vld [vmem:[#allocation52_spill] sm:$0xff] }
 0x96e   : > { %v8294_v58 = vsel %vm8237_vm7, %v8229_v61, 0.0  ;;  %v1700_v63 = vmul.f32 1.442695, %v16741_v11 }
 0x96f   : > { %8358 = vst [vmem:[%s13703_s15 + $0x1c0] sm:$0xff] %v8294_v58 }
 0x970   : > { %10144 = vpow2.f32 %v1700_v63 }
 0x971   : > { %10146 = vpow2.f32 %v1708_v56 }
 0x972   : > { %10148 = vpow2.f32 %v1712_v21 }
 0x973   : > { %v8025_v10 = vpop.permute.xlu1 %8024 }
 0x974   : > { %v8227_v55 = vsel %vm8172_vm6, %v16740_v13, %v8025_v10 }
 0x975   : > { %v8292_v42 = vsel %vm8237_vm7, %v8227_v55, 0.0 }
 0x976   : > { %8356 = vst [vmem:[%s13703_s15 + $0x1b0] sm:$0xff] %v8292_v42  ;;  %v10145_v47 = vpop.eup %10144 }
 0x977   : > { %v1771_v22 = vmul.f32 %v10145_v47, %v16717_v46  ;;  %v10147_v17 = vpop.eup %10146 }
 0x978   : > { %v1775_v50 = vmul.f32 %v10147_v17, %v16726_v41  ;;  %v10149_v27 = vpop.eup %10148 }
 0x979   : > { %v1835_v12 = vsel %vm1585_vm11, %v1771_v22, %v16741_v11  ;;  %v1777_v33 = vmul.f32 %v10149_v27, %v16731_v25 }
 0x97a   : > { %v8165_v52 = vsel %vm1866_vm3, %v1835_v12, %v16743_v59  ;;  %v1839_v26 = vsel %vm1585_vm11, %v1775_v50, %v16744_v57 }
 0x97b   : > { %v8169_v6 = vsel %vm1866_vm3, %v1839_v26, %v16749_v2  ;;  %v1841_v18 = vsel %vm1585_vm11, %v1777_v33, %v16747_v29 }
 0x97c   : > { %v8027_v0 = vpop.permute.xlu0 %8026  ;;  %v8171_v45 = vsel %vm1866_vm3, %v1841_v18, %v16750_v36 }
 0x97d   : > { %v8228_v30 = vsel %vm8172_vm6, %v8163_v1, %v8027_v0 }
 0x97e   : > { %v8293_v19 = vsel %vm8237_vm7, %v8228_v30, 0.0 }
 0x97f   : > { %8357 = vst [vmem:[%s13703_s15 + $0x1b8] sm:$0xff] %v8293_v19 }
 0x981   : > { %v8035_v5 = vpop.permute.xlu2 %8034 }
 0x982   : > { %v8232_v9 = vsel %vm8172_vm6, %v8167_v44, %v8035_v5 }
 0x983   : > { %v8297_v48 = vsel %vm8237_vm7, %v8232_v9, 0.0 }
 0x984   : > { %8361 = vst [vmem:[%s13703_s15 + $0x1d8] sm:$0xff] %v8297_v48 }
 0x98c   : > { %v8031_v35 = vpop.permute.xlu1 %8030 }
 0x98d   : > { %v8230_v15 = vsel %vm8172_vm6, %v8165_v52, %v8031_v35 }
 0x98e   : > { %v8295_v3 = vsel %vm8237_vm7, %v8230_v15, 0.0 }
 0x98f   : > { %8359 = vst [vmem:[%s13703_s15 + $0x1c8] sm:$0xff] %v8295_v3 }
 0x991   : > { %v8041_v31 = vpop.permute.xlu2 %8040 }
 0x992   : > { %v8235_v46 = vsel %vm8172_vm6, %v16745_v60, %v8041_v31 }
 0x993   : > { %v8033_v62 = vpop.permute.xlu0 %8032  ;;  %v8300_v4 = vsel %vm8237_vm7, %v8235_v46, 0.0 }
 0x994   : > { %v8231_v39 = vsel %vm8172_vm6, %v16746_v7, %v8033_v62  ;;  %8364 = vst [vmem:[%s13703_s15 + $0x1f0] sm:$0xff] %v8300_v4 }
 0x995   : > { %v8296_v49 = vsel %vm8237_vm7, %v8231_v39, 0.0 }
 0x996   : > { %8360 = vst [vmem:[%s13703_s15 + $0x1d0] sm:$0xff] %v8296_v49 }
 0x9a2   : > { %v8037_v38 = vpop.permute.xlu1 %8036 }
 0x9a3   : > { %v8233_v8 = vsel %vm8172_vm6, %v16748_v32, %v8037_v38 }
 0x9a4   : > { %v8298_v53 = vsel %vm8237_vm7, %v8233_v8, 0.0  ;;  %v8039_v54 = vpop.permute.xlu0 %8038 }
 0x9a5   : > { %8362 = vst [vmem:[%s13703_s15 + $0x1e0] sm:$0xff] %v8298_v53  ;;  %v8234_v41 = vsel %vm8172_vm6, %v8169_v6, %v8039_v54 }
 0x9a6   : > { %v8299_v14 = vsel %vm8237_vm7, %v8234_v41, 0.0 }
 0x9a7   : > { %8363 = vst [vmem:[%s13703_s15 + $0x1e8] sm:$0xff] %v8299_v14 }
 0x9b3   : > { %v8043_v61 = vpop.permute.xlu1 %8042 }
 0x9b4   : > { %v8236_v58 = vsel %vm8172_vm6, %v8171_v45, %v8043_v61 }
 0x9b5   : > { %v8301_v16 = vsel %vm8237_vm7, %v8236_v58, 0.0 }
 0x9b6   : > { %8365 = vst [vmem:[%s13703_s15 + $0x1f8] sm:$0xff] %v8301_v16 }
 0x9b7   : > { %10271 = shalt.err (!%p10268_p4)
}
 0x9b8   : > { %s10316_s22 = smov 128   ;;  %s10317_s15 = smov 8  }
 0x9b9   : > { %9076 = dma.vmem_to_hbm [thread:$0]  (%p10428_p11), %s8380_s17, 8192, %s8382_s30, %s8367_s21, %s10316_s22, %s10316_s22, %s10317_s15  }
 0x9ba PF: > { %s16751_s16 = sld [smem:[#allocation8_spill]]  ;;  %p16753_p7 = scmp.ge.s32.totalorder %s10310_s20, 2 }
 0x9bc   : > { %p9083_p5 = pnand %p16753_p7, %p10432_p12 }
 0x9be   : > { %p9084_p8 = pneg %p9083_p5 }
 0x9c0   : > { %s8396_s12 = sand.u32 1, %s16751_s16  }
 0x9c1   : > { %s8397_s24 = scalar_lea.sflag [#allocation4], %s8396_s12 }
 0x9c2   : > { %10293 = dma.done.wait (%p9084_p8), %s8397_s24, 8192  }
 0x9c3   : > { %10295 = vsyncadd (%p9084_p8), %s8397_s24, 4294959104  ;;  %s16754_s20 = sld [smem:[#allocation10_spill]]  ;;  %s16757_s17 = smov %s10302_s18 }
 0x9c4   : > { %s16755_s19 = sld [smem:[#allocation9_spill]] }
 0x9c5   : > { %s16756_s23 = sld [smem:[#allocation11_spill]] }
 0x9c9   : > { %p24_p10 = scmp.ge.s32.totalorder %s16754_s20, 4  }
 0x9ca   : > { %s16758_s18 = smov %s16755_s19 }
 0x9cb   : > { %s16759_s19 = smov %s16756_s23  ;;  %26 = sbr.rel (!%p24_p10) target bundleno = 5 (0x5), region = 109 }
 0x9d0   :  { %8403 = vsyncpa [#allocation3], 1 }
 0x9d1   :  { %8405 = vsyncpa [#allocation3 + $0x1], 1 }
 0x9d2   :  { %8406 = vsyncpa [#allocation4], 1 }
 0x9d3   :  { %8408 = vsyncpa [#allocation4 + $0x1], 1 }

</bundles_post_ra>
